<compile_context>
chip_gen: v7x
topology: tpu7x:2x2x1
jax: 0.10.0
libtpu: 0.0.40
codegen_flags: <defaults>
</compile_context>

<pallas_src>
import jax
import jax.numpy as jnp
from jax.experimental import pallas as pl
from jax.experimental.pallas import tpu as pltpu


# --------------------------- fused Pallas kernel ----------------------------

def _lenet_kernel(x_ref, w1_ref, b1_ref, w2_ref, b2_ref,
                  wf1_ref, bf1_ref, wf2_ref, bf2_ref, wf3_ref, bf3_ref,
                  o_ref):
    f32 = jnp.float32
    mxu = w1_ref.dtype                       # bf16 MXU operands, f32 accumulate

    x = x_ref[...]                           # [BT, 896] bf16 (pre-cast/padded)

    # conv1 + relu + 2x2 maxpool: ONE fused MXU matmul over all 4 pool
    # positions (column-concatenated Toeplitz RHS), then 3 VPU max ops over
    # lane-aligned 896-wide slices.  Bias/ReLU commute with the max (same
    # per-channel bias across pool positions, ReLU monotonic).
    C1 = 896
    y1 = jnp.dot(x, w1_ref[...], preferred_element_type=f32)       # [BT, 3584]
    p1 = jnp.maximum(jnp.maximum(y1[:, 0 * C1:1 * C1], y1[:, 1 * C1:2 * C1]),
                     jnp.maximum(y1[:, 2 * C1:3 * C1], y1[:, 3 * C1:4 * C1]))
    p1 = jnp.maximum(p1 + b1_ref[...], 0.0).astype(mxu)            # [BT, 896]

    # conv2 + relu + 2x2 maxpool (same scheme, 256-wide lane-aligned slices).
    C2 = 256
    y2 = jnp.dot(p1, w2_ref[...], preferred_element_type=f32)      # [BT, 1024]
    p2 = jnp.maximum(jnp.maximum(y2[:, 0 * C2:1 * C2], y2[:, 1 * C2:2 * C2]),
                     jnp.maximum(y2[:, 2 * C2:3 * C2], y2[:, 3 * C2:4 * C2]))
    p2 = jnp.maximum(p2 + b2_ref[...], 0.0).astype(mxu)            # [BT, 256]

    # fc1 -> fc2 -> fc3 (output lanes padded to 128; padding rows/cols are 0).
    f1 = jnp.maximum(jnp.dot(p2, wf1_ref[...], preferred_element_type=f32)
                     + bf1_ref[...], 0.0).astype(mxu)               # [BT, 128]
    f2 = jnp.maximum(jnp.dot(f1, wf2_ref[...], preferred_element_type=f32)
                     + bf2_ref[...], 0.0).astype(mxu)               # [BT, 128]
    f3 = jnp.dot(f2, wf3_ref[...], preferred_element_type=f32) + bf3_ref[...]

    o_ref[...] = f3.astype(o_ref.dtype)                             # [BT, 128]


# ----------------------- weight preparation (init-time) ---------------------

def _conv_to_dense(w, H, W):
    """w: [CO, CI, KH, KW] (PyTorch layout) -> dense matrix [CI*H*W, CO*OH*OW]
    (both sides NCHW-flattened) such that x_flat @ D == valid-conv(x, w) flat."""
    CO, CI, KH, KW = w.shape
    OH, OW = H - KH + 1, W - KW + 1
    th = jnp.stack([jnp.eye(H, dtype=w.dtype)[:, k:k + OH] for k in range(KH)])  # [KH,H,OH]
    tw = jnp.stack([jnp.eye(W, dtype=w.dtype)[:, k:k + OW] for k in range(KW)])  # [KW,W,OW]
    d = jnp.einsum('oikl,khp,lwq->ihwopq', w, th, tw)   # [CI, H, W, CO, OH, OW]
    return d.reshape(CI * H * W, CO * OH * OW)


def _pool_split(dense, CO, OH, OW):
    """Split dense conv matrix columns by 2x2-pool position -> [4, K, CO*OH//2*OW//2]."""
    K = dense.shape[0]
    d = dense.reshape(K, CO, OH, OW)
    parts = [d[:, :, u::2, v::2].reshape(K, -1) for u in (0, 1) for v in (0, 1)]
    return jnp.stack(parts, axis=0)


def _pad_to(a, rows, cols):
    return jnp.pad(a, ((0, rows - a.shape[0]), (0, cols - a.shape[1])))


def prepare_kernel_params(p, mxu_dtype=jnp.bfloat16):
    """One-time conversion from PyTorch-layout params to kernel layout."""
    f32 = jnp.float32
    X_IN, C1W = 896, 896      # lane-padded input width (784->896), conv1 width (864->896)

    # conv1: dense [784, 6*24*24], split by 2x2-pool position -> [4, 784, 864],
    # zero-pad rows 784->896 (matches lane-padded x) and cols 864->896, then
    # concatenate the 4 pool-position slabs along columns -> [896, 3584].
    w1d = _conv_to_dense(p["conv1_w"].astype(f32), 28, 28)
    w1s = _pool_split(w1d, 6, 24, 24)                                   # [4,784,864]
    w1s = jnp.pad(w1s, ((0, 0), (0, X_IN - 784), (0, C1W - 864)))       # [4,896,896]
    w1 = jnp.concatenate([w1s[i] for i in range(4)], axis=1).astype(mxu_dtype)  # [896,3584]
    b1 = jnp.pad(jnp.repeat(p["conv1_b"].astype(f32), 12 * 12)[None, :],
                 ((0, 0), (0, C1W - 864)))                              # [1, 896]

    # conv2: dense [864, 16*8*8], split -> [4, 864, 256]; zero-pad K rows
    # 864->896 (so padded p1 lanes hit zero rows), concat -> [896, 1024].
    w2d = _conv_to_dense(p["conv2_w"].astype(f32), 12, 12)
    w2s = _pool_split(w2d, 16, 8, 8)                                    # [4,864,256]
    w2s = jnp.pad(w2s, ((0, 0), (0, C1W - 864), (0, 0)))                # [4,896,256]
    w2 = jnp.concatenate([w2s[i] for i in range(4)], axis=1).astype(mxu_dtype)  # [896,1024]
    b2 = jnp.repeat(p["conv2_b"].astype(f32), 4 * 4)[None, :]           # [1, 256]

    # FC weights: [in, out] layout, outputs (and fc2/fc3 inputs) padded to 128.
    wf1 = _pad_to(p["fc1_w"].T.astype(f32), 256, 128).astype(mxu_dtype)  # [256,128]
    bf1 = _pad_to(p["fc1_b"][None, :].astype(f32), 1, 128)
    wf2 = _pad_to(p["fc2_w"].T.astype(f32), 128, 128).astype(mxu_dtype)  # [128,128]
    bf2 = _pad_to(p["fc2_b"][None, :].astype(f32), 1, 128)
    wf3 = _pad_to(p["fc3_w"].T.astype(f32), 128, 128).astype(mxu_dtype)  # [128,128]
    bf3 = _pad_to(p["fc3_b"][None, :].astype(f32), 1, 128)
    return dict(w1=w1, b1=b1, w2=w2, b2=b2,
                wf1=wf1, bf1=bf1, wf2=wf2, bf2=bf2, wf3=wf3, bf3=bf3)


# ------------------------------- forward ------------------------------------

def _round_up(n, m):
    return (n + m - 1) // m * m


def _cdiv(a, b):
    return -(-a // b)


def lenet_forward(kparams, x):
    """x: [B, 784] (or [B,1,28,28]) -> logits [B, 10]."""
    x = x.reshape(-1, 28 * 28)
    B = x.shape[0]

    # Batch tiling:
    #  * tiles are multiples of 16 rows (bf16 sublane packing),
    #  * even number of tiles whenever B > 16 so both v7x TensorCores get
    #    work under dimension_semantics=("parallel",),
    #  * BT=256 for large batches to fill the 256-wide MXU M dim on v6e/v7x
    #    (on v5e's 128x128 MXU this simply becomes two M passes).
    if B <= 16:
        BT = 16
        n_tiles = 1
    elif B < 512:
        BT = min(128, _round_up((B + 1) // 2, 16))
        n_tiles = _round_up(_cdiv(B, BT), 2)
    else:
        BT = 256
        n_tiles = _round_up(_cdiv(B, BT), 2)
    Bp = n_tiles * BT

    # bf16 cast + zero lane-pad 784 -> 896 and row-pad B -> Bp in the wrapper:
    # halves HBM input traffic and removes the in-kernel cast / masked vregs.
    xb = jnp.pad(x.astype(jnp.bfloat16), ((0, Bp - B), (0, 896 - 784)))

    def full(a):      # VMEM-resident, grid-invariant block (whole array)
        return pl.BlockSpec(a.shape, lambda i, _nd=a.ndim: (0,) * _nd)

    # ~2x the resident footprint: ~8.5 MiB bf16 weights (x2 buffers) + x/out
    # buffers + f32 temporaries.  Well inside v7x's 64 MiB physical VMEM.
    vmem_limit = (36 if BT >= 256 else 28) * 1024 * 1024

    kp = kparams
    out = pl.pallas_call(
        _lenet_kernel,
        grid=(n_tiles,),
        in_specs=[pl.BlockSpec((BT, 896), lambda i: (i, 0)),
                  full(kp["w1"]), full(kp["b1"]),
                  full(kp["w2"]), full(kp["b2"]),
                  full(kp["wf1"]), full(kp["bf1"]),
                  full(kp["wf2"]), full(kp["bf2"]),
                  full(kp["wf3"]), full(kp["bf3"])],
        out_specs=pl.BlockSpec((BT, 128), lambda i: (i, 0)),
        out_shape=jax.ShapeDtypeStruct((Bp, 128), jnp.float32),
        compiler_params=pltpu.CompilerParams(
            dimension_semantics=("parallel",),
            vmem_limit_bytes=vmem_limit),
    )(xb, kp["w1"], kp["b1"], kp["w2"], kp["b2"],
      kp["wf1"], kp["bf1"], kp["wf2"], kp["bf2"], kp["wf3"], kp["bf3"])

    return out[:B, :10]
    # TODO(synk): `predict` (softmax/argmax wrapper) not implemented; only forward() required.


# --------------------------- init & reference check -------------------------

def init_params(key):
    ks = jax.random.split(key, 10)

    def w(k, shape, fan_in):
        return (jax.random.normal(k, shape, jnp.float32)
                / jnp.sqrt(jnp.float32(fan_in))).astype(jnp.float32)

    return dict(
        conv1_w=w(ks[0], (6, 1, 5, 5), 25),   conv1_b=w(ks[1], (6,), 25),
        conv2_w=w(ks[2], (16, 6, 5, 5), 150), conv2_b=w(ks[3], (16,), 150),
        fc1_w=w(ks[4], (120, 256), 256),      fc1_b=w(ks[5], (120,), 256),
        fc2_w=w(ks[6], (84, 120), 120),       fc2_b=w(ks[7], (84,), 120),
        fc3_w=w(ks[8], (10, 84), 84),         fc3_b=w(ks[9], (10,), 84),
    )


def _reference_forward(p, x):
    """Plain-JAX reference of the PyTorch module (test-only, not the hot path)."""
    x = x.reshape(-1, 1, 28, 28).astype(jnp.float32)
    y = jax.lax.conv_general_dilated(x, p["conv1_w"], (1, 1), "VALID")
    y = jnp.maximum(y + p["conv1_b"][None, :, None, None], 0.0)
    y = jnp.max(y.reshape(y.shape[0], 6, 12, 2, 12, 2), axis=(3, 5))
    y = jax.lax.conv_general_dilated(y, p["conv2_w"], (1, 1), "VALID")
    y = jnp.maximum(y + p["conv2_b"][None, :, None, None], 0.0)
    y = jnp.max(y.reshape(y.shape[0], 16, 4, 2, 4, 2), axis=(3, 5))
    y = y.reshape(y.shape[0], -1)
    y = jnp.maximum(y @ p["fc1_w"].T + p["fc1_b"], 0.0)
    y = jnp.maximum(y @ p["fc2_w"].T + p["fc2_b"], 0.0)
    return y @ p["fc3_w"].T + p["fc3_b"]


if __name__ == "__main__":
    key = jax.random.PRNGKey(0)
    pkey, xkey = jax.random.split(key)
    params = init_params(pkey)
    kparams = prepare_kernel_params(params)

    # batch of 2 flattened 28x28 MNIST-like images (forward reshapes internally)
    x = jax.random.normal(xkey, (2, 784), dtype=jnp.float32)

    out = jax.block_until_ready(jax.jit(lenet_forward)(kparams, x))

    assert out.shape == (2, 10), out.shape
    assert out.dtype == jnp.float32, out.dtype
    assert bool(jnp.all(jnp.isfinite(out)))

    # sanity-check the fused bf16 kernel against an f32 reference (loose tol)
    ref = _reference_forward(params, x)
    err = float(jnp.max(jnp.abs(out - ref)))
    tol = 0.1 * (1.0 + float(jnp.max(jnp.abs(ref))))
    assert err < tol, (err, tol)

    print("KERNEL_OK")
</pallas_src>

<mosaic_0001>
module attributes {stable_mosaic.version = 11 : i64} {
  func.func @_lenet_kernel(%arg0: i32, %arg1: memref<16x896xbf16, #tpu.memory_space<vmem>>, %arg2: memref<896x3584xbf16, #tpu.memory_space<vmem>>, %arg3: memref<1x896xf32, #tpu.memory_space<vmem>>, %arg4: memref<896x1024xbf16, #tpu.memory_space<vmem>>, %arg5: memref<1x256xf32, #tpu.memory_space<vmem>>, %arg6: memref<256x128xbf16, #tpu.memory_space<vmem>>, %arg7: memref<1x128xf32, #tpu.memory_space<vmem>>, %arg8: memref<128x128xbf16, #tpu.memory_space<vmem>>, %arg9: memref<1x128xf32, #tpu.memory_space<vmem>>, %arg10: memref<128x128xbf16, #tpu.memory_space<vmem>>, %arg11: memref<1x128xf32, #tpu.memory_space<vmem>>, %arg12: memref<16x128xf32, #tpu.memory_space<vmem>>) attributes {dimension_semantics = [#tpu.dimension_semantics<parallel>], iteration_bounds = array<i64: 1>, scalar_prefetch = 0 : i64, scratch_operands = 0 : i64, tpu.core_type = #tpu.core_type<tc>, window_params = [{transform_indices = @transform_0, window_bounds = array<i64: 16, 896>}, {pipeline_mode = #tpu.pipeline_mode<synchronous>, transform_indices = @transform_1, window_bounds = array<i64: 896, 3584>}, {pipeline_mode = #tpu.pipeline_mode<synchronous>, transform_indices = @transform_2, window_bounds = array<i64: 1, 896>}, {pipeline_mode = #tpu.pipeline_mode<synchronous>, transform_indices = @transform_3, window_bounds = array<i64: 896, 1024>}, {pipeline_mode = #tpu.pipeline_mode<synchronous>, transform_indices = @transform_4, window_bounds = array<i64: 1, 256>}, {pipeline_mode = #tpu.pipeline_mode<synchronous>, transform_indices = @transform_5, window_bounds = array<i64: 256, 128>}, {pipeline_mode = #tpu.pipeline_mode<synchronous>, transform_indices = @transform_6, window_bounds = array<i64: 1, 128>}, {pipeline_mode = #tpu.pipeline_mode<synchronous>, transform_indices = @transform_7, window_bounds = array<i64: 128, 128>}, {pipeline_mode = #tpu.pipeline_mode<synchronous>, transform_indices = @transform_8, window_bounds = array<i64: 1, 128>}, {pipeline_mode = #tpu.pipeline_mode<synchronous>, transform_indices = @transform_9, window_bounds = array<i64: 128, 128>}, {pipeline_mode = #tpu.pipeline_mode<synchronous>, transform_indices = @transform_10, window_bounds = array<i64: 1, 128>}, {transform_indices = @transform_11, window_bounds = array<i64: 16, 128>}]} {
    %c0 = arith.constant 0 : index
    %c0_0 = arith.constant 0 : index
    %0 = vector.load %arg1[%c0, %c0_0] : memref<16x896xbf16, #tpu.memory_space<vmem>>, vector<16x896xbf16>
    %c0_1 = arith.constant 0 : index
    %c0_2 = arith.constant 0 : index
    %1 = vector.load %arg2[%c0_1, %c0_2] : memref<896x3584xbf16, #tpu.memory_space<vmem>>, vector<896x3584xbf16>
    %cst = arith.constant dense<0.000000e+00> : vector<16x3584xf32>
    %2 = tpu.matmul %0, %1, %cst {dimension_numbers = #tpu.dot_dimension_numbers<[1], [0], [0], [1], [0, 0, 1, 1], [], []>} : vector<16x896xbf16>, vector<896x3584xbf16>, vector<16x3584xf32> -> vector<16x3584xf32>
    %3 = vector.extract_strided_slice %2 {offsets = [0, 0], sizes = [16, 896], strides = [1, 1]} : vector<16x3584xf32> to vector<16x896xf32>
    %4 = vector.extract_strided_slice %2 {offsets = [0, 896], sizes = [16, 896], strides = [1, 1]} : vector<16x3584xf32> to vector<16x896xf32>
    %5 = arith.maximumf %3, %4 : vector<16x896xf32>
    %6 = vector.extract_strided_slice %2 {offsets = [0, 1792], sizes = [16, 896], strides = [1, 1]} : vector<16x3584xf32> to vector<16x896xf32>
    %7 = vector.extract_strided_slice %2 {offsets = [0, 2688], sizes = [16, 896], strides = [1, 1]} : vector<16x3584xf32> to vector<16x896xf32>
    %8 = arith.maximumf %6, %7 : vector<16x896xf32>
    %9 = arith.maximumf %5, %8 : vector<16x896xf32>
    %c0_3 = arith.constant 0 : index
    %c0_4 = arith.constant 0 : index
    %10 = vector.load %arg3[%c0_3, %c0_4] : memref<1x896xf32, #tpu.memory_space<vmem>>, vector<1x896xf32>
    %11 = vector.broadcast %10 : vector<1x896xf32> to vector<16x896xf32>
    %12 = arith.addf %9, %11 : vector<16x896xf32>
    %cst_5 = arith.constant 0.000000e+00 : f32
    %13 = vector.broadcast %cst_5 : f32 to vector<16x896xf32>
    %14 = arith.maximumf %12, %13 : vector<16x896xf32>
    %15 = arith.truncf %14 : vector<16x896xf32> to vector<16x896xbf16>
    %c0_6 = arith.constant 0 : index
    %c0_7 = arith.constant 0 : index
    %16 = vector.load %arg4[%c0_6, %c0_7] : memref<896x1024xbf16, #tpu.memory_space<vmem>>, vector<896x1024xbf16>
    %cst_8 = arith.constant dense<0.000000e+00> : vector<16x1024xf32>
    %17 = tpu.matmul %15, %16, %cst_8 {dimension_numbers = #tpu.dot_dimension_numbers<[1], [0], [0], [1], [0, 0, 1, 1], [], []>} : vector<16x896xbf16>, vector<896x1024xbf16>, vector<16x1024xf32> -> vector<16x1024xf32>
    %18 = vector.extract_strided_slice %17 {offsets = [0, 0], sizes = [16, 256], strides = [1, 1]} : vector<16x1024xf32> to vector<16x256xf32>
    %19 = vector.extract_strided_slice %17 {offsets = [0, 256], sizes = [16, 256], strides = [1, 1]} : vector<16x1024xf32> to vector<16x256xf32>
    %20 = arith.maximumf %18, %19 : vector<16x256xf32>
    %21 = vector.extract_strided_slice %17 {offsets = [0, 512], sizes = [16, 256], strides = [1, 1]} : vector<16x1024xf32> to vector<16x256xf32>
    %22 = vector.extract_strided_slice %17 {offsets = [0, 768], sizes = [16, 256], strides = [1, 1]} : vector<16x1024xf32> to vector<16x256xf32>
    %23 = arith.maximumf %21, %22 : vector<16x256xf32>
    %24 = arith.maximumf %20, %23 : vector<16x256xf32>
    %c0_9 = arith.constant 0 : index
    %c0_10 = arith.constant 0 : index
    %25 = vector.load %arg5[%c0_9, %c0_10] : memref<1x256xf32, #tpu.memory_space<vmem>>, vector<1x256xf32>
    %26 = vector.broadcast %25 : vector<1x256xf32> to vector<16x256xf32>
    %27 = arith.addf %24, %26 : vector<16x256xf32>
    %cst_11 = arith.constant 0.000000e+00 : f32
    %28 = vector.broadcast %cst_11 : f32 to vector<16x256xf32>
    %29 = arith.maximumf %27, %28 : vector<16x256xf32>
    %30 = arith.truncf %29 : vector<16x256xf32> to vector<16x256xbf16>
    %c0_12 = arith.constant 0 : index
    %c0_13 = arith.constant 0 : index
    %31 = vector.load %arg6[%c0_12, %c0_13] : memref<256x128xbf16, #tpu.memory_space<vmem>>, vector<256x128xbf16>
    %cst_14 = arith.constant dense<0.000000e+00> : vector<16x128xf32>
    %32 = tpu.matmul %30, %31, %cst_14 {dimension_numbers = #tpu.dot_dimension_numbers<[1], [0], [0], [1], [0, 0, 1, 1], [], []>} : vector<16x256xbf16>, vector<256x128xbf16>, vector<16x128xf32> -> vector<16x128xf32>
    %c0_15 = arith.constant 0 : index
    %c0_16 = arith.constant 0 : index
    %33 = vector.load %arg7[%c0_15, %c0_16] : memref<1x128xf32, #tpu.memory_space<vmem>>, vector<1x128xf32>
    %34 = vector.broadcast %33 : vector<1x128xf32> to vector<16x128xf32>
    %35 = arith.addf %32, %34 : vector<16x128xf32>
    %cst_17 = arith.constant 0.000000e+00 : f32
    %36 = vector.broadcast %cst_17 : f32 to vector<16x128xf32>
    %37 = arith.maximumf %35, %36 : vector<16x128xf32>
    %38 = arith.truncf %37 : vector<16x128xf32> to vector<16x128xbf16>
    %c0_18 = arith.constant 0 : index
    %c0_19 = arith.constant 0 : index
    %39 = vector.load %arg8[%c0_18, %c0_19] : memref<128x128xbf16, #tpu.memory_space<vmem>>, vector<128x128xbf16>
    %cst_20 = arith.constant dense<0.000000e+00> : vector<16x128xf32>
    %40 = tpu.matmul %38, %39, %cst_20 {dimension_numbers = #tpu.dot_dimension_numbers<[1], [0], [0], [1], [0, 0, 1, 1], [], []>} : vector<16x128xbf16>, vector<128x128xbf16>, vector<16x128xf32> -> vector<16x128xf32>
    %c0_21 = arith.constant 0 : index
    %c0_22 = arith.constant 0 : index
    %41 = vector.load %arg9[%c0_21, %c0_22] : memref<1x128xf32, #tpu.memory_space<vmem>>, vector<1x128xf32>
    %42 = vector.broadcast %41 : vector<1x128xf32> to vector<16x128xf32>
    %43 = arith.addf %40, %42 : vector<16x128xf32>
    %cst_23 = arith.constant 0.000000e+00 : f32
    %44 = vector.broadcast %cst_23 : f32 to vector<16x128xf32>
    %45 = arith.maximumf %43, %44 : vector<16x128xf32>
    %46 = arith.truncf %45 : vector<16x128xf32> to vector<16x128xbf16>
    %c0_24 = arith.constant 0 : index
    %c0_25 = arith.constant 0 : index
    %47 = vector.load %arg10[%c0_24, %c0_25] : memref<128x128xbf16, #tpu.memory_space<vmem>>, vector<128x128xbf16>
    %cst_26 = arith.constant dense<0.000000e+00> : vector<16x128xf32>
    %48 = tpu.matmul %46, %47, %cst_26 {dimension_numbers = #tpu.dot_dimension_numbers<[1], [0], [0], [1], [0, 0, 1, 1], [], []>} : vector<16x128xbf16>, vector<128x128xbf16>, vector<16x128xf32> -> vector<16x128xf32>
    %c0_27 = arith.constant 0 : index
    %c0_28 = arith.constant 0 : index
    %49 = vector.load %arg11[%c0_27, %c0_28] : memref<1x128xf32, #tpu.memory_space<vmem>>, vector<1x128xf32>
    %50 = vector.broadcast %49 : vector<1x128xf32> to vector<16x128xf32>
    %51 = arith.addf %48, %50 : vector<16x128xf32>
    %c0_29 = arith.constant 0 : index
    %c0_30 = arith.constant 0 : index
    %52 = vector.load %arg12[%c0_29, %c0_30] : memref<16x128xf32, #tpu.memory_space<vmem>>, vector<16x128xf32>
    tpu.vector_store %arg12[%c0_29, %c0_30], %51 {strides = array<i32>} : memref<16x128xf32, #tpu.memory_space<vmem>>, vector<16x128xf32>,
    return
  }
  func.func @transform_0(%arg0: i32) -> (i32, i32) {
    %c0_i32 = arith.constant 0 : i32
    %c0_i32_0 = arith.constant 0 : i32
    return %arg0, %c0_i32 : i32, i32
  }
  func.func @transform_1(%arg0: i32) -> (i32, i32) {
    %c0_i32 = arith.constant 0 : i32
    %c0_i32_0 = arith.constant 0 : i32
    %c0_i32_1 = arith.constant 0 : i32
    return %c0_i32, %c0_i32_0 : i32, i32
  }
  func.func @transform_2(%arg0: i32) -> (i32, i32) {
    %c0_i32 = arith.constant 0 : i32
    %c0_i32_0 = arith.constant 0 : i32
    %c0_i32_1 = arith.constant 0 : i32
    return %c0_i32, %c0_i32_0 : i32, i32
  }
  func.func @transform_3(%arg0: i32) -> (i32, i32) {
    %c0_i32 = arith.constant 0 : i32
    %c0_i32_0 = arith.constant 0 : i32
    %c0_i32_1 = arith.constant 0 : i32
    return %c0_i32, %c0_i32_0 : i32, i32
  }
  func.func @transform_4(%arg0: i32) -> (i32, i32) {
    %c0_i32 = arith.constant 0 : i32
    %c0_i32_0 = arith.constant 0 : i32
    %c0_i32_1 = arith.constant 0 : i32
    return %c0_i32, %c0_i32_0 : i32, i32
  }
  func.func @transform_5(%arg0: i32) -> (i32, i32) {
    %c0_i32 = arith.constant 0 : i32
    %c0_i32_0 = arith.constant 0 : i32
    %c0_i32_1 = arith.constant 0 : i32
    return %c0_i32, %c0_i32_0 : i32, i32
  }
  func.func @transform_6(%arg0: i32) -> (i32, i32) {
    %c0_i32 = arith.constant 0 : i32
    %c0_i32_0 = arith.constant 0 : i32
    %c0_i32_1 = arith.constant 0 : i32
    return %c0_i32, %c0_i32_0 : i32, i32
  }
  func.func @transform_7(%arg0: i32) -> (i32, i32) {
    %c0_i32 = arith.constant 0 : i32
    %c0_i32_0 = arith.constant 0 : i32
    %c0_i32_1 = arith.constant 0 : i32
    return %c0_i32, %c0_i32_0 : i32, i32
  }
  func.func @transform_8(%arg0: i32) -> (i32, i32) {
    %c0_i32 = arith.constant 0 : i32
    %c0_i32_0 = arith.constant 0 : i32
    %c0_i32_1 = arith.constant 0 : i32
    return %c0_i32, %c0_i32_0 : i32, i32
  }
  func.func @transform_9(%arg0: i32) -> (i32, i32) {
    %c0_i32 = arith.constant 0 : i32
    %c0_i32_0 = arith.constant 0 : i32
    %c0_i32_1 = arith.constant 0 : i32
    return %c0_i32, %c0_i32_0 : i32, i32
  }
  func.func @transform_10(%arg0: i32) -> (i32, i32) {
    %c0_i32 = arith.constant 0 : i32
    %c0_i32_0 = arith.constant 0 : i32
    %c0_i32_1 = arith.constant 0 : i32
    return %c0_i32, %c0_i32_0 : i32, i32
  }
  func.func @transform_11(%arg0: i32) -> (i32, i32) {
    %c0_i32 = arith.constant 0 : i32
    %c0_i32_0 = arith.constant 0 : i32
    return %arg0, %c0_i32 : i32, i32
  }
}

</mosaic_0001>

<bundles_post_ra>
// kernel: lenet_forward.1
= control target key start
LH: loop header
LB: loop body
LE: loop exit
PB: predicated region body
PF: predicated region fallthrough
CT: control target
= control target key end

     0   :  { %16 = vsyncpa [#allocation3], 0  ;;  %s21713_s0 = inlined_call_operand.vmem [shape: bf16[16,896], index: 0, kind: input, shape index: {}]   ;;  %s21714_s1 = inlined_call_operand.hbm [shape: bf16[896,3584], index: 1, kind: input, shape index: {}]   ;;  %s21715_s2 = inlined_call_operand.hbm [shape: f32[1,896], index: 2, kind: input, shape index: {}]   ;;  %s21716_s3 = inlined_call_operand.hbm [shape: bf16[896,1024], index: 3, kind: input, shape index: {}]   ;;  %s21717_s4 = inlined_call_operand.hbm [shape: f32[1,256], index: 4, kind: input, shape index: {}]   ;;  %s21718_s5 = inlined_call_operand.hbm [shape: bf16[256,128], index: 5, kind: input, shape index: {}]   ;;  %s21719_s6 = inlined_call_operand.hbm [shape: f32[1,128], index: 6, kind: input, shape index: {}]   ;;  %s21720_s7 = inlined_call_operand.hbm [shape: bf16[128,128], index: 7, kind: input, shape index: {}]   ;;  %s21721_s8 = inlined_call_operand.hbm [shape: f32[1,128], index: 8, kind: input, shape index: {}]   ;;  %s21722_s9 = inlined_call_operand.hbm [shape: bf16[128,128], index: 9, kind: input, shape index: {}]   ;;  %s21723_s10 = inlined_call_operand.hbm [shape: f32[1,128], index: 10, kind: input, shape index: {}]   ;;  %s21724_s11 = inlined_call_operand.vmem [shape: f32[16,128], index: 11, kind: output, shape index: {}]  }
   0x1   :  { %17 = vsyncpa [#allocation5], 0 }
   0x2   :  { %18 = vsyncpa [#allocation8], 0 }
   0x3   :  { %19 = vsyncpa [#allocation11], 0 }
   0x4   :  { %20 = vsyncpa [#allocation14], 0 }
   0x5   :  { %21 = vsyncpa [#allocation17], 0  ;;  %s21001_s17 = smov [#allocation4]   ;;  %s21002_s19 = smov [#allocation7]  }
   0x6   :  { %s42_s18 = sshll.u32 %s21001_s17, 4  ;;  %s64_s20 = sshll.u32 %s21002_s19, 4  ;;  %s43_s18 = int_to_ptr.vmem [resolvable:$true] %s42_s18  ;;  %s65_s20 = int_to_ptr.vmem [resolvable:$true] %s64_s20 }
   0x7   :  { %s20769_s23 = scalar_lea.hbm %s21715_s2, 112 }
   0x8   :  { %p20770_p0 = scmp.ne.s32.totalorder %s21715_s2, %s20769_s23  ;;  %p20773_p1 = scmp.lt.u32.totalorder %s20769_s23, %s21715_s2 }
   0xa   :  { %p20775_p2 = pnand %p20773_p1, %p20770_p0 }
   0xc   :  { %20778 = shalt.err (!%p20775_p2)
}
   0xd   :  { %s20779_s28 = scalar_lea.vmem %s43_s18, 112  ;;  %s20783_s29 = scalar_lea.vmem %s43_s18, 128 }
   0xe   :  { %p20780_p3 = scmp.ne.s32.totalorder %s43_s18, %s20779_s28  ;;  %p20784_p4 = scmp.lt.s32.totalorder %s43_s18, %s43_s18 }
   0xf   :  { %p20785_p5 = scmp.lt.s32.totalorder %s20783_s29, %s20779_s28 }
  0x11   :  { %p20786_p6 = por %p20785_p5, %p20784_p4 }
  0x13   :  { %p20787_p7 = pnand %p20786_p6, %p20780_p3 }
  0x15   :  { %20790 = shalt.err (!%p20787_p7)
}
  0x16   :  { %45 = dma.hbm_to_vmem [thread:$0]  %s21715_s2, 112, %s43_s18, [#allocation5]  }
  0x17   :  { %s20791_s15 = scalar_lea.hbm %s21717_s4, 32 }
  0x18   :  { %p20792_p8 = scmp.ne.s32.totalorder %s21717_s4, %s20791_s15  ;;  %p20795_p9 = scmp.lt.u32.totalorder %s20791_s15, %s21717_s4 }
  0x1a   :  { %p20797_p10 = pnand %p20795_p9, %p20792_p8 }
  0x1c   :  { %20800 = shalt.err (!%p20797_p10)
}
  0x1d   :  { %s20801_s22 = scalar_lea.vmem %s65_s20, 32  ;;  %p20806_p12 = scmp.lt.s32.totalorder %s65_s20, %s65_s20 }
  0x1e   :  { %p20802_p11 = scmp.ne.s32.totalorder %s65_s20, %s20801_s22  ;;  %p20807_p13 = scmp.lt.s32.totalorder %s20801_s22, %s20801_s22 }
  0x20   :  { %p20808_p0 = por %p20807_p13, %p20806_p12 }
  0x22   :  { %p20809_p1 = pnand %p20808_p0, %p20802_p11 }
  0x24   :  { %20812 = shalt.err (!%p20809_p1)
}
  0x25   :  { %67 = dma.hbm_to_vmem [thread:$0]  %s21717_s4, 32, %s65_s20, [#allocation8]  }
  0x26   :  { %s21003_s23 = smov [#allocation10]   ;;  %s21004_s25 = smov [#allocation13]  }
  0x27   :  { %s86_s24 = sshll.u32 %s21003_s23, 4  ;;  %s108_s26 = sshll.u32 %s21004_s25, 4  ;;  %s87_s24 = int_to_ptr.vmem [resolvable:$true] %s86_s24  ;;  %s109_s26 = int_to_ptr.vmem [resolvable:$true] %s108_s26 }
  0x28   :  { %s20813_s29 = scalar_lea.hbm %s21719_s6, 16 }
  0x29   :  { %p20814_p2 = scmp.ne.s32.totalorder %s21719_s6, %s20813_s29  ;;  %p20817_p3 = scmp.lt.u32.totalorder %s20813_s29, %s21719_s6 }
  0x2b   :  { %p20819_p4 = pnand %p20817_p3, %p20814_p2 }
  0x2d   :  { %20822 = shalt.err (!%p20819_p4)
}
  0x2e   :  { %s20823_s4 = scalar_lea.vmem %s87_s24, 16  ;;  %s20827_s20 = scalar_lea.vmem %s87_s24, 32 }
  0x2f   :  { %p20824_p5 = scmp.ne.s32.totalorder %s87_s24, %s20823_s4  ;;  %p20828_p6 = scmp.lt.s32.totalorder %s87_s24, %s87_s24 }
  0x30   :  { %p20829_p7 = scmp.lt.s32.totalorder %s20827_s20, %s20823_s4 }
  0x32   :  { %p20830_p8 = por %p20829_p7, %p20828_p6 }
  0x34   :  { %p20831_p9 = pnand %p20830_p8, %p20824_p5 }
  0x36   :  { %20834 = shalt.err (!%p20831_p9)
}
  0x37   :  { %89 = dma.hbm_to_vmem [thread:$0]  %s21719_s6, 16, %s87_s24, [#allocation11]  }
  0x38   :  { %s20835_s21 = scalar_lea.hbm %s21721_s8, 16 }
  0x39   :  { %p20836_p10 = scmp.ne.s32.totalorder %s21721_s8, %s20835_s21  ;;  %p20839_p11 = scmp.lt.u32.totalorder %s20835_s21, %s21721_s8 }
  0x3b   :  { %p20841_p12 = pnand %p20839_p11, %p20836_p10 }
  0x3d   :  { %20844 = shalt.err (!%p20841_p12)
}
  0x3e   :  { %s20845_s25 = scalar_lea.vmem %s109_s26, 16  ;;  %s20849_s27 = scalar_lea.vmem %s109_s26, 32 }
  0x3f   :  { %p20846_p13 = scmp.ne.s32.totalorder %s109_s26, %s20845_s25  ;;  %p20850_p0 = scmp.lt.s32.totalorder %s109_s26, %s109_s26 }
  0x40   :  { %p20851_p1 = scmp.lt.s32.totalorder %s20849_s27, %s20845_s25 }
  0x42   :  { %p20852_p2 = por %p20851_p1, %p20850_p0 }
  0x44   :  { %p20853_p3 = pnand %p20852_p2, %p20846_p13 }
  0x46   :  { %20856 = shalt.err (!%p20853_p3)
}
  0x47   :  { %111 = dma.hbm_to_vmem [thread:$0]  %s21721_s8, 16, %s109_s26, [#allocation14]  }
  0x48   :  { %s21005_s28 = smov [#allocation2]   ;;  %s20857_s13 = scalar_lea.hbm %s21714_s1, 200704 }
  0x49   :  { %s29_s29 = sshll.u32 %s21005_s28, 4  ;;  %p20858_p4 = scmp.ne.s32.totalorder %s21714_s1, %s20857_s13  ;;  %s30_s29 = int_to_ptr.vmem [resolvable:$true] %s29_s29 }
  0x4a   :  { %p20861_p5 = scmp.lt.u32.totalorder %s20857_s13, %s21714_s1 }
  0x4c   :  { %p20863_p6 = pnand %p20861_p5, %p20858_p4 }
  0x4e   :  { %20866 = shalt.err (!%p20863_p6)
}
  0x4f   :  { %s20867_s16 = scalar_lea.vmem %s30_s29, 200704  ;;  %p20872_p8 = scmp.lt.s32.totalorder %s30_s29, %s30_s29 }
  0x50   :  { %p20868_p7 = scmp.ne.s32.totalorder %s30_s29, %s20867_s16  ;;  %p20873_p9 = scmp.lt.s32.totalorder %s20867_s16, %s20867_s16 }
  0x52   :  { %p20874_p10 = por %p20873_p9, %p20872_p8 }
  0x54   :  { %p20875_p11 = pnand %p20874_p10, %p20868_p7 }
  0x56   :  { %20878 = shalt.err (!%p20875_p11)
}
  0x57   :  { %s21006_s8 = smov 1792   ;;  %s21007_s26 = smov 112  }
  0x58   :  { %35 = dma.hbm_to_vmem [thread:$0]  %s21714_s1, 200704, %s30_s29, [#allocation3], %s21006_s8, %s21006_s8, %s21007_s26  }
  0x59   :  { %s21008_s21 = smov [#allocation6]   ;;  %s20879_s23 = scalar_lea.hbm %s21716_s3, 57344 }
  0x5a   :  { %s51_s22 = sshll.u32 %s21008_s21, 4  ;;  %p20880_p12 = scmp.ne.s32.totalorder %s21716_s3, %s20879_s23  ;;  %s52_s22 = int_to_ptr.vmem [resolvable:$true] %s51_s22 }
  0x5b   :  { %p20883_p13 = scmp.lt.u32.totalorder %s20879_s23, %s21716_s3 }
  0x5d   :  { %p20885_p0 = pnand %p20883_p13, %p20880_p12 }
  0x5f   :  { %20888 = shalt.err (!%p20885_p0)
}
  0x60   :  { %s20889_s28 = scalar_lea.vmem %s52_s22, 57344  ;;  %p20894_p2 = scmp.lt.s32.totalorder %s52_s22, %s52_s22 }
  0x61   :  { %p20890_p1 = scmp.ne.s32.totalorder %s52_s22, %s20889_s28  ;;  %p20895_p3 = scmp.lt.s32.totalorder %s20889_s28, %s20889_s28 }
  0x63   :  { %p20896_p4 = por %p20895_p3, %p20894_p2 }
  0x65   :  { %p20897_p5 = pnand %p20896_p4, %p20890_p1 }
  0x67   :  { %20900 = shalt.err (!%p20897_p5)
}
  0x68   :  { %s21009_s1 = smov 512   ;;  %s21010_s29 = smov 32  }
  0x69   :  { %57 = dma.hbm_to_vmem [thread:$0]  %s21716_s3, 57344, %s52_s22, [#allocation5], %s21009_s1, %s21009_s1, %s21010_s29  }
  0x6a   :  { %s21011_s13 = smov [#allocation9]   ;;  %s20901_s15 = scalar_lea.hbm %s21718_s5, 2048 }
  0x6b   :  { %s73_s14 = sshll.u32 %s21011_s13, 4  ;;  %p20902_p6 = scmp.ne.s32.totalorder %s21718_s5, %s20901_s15  ;;  %s74_s14 = int_to_ptr.vmem [resolvable:$true] %s73_s14 }
  0x6c   :  { %p20905_p7 = scmp.lt.u32.totalorder %s20901_s15, %s21718_s5 }
  0x6e   :  { %p20907_p8 = pnand %p20905_p7, %p20902_p6 }
  0x70   :  { %20910 = shalt.err (!%p20907_p8)
}
  0x71   :  { %s20911_s19 = scalar_lea.vmem %s74_s14, 2048  ;;  %p20916_p10 = scmp.lt.s32.totalorder %s74_s14, %s74_s14 }
  0x72   :  { %p20912_p9 = scmp.ne.s32.totalorder %s74_s14, %s20911_s19  ;;  %p20917_p11 = scmp.lt.s32.totalorder %s20911_s19, %s20911_s19 }
  0x74   :  { %p20918_p12 = por %p20917_p11, %p20916_p10 }
  0x76   :  { %p20919_p13 = pnand %p20918_p12, %p20912_p9 }
  0x78   :  { %20922 = shalt.err (!%p20919_p13)
}
  0x79   :  { %s21012_s3 = smov 64   ;;  %s21013_s21 = smov 4  }
  0x7a   :  { %79 = dma.hbm_to_vmem [thread:$0]  %s21718_s5, 2048, %s74_s14, [#allocation8], %s21012_s3, %s21012_s3, %s21013_s21  }
  0x7b   :  { %s21014_s18 = smov [#allocation12]   ;;  %s21015_s25 = smov [#allocation15]  }
  0x7c   :  { %s95_s23 = sshll.u32 %s21014_s18, 4  ;;  %s117_s27 = sshll.u32 %s21015_s25, 4  ;;  %s96_s23 = int_to_ptr.vmem [resolvable:$true] %s95_s23  ;;  %s118_s27 = int_to_ptr.vmem [resolvable:$true] %s117_s27 }
  0x7d   :  { %s20923_s28 = scalar_lea.hbm %s21720_s7, 1024 }
  0x7e   :  { %p20924_p0 = scmp.ne.s32.totalorder %s21720_s7, %s20923_s28  ;;  %p20927_p1 = scmp.lt.u32.totalorder %s20923_s28, %s21720_s7 }
  0x80   :  { %p20929_p2 = pnand %p20927_p1, %p20924_p0 }
  0x82   :  { %20932 = shalt.err (!%p20929_p2)
}
  0x83   :  { %s20933_s5 = scalar_lea.vmem %s96_s23, 1024  ;;  %p20938_p4 = scmp.lt.s32.totalorder %s96_s23, %s96_s23 }
  0x84   :  { %p20934_p3 = scmp.ne.s32.totalorder %s96_s23, %s20933_s5  ;;  %p20939_p5 = scmp.lt.s32.totalorder %s20933_s5, %s20933_s5 }
  0x86   :  { %p20940_p6 = por %p20939_p5, %p20938_p4 }
  0x88   :  { %p20941_p7 = pnand %p20940_p6, %p20934_p3 }
  0x8a   :  { %20944 = shalt.err (!%p20941_p7)
}
  0x8b   :  { %101 = dma.hbm_to_vmem [thread:$0]  %s21720_s7, 1024, %s96_s23, [#allocation11], %s21012_s3, %s21012_s3, %s21013_s21  }
  0x8c   :  { %s20945_s15 = scalar_lea.hbm %s21722_s9, 1024 }
  0x8d   :  { %p20946_p8 = scmp.ne.s32.totalorder %s21722_s9, %s20945_s15  ;;  %p20949_p9 = scmp.lt.u32.totalorder %s20945_s15, %s21722_s9 }
  0x8f   :  { %p20951_p10 = pnand %p20949_p9, %p20946_p8 }
  0x91   :  { %20954 = shalt.err (!%p20951_p10)
}
  0x92   :  { %s20955_s19 = scalar_lea.vmem %s118_s27, 1024  ;;  %p20960_p12 = scmp.lt.s32.totalorder %s118_s27, %s118_s27 }
  0x93   :  { %p20956_p11 = scmp.ne.s32.totalorder %s118_s27, %s20955_s19  ;;  %p20961_p13 = scmp.lt.s32.totalorder %s20955_s19, %s20955_s19 }
  0x95   :  { %p20962_p0 = por %p20961_p13, %p20960_p12 }
  0x97   :  { %p20963_p1 = pnand %p20962_p0, %p20956_p11 }
  0x99   :  { %20966 = shalt.err (!%p20963_p1)
}
  0x9a   :  { %123 = dma.hbm_to_vmem [thread:$0]  %s21722_s9, 1024, %s118_s27, [#allocation14], %s21012_s3, %s21012_s3, %s21013_s21  }
  0x9b   :  { %s21016_s2 = smov [#allocation16]   ;;  %s20967_s6 = scalar_lea.hbm %s21723_s10, 16 }
  0x9c   :  { %s130_s18 = sshll.u32 %s21016_s2, 4  ;;  %p20968_p2 = scmp.ne.s32.totalorder %s21723_s10, %s20967_s6  ;;  %s131_s18 = int_to_ptr.vmem [resolvable:$true] %s130_s18 }
  0x9d   :  { %p20971_p3 = scmp.lt.u32.totalorder %s20967_s6, %s21723_s10 }
  0x9f   :  { %p20973_p4 = pnand %p20971_p3, %p20968_p2 }
  0xa1   :  { %20976 = shalt.err (!%p20973_p4)
}
  0xa2   :  { %s20977_s30 = scalar_lea.vmem %s131_s18, 16  ;;  %s20981_s9 = scalar_lea.vmem %s131_s18, 32 }
  0xa3   :  { %p20978_p5 = scmp.ne.s32.totalorder %s131_s18, %s20977_s30  ;;  %p20982_p6 = scmp.lt.s32.totalorder %s131_s18, %s131_s18 }
  0xa4   :  { %p20983_p7 = scmp.lt.s32.totalorder %s20981_s9, %s20977_s30 }
  0xa6   :  { %p20984_p8 = por %p20983_p7, %p20982_p6 }
  0xa8   :  { %p20985_p9 = pnand %p20984_p8, %p20978_p5 }
  0xaa   :  { %20988 = shalt.err (!%p20985_p9)
}
  0xab   :  { %133 = dma.hbm_to_vmem [thread:$0]  %s21723_s10, 16, %s131_s18, [#allocation17]  }
  0xac   :  { %20989 = dma.done.wait [#allocation3], 200704  }
  0xad   :  { %20990 = vsyncadd [#allocation3], 4294766592 }
  0xae   :  { %20991 = dma.done.wait [#allocation5], 57456  }
  0xaf   :  { %20992 = vsyncadd [#allocation5], 4294909840 }
  0xb0   :  { %20993 = dma.done.wait [#allocation8], 2080  }
  0xb1   :  { %20994 = vsyncadd [#allocation8], 4294965216 }
  0xb2   :  { %20995 = dma.done.wait [#allocation11], 1040  }
  0xb3   :  { %20996 = vsyncadd [#allocation11], 4294966256 }
  0xb4   :  { %20997 = dma.done.wait [#allocation14], 1040  }
  0xb5   :  { %20998 = vsyncadd [#allocation14], 4294966256 }
  0xb6   :  { %20999 = dma.done.wait [#allocation17], 16  }
  0xb7   :  { %21000 = vsyncadd [#allocation17], 4294967280  ;;  %v18340_v0 = vld [vmem:[#allocation2 + $0x4] ss:$112 sps:$4 sm:$0xff]   ;;  %v18342_v1 = vld [vmem:[#allocation2 + $0xc] ss:$112 sps:$4 sm:$0xff]  }
  0xb8   :  { %9617 = vmatprep.subr.bf16.mxu0 %v18340_v0  ;;  %v18344_v2 = vld [vmem:[#allocation2] ss:$112 sps:$4 sm:$0xff]   ;;  %v18345_v3 = vld [vmem:[#allocation2 + $0x8] ss:$112 sps:$4 sm:$0xff]   ;;  %9789 = vmatprep.subr.bf16.mxu1 %v18342_v1  ;;  %v18346_v4 = vld [vmem:[#allocation2 + $0xe4] ss:$112 sps:$4 sm:$0xff]  }
  0xb9   :  { %9618 = vmatpush1.bf16.msra.mxu0 %v18344_v2  ;;  %9790 = vmatpush1.bf16.msra.mxu1 %v18345_v3  ;;  %v18348_v5 = vld [vmem:[#allocation2 + $0xec] ss:$112 sps:$4 sm:$0xff]   ;;  %v18350_v6 = vld [vmem:[#allocation2 + $0xe0] ss:$112 sps:$4 sm:$0xff]   ;;  %v18351_v7 = vld [vmem:[#allocation2 + $0xe8] ss:$112 sps:$4 sm:$0xff]  }
  0xba   :  { %9619 = vmatprep.subr.bf16.mxu0 %v18346_v4  ;;  %9791 = vmatprep.subr.bf16.mxu1 %v18348_v5  ;;  %v18352_v8 = vld [vmem:[#allocation2 + $0x1c4] ss:$112 sps:$4 sm:$0xff]   ;;  %v18354_v9 = vld [vmem:[#allocation2 + $0x1cc] ss:$112 sps:$4 sm:$0xff]   ;;  %v18356_v10 = vld [vmem:[#allocation2 + $0x1c0] ss:$112 sps:$4 sm:$0xff]  }
  0xbb   :  { %v18357_v11 = vld [vmem:[#allocation2 + $0x1c8] ss:$112 sps:$4 sm:$0xff]   ;;  %v18358_v12 = vld [vmem:[#allocation2 + $0x2a4] ss:$112 sps:$4 sm:$0xff]   ;;  %v18360_v13 = vld [vmem:[#allocation2 + $0x2ac] ss:$112 sps:$4 sm:$0xff]  }
  0xbc   :  { %v18362_v14 = vld [vmem:[#allocation2 + $0x2a0] ss:$112 sps:$4 sm:$0xff]   ;;  %v18363_v15 = vld [vmem:[#allocation2 + $0x2a8] ss:$112 sps:$4 sm:$0xff]   ;;  %v18364_v16 = vld [vmem:[#allocation2 + $0x384] ss:$112 sps:$4 sm:$0xff]  }
  0xbd   :  { %9620 = vmatpush1.bf16.msra.mxu0 %v18350_v6  ;;  %9792 = vmatpush1.bf16.msra.mxu1 %v18351_v7  ;;  %v18366_v17 = vld [vmem:[#allocation2 + $0x38c] ss:$112 sps:$4 sm:$0xff]   ;;  %v18368_v18 = vld [vmem:[#allocation2 + $0x380] ss:$112 sps:$4 sm:$0xff]   ;;  %v18369_v19 = vld [vmem:[#allocation2 + $0x388] ss:$112 sps:$4 sm:$0xff]  }
  0xbe   :  { %9621 = vmatprep.subr.bf16.mxu0 %v18352_v8  ;;  %9793 = vmatprep.subr.bf16.mxu1 %v18354_v9  ;;  %v18370_v20 = vld [vmem:[#allocation2 + $0x464] ss:$112 sps:$4 sm:$0xff]   ;;  %v18372_v21 = vld [vmem:[#allocation2 + $0x46c] ss:$112 sps:$4 sm:$0xff]   ;;  %v18374_v22 = vld [vmem:[#allocation2 + $0x460] ss:$112 sps:$4 sm:$0xff]  }
  0xbf   :  { %v18375_v23 = vld [vmem:[#allocation2 + $0x468] ss:$112 sps:$4 sm:$0xff]   ;;  %v18376_v24 = vld [vmem:[#allocation2 + $0x544] ss:$112 sps:$4 sm:$0xff]   ;;  %v18378_v25 = vld [vmem:[#allocation2 + $0x54c] ss:$112 sps:$4 sm:$0xff]  }
  0xc0   :  { %v18380_v26 = vld [vmem:[#allocation2 + $0x540] ss:$112 sps:$4 sm:$0xff]   ;;  %v18381_v27 = vld [vmem:[#allocation2 + $0x548] ss:$112 sps:$4 sm:$0xff]   ;;  %v18382_v28 = vld [vmem:[#allocation2 + $0x624] ss:$112 sps:$4 sm:$0xff]  }
  0xc1   :  { %9622 = vmatpush1.bf16.msra.mxu0 %v18356_v10  ;;  %9794 = vmatpush1.bf16.msra.mxu1 %v18357_v11  ;;  %v18384_v29 = vld [vmem:[#allocation2 + $0x62c] ss:$112 sps:$4 sm:$0xff]   ;;  %v18386_v30 = vld [vmem:[#allocation2 + $0x620] ss:$112 sps:$4 sm:$0xff]   ;;  %v18387_v31 = vld [vmem:[#allocation2 + $0x628] ss:$112 sps:$4 sm:$0xff]  }
  0xc2   :  { %9623 = vmatprep.subr.bf16.mxu0 %v18358_v12  ;;  %9795 = vmatprep.subr.bf16.mxu1 %v18360_v13  ;;  %v18388_v32 = vld [vmem:[#allocation2 + $0x704] ss:$112 sps:$4 sm:$0xff]   ;;  %v18390_v33 = vld [vmem:[#allocation2 + $0x70c] ss:$112 sps:$4 sm:$0xff]   ;;  %v18392_v34 = vld [vmem:[#allocation2 + $0x700] ss:$112 sps:$4 sm:$0xff]  }
  0xc3   :  { %v18393_v35 = vld [vmem:[#allocation2 + $0x708] ss:$112 sps:$4 sm:$0xff]   ;;  %v18394_v36 = vld [vmem:[#allocation2 + $0x7e4] ss:$112 sps:$4 sm:$0xff]   ;;  %v18396_v37 = vld [vmem:[#allocation2 + $0x7ec] ss:$112 sps:$4 sm:$0xff]  }
  0xc4   :  { %v18398_v38 = vld [vmem:[#allocation2 + $0x7e0] ss:$112 sps:$4 sm:$0xff]   ;;  %v18399_v39 = vld [vmem:[#allocation2 + $0x7e8] ss:$112 sps:$4 sm:$0xff]   ;;  %v18400_v40 = vld [vmem:[#allocation2 + $0x8c4] ss:$112 sps:$4 sm:$0xff]  }
  0xc5   :  { %9624 = vmatpush1.bf16.msra.mxu0 %v18362_v14  ;;  %9796 = vmatpush1.bf16.msra.mxu1 %v18363_v15  ;;  %v18402_v41 = vld [vmem:[#allocation2 + $0x8cc] ss:$112 sps:$4 sm:$0xff]   ;;  %v18404_v42 = vld [vmem:[#allocation2 + $0x8c0] ss:$112 sps:$4 sm:$0xff]   ;;  %v18405_v43 = vld [vmem:[#allocation2 + $0x8c8] ss:$112 sps:$4 sm:$0xff]  }
  0xc6   :  { %9625 = vmatprep.subr.bf16.mxu0 %v18364_v16  ;;  %9797 = vmatprep.subr.bf16.mxu1 %v18366_v17  ;;  %v18406_v44 = vld [vmem:[#allocation2 + $0x9a4] ss:$112 sps:$4 sm:$0xff]   ;;  %v18408_v45 = vld [vmem:[#allocation2 + $0x9ac] ss:$112 sps:$4 sm:$0xff]   ;;  %v18410_v46 = vld [vmem:[#allocation2 + $0x9a0] ss:$112 sps:$4 sm:$0xff]  }
  0xc7   :  { %v18436_v47 = vld [vmem:[%s21713_s0 + $0x4] ss:$28 sps:$4 sm:$0xff]   ;;  %v18411_v48 = vld [vmem:[#allocation2 + $0x9a8] ss:$112 sps:$4 sm:$0xff]   ;;  %v18414_v50 = vld [vmem:[#allocation2 + $0xa8c] ss:$112 sps:$4 sm:$0xff]  }
  0xc8   :  { %v18412_v49 = vld [vmem:[#allocation2 + $0xa84] ss:$112 sps:$4 sm:$0xff]   ;;  %9649 = vmatprep.mubr.bf16.mxu0 %v18436_v47  ;;  %9821 = vmatprep.mubr.bf16.mxu1 %v18436_v47  ;;  %v18416_v51 = vld [vmem:[#allocation2 + $0xa80] ss:$112 sps:$4 sm:$0xff]   ;;  %v18417_v52 = vld [vmem:[#allocation2 + $0xa88] ss:$112 sps:$4 sm:$0xff]  }
  0xc9   :  { %9626 = vmatpush1.bf16.msra.mxu0 %v18368_v18  ;;  %9798 = vmatpush1.bf16.msra.mxu1 %v18369_v19  ;;  %v18418_v53 = vld [vmem:[#allocation2 + $0xb64] ss:$112 sps:$4 sm:$0xff]   ;;  %v18420_v54 = vld [vmem:[#allocation2 + $0xb6c] ss:$112 sps:$4 sm:$0xff]   ;;  %v18422_v55 = vld [vmem:[#allocation2 + $0xb60] ss:$112 sps:$4 sm:$0xff]  }
  0xca   :  { %9627 = vmatprep.subr.bf16.mxu0 %v18370_v20  ;;  %9799 = vmatprep.subr.bf16.mxu1 %v18372_v21  ;;  %v18423_v56 = vld [vmem:[#allocation2 + $0xb68] ss:$112 sps:$4 sm:$0xff]   ;;  %v18424_v57 = vld [vmem:[#allocation2 + $0xc44] ss:$112 sps:$4 sm:$0xff]   ;;  %v18426_v58 = vld [vmem:[#allocation2 + $0xc4c] ss:$112 sps:$4 sm:$0xff]  }
  0xcb   :  { %v18428_v59 = vld [vmem:[#allocation2 + $0xc40] ss:$112 sps:$4 sm:$0xff]   ;;  %v18429_v60 = vld [vmem:[#allocation2 + $0xc48] ss:$112 sps:$4 sm:$0xff]   ;;  %v18430_v61 = vld [vmem:[#allocation2 + $0xd24] ss:$112 sps:$4 sm:$0xff]  }
  0xcc   :  { %v18432_v62 = vld [vmem:[#allocation2 + $0xd2c] ss:$112 sps:$4 sm:$0xff]   ;;  %v18434_v63 = vld [vmem:[#allocation2 + $0xd20] ss:$112 sps:$4 sm:$0xff]   ;;  %v18435_v0 = vld [vmem:[#allocation2 + $0xd28] ss:$112 sps:$4 sm:$0xff]  }
  0xcd   :  { %9628 = vmatpush1.bf16.msra.mxu0 %v18374_v22  ;;  %9800 = vmatpush1.bf16.msra.mxu1 %v18375_v23  ;;  %v18440_v1 = vld [vmem:[#allocation2 + $0xe04] ss:$112 sps:$4 sm:$0xff]   ;;  %v18443_v2 = vld [vmem:[#allocation2 + $0xe0c] ss:$112 sps:$4 sm:$0xff]   ;;  %v18438_v3 = vld [vmem:[#allocation2 + $0xe00] ss:$112 sps:$4 sm:$0xff]  }
  0xce   :  { %9629 = vmatprep.subr.bf16.mxu0 %v18376_v24  ;;  %9801 = vmatprep.subr.bf16.mxu1 %v18378_v25  ;;  %v18441_v4 = vld [vmem:[#allocation2 + $0xe08] ss:$112 sps:$4 sm:$0xff]   ;;  %v18444_v5 = vld [vmem:[%s21713_s0] ss:$28 sps:$4 sm:$0xff]   ;;  %v18447_v6 = vld [vmem:[#allocation2 + $0xee4] ss:$112 sps:$4 sm:$0xff]  }
  0xcf   :  { %v18450_v7 = vld [vmem:[#allocation2 + $0xeec] ss:$112 sps:$4 sm:$0xff]   ;;  %v18445_v8 = vld [vmem:[#allocation2 + $0xee0] ss:$112 sps:$4 sm:$0xff]   ;;  %v18448_v9 = vld [vmem:[#allocation2 + $0xee8] ss:$112 sps:$4 sm:$0xff]  }
  0xd0   :  { %v18453_v10 = vld [vmem:[#allocation2 + $0xfc4] ss:$112 sps:$4 sm:$0xff]   ;;  %v18456_v11 = vld [vmem:[#allocation2 + $0xfcc] ss:$112 sps:$4 sm:$0xff]   ;;  %v18451_v12 = vld [vmem:[#allocation2 + $0xfc0] ss:$112 sps:$4 sm:$0xff]  }
  0xd1   :  { %9630 = vmatpush1.bf16.msra.mxu0 %v18380_v26  ;;  %9802 = vmatpush1.bf16.msra.mxu1 %v18381_v27  ;;  %v18454_v13 = vld [vmem:[#allocation2 + $0xfc8] ss:$112 sps:$4 sm:$0xff]   ;;  %v18459_v14 = vld [vmem:[#allocation2 + $0x10a4] ss:$112 sps:$4 sm:$0xff]   ;;  %v18462_v15 = vld [vmem:[#allocation2 + $0x10ac] ss:$112 sps:$4 sm:$0xff]  }
  0xd2   :  { %9631 = vmatprep.subr.bf16.mxu0 %v18382_v28  ;;  %9803 = vmatprep.subr.bf16.mxu1 %v18384_v29  ;;  %v18457_v16 = vld [vmem:[#allocation2 + $0x10a0] ss:$112 sps:$4 sm:$0xff]   ;;  %v18460_v17 = vld [vmem:[#allocation2 + $0x10a8] ss:$112 sps:$4 sm:$0xff]   ;;  %v18465_v18 = vld [vmem:[#allocation2 + $0x1184] ss:$112 sps:$4 sm:$0xff]  }
  0xd3   :  { %v18468_v19 = vld [vmem:[#allocation2 + $0x118c] ss:$112 sps:$4 sm:$0xff]   ;;  %v18463_v20 = vld [vmem:[#allocation2 + $0x1180] ss:$112 sps:$4 sm:$0xff]   ;;  %v18466_v21 = vld [vmem:[#allocation2 + $0x1188] ss:$112 sps:$4 sm:$0xff]  }
  0xd4   :  { %v18471_v22 = vld [vmem:[#allocation2 + $0x1264] ss:$112 sps:$4 sm:$0xff]   ;;  %v18474_v23 = vld [vmem:[#allocation2 + $0x126c] ss:$112 sps:$4 sm:$0xff]   ;;  %v18469_v24 = vld [vmem:[#allocation2 + $0x1260] ss:$112 sps:$4 sm:$0xff]  }
  0xd5   :  { %9632 = vmatpush1.bf16.msra.mxu0 %v18386_v30  ;;  %9804 = vmatpush1.bf16.msra.mxu1 %v18387_v31  ;;  %v18472_v25 = vld [vmem:[#allocation2 + $0x1268] ss:$112 sps:$4 sm:$0xff]   ;;  %v18477_v26 = vld [vmem:[#allocation2 + $0x1344] ss:$112 sps:$4 sm:$0xff]   ;;  %v18480_v27 = vld [vmem:[#allocation2 + $0x134c] ss:$112 sps:$4 sm:$0xff]  }
  0xd6   :  { %9633 = vmatprep.subr.bf16.mxu0 %v18388_v32  ;;  %9805 = vmatprep.subr.bf16.mxu1 %v18390_v33  ;;  %v18475_v28 = vld [vmem:[#allocation2 + $0x1340] ss:$112 sps:$4 sm:$0xff]   ;;  %v18535_v29 = vld [vmem:[%s21713_s0 + $0xc] ss:$28 sps:$4 sm:$0xff]   ;;  %v18483_v31 = vld [vmem:[#allocation2 + $0x1424] ss:$112 sps:$4 sm:$0xff]  }
  0xd7   :  { %v18478_v30 = vld [vmem:[#allocation2 + $0x1348] ss:$112 sps:$4 sm:$0xff]   ;;  %v18486_v32 = vld [vmem:[#allocation2 + $0x142c] ss:$112 sps:$4 sm:$0xff]   ;;  %v18481_v33 = vld [vmem:[#allocation2 + $0x1420] ss:$112 sps:$4 sm:$0xff]  }
  0xd8   :  { %v18507_v47 = vld [vmem:[#allocation2 + $0x17a4] ss:$112 sps:$4 sm:$0xff]   ;;  %vm21019_vm0 = vmmov 0  }
  0xd9   :  { %9634 = vmatpush1.bf16.msra.mxu0 %v18392_v34  ;;  %9806 = vmatpush1.bf16.msra.mxu1 %v18393_v35  ;;  %v18484_v34 = vld [vmem:[#allocation2 + $0x1428] ss:$112 sps:$4 sm:$0xff]   ;;  %v18489_v35 = vld [vmem:[#allocation2 + $0x1504] ss:$112 sps:$4 sm:$0xff]  }
  0xda   :  { %9635 = vmatprep.subr.bf16.mxu0 %v18394_v36  ;;  %9807 = vmatprep.subr.bf16.mxu1 %v18396_v37  ;;  %v18492_v36 = vld [vmem:[#allocation2 + $0x150c] ss:$112 sps:$4 sm:$0xff]   ;;  %v18487_v37 = vld [vmem:[#allocation2 + $0x1500] ss:$112 sps:$4 sm:$0xff]  }
  0xdd   :  { %9636 = vmatpush1.bf16.msra.mxu0 %v18398_v38  ;;  %9808 = vmatpush1.bf16.msra.mxu1 %v18399_v39  ;;  %v18490_v38 = vld [vmem:[#allocation2 + $0x1508] ss:$112 sps:$4 sm:$0xff]   ;;  %v18495_v39 = vld [vmem:[#allocation2 + $0x15e4] ss:$112 sps:$4 sm:$0xff]  }
  0xde   :  { %9637 = vmatprep.subr.bf16.mxu0 %v18400_v40  ;;  %9809 = vmatprep.subr.bf16.mxu1 %v18402_v41  ;;  %v18498_v40 = vld [vmem:[#allocation2 + $0x15ec] ss:$112 sps:$4 sm:$0xff]   ;;  %v18493_v41 = vld [vmem:[#allocation2 + $0x15e0] ss:$112 sps:$4 sm:$0xff]  }
  0xe1   :  { %9638 = vmatpush1.bf16.msra.mxu0 %v18404_v42  ;;  %9810 = vmatpush1.bf16.msra.mxu1 %v18405_v43  ;;  %v18496_v42 = vld [vmem:[#allocation2 + $0x15e8] ss:$112 sps:$4 sm:$0xff]   ;;  %v18501_v43 = vld [vmem:[#allocation2 + $0x16c4] ss:$112 sps:$4 sm:$0xff]  }
  0xe2   :  { %9639 = vmatprep.subr.bf16.mxu0 %v18406_v44  ;;  %9811 = vmatprep.subr.bf16.mxu1 %v18408_v45  ;;  %v18504_v44 = vld [vmem:[#allocation2 + $0x16cc] ss:$112 sps:$4 sm:$0xff]   ;;  %v18499_v45 = vld [vmem:[#allocation2 + $0x16c0] ss:$112 sps:$4 sm:$0xff]  }
  0xe5   :  { %9640 = vmatpush1.bf16.msra.mxu0 %v18410_v46  ;;  %9812 = vmatpush1.bf16.msra.mxu1 %v18411_v48  ;;  %v18502_v46 = vld [vmem:[#allocation2 + $0x16c8] ss:$112 sps:$4 sm:$0xff]   ;;  %v18510_v48 = vld [vmem:[#allocation2 + $0x17ac] ss:$112 sps:$4 sm:$0xff]  }
  0xe6   :  { %9641 = vmatprep.subr.bf16.mxu0 %v18412_v49  ;;  %9813 = vmatprep.subr.bf16.mxu1 %v18414_v50  ;;  %v18505_v49 = vld [vmem:[#allocation2 + $0x17a0] ss:$112 sps:$4 sm:$0xff]   ;;  %v18508_v50 = vld [vmem:[#allocation2 + $0x17a8] ss:$112 sps:$4 sm:$0xff]  }
  0xe9   :  { %9642 = vmatpush1.bf16.msra.mxu0 %v18416_v51  ;;  %9814 = vmatpush1.bf16.msra.mxu1 %v18417_v52  ;;  %v18513_v51 = vld [vmem:[#allocation2 + $0x1884] ss:$112 sps:$4 sm:$0xff]   ;;  %v18516_v52 = vld [vmem:[#allocation2 + $0x188c] ss:$112 sps:$4 sm:$0xff]  }
  0xea   :  { %9643 = vmatprep.subr.bf16.mxu0 %v18418_v53  ;;  %9815 = vmatprep.subr.bf16.mxu1 %v18420_v54  ;;  %v18511_v53 = vld [vmem:[#allocation2 + $0x1880] ss:$112 sps:$4 sm:$0xff]   ;;  %v18514_v54 = vld [vmem:[#allocation2 + $0x1888] ss:$112 sps:$4 sm:$0xff]  }
  0xed   :  { %9644 = vmatpush1.bf16.msra.mxu0 %v18422_v55  ;;  %9816 = vmatpush1.bf16.msra.mxu1 %v18423_v56  ;;  %v18519_v55 = vld [vmem:[#allocation2 + $0x1964] ss:$112 sps:$4 sm:$0xff]   ;;  %v18522_v56 = vld [vmem:[#allocation2 + $0x196c] ss:$112 sps:$4 sm:$0xff]  }
  0xee   :  { %9645 = vmatprep.subr.bf16.mxu0 %v18424_v57  ;;  %9817 = vmatprep.subr.bf16.mxu1 %v18426_v58  ;;  %v18517_v57 = vld [vmem:[#allocation2 + $0x1960] ss:$112 sps:$4 sm:$0xff]   ;;  %v18520_v58 = vld [vmem:[#allocation2 + $0x1968] ss:$112 sps:$4 sm:$0xff]  }
  0xf1   :  { %9646 = vmatpush1.bf16.msra.mxu0 %v18428_v59  ;;  %9818 = vmatpush1.bf16.msra.mxu1 %v18429_v60  ;;  %v18525_v59 = vld [vmem:[#allocation2 + $0x1a44] ss:$112 sps:$4 sm:$0xff]   ;;  %v18528_v60 = vld [vmem:[#allocation2 + $0x1a4c] ss:$112 sps:$4 sm:$0xff]  }
  0xf2   :  { %9647 = vmatprep.subr.bf16.mxu0 %v18430_v61  ;;  %9819 = vmatprep.subr.bf16.mxu1 %v18432_v62  ;;  %v18523_v61 = vld [vmem:[#allocation2 + $0x1a40] ss:$112 sps:$4 sm:$0xff]   ;;  %v18526_v62 = vld [vmem:[#allocation2 + $0x1a48] ss:$112 sps:$4 sm:$0xff]  }
  0xf5   :  { %9648 = vmatpush1.bf16.msra.mxu0 %v18434_v63  ;;  %9820 = vmatpush1.bf16.msra.mxu1 %v18435_v0  ;;  %v18531_v63 = vld [vmem:[#allocation2 + $0x1b24] ss:$112 sps:$4 sm:$0xff]   ;;  %v18534_v0 = vld [vmem:[#allocation2 + $0x1b2c] ss:$112 sps:$4 sm:$0xff]  }
  0xf6   :  { %9660 = vmatprep.subr.bf16.mxu0 %v18440_v1  ;;  %9832 = vmatprep.subr.bf16.mxu1 %v18443_v2  ;;  %v18529_v1 = vld [vmem:[#allocation2 + $0x1b20] ss:$112 sps:$4 sm:$0xff]   ;;  %v18532_v2 = vld [vmem:[#allocation2 + $0x1b28] ss:$112 sps:$4 sm:$0xff]  }
  0xf8   :  { %9650 = vmatmul.mubr.bf16.vlgmr.msra.gmra.mrb[0].mxu0 %v18444_v5  ;;  %9822 = vmatmul.mubr.bf16.vlgmr.msra.gmra.mrb[0].mxu1 %v18444_v5  ;;  %v18537_v5 = vld [vmem:[#allocation2 + $0x1c00] ss:$112 sps:$4 sm:$0xff]  }
  0xf9   :  { %9661 = vmatpush1.bf16.msra.mxu0 %v18438_v3  ;;  %9833 = vmatpush1.bf16.msra.mxu1 %v18441_v4  ;;  %v18539_v3 = vld [vmem:[#allocation2 + $0x1c04] ss:$112 sps:$4 sm:$0xff]   ;;  %v18542_v4 = vld [vmem:[#allocation2 + $0x1c0c] ss:$112 sps:$4 sm:$0xff]  }
  0xfa   :  { %9662 = vmatprep.subr.bf16.mxu0 %v18447_v6  ;;  %9834 = vmatprep.subr.bf16.mxu1 %v18450_v7  ;;  %v18540_v6 = vld [vmem:[#allocation2 + $0x1c08] ss:$112 sps:$4 sm:$0xff]  }
  0xfb   :  { %9692 = vmatprep.mubr.bf16.mxu0 %v18535_v29  ;;  %9864 = vmatprep.mubr.bf16.mxu1 %v18535_v29  ;;  %v18543_v7 = vld [vmem:[%s21713_s0 + $0x8] ss:$28 sps:$4 sm:$0xff]  }
  0xfc   :  { %v18576_v29 = vld [vmem:[#allocation2 + $0x2144] ss:$112 sps:$4 sm:$0xff]  }
  0xfd   :  { %9663 = vmatpush1.bf16.msra.mxu0 %v18445_v8  ;;  %9835 = vmatpush1.bf16.msra.mxu1 %v18448_v9  ;;  %v18546_v8 = vld [vmem:[#allocation2 + $0x1ce4] ss:$112 sps:$4 sm:$0xff]   ;;  %v18549_v9 = vld [vmem:[#allocation2 + $0x1cec] ss:$112 sps:$4 sm:$0xff]  }
  0xfe   :  { %9664 = vmatprep.subr.bf16.mxu0 %v18453_v10  ;;  %9836 = vmatprep.subr.bf16.mxu1 %v18456_v11  ;;  %v18544_v10 = vld [vmem:[#allocation2 + $0x1ce0] ss:$112 sps:$4 sm:$0xff]  }
  0xff   :  { %v18634_v11 = vld [vmem:[%s21713_s0 + $0x14] ss:$28 sps:$4 sm:$0xff]  }
 0x101   :  { %9665 = vmatpush1.bf16.msra.mxu0 %v18451_v12  ;;  %9837 = vmatpush1.bf16.msra.mxu1 %v18454_v13  ;;  %v18547_v12 = vld [vmem:[#allocation2 + $0x1ce8] ss:$112 sps:$4 sm:$0xff]   ;;  %v18552_v13 = vld [vmem:[#allocation2 + $0x1dc4] ss:$112 sps:$4 sm:$0xff]  }
 0x102   :  { %9666 = vmatprep.subr.bf16.mxu0 %v18459_v14  ;;  %9838 = vmatprep.subr.bf16.mxu1 %v18462_v15  ;;  %v18555_v14 = vld [vmem:[#allocation2 + $0x1dcc] ss:$112 sps:$4 sm:$0xff]   ;;  %v18550_v15 = vld [vmem:[#allocation2 + $0x1dc0] ss:$112 sps:$4 sm:$0xff]  }
 0x105   :  { %9667 = vmatpush1.bf16.msra.mxu0 %v18457_v16  ;;  %9839 = vmatpush1.bf16.msra.mxu1 %v18460_v17  ;;  %v18553_v16 = vld [vmem:[#allocation2 + $0x1dc8] ss:$112 sps:$4 sm:$0xff]   ;;  %v18558_v17 = vld [vmem:[#allocation2 + $0x1ea4] ss:$112 sps:$4 sm:$0xff]  }
 0x106   :  { %9668 = vmatprep.subr.bf16.mxu0 %v18465_v18  ;;  %9840 = vmatprep.subr.bf16.mxu1 %v18468_v19  ;;  %v18561_v18 = vld [vmem:[#allocation2 + $0x1eac] ss:$112 sps:$4 sm:$0xff]   ;;  %v18556_v19 = vld [vmem:[#allocation2 + $0x1ea0] ss:$112 sps:$4 sm:$0xff]  }
 0x109   :  { %9669 = vmatpush1.bf16.msra.mxu0 %v18463_v20  ;;  %9841 = vmatpush1.bf16.msra.mxu1 %v18466_v21  ;;  %v18559_v20 = vld [vmem:[#allocation2 + $0x1ea8] ss:$112 sps:$4 sm:$0xff]   ;;  %v18564_v21 = vld [vmem:[#allocation2 + $0x1f84] ss:$112 sps:$4 sm:$0xff]  }
 0x10a   :  { %9670 = vmatprep.subr.bf16.mxu0 %v18471_v22  ;;  %9842 = vmatprep.subr.bf16.mxu1 %v18474_v23  ;;  %v18567_v22 = vld [vmem:[#allocation2 + $0x1f8c] ss:$112 sps:$4 sm:$0xff]   ;;  %v18562_v23 = vld [vmem:[#allocation2 + $0x1f80] ss:$112 sps:$4 sm:$0xff]  }
 0x10d   :  { %9671 = vmatpush1.bf16.msra.mxu0 %v18469_v24  ;;  %9843 = vmatpush1.bf16.msra.mxu1 %v18472_v25  ;;  %v18565_v24 = vld [vmem:[#allocation2 + $0x1f88] ss:$112 sps:$4 sm:$0xff]   ;;  %v18570_v25 = vld [vmem:[#allocation2 + $0x2064] ss:$112 sps:$4 sm:$0xff]  }
 0x10e   :  { %9672 = vmatprep.subr.bf16.mxu0 %v18477_v26  ;;  %9844 = vmatprep.subr.bf16.mxu1 %v18480_v27  ;;  %v18573_v26 = vld [vmem:[#allocation2 + $0x206c] ss:$112 sps:$4 sm:$0xff]   ;;  %v18568_v27 = vld [vmem:[#allocation2 + $0x2060] ss:$112 sps:$4 sm:$0xff]  }
 0x111   :  { %9673 = vmatpush1.bf16.msra.mxu0 %v18475_v28  ;;  %9845 = vmatpush1.bf16.msra.mxu1 %v18478_v30  ;;  %v18571_v28 = vld [vmem:[#allocation2 + $0x2068] ss:$112 sps:$4 sm:$0xff]   ;;  %v18579_v30 = vld [vmem:[#allocation2 + $0x214c] ss:$112 sps:$4 sm:$0xff]  }
 0x112   :  { %9674 = vmatprep.subr.bf16.mxu0 %v18483_v31  ;;  %9846 = vmatprep.subr.bf16.mxu1 %v18486_v32  ;;  %v18574_v31 = vld [vmem:[#allocation2 + $0x2140] ss:$112 sps:$4 sm:$0xff]   ;;  %v18577_v32 = vld [vmem:[#allocation2 + $0x2148] ss:$112 sps:$4 sm:$0xff]  }
 0x115   :  { %9675 = vmatpush1.bf16.msra.mxu0 %v18481_v33  ;;  %9847 = vmatpush1.bf16.msra.mxu1 %v18484_v34  ;;  %v18582_v33 = vld [vmem:[#allocation2 + $0x2224] ss:$112 sps:$4 sm:$0xff]   ;;  %v18585_v34 = vld [vmem:[#allocation2 + $0x222c] ss:$112 sps:$4 sm:$0xff]  }
 0x116   :  { %9676 = vmatprep.subr.bf16.mxu0 %v18489_v35  ;;  %9848 = vmatprep.subr.bf16.mxu1 %v18492_v36  ;;  %v18580_v35 = vld [vmem:[#allocation2 + $0x2220] ss:$112 sps:$4 sm:$0xff]   ;;  %v18583_v36 = vld [vmem:[#allocation2 + $0x2228] ss:$112 sps:$4 sm:$0xff]  }
 0x119   :  { %9677 = vmatpush1.bf16.msra.mxu0 %v18487_v37  ;;  %9849 = vmatpush1.bf16.msra.mxu1 %v18490_v38  ;;  %v18588_v37 = vld [vmem:[#allocation2 + $0x2304] ss:$112 sps:$4 sm:$0xff]   ;;  %v18591_v38 = vld [vmem:[#allocation2 + $0x230c] ss:$112 sps:$4 sm:$0xff]  }
 0x11a   :  { %9678 = vmatprep.subr.bf16.mxu0 %v18495_v39  ;;  %9850 = vmatprep.subr.bf16.mxu1 %v18498_v40  ;;  %v18586_v39 = vld [vmem:[#allocation2 + $0x2300] ss:$112 sps:$4 sm:$0xff]   ;;  %v18589_v40 = vld [vmem:[#allocation2 + $0x2308] ss:$112 sps:$4 sm:$0xff]  }
 0x11d   :  { %9679 = vmatpush1.bf16.msra.mxu0 %v18493_v41  ;;  %9851 = vmatpush1.bf16.msra.mxu1 %v18496_v42  ;;  %v18594_v41 = vld [vmem:[#allocation2 + $0x23e4] ss:$112 sps:$4 sm:$0xff]   ;;  %v18597_v42 = vld [vmem:[#allocation2 + $0x23ec] ss:$112 sps:$4 sm:$0xff]  }
 0x11e   :  { %9680 = vmatprep.subr.bf16.mxu0 %v18501_v43  ;;  %9852 = vmatprep.subr.bf16.mxu1 %v18504_v44  ;;  %v18592_v43 = vld [vmem:[#allocation2 + $0x23e0] ss:$112 sps:$4 sm:$0xff]   ;;  %v18595_v44 = vld [vmem:[#allocation2 + $0x23e8] ss:$112 sps:$4 sm:$0xff]  }
 0x121   :  { %9681 = vmatpush1.bf16.msra.mxu0 %v18499_v45  ;;  %9853 = vmatpush1.bf16.msra.mxu1 %v18502_v46  ;;  %v18600_v45 = vld [vmem:[#allocation2 + $0x24c4] ss:$112 sps:$4 sm:$0xff]   ;;  %v18603_v46 = vld [vmem:[#allocation2 + $0x24cc] ss:$112 sps:$4 sm:$0xff]  }
 0x122   :  { %9682 = vmatprep.subr.bf16.mxu0 %v18507_v47  ;;  %9854 = vmatprep.subr.bf16.mxu1 %v18510_v48  ;;  %v18598_v47 = vld [vmem:[#allocation2 + $0x24c0] ss:$112 sps:$4 sm:$0xff]   ;;  %v18601_v48 = vld [vmem:[#allocation2 + $0x24c8] ss:$112 sps:$4 sm:$0xff]  }
 0x125   :  { %9683 = vmatpush1.bf16.msra.mxu0 %v18505_v49  ;;  %9855 = vmatpush1.bf16.msra.mxu1 %v18508_v50  ;;  %v18606_v49 = vld [vmem:[#allocation2 + $0x25a4] ss:$112 sps:$4 sm:$0xff]   ;;  %v18609_v50 = vld [vmem:[#allocation2 + $0x25ac] ss:$112 sps:$4 sm:$0xff]  }
 0x126   :  { %9684 = vmatprep.subr.bf16.mxu0 %v18513_v51  ;;  %9856 = vmatprep.subr.bf16.mxu1 %v18516_v52  ;;  %v18604_v51 = vld [vmem:[#allocation2 + $0x25a0] ss:$112 sps:$4 sm:$0xff]   ;;  %v18607_v52 = vld [vmem:[#allocation2 + $0x25a8] ss:$112 sps:$4 sm:$0xff]  }
 0x129   :  { %9685 = vmatpush1.bf16.msra.mxu0 %v18511_v53  ;;  %9857 = vmatpush1.bf16.msra.mxu1 %v18514_v54  ;;  %v18612_v53 = vld [vmem:[#allocation2 + $0x2684] ss:$112 sps:$4 sm:$0xff]   ;;  %v18615_v54 = vld [vmem:[#allocation2 + $0x268c] ss:$112 sps:$4 sm:$0xff]  }
 0x12a   :  { %9686 = vmatprep.subr.bf16.mxu0 %v18519_v55  ;;  %9858 = vmatprep.subr.bf16.mxu1 %v18522_v56  ;;  %v18610_v55 = vld [vmem:[#allocation2 + $0x2680] ss:$112 sps:$4 sm:$0xff]   ;;  %v18613_v56 = vld [vmem:[#allocation2 + $0x2688] ss:$112 sps:$4 sm:$0xff]  }
 0x12d   :  { %9687 = vmatpush1.bf16.msra.mxu0 %v18517_v57  ;;  %9859 = vmatpush1.bf16.msra.mxu1 %v18520_v58  ;;  %v18618_v57 = vld [vmem:[#allocation2 + $0x2764] ss:$112 sps:$4 sm:$0xff]   ;;  %v18621_v58 = vld [vmem:[#allocation2 + $0x276c] ss:$112 sps:$4 sm:$0xff]  }
 0x12e   :  { %9688 = vmatprep.subr.bf16.mxu0 %v18525_v59  ;;  %9860 = vmatprep.subr.bf16.mxu1 %v18528_v60  ;;  %v18616_v59 = vld [vmem:[#allocation2 + $0x2760] ss:$112 sps:$4 sm:$0xff]   ;;  %v18619_v60 = vld [vmem:[#allocation2 + $0x2768] ss:$112 sps:$4 sm:$0xff]  }
 0x131   :  { %9689 = vmatpush1.bf16.msra.mxu0 %v18523_v61  ;;  %9861 = vmatpush1.bf16.msra.mxu1 %v18526_v62  ;;  %v18624_v61 = vld [vmem:[#allocation2 + $0x2844] ss:$112 sps:$4 sm:$0xff]   ;;  %v18627_v62 = vld [vmem:[#allocation2 + $0x284c] ss:$112 sps:$4 sm:$0xff]  }
 0x132   :  { %9690 = vmatprep.subr.bf16.mxu0 %v18531_v63  ;;  %9862 = vmatprep.subr.bf16.mxu1 %v18534_v0  ;;  %v18622_v63 = vld [vmem:[#allocation2 + $0x2840] ss:$112 sps:$4 sm:$0xff]   ;;  %v18625_v0 = vld [vmem:[#allocation2 + $0x2848] ss:$112 sps:$4 sm:$0xff]  }
 0x135   :  { %9691 = vmatpush1.bf16.msra.mxu0 %v18529_v1  ;;  %9863 = vmatpush1.bf16.msra.mxu1 %v18532_v2  ;;  %v18630_v1 = vld [vmem:[#allocation2 + $0x2924] ss:$112 sps:$4 sm:$0xff]   ;;  %v18633_v2 = vld [vmem:[#allocation2 + $0x292c] ss:$112 sps:$4 sm:$0xff]  }
 0x136   :  { %9703 = vmatprep.subr.bf16.mxu0 %v18539_v3  ;;  %9875 = vmatprep.subr.bf16.mxu1 %v18542_v4  ;;  %v18628_v3 = vld [vmem:[#allocation2 + $0x2920] ss:$112 sps:$4 sm:$0xff]   ;;  %v18631_v4 = vld [vmem:[#allocation2 + $0x2928] ss:$112 sps:$4 sm:$0xff]  }
 0x138   :  { %9693 = vmatmul.mubr.bf16.vlgmr.msra.gmra.mrb[0].mxu0 %v18543_v7  ;;  %9865 = vmatmul.mubr.bf16.vlgmr.msra.gmra.mrb[0].mxu1 %v18543_v7  ;;  %v18636_v7 = vld [vmem:[#allocation2 + $0x2a00] ss:$112 sps:$4 sm:$0xff]  }
 0x139   :  { %9704 = vmatpush1.bf16.msra.mxu0 %v18537_v5  ;;  %9876 = vmatpush1.bf16.msra.mxu1 %v18540_v6  ;;  %v18638_v5 = vld [vmem:[#allocation2 + $0x2a04] ss:$112 sps:$4 sm:$0xff]   ;;  %v18641_v6 = vld [vmem:[#allocation2 + $0x2a0c] ss:$112 sps:$4 sm:$0xff]  }
 0x13a   :  { %9705 = vmatprep.subr.bf16.mxu0 %v18546_v8  ;;  %9877 = vmatprep.subr.bf16.mxu1 %v18549_v9  ;;  %v18642_v8 = vld [vmem:[%s21713_s0 + $0x10] ss:$28 sps:$4 sm:$0xff]   ;;  %v18639_v9 = vld [vmem:[#allocation2 + $0x2a08] ss:$112 sps:$4 sm:$0xff]  }
 0x13b   :  { %9735 = vmatprep.mubr.bf16.mxu0 %v18634_v11  ;;  %9907 = vmatprep.mubr.bf16.mxu1 %v18634_v11  ;;  %v18648_v11 = vld [vmem:[#allocation2 + $0x2aec] ss:$112 sps:$4 sm:$0xff]  }
 0x13d   :  { %9706 = vmatpush1.bf16.msra.mxu0 %v18544_v10  ;;  %9878 = vmatpush1.bf16.msra.mxu1 %v18547_v12  ;;  %v18645_v10 = vld [vmem:[#allocation2 + $0x2ae4] ss:$112 sps:$4 sm:$0xff]   ;;  %v18643_v12 = vld [vmem:[#allocation2 + $0x2ae0] ss:$112 sps:$4 sm:$0xff]  }
 0x13e   :  { %9707 = vmatprep.subr.bf16.mxu0 %v18552_v13  ;;  %9879 = vmatprep.subr.bf16.mxu1 %v18555_v14  ;;  %v18646_v13 = vld [vmem:[#allocation2 + $0x2ae8] ss:$112 sps:$4 sm:$0xff]   ;;  %v18651_v14 = vld [vmem:[#allocation2 + $0x2bc4] ss:$112 sps:$4 sm:$0xff]  }
 0x141   :  { %9708 = vmatpush1.bf16.msra.mxu0 %v18550_v15  ;;  %9880 = vmatpush1.bf16.msra.mxu1 %v18553_v16  ;;  %v18654_v15 = vld [vmem:[#allocation2 + $0x2bcc] ss:$112 sps:$4 sm:$0xff]   ;;  %v21725_v16 = vmov 0  }
 0x142   :  { %9709 = vmatprep.subr.bf16.mxu0 %v18558_v17  ;;  %9881 = vmatprep.subr.bf16.mxu1 %v18561_v18  ;;  %v18649_v17 = vld [vmem:[#allocation2 + $0x2bc0] ss:$112 sps:$4 sm:$0xff]   ;;  %v18652_v18 = vld [vmem:[#allocation2 + $0x2bc8] ss:$112 sps:$4 sm:$0xff]  }
 0x145   :  { %9710 = vmatpush1.bf16.msra.mxu0 %v18556_v19  ;;  %9882 = vmatpush1.bf16.msra.mxu1 %v18559_v20  ;;  %v18657_v19 = vld [vmem:[#allocation2 + $0x2ca4] ss:$112 sps:$4 sm:$0xff]   ;;  %v18660_v20 = vld [vmem:[#allocation2 + $0x2cac] ss:$112 sps:$4 sm:$0xff]  }
 0x146   :  { %9711 = vmatprep.subr.bf16.mxu0 %v18564_v21  ;;  %9883 = vmatprep.subr.bf16.mxu1 %v18567_v22  ;;  %v18655_v21 = vld [vmem:[#allocation2 + $0x2ca0] ss:$112 sps:$4 sm:$0xff]   ;;  %v18658_v22 = vld [vmem:[#allocation2 + $0x2ca8] ss:$112 sps:$4 sm:$0xff]  }
 0x149   :  { %9712 = vmatpush1.bf16.msra.mxu0 %v18562_v23  ;;  %9884 = vmatpush1.bf16.msra.mxu1 %v18565_v24  ;;  %v18663_v23 = vld [vmem:[#allocation2 + $0x2d84] ss:$112 sps:$4 sm:$0xff]   ;;  %v18666_v24 = vld [vmem:[#allocation2 + $0x2d8c] ss:$112 sps:$4 sm:$0xff]  }
 0x14a   :  { %9713 = vmatprep.subr.bf16.mxu0 %v18570_v25  ;;  %9885 = vmatprep.subr.bf16.mxu1 %v18573_v26  ;;  %v18661_v25 = vld [vmem:[#allocation2 + $0x2d80] ss:$112 sps:$4 sm:$0xff]   ;;  %v18664_v26 = vld [vmem:[#allocation2 + $0x2d88] ss:$112 sps:$4 sm:$0xff]  }
 0x14d   :  { %9714 = vmatpush1.bf16.msra.mxu0 %v18568_v27  ;;  %9886 = vmatpush1.bf16.msra.mxu1 %v18571_v28  ;;  %v18669_v27 = vld [vmem:[#allocation2 + $0x2e64] ss:$112 sps:$4 sm:$0xff]   ;;  %v18672_v28 = vld [vmem:[#allocation2 + $0x2e6c] ss:$112 sps:$4 sm:$0xff]  }
 0x14e   :  { %9715 = vmatprep.subr.bf16.mxu0 %v18576_v29  ;;  %9887 = vmatprep.subr.bf16.mxu1 %v18579_v30  ;;  %v18667_v29 = vld [vmem:[#allocation2 + $0x2e60] ss:$112 sps:$4 sm:$0xff]   ;;  %v18670_v30 = vld [vmem:[#allocation2 + $0x2e68] ss:$112 sps:$4 sm:$0xff]  }
 0x151   :  { %9716 = vmatpush1.bf16.msra.mxu0 %v18574_v31  ;;  %9888 = vmatpush1.bf16.msra.mxu1 %v18577_v32  ;;  %v18675_v31 = vld [vmem:[#allocation2 + $0x2f44] ss:$112 sps:$4 sm:$0xff]   ;;  %v18678_v32 = vld [vmem:[#allocation2 + $0x2f4c] ss:$112 sps:$4 sm:$0xff]  }
 0x152   :  { %9717 = vmatprep.subr.bf16.mxu0 %v18582_v33  ;;  %9889 = vmatprep.subr.bf16.mxu1 %v18585_v34  ;;  %v18673_v33 = vld [vmem:[#allocation2 + $0x2f40] ss:$112 sps:$4 sm:$0xff]   ;;  %v18676_v34 = vld [vmem:[#allocation2 + $0x2f48] ss:$112 sps:$4 sm:$0xff]  }
 0x155   :  { %9718 = vmatpush1.bf16.msra.mxu0 %v18580_v35  ;;  %9890 = vmatpush1.bf16.msra.mxu1 %v18583_v36  ;;  %v18681_v35 = vld [vmem:[#allocation2 + $0x3024] ss:$112 sps:$4 sm:$0xff]   ;;  %v18684_v36 = vld [vmem:[#allocation2 + $0x302c] ss:$112 sps:$4 sm:$0xff]  }
 0x156   :  { %9719 = vmatprep.subr.bf16.mxu0 %v18588_v37  ;;  %9891 = vmatprep.subr.bf16.mxu1 %v18591_v38  ;;  %v18679_v37 = vld [vmem:[#allocation2 + $0x3020] ss:$112 sps:$4 sm:$0xff]   ;;  %v18682_v38 = vld [vmem:[#allocation2 + $0x3028] ss:$112 sps:$4 sm:$0xff]  }
 0x159   :  { %9720 = vmatpush1.bf16.msra.mxu0 %v18586_v39  ;;  %9892 = vmatpush1.bf16.msra.mxu1 %v18589_v40  ;;  %v18688_v39 = vld [vmem:[#allocation2 + $0x14] ss:$112 sps:$4 sm:$0xff]   ;;  %v18691_v40 = vld [vmem:[#allocation2 + $0x1c] ss:$112 sps:$4 sm:$0xff]  }
 0x15a   :  { %9721 = vmatprep.subr.bf16.mxu0 %v18594_v41  ;;  %9893 = vmatprep.subr.bf16.mxu1 %v18597_v42  ;;  %v18685_v41 = vld [vmem:[%s21713_s0 + $0x18] ss:$28 sps:$4 sm:$0xff]   ;;  %v18686_v42 = vld [vmem:[#allocation2 + $0x10] ss:$112 sps:$4 sm:$0xff]  }
 0x15d   :  { %9722 = vmatpush1.bf16.msra.mxu0 %v18592_v43  ;;  %9894 = vmatpush1.bf16.msra.mxu1 %v18595_v44  ;;  %v18689_v43 = vld [vmem:[#allocation2 + $0x18] ss:$112 sps:$4 sm:$0xff]   ;;  %v18694_v44 = vld [vmem:[#allocation2 + $0xf4] ss:$112 sps:$4 sm:$0xff]  }
 0x15e   :  { %9723 = vmatprep.subr.bf16.mxu0 %v18600_v45  ;;  %9895 = vmatprep.subr.bf16.mxu1 %v18603_v46  ;;  %v18697_v45 = vld [vmem:[#allocation2 + $0xfc] ss:$112 sps:$4 sm:$0xff]   ;;  %v18692_v46 = vld [vmem:[#allocation2 + $0xf0] ss:$112 sps:$4 sm:$0xff]  }
 0x161   :  { %9724 = vmatpush1.bf16.msra.mxu0 %v18598_v47  ;;  %9896 = vmatpush1.bf16.msra.mxu1 %v18601_v48  ;;  %v18695_v47 = vld [vmem:[#allocation2 + $0xf8] ss:$112 sps:$4 sm:$0xff]   ;;  %v18700_v48 = vld [vmem:[#allocation2 + $0x1d4] ss:$112 sps:$4 sm:$0xff]  }
 0x162   :  { %9725 = vmatprep.subr.bf16.mxu0 %v18606_v49  ;;  %9897 = vmatprep.subr.bf16.mxu1 %v18609_v50  ;;  %v18703_v49 = vld [vmem:[#allocation2 + $0x1dc] ss:$112 sps:$4 sm:$0xff]   ;;  %v20734_v50 = vld [vmem:[%s21713_s0 + $0x4] ss:$28 sps:$4 sm:$0xff]  }
 0x165   :  { %9726 = vmatpush1.bf16.msra.mxu0 %v18604_v51  ;;  %9898 = vmatpush1.bf16.msra.mxu1 %v18607_v52  ;;  %v18698_v51 = vld [vmem:[#allocation2 + $0x1d0] ss:$112 sps:$4 sm:$0xff]   ;;  %v18701_v52 = vld [vmem:[#allocation2 + $0x1d8] ss:$112 sps:$4 sm:$0xff]  }
 0x166   :  { %9727 = vmatprep.subr.bf16.mxu0 %v18612_v53  ;;  %9899 = vmatprep.subr.bf16.mxu1 %v18615_v54  ;;  %v18706_v53 = vld [vmem:[#allocation2 + $0x2b4] ss:$112 sps:$4 sm:$0xff]   ;;  %v18709_v54 = vld [vmem:[#allocation2 + $0x2bc] ss:$112 sps:$4 sm:$0xff]  }
 0x169   :  { %9728 = vmatpush1.bf16.msra.mxu0 %v18610_v55  ;;  %9900 = vmatpush1.bf16.msra.mxu1 %v18613_v56  ;;  %v18704_v55 = vld [vmem:[#allocation2 + $0x2b0] ss:$112 sps:$4 sm:$0xff]   ;;  %v18707_v56 = vld [vmem:[#allocation2 + $0x2b8] ss:$112 sps:$4 sm:$0xff]  }
 0x16a   :  { %9729 = vmatprep.subr.bf16.mxu0 %v18618_v57  ;;  %9901 = vmatprep.subr.bf16.mxu1 %v18621_v58  ;;  %v18712_v57 = vld [vmem:[#allocation2 + $0x394] ss:$112 sps:$4 sm:$0xff]   ;;  %v18715_v58 = vld [vmem:[#allocation2 + $0x39c] ss:$112 sps:$4 sm:$0xff]  }
 0x16d   :  { %9730 = vmatpush1.bf16.msra.mxu0 %v18616_v59  ;;  %9902 = vmatpush1.bf16.msra.mxu1 %v18619_v60  ;;  %v18710_v59 = vld [vmem:[#allocation2 + $0x390] ss:$112 sps:$4 sm:$0xff]   ;;  %v18713_v60 = vld [vmem:[#allocation2 + $0x398] ss:$112 sps:$4 sm:$0xff]  }
 0x16e   :  { %9731 = vmatprep.subr.bf16.mxu0 %v18624_v61  ;;  %9903 = vmatprep.subr.bf16.mxu1 %v18627_v62  ;;  %v18718_v61 = vld [vmem:[#allocation2 + $0x474] ss:$112 sps:$4 sm:$0xff]   ;;  %v18721_v62 = vld [vmem:[#allocation2 + $0x47c] ss:$112 sps:$4 sm:$0xff]  }
 0x171   :  { %9732 = vmatpush1.bf16.msra.mxu0 %v18622_v63  ;;  %9904 = vmatpush1.bf16.msra.mxu1 %v18625_v0  ;;  %v18716_v63 = vld [vmem:[#allocation2 + $0x470] ss:$112 sps:$4 sm:$0xff]   ;;  %v18719_v0 = vld [vmem:[#allocation2 + $0x478] ss:$112 sps:$4 sm:$0xff]  }
 0x172   :  { %9733 = vmatprep.subr.bf16.mxu0 %v18630_v1  ;;  %9905 = vmatprep.subr.bf16.mxu1 %v18633_v2  ;;  %v18724_v1 = vld [vmem:[#allocation2 + $0x554] ss:$112 sps:$4 sm:$0xff]   ;;  %v18727_v2 = vld [vmem:[#allocation2 + $0x55c] ss:$112 sps:$4 sm:$0xff]  }
 0x175   :  { %9734 = vmatpush1.bf16.msra.mxu0 %v18628_v3  ;;  %9906 = vmatpush1.bf16.msra.mxu1 %v18631_v4  ;;  %v18722_v3 = vld [vmem:[#allocation2 + $0x550] ss:$112 sps:$4 sm:$0xff]   ;;  %v18725_v4 = vld [vmem:[#allocation2 + $0x558] ss:$112 sps:$4 sm:$0xff]  }
 0x176   :  { %9746 = vmatprep.subr.bf16.mxu0 %v18638_v5  ;;  %9918 = vmatprep.subr.bf16.mxu1 %v18641_v6  ;;  %v18730_v5 = vld [vmem:[#allocation2 + $0x634] ss:$112 sps:$4 sm:$0xff]   ;;  %v18733_v6 = vld [vmem:[#allocation2 + $0x63c] ss:$112 sps:$4 sm:$0xff]  }
 0x178   :  { %9736 = vmatmul.mubr.bf16.vlgmr.msra.gmra.mrb[0].mxu0 %v18642_v8  ;;  %9908 = vmatmul.mubr.bf16.vlgmr.msra.gmra.mrb[0].mxu1 %v18642_v8  ;;  %v18731_v8 = vld [vmem:[#allocation2 + $0x638] ss:$112 sps:$4 sm:$0xff]  }
 0x179   :  { %9747 = vmatpush1.bf16.msra.mxu0 %v18636_v7  ;;  %9919 = vmatpush1.bf16.msra.mxu1 %v18639_v9  ;;  %v18728_v7 = vld [vmem:[#allocation2 + $0x630] ss:$112 sps:$4 sm:$0xff]   ;;  %v18736_v9 = vld [vmem:[#allocation2 + $0x714] ss:$112 sps:$4 sm:$0xff]  }
 0x17a   :  { %9748 = vmatprep.subr.bf16.mxu0 %v18645_v10  ;;  %9920 = vmatprep.subr.bf16.mxu1 %v18648_v11  ;;  %v18739_v10 = vld [vmem:[#allocation2 + $0x71c] ss:$112 sps:$4 sm:$0xff]   ;;  %v18734_v11 = vld [vmem:[#allocation2 + $0x710] ss:$112 sps:$4 sm:$0xff]  }
 0x17b   :  { %9778 = vmatprep.mubr.bf16.mxu0 %v21725_v16  ;;  %9950 = vmatprep.mubr.bf16.mxu1 %v21725_v16 }
 0x17d   :  { %9749 = vmatpush1.bf16.msra.mxu0 %v18643_v12  ;;  %9921 = vmatpush1.bf16.msra.mxu1 %v18646_v13  ;;  %v18737_v12 = vld [vmem:[#allocation2 + $0x718] ss:$112 sps:$4 sm:$0xff]   ;;  %v18742_v13 = vld [vmem:[#allocation2 + $0x7f4] ss:$112 sps:$4 sm:$0xff]  }
 0x17e   :  { %9750 = vmatprep.subr.bf16.mxu0 %v18651_v14  ;;  %9922 = vmatprep.subr.bf16.mxu1 %v18654_v15  ;;  %v18745_v14 = vld [vmem:[#allocation2 + $0x7fc] ss:$112 sps:$4 sm:$0xff]   ;;  %v18740_v15 = vld [vmem:[#allocation2 + $0x7f0] ss:$112 sps:$4 sm:$0xff]  }
 0x181   :  { %9751 = vmatpush1.bf16.msra.mxu0 %v18649_v17  ;;  %9923 = vmatpush1.bf16.msra.mxu1 %v18652_v18  ;;  %v18743_v17 = vld [vmem:[#allocation2 + $0x7f8] ss:$112 sps:$4 sm:$0xff]   ;;  %v18748_v18 = vld [vmem:[#allocation2 + $0x8d4] ss:$112 sps:$4 sm:$0xff]  }
 0x182   :  { %9752 = vmatprep.subr.bf16.mxu0 %v18657_v19  ;;  %9924 = vmatprep.subr.bf16.mxu1 %v18660_v20  ;;  %v18751_v19 = vld [vmem:[#allocation2 + $0x8dc] ss:$112 sps:$4 sm:$0xff]   ;;  %v18746_v20 = vld [vmem:[#allocation2 + $0x8d0] ss:$112 sps:$4 sm:$0xff]  }
 0x185   :  { %9753 = vmatpush1.bf16.msra.mxu0 %v18655_v21  ;;  %9925 = vmatpush1.bf16.msra.mxu1 %v18658_v22  ;;  %v18749_v21 = vld [vmem:[#allocation2 + $0x8d8] ss:$112 sps:$4 sm:$0xff]   ;;  %v18754_v22 = vld [vmem:[#allocation2 + $0x9b4] ss:$112 sps:$4 sm:$0xff]  }
 0x186   :  { %9754 = vmatprep.subr.bf16.mxu0 %v18663_v23  ;;  %9926 = vmatprep.subr.bf16.mxu1 %v18666_v24  ;;  %v18757_v23 = vld [vmem:[#allocation2 + $0x9bc] ss:$112 sps:$4 sm:$0xff]   ;;  %v18752_v24 = vld [vmem:[#allocation2 + $0x9b0] ss:$112 sps:$4 sm:$0xff]  }
 0x189   :  { %9755 = vmatpush1.bf16.msra.mxu0 %v18661_v25  ;;  %9927 = vmatpush1.bf16.msra.mxu1 %v18664_v26  ;;  %v18755_v25 = vld [vmem:[#allocation2 + $0x9b8] ss:$112 sps:$4 sm:$0xff]   ;;  %v18760_v26 = vld [vmem:[#allocation2 + $0xa94] ss:$112 sps:$4 sm:$0xff]  }
 0x18a   :  { %9756 = vmatprep.subr.bf16.mxu0 %v18669_v27  ;;  %9928 = vmatprep.subr.bf16.mxu1 %v18672_v28  ;;  %v18763_v27 = vld [vmem:[#allocation2 + $0xa9c] ss:$112 sps:$4 sm:$0xff]   ;;  %v18758_v28 = vld [vmem:[#allocation2 + $0xa90] ss:$112 sps:$4 sm:$0xff]  }
 0x18d   :  { %9757 = vmatpush1.bf16.msra.mxu0 %v18667_v29  ;;  %9929 = vmatpush1.bf16.msra.mxu1 %v18670_v30  ;;  %v18761_v29 = vld [vmem:[#allocation2 + $0xa98] ss:$112 sps:$4 sm:$0xff]   ;;  %v18766_v30 = vld [vmem:[#allocation2 + $0xb74] ss:$112 sps:$4 sm:$0xff]  }
 0x18e   :  { %9758 = vmatprep.subr.bf16.mxu0 %v18675_v31  ;;  %9930 = vmatprep.subr.bf16.mxu1 %v18678_v32  ;;  %v18769_v31 = vld [vmem:[#allocation2 + $0xb7c] ss:$112 sps:$4 sm:$0xff]   ;;  %v18764_v32 = vld [vmem:[#allocation2 + $0xb70] ss:$112 sps:$4 sm:$0xff]  }
 0x191   :  { %9759 = vmatpush1.bf16.msra.mxu0 %v18673_v33  ;;  %9931 = vmatpush1.bf16.msra.mxu1 %v18676_v34  ;;  %v18767_v33 = vld [vmem:[#allocation2 + $0xb78] ss:$112 sps:$4 sm:$0xff]   ;;  %v18772_v34 = vld [vmem:[#allocation2 + $0xc54] ss:$112 sps:$4 sm:$0xff]  }
 0x192   :  { %9760 = vmatprep.subr.bf16.mxu0 %v18681_v35  ;;  %9932 = vmatprep.subr.bf16.mxu1 %v18684_v36  ;;  %v18775_v35 = vld [vmem:[#allocation2 + $0xc5c] ss:$112 sps:$4 sm:$0xff]   ;;  %v18770_v36 = vld [vmem:[#allocation2 + $0xc50] ss:$112 sps:$4 sm:$0xff]  }
 0x195   :  { %9761 = vmatpush1.bf16.msra.mxu0 %v18679_v37  ;;  %9933 = vmatpush1.bf16.msra.mxu1 %v18682_v38  ;;  %v18773_v37 = vld [vmem:[#allocation2 + $0xc58] ss:$112 sps:$4 sm:$0xff]   ;;  %v18778_v38 = vld [vmem:[#allocation2 + $0xd34] ss:$112 sps:$4 sm:$0xff]  }
 0x196   :  { %9961 = vmatprep.subr.bf16.mxu0 %v18688_v39  ;;  %10133 = vmatprep.subr.bf16.mxu1 %v18691_v40  ;;  %v18781_v39 = vld [vmem:[#allocation2 + $0xd3c] ss:$112 sps:$4 sm:$0xff]   ;;  %v18776_v40 = vld [vmem:[#allocation2 + $0xd30] ss:$112 sps:$4 sm:$0xff]  }
 0x198   :  { %9779 = vmatmul.mubr.bf16.vlgmr.msra.gmra.mrb[0].mxu0 %v18685_v41  ;;  %9951 = vmatmul.mubr.bf16.vlgmr.msra.gmra.mrb[0].mxu1 %v18685_v41  ;;  %v18779_v41 = vld [vmem:[#allocation2 + $0xd38] ss:$112 sps:$4 sm:$0xff]  }
 0x199   :  { %9962 = vmatpush1.bf16.msra.mxu0 %v18686_v42  ;;  %10134 = vmatpush1.bf16.msra.mxu1 %v18689_v43  ;;  %v18784_v42 = vld [vmem:[#allocation2 + $0xe14] ss:$112 sps:$4 sm:$0xff]   ;;  %v18787_v43 = vld [vmem:[#allocation2 + $0xe1c] ss:$112 sps:$4 sm:$0xff]  }
 0x19a   :  { %9963 = vmatprep.subr.bf16.mxu0 %v18694_v44  ;;  %10135 = vmatprep.subr.bf16.mxu1 %v18697_v45  ;;  %v18782_v44 = vld [vmem:[#allocation2 + $0xe10] ss:$112 sps:$4 sm:$0xff]   ;;  %v18785_v45 = vld [vmem:[#allocation2 + $0xe18] ss:$112 sps:$4 sm:$0xff]  }
 0x19b   :  { %9993 = vmatprep.mubr.bf16.mxu0 %v20734_v50  ;;  %10165 = vmatprep.mubr.bf16.mxu1 %v20734_v50  ;;  %v18791_v50 = vld [vmem:[#allocation2 + $0xef8] ss:$112 sps:$4 sm:$0xff]  }
 0x19d   :  { %9964 = vmatpush1.bf16.msra.mxu0 %v18692_v46  ;;  %10136 = vmatpush1.bf16.msra.mxu1 %v18695_v47  ;;  %v18790_v46 = vld [vmem:[#allocation2 + $0xef4] ss:$112 sps:$4 sm:$0xff]   ;;  %v18793_v47 = vld [vmem:[#allocation2 + $0xefc] ss:$112 sps:$4 sm:$0xff]  }
 0x19e   :  { %9965 = vmatprep.subr.bf16.mxu0 %v18700_v48  ;;  %10137 = vmatprep.subr.bf16.mxu1 %v18703_v49  ;;  %v20735_v48 = vld [vmem:[%s21713_s0] ss:$28 sps:$4 sm:$0xff]  }
 0x19f   :  { %v18788_v49 = vld [vmem:[#allocation2 + $0xef0] ss:$112 sps:$4 sm:$0xff]  }
 0x1a1   :  { %9966 = vmatpush1.bf16.msra.mxu0 %v18698_v51  ;;  %10138 = vmatpush1.bf16.msra.mxu1 %v18701_v52  ;;  %v18796_v51 = vld [vmem:[#allocation2 + $0xfd4] ss:$112 sps:$4 sm:$0xff]   ;;  %v18799_v52 = vld [vmem:[#allocation2 + $0xfdc] ss:$112 sps:$4 sm:$0xff]  }
 0x1a2   :  { %9967 = vmatprep.subr.bf16.mxu0 %v18706_v53  ;;  %10139 = vmatprep.subr.bf16.mxu1 %v18709_v54  ;;  %v20736_v53 = vld [vmem:[%s21713_s0 + $0xc] ss:$28 sps:$4 sm:$0xff]   ;;  %v18794_v54 = vld [vmem:[#allocation2 + $0xfd0] ss:$112 sps:$4 sm:$0xff]  }
 0x1a5   :  { %9968 = vmatpush1.bf16.msra.mxu0 %v18704_v55  ;;  %10140 = vmatpush1.bf16.msra.mxu1 %v18707_v56  ;;  %v18797_v55 = vld [vmem:[#allocation2 + $0xfd8] ss:$112 sps:$4 sm:$0xff]   ;;  %v18802_v56 = vld [vmem:[#allocation2 + $0x10b4] ss:$112 sps:$4 sm:$0xff]  }
 0x1a6   :  { %9969 = vmatprep.subr.bf16.mxu0 %v18712_v57  ;;  %10141 = vmatprep.subr.bf16.mxu1 %v18715_v58  ;;  %v18805_v57 = vld [vmem:[#allocation2 + $0x10bc] ss:$112 sps:$4 sm:$0xff]   ;;  %v18800_v58 = vld [vmem:[#allocation2 + $0x10b0] ss:$112 sps:$4 sm:$0xff]  }
 0x1a9   :  { %9970 = vmatpush1.bf16.msra.mxu0 %v18710_v59  ;;  %10142 = vmatpush1.bf16.msra.mxu1 %v18713_v60  ;;  %v18803_v59 = vld [vmem:[#allocation2 + $0x10b8] ss:$112 sps:$4 sm:$0xff]   ;;  %v18808_v60 = vld [vmem:[#allocation2 + $0x1194] ss:$112 sps:$4 sm:$0xff]  }
 0x1aa   :  { %9971 = vmatprep.subr.bf16.mxu0 %v18718_v61  ;;  %10143 = vmatprep.subr.bf16.mxu1 %v18721_v62  ;;  %v18811_v61 = vld [vmem:[#allocation2 + $0x119c] ss:$112 sps:$4 sm:$0xff]   ;;  %v18806_v62 = vld [vmem:[#allocation2 + $0x1190] ss:$112 sps:$4 sm:$0xff]  }
 0x1ad   :  { %9972 = vmatpush1.bf16.msra.mxu0 %v18716_v63  ;;  %10144 = vmatpush1.bf16.msra.mxu1 %v18719_v0  ;;  %v18809_v63 = vld [vmem:[#allocation2 + $0x1198] ss:$112 sps:$4 sm:$0xff]   ;;  %v18814_v0 = vld [vmem:[#allocation2 + $0x1274] ss:$112 sps:$4 sm:$0xff]  }
 0x1ae   :  { %9973 = vmatprep.subr.bf16.mxu0 %v18724_v1  ;;  %10145 = vmatprep.subr.bf16.mxu1 %v18727_v2  ;;  %v18817_v1 = vld [vmem:[#allocation2 + $0x127c] ss:$112 sps:$4 sm:$0xff]   ;;  %v18812_v2 = vld [vmem:[#allocation2 + $0x1270] ss:$112 sps:$4 sm:$0xff]  }
 0x1b1   :  { %9974 = vmatpush1.bf16.msra.mxu0 %v18722_v3  ;;  %10146 = vmatpush1.bf16.msra.mxu1 %v18725_v4  ;;  %v18815_v3 = vld [vmem:[#allocation2 + $0x1278] ss:$112 sps:$4 sm:$0xff]   ;;  %v18820_v4 = vld [vmem:[#allocation2 + $0x1354] ss:$112 sps:$4 sm:$0xff]  }
 0x1b2   :  { %9975 = vmatprep.subr.bf16.mxu0 %v18730_v5  ;;  %10147 = vmatprep.subr.bf16.mxu1 %v18733_v6  ;;  %v18823_v5 = vld [vmem:[#allocation2 + $0x135c] ss:$112 sps:$4 sm:$0xff]   ;;  %v18818_v6 = vld [vmem:[#allocation2 + $0x1350] ss:$112 sps:$4 sm:$0xff]  }
 0x1b5   :  { %9976 = vmatpush1.bf16.msra.mxu0 %v18728_v7  ;;  %10148 = vmatpush1.bf16.msra.mxu1 %v18731_v8  ;;  %v18821_v7 = vld [vmem:[#allocation2 + $0x1358] ss:$112 sps:$4 sm:$0xff]   ;;  %v18826_v8 = vld [vmem:[#allocation2 + $0x1434] ss:$112 sps:$4 sm:$0xff]  }
 0x1b6   :  { %9977 = vmatprep.subr.bf16.mxu0 %v18736_v9  ;;  %10149 = vmatprep.subr.bf16.mxu1 %v18739_v10  ;;  %v18829_v9 = vld [vmem:[#allocation2 + $0x143c] ss:$112 sps:$4 sm:$0xff]   ;;  %v18824_v10 = vld [vmem:[#allocation2 + $0x1430] ss:$112 sps:$4 sm:$0xff]  }
 0x1b9   :  { %9978 = vmatpush1.bf16.msra.mxu0 %v18734_v11  ;;  %10150 = vmatpush1.bf16.msra.mxu1 %v18737_v12  ;;  %v18827_v11 = vld [vmem:[#allocation2 + $0x1438] ss:$112 sps:$4 sm:$0xff]   ;;  %v18832_v12 = vld [vmem:[#allocation2 + $0x1514] ss:$112 sps:$4 sm:$0xff]  }
 0x1ba   :  { %9979 = vmatprep.subr.bf16.mxu0 %v18742_v13  ;;  %10151 = vmatprep.subr.bf16.mxu1 %v18745_v14  ;;  %v18835_v13 = vld [vmem:[#allocation2 + $0x151c] ss:$112 sps:$4 sm:$0xff]   ;;  %v18830_v14 = vld [vmem:[#allocation2 + $0x1510] ss:$112 sps:$4 sm:$0xff]  }
 0x1bd   :  { %9980 = vmatpush1.bf16.msra.mxu0 %v18740_v15  ;;  %10152 = vmatpush1.bf16.msra.mxu1 %v18743_v17  ;;  %v18833_v15 = vld [vmem:[#allocation2 + $0x1518] ss:$112 sps:$4 sm:$0xff]   ;;  %v18838_v17 = vld [vmem:[#allocation2 + $0x15f4] ss:$112 sps:$4 sm:$0xff]  }
 0x1be   :  { %9981 = vmatprep.subr.bf16.mxu0 %v18748_v18  ;;  %10153 = vmatprep.subr.bf16.mxu1 %v18751_v19  ;;  %v18841_v18 = vld [vmem:[#allocation2 + $0x15fc] ss:$112 sps:$4 sm:$0xff]   ;;  %v18836_v19 = vld [vmem:[#allocation2 + $0x15f0] ss:$112 sps:$4 sm:$0xff]  }
 0x1c1   :  { %9982 = vmatpush1.bf16.msra.mxu0 %v18746_v20  ;;  %10154 = vmatpush1.bf16.msra.mxu1 %v18749_v21  ;;  %v18839_v20 = vld [vmem:[#allocation2 + $0x15f8] ss:$112 sps:$4 sm:$0xff]   ;;  %v18844_v21 = vld [vmem:[#allocation2 + $0x16d4] ss:$112 sps:$4 sm:$0xff]  }
 0x1c2   :  { %9983 = vmatprep.subr.bf16.mxu0 %v18754_v22  ;;  %10155 = vmatprep.subr.bf16.mxu1 %v18757_v23  ;;  %v18847_v22 = vld [vmem:[#allocation2 + $0x16dc] ss:$112 sps:$4 sm:$0xff]   ;;  %v18842_v23 = vld [vmem:[#allocation2 + $0x16d0] ss:$112 sps:$4 sm:$0xff]  }
 0x1c5   :  { %9984 = vmatpush1.bf16.msra.mxu0 %v18752_v24  ;;  %10156 = vmatpush1.bf16.msra.mxu1 %v18755_v25  ;;  %v18845_v24 = vld [vmem:[#allocation2 + $0x16d8] ss:$112 sps:$4 sm:$0xff]   ;;  %v18850_v25 = vld [vmem:[#allocation2 + $0x17b4] ss:$112 sps:$4 sm:$0xff]  }
 0x1c6   :  { %9985 = vmatprep.subr.bf16.mxu0 %v18760_v26  ;;  %10157 = vmatprep.subr.bf16.mxu1 %v18763_v27  ;;  %v18853_v26 = vld [vmem:[#allocation2 + $0x17bc] ss:$112 sps:$4 sm:$0xff]   ;;  %v18848_v27 = vld [vmem:[#allocation2 + $0x17b0] ss:$112 sps:$4 sm:$0xff]  }
 0x1c9   :  { %9986 = vmatpush1.bf16.msra.mxu0 %v18758_v28  ;;  %10158 = vmatpush1.bf16.msra.mxu1 %v18761_v29  ;;  %v18851_v28 = vld [vmem:[#allocation2 + $0x17b8] ss:$112 sps:$4 sm:$0xff]   ;;  %v18856_v29 = vld [vmem:[#allocation2 + $0x1894] ss:$112 sps:$4 sm:$0xff]  }
 0x1ca   :  { %9987 = vmatprep.subr.bf16.mxu0 %v18766_v30  ;;  %10159 = vmatprep.subr.bf16.mxu1 %v18769_v31  ;;  %v18859_v30 = vld [vmem:[#allocation2 + $0x189c] ss:$112 sps:$4 sm:$0xff]   ;;  %v18854_v31 = vld [vmem:[#allocation2 + $0x1890] ss:$112 sps:$4 sm:$0xff]  }
 0x1cd   :  { %9988 = vmatpush1.bf16.msra.mxu0 %v18764_v32  ;;  %10160 = vmatpush1.bf16.msra.mxu1 %v18767_v33  ;;  %v18857_v32 = vld [vmem:[#allocation2 + $0x1898] ss:$112 sps:$4 sm:$0xff]   ;;  %v18862_v33 = vld [vmem:[#allocation2 + $0x1974] ss:$112 sps:$4 sm:$0xff]  }
 0x1ce   :  { %9989 = vmatprep.subr.bf16.mxu0 %v18772_v34  ;;  %10161 = vmatprep.subr.bf16.mxu1 %v18775_v35  ;;  %v18865_v34 = vld [vmem:[#allocation2 + $0x197c] ss:$112 sps:$4 sm:$0xff]   ;;  %v18860_v35 = vld [vmem:[#allocation2 + $0x1970] ss:$112 sps:$4 sm:$0xff]  }
 0x1d1   :  { %9990 = vmatpush1.bf16.msra.mxu0 %v18770_v36  ;;  %10162 = vmatpush1.bf16.msra.mxu1 %v18773_v37  ;;  %v18863_v36 = vld [vmem:[#allocation2 + $0x1978] ss:$112 sps:$4 sm:$0xff]   ;;  %v18868_v37 = vld [vmem:[#allocation2 + $0x1a54] ss:$112 sps:$4 sm:$0xff]  }
 0x1d2   :  { %9991 = vmatprep.subr.bf16.mxu0 %v18778_v38  ;;  %10163 = vmatprep.subr.bf16.mxu1 %v18781_v39  ;;  %v18871_v38 = vld [vmem:[#allocation2 + $0x1a5c] ss:$112 sps:$4 sm:$0xff]   ;;  %v18866_v39 = vld [vmem:[#allocation2 + $0x1a50] ss:$112 sps:$4 sm:$0xff]  }
 0x1d5   :  { %9992 = vmatpush1.bf16.msra.mxu0 %v18776_v40  ;;  %10164 = vmatpush1.bf16.msra.mxu1 %v18779_v41  ;;  %v18869_v40 = vld [vmem:[#allocation2 + $0x1a58] ss:$112 sps:$4 sm:$0xff]   ;;  %v18874_v41 = vld [vmem:[#allocation2 + $0x1b34] ss:$112 sps:$4 sm:$0xff]  }
 0x1d6   :  { %10004 = vmatprep.subr.bf16.mxu0 %v18784_v42  ;;  %10176 = vmatprep.subr.bf16.mxu1 %v18787_v43  ;;  %v18877_v42 = vld [vmem:[#allocation2 + $0x1b3c] ss:$112 sps:$4 sm:$0xff]   ;;  %v18872_v43 = vld [vmem:[#allocation2 + $0x1b30] ss:$112 sps:$4 sm:$0xff]  }
 0x1d8   :  { %9994 = vmatmul.mubr.bf16.vlgmr.msra.gmra.mrb[4].mxu0 %v20735_v48  ;;  %10166 = vmatmul.mubr.bf16.vlgmr.msra.gmra.mrb[4].mxu1 %v20735_v48  ;;  %v18881_v48 = vld [vmem:[#allocation2 + $0x1c18] ss:$112 sps:$4 sm:$0xff]  }
 0x1d9   :  { %10005 = vmatpush1.bf16.msra.mxu0 %v18782_v44  ;;  %10177 = vmatpush1.bf16.msra.mxu1 %v18785_v45  ;;  %v18875_v44 = vld [vmem:[#allocation2 + $0x1b38] ss:$112 sps:$4 sm:$0xff]   ;;  %v18880_v45 = vld [vmem:[#allocation2 + $0x1c14] ss:$112 sps:$4 sm:$0xff]  }
 0x1da   :  { %10006 = vmatprep.subr.bf16.mxu0 %v18790_v46  ;;  %10178 = vmatprep.subr.bf16.mxu1 %v18793_v47  ;;  %v18883_v46 = vld [vmem:[#allocation2 + $0x1c1c] ss:$112 sps:$4 sm:$0xff]   ;;  %v18878_v47 = vld [vmem:[#allocation2 + $0x1c10] ss:$112 sps:$4 sm:$0xff]  }
 0x1db   :  { %10036 = vmatprep.mubr.bf16.mxu0 %v20736_v53  ;;  %10208 = vmatprep.mubr.bf16.mxu1 %v20736_v53  ;;  %v18887_v53 = vld [vmem:[#allocation2 + $0x1cf8] ss:$112 sps:$4 sm:$0xff]  }
 0x1dd   :  { %10007 = vmatpush1.bf16.msra.mxu0 %v18788_v49  ;;  %10179 = vmatpush1.bf16.msra.mxu1 %v18791_v50  ;;  %v18886_v49 = vld [vmem:[#allocation2 + $0x1cf4] ss:$112 sps:$4 sm:$0xff]   ;;  %v18889_v50 = vld [vmem:[#allocation2 + $0x1cfc] ss:$112 sps:$4 sm:$0xff]  }
 0x1de   :  { %10008 = vmatprep.subr.bf16.mxu0 %v18796_v51  ;;  %10180 = vmatprep.subr.bf16.mxu1 %v18799_v52  ;;  %v20737_v51 = vld [vmem:[%s21713_s0 + $0x8] ss:$28 sps:$4 sm:$0xff]   ;;  %v18884_v52 = vld [vmem:[#allocation2 + $0x1cf0] ss:$112 sps:$4 sm:$0xff]  }
 0x1e1   :  { %10009 = vmatpush1.bf16.msra.mxu0 %v18794_v54  ;;  %10181 = vmatpush1.bf16.msra.mxu1 %v18797_v55  ;;  %v18892_v54 = vld [vmem:[#allocation2 + $0x1dd4] ss:$112 sps:$4 sm:$0xff]   ;;  %v18895_v55 = vld [vmem:[#allocation2 + $0x1ddc] ss:$112 sps:$4 sm:$0xff]  }
 0x1e2   :  { %10010 = vmatprep.subr.bf16.mxu0 %v18802_v56  ;;  %10182 = vmatprep.subr.bf16.mxu1 %v18805_v57  ;;  %v20738_v56 = vld [vmem:[%s21713_s0 + $0x14] ss:$28 sps:$4 sm:$0xff]  }
 0x1e3   :  { %v18890_v57 = vld [vmem:[#allocation2 + $0x1dd0] ss:$112 sps:$4 sm:$0xff]  }
 0x1e5   :  { %10011 = vmatpush1.bf16.msra.mxu0 %v18800_v58  ;;  %10183 = vmatpush1.bf16.msra.mxu1 %v18803_v59  ;;  %v18893_v58 = vld [vmem:[#allocation2 + $0x1dd8] ss:$112 sps:$4 sm:$0xff]   ;;  %v18898_v59 = vld [vmem:[#allocation2 + $0x1eb4] ss:$112 sps:$4 sm:$0xff]  }
 0x1e6   :  { %10012 = vmatprep.subr.bf16.mxu0 %v18808_v60  ;;  %10184 = vmatprep.subr.bf16.mxu1 %v18811_v61  ;;  %v18901_v60 = vld [vmem:[#allocation2 + $0x1ebc] ss:$112 sps:$4 sm:$0xff]   ;;  %v18896_v61 = vld [vmem:[#allocation2 + $0x1eb0] ss:$112 sps:$4 sm:$0xff]  }
 0x1e9   :  { %10013 = vmatpush1.bf16.msra.mxu0 %v18806_v62  ;;  %10185 = vmatpush1.bf16.msra.mxu1 %v18809_v63  ;;  %v18899_v62 = vld [vmem:[#allocation2 + $0x1eb8] ss:$112 sps:$4 sm:$0xff]   ;;  %v18904_v63 = vld [vmem:[#allocation2 + $0x1f94] ss:$112 sps:$4 sm:$0xff]  }
 0x1ea   :  { %10014 = vmatprep.subr.bf16.mxu0 %v18814_v0  ;;  %10186 = vmatprep.subr.bf16.mxu1 %v18817_v1  ;;  %v18907_v0 = vld [vmem:[#allocation2 + $0x1f9c] ss:$112 sps:$4 sm:$0xff]   ;;  %v18902_v1 = vld [vmem:[#allocation2 + $0x1f90] ss:$112 sps:$4 sm:$0xff]  }
 0x1ed   :  { %10015 = vmatpush1.bf16.msra.mxu0 %v18812_v2  ;;  %10187 = vmatpush1.bf16.msra.mxu1 %v18815_v3  ;;  %v18905_v2 = vld [vmem:[#allocation2 + $0x1f98] ss:$112 sps:$4 sm:$0xff]   ;;  %v18910_v3 = vld [vmem:[#allocation2 + $0x2074] ss:$112 sps:$4 sm:$0xff]  }
 0x1ee   :  { %10016 = vmatprep.subr.bf16.mxu0 %v18820_v4  ;;  %10188 = vmatprep.subr.bf16.mxu1 %v18823_v5  ;;  %v18913_v4 = vld [vmem:[#allocation2 + $0x207c] ss:$112 sps:$4 sm:$0xff]   ;;  %v18908_v5 = vld [vmem:[#allocation2 + $0x2070] ss:$112 sps:$4 sm:$0xff]  }
 0x1f1   :  { %10017 = vmatpush1.bf16.msra.mxu0 %v18818_v6  ;;  %10189 = vmatpush1.bf16.msra.mxu1 %v18821_v7  ;;  %v18911_v6 = vld [vmem:[#allocation2 + $0x2078] ss:$112 sps:$4 sm:$0xff]   ;;  %v18916_v7 = vld [vmem:[#allocation2 + $0x2154] ss:$112 sps:$4 sm:$0xff]  }
 0x1f2   :  { %10018 = vmatprep.subr.bf16.mxu0 %v18826_v8  ;;  %10190 = vmatprep.subr.bf16.mxu1 %v18829_v9  ;;  %v18919_v8 = vld [vmem:[#allocation2 + $0x215c] ss:$112 sps:$4 sm:$0xff]   ;;  %v18914_v9 = vld [vmem:[#allocation2 + $0x2150] ss:$112 sps:$4 sm:$0xff]  }
 0x1f5   :  { %10019 = vmatpush1.bf16.msra.mxu0 %v18824_v10  ;;  %10191 = vmatpush1.bf16.msra.mxu1 %v18827_v11  ;;  %v18917_v10 = vld [vmem:[#allocation2 + $0x2158] ss:$112 sps:$4 sm:$0xff]   ;;  %v18922_v11 = vld [vmem:[#allocation2 + $0x2234] ss:$112 sps:$4 sm:$0xff]  }
 0x1f6   :  { %10020 = vmatprep.subr.bf16.mxu0 %v18832_v12  ;;  %10192 = vmatprep.subr.bf16.mxu1 %v18835_v13  ;;  %v18925_v12 = vld [vmem:[#allocation2 + $0x223c] ss:$112 sps:$4 sm:$0xff]   ;;  %v18920_v13 = vld [vmem:[#allocation2 + $0x2230] ss:$112 sps:$4 sm:$0xff]  }
 0x1f9   :  { %10021 = vmatpush1.bf16.msra.mxu0 %v18830_v14  ;;  %10193 = vmatpush1.bf16.msra.mxu1 %v18833_v15  ;;  %v18923_v14 = vld [vmem:[#allocation2 + $0x2238] ss:$112 sps:$4 sm:$0xff]   ;;  %v18928_v15 = vld [vmem:[#allocation2 + $0x2314] ss:$112 sps:$4 sm:$0xff]  }
 0x1fa   :  { %10022 = vmatprep.subr.bf16.mxu0 %v18838_v17  ;;  %10194 = vmatprep.subr.bf16.mxu1 %v18841_v18  ;;  %v18931_v17 = vld [vmem:[#allocation2 + $0x231c] ss:$112 sps:$4 sm:$0xff]   ;;  %v18926_v18 = vld [vmem:[#allocation2 + $0x2310] ss:$112 sps:$4 sm:$0xff]  }
 0x1fd   :  { %10023 = vmatpush1.bf16.msra.mxu0 %v18836_v19  ;;  %10195 = vmatpush1.bf16.msra.mxu1 %v18839_v20  ;;  %v18929_v19 = vld [vmem:[#allocation2 + $0x2318] ss:$112 sps:$4 sm:$0xff]   ;;  %v18934_v20 = vld [vmem:[#allocation2 + $0x23f4] ss:$112 sps:$4 sm:$0xff]  }
 0x1fe   :  { %10024 = vmatprep.subr.bf16.mxu0 %v18844_v21  ;;  %10196 = vmatprep.subr.bf16.mxu1 %v18847_v22  ;;  %v18937_v21 = vld [vmem:[#allocation2 + $0x23fc] ss:$112 sps:$4 sm:$0xff]   ;;  %v18932_v22 = vld [vmem:[#allocation2 + $0x23f0] ss:$112 sps:$4 sm:$0xff]  }
 0x201   :  { %10025 = vmatpush1.bf16.msra.mxu0 %v18842_v23  ;;  %10197 = vmatpush1.bf16.msra.mxu1 %v18845_v24  ;;  %v18935_v23 = vld [vmem:[#allocation2 + $0x23f8] ss:$112 sps:$4 sm:$0xff]   ;;  %v18940_v24 = vld [vmem:[#allocation2 + $0x24d4] ss:$112 sps:$4 sm:$0xff]  }
 0x202   :  { %10026 = vmatprep.subr.bf16.mxu0 %v18850_v25  ;;  %10198 = vmatprep.subr.bf16.mxu1 %v18853_v26  ;;  %v18943_v25 = vld [vmem:[#allocation2 + $0x24dc] ss:$112 sps:$4 sm:$0xff]   ;;  %v18938_v26 = vld [vmem:[#allocation2 + $0x24d0] ss:$112 sps:$4 sm:$0xff]  }
 0x205   :  { %10027 = vmatpush1.bf16.msra.mxu0 %v18848_v27  ;;  %10199 = vmatpush1.bf16.msra.mxu1 %v18851_v28  ;;  %v18941_v27 = vld [vmem:[#allocation2 + $0x24d8] ss:$112 sps:$4 sm:$0xff]   ;;  %v18946_v28 = vld [vmem:[#allocation2 + $0x25b4] ss:$112 sps:$4 sm:$0xff]  }
 0x206   :  { %10028 = vmatprep.subr.bf16.mxu0 %v18856_v29  ;;  %10200 = vmatprep.subr.bf16.mxu1 %v18859_v30  ;;  %v18949_v29 = vld [vmem:[#allocation2 + $0x25bc] ss:$112 sps:$4 sm:$0xff]   ;;  %v18944_v30 = vld [vmem:[#allocation2 + $0x25b0] ss:$112 sps:$4 sm:$0xff]  }
 0x209   :  { %10029 = vmatpush1.bf16.msra.mxu0 %v18854_v31  ;;  %10201 = vmatpush1.bf16.msra.mxu1 %v18857_v32  ;;  %v18947_v31 = vld [vmem:[#allocation2 + $0x25b8] ss:$112 sps:$4 sm:$0xff]   ;;  %v18952_v32 = vld [vmem:[#allocation2 + $0x2694] ss:$112 sps:$4 sm:$0xff]  }
 0x20a   :  { %10030 = vmatprep.subr.bf16.mxu0 %v18862_v33  ;;  %10202 = vmatprep.subr.bf16.mxu1 %v18865_v34  ;;  %v18955_v33 = vld [vmem:[#allocation2 + $0x269c] ss:$112 sps:$4 sm:$0xff]   ;;  %v18950_v34 = vld [vmem:[#allocation2 + $0x2690] ss:$112 sps:$4 sm:$0xff]  }
 0x20d   :  { %10031 = vmatpush1.bf16.msra.mxu0 %v18860_v35  ;;  %10203 = vmatpush1.bf16.msra.mxu1 %v18863_v36  ;;  %v18953_v35 = vld [vmem:[#allocation2 + $0x2698] ss:$112 sps:$4 sm:$0xff]   ;;  %v18958_v36 = vld [vmem:[#allocation2 + $0x2774] ss:$112 sps:$4 sm:$0xff]  }
 0x20e   :  { %10032 = vmatprep.subr.bf16.mxu0 %v18868_v37  ;;  %10204 = vmatprep.subr.bf16.mxu1 %v18871_v38  ;;  %v18961_v37 = vld [vmem:[#allocation2 + $0x277c] ss:$112 sps:$4 sm:$0xff]   ;;  %v18956_v38 = vld [vmem:[#allocation2 + $0x2770] ss:$112 sps:$4 sm:$0xff]  }
 0x211   :  { %10033 = vmatpush1.bf16.msra.mxu0 %v18866_v39  ;;  %10205 = vmatpush1.bf16.msra.mxu1 %v18869_v40  ;;  %v18959_v39 = vld [vmem:[#allocation2 + $0x2778] ss:$112 sps:$4 sm:$0xff]   ;;  %v18964_v40 = vld [vmem:[#allocation2 + $0x2854] ss:$112 sps:$4 sm:$0xff]  }
 0x212   :  { %10034 = vmatprep.subr.bf16.mxu0 %v18874_v41  ;;  %10206 = vmatprep.subr.bf16.mxu1 %v18877_v42  ;;  %v18967_v41 = vld [vmem:[#allocation2 + $0x285c] ss:$112 sps:$4 sm:$0xff]   ;;  %v18962_v42 = vld [vmem:[#allocation2 + $0x2850] ss:$112 sps:$4 sm:$0xff]  }
 0x215   :  { %10035 = vmatpush1.bf16.msra.mxu0 %v18872_v43  ;;  %10207 = vmatpush1.bf16.msra.mxu1 %v18875_v44  ;;  %v18965_v43 = vld [vmem:[#allocation2 + $0x2858] ss:$112 sps:$4 sm:$0xff]   ;;  %v18970_v44 = vld [vmem:[#allocation2 + $0x2934] ss:$112 sps:$4 sm:$0xff]  }
 0x216   :  { %10047 = vmatprep.subr.bf16.mxu0 %v18880_v45  ;;  %10219 = vmatprep.subr.bf16.mxu1 %v18883_v46  ;;  %v18973_v45 = vld [vmem:[#allocation2 + $0x293c] ss:$112 sps:$4 sm:$0xff]   ;;  %v18968_v46 = vld [vmem:[#allocation2 + $0x2930] ss:$112 sps:$4 sm:$0xff]  }
 0x218   :  { %10037 = vmatmul.mubr.bf16.vlgmr.msra.gmra.mrb[4].mxu0 %v20737_v51  ;;  %10209 = vmatmul.mubr.bf16.vlgmr.msra.gmra.mrb[4].mxu1 %v20737_v51  ;;  %v18977_v51 = vld [vmem:[#allocation2 + $0x2a18] ss:$112 sps:$4 sm:$0xff]  }
 0x219   :  { %10048 = vmatpush1.bf16.msra.mxu0 %v18878_v47  ;;  %10220 = vmatpush1.bf16.msra.mxu1 %v18881_v48  ;;  %v18971_v47 = vld [vmem:[#allocation2 + $0x2938] ss:$112 sps:$4 sm:$0xff]   ;;  %v18976_v48 = vld [vmem:[#allocation2 + $0x2a14] ss:$112 sps:$4 sm:$0xff]  }
 0x21a   :  { %10049 = vmatprep.subr.bf16.mxu0 %v18886_v49  ;;  %10221 = vmatprep.subr.bf16.mxu1 %v18889_v50  ;;  %v18979_v49 = vld [vmem:[#allocation2 + $0x2a1c] ss:$112 sps:$4 sm:$0xff]   ;;  %v18974_v50 = vld [vmem:[#allocation2 + $0x2a10] ss:$112 sps:$4 sm:$0xff]  }
 0x21b   :  { %10079 = vmatprep.mubr.bf16.mxu0 %v20738_v56  ;;  %10251 = vmatprep.mubr.bf16.mxu1 %v20738_v56  ;;  %v18983_v56 = vld [vmem:[#allocation2 + $0x2af8] ss:$112 sps:$4 sm:$0xff]  }
 0x21d   :  { %10050 = vmatpush1.bf16.msra.mxu0 %v18884_v52  ;;  %10222 = vmatpush1.bf16.msra.mxu1 %v18887_v53  ;;  %v18982_v52 = vld [vmem:[#allocation2 + $0x2af4] ss:$112 sps:$4 sm:$0xff]   ;;  %v18985_v53 = vld [vmem:[#allocation2 + $0x2afc] ss:$112 sps:$4 sm:$0xff]  }
 0x21e   :  { %10051 = vmatprep.subr.bf16.mxu0 %v18892_v54  ;;  %10223 = vmatprep.subr.bf16.mxu1 %v18895_v55  ;;  %v20739_v54 = vld [vmem:[%s21713_s0 + $0x10] ss:$28 sps:$4 sm:$0xff]  }
 0x21f   :  { %v18980_v55 = vld [vmem:[#allocation2 + $0x2af0] ss:$112 sps:$4 sm:$0xff]  }
 0x221   :  { %10052 = vmatpush1.bf16.msra.mxu0 %v18890_v57  ;;  %10224 = vmatpush1.bf16.msra.mxu1 %v18893_v58  ;;  %v18988_v57 = vld [vmem:[#allocation2 + $0x2bd4] ss:$112 sps:$4 sm:$0xff]   ;;  %v18991_v58 = vld [vmem:[#allocation2 + $0x2bdc] ss:$112 sps:$4 sm:$0xff]  }
 0x222   :  { %10053 = vmatprep.subr.bf16.mxu0 %v18898_v59  ;;  %10225 = vmatprep.subr.bf16.mxu1 %v18901_v60  ;;  %v18986_v59 = vld [vmem:[#allocation2 + $0x2bd0] ss:$112 sps:$4 sm:$0xff]   ;;  %v18989_v60 = vld [vmem:[#allocation2 + $0x2bd8] ss:$112 sps:$4 sm:$0xff]  }
 0x225   :  { %10054 = vmatpush1.bf16.msra.mxu0 %v18896_v61  ;;  %10226 = vmatpush1.bf16.msra.mxu1 %v18899_v62  ;;  %v18994_v61 = vld [vmem:[#allocation2 + $0x2cb4] ss:$112 sps:$4 sm:$0xff]   ;;  %v18997_v62 = vld [vmem:[#allocation2 + $0x2cbc] ss:$112 sps:$4 sm:$0xff]  }
 0x226   :  { %10055 = vmatprep.subr.bf16.mxu0 %v18904_v63  ;;  %10227 = vmatprep.subr.bf16.mxu1 %v18907_v0  ;;  %v18992_v63 = vld [vmem:[#allocation2 + $0x2cb0] ss:$112 sps:$4 sm:$0xff]   ;;  %v18995_v0 = vld [vmem:[#allocation2 + $0x2cb8] ss:$112 sps:$4 sm:$0xff]  }
 0x229   :  { %10056 = vmatpush1.bf16.msra.mxu0 %v18902_v1  ;;  %10228 = vmatpush1.bf16.msra.mxu1 %v18905_v2  ;;  %v19000_v1 = vld [vmem:[#allocation2 + $0x2d94] ss:$112 sps:$4 sm:$0xff]   ;;  %v19003_v2 = vld [vmem:[#allocation2 + $0x2d9c] ss:$112 sps:$4 sm:$0xff]  }
 0x22a   :  { %10057 = vmatprep.subr.bf16.mxu0 %v18910_v3  ;;  %10229 = vmatprep.subr.bf16.mxu1 %v18913_v4  ;;  %v18998_v3 = vld [vmem:[#allocation2 + $0x2d90] ss:$112 sps:$4 sm:$0xff]   ;;  %v19001_v4 = vld [vmem:[#allocation2 + $0x2d98] ss:$112 sps:$4 sm:$0xff]  }
 0x22d   :  { %10058 = vmatpush1.bf16.msra.mxu0 %v18908_v5  ;;  %10230 = vmatpush1.bf16.msra.mxu1 %v18911_v6  ;;  %v19006_v5 = vld [vmem:[#allocation2 + $0x2e74] ss:$112 sps:$4 sm:$0xff]   ;;  %v19009_v6 = vld [vmem:[#allocation2 + $0x2e7c] ss:$112 sps:$4 sm:$0xff]  }
 0x22e   :  { %10059 = vmatprep.subr.bf16.mxu0 %v18916_v7  ;;  %10231 = vmatprep.subr.bf16.mxu1 %v18919_v8  ;;  %v19004_v7 = vld [vmem:[#allocation2 + $0x2e70] ss:$112 sps:$4 sm:$0xff]   ;;  %v19007_v8 = vld [vmem:[#allocation2 + $0x2e78] ss:$112 sps:$4 sm:$0xff]  }
 0x231   :  { %10060 = vmatpush1.bf16.msra.mxu0 %v18914_v9  ;;  %10232 = vmatpush1.bf16.msra.mxu1 %v18917_v10  ;;  %v19012_v9 = vld [vmem:[#allocation2 + $0x2f54] ss:$112 sps:$4 sm:$0xff]   ;;  %v19015_v10 = vld [vmem:[#allocation2 + $0x2f5c] ss:$112 sps:$4 sm:$0xff]  }
 0x232   :  { %10061 = vmatprep.subr.bf16.mxu0 %v18922_v11  ;;  %10233 = vmatprep.subr.bf16.mxu1 %v18925_v12 }
 0x235   :  { %10062 = vmatpush1.bf16.msra.mxu0 %v18920_v13  ;;  %10234 = vmatpush1.bf16.msra.mxu1 %v18923_v14 }
 0x236   :  { %10063 = vmatprep.subr.bf16.mxu0 %v18928_v15  ;;  %10235 = vmatprep.subr.bf16.mxu1 %v18931_v17 }
 0x239   :  { %10064 = vmatpush1.bf16.msra.mxu0 %v18926_v18  ;;  %10236 = vmatpush1.bf16.msra.mxu1 %v18929_v19  ;;  %v19010_v18 = vld [vmem:[#allocation2 + $0x2f50] ss:$112 sps:$4 sm:$0xff]   ;;  %v19013_v19 = vld [vmem:[#allocation2 + $0x2f58] ss:$112 sps:$4 sm:$0xff]  }
 0x23a   :  { %10065 = vmatprep.subr.bf16.mxu0 %v18934_v20  ;;  %10237 = vmatprep.subr.bf16.mxu1 %v18937_v21 }
 0x23d   :  { %10066 = vmatpush1.bf16.msra.mxu0 %v18932_v22  ;;  %10238 = vmatpush1.bf16.msra.mxu1 %v18935_v23  ;;  %v19018_v22 = vld [vmem:[#allocation2 + $0x3034] ss:$112 sps:$4 sm:$0xff]   ;;  %v19021_v23 = vld [vmem:[#allocation2 + $0x303c] ss:$112 sps:$4 sm:$0xff]  }
 0x23e   :  { %10067 = vmatprep.subr.bf16.mxu0 %v18940_v24  ;;  %10239 = vmatprep.subr.bf16.mxu1 %v18943_v25  ;;  %v19016_v24 = vld [vmem:[#allocation2 + $0x3030] ss:$112 sps:$4 sm:$0xff]   ;;  %v19019_v25 = vld [vmem:[#allocation2 + $0x3038] ss:$112 sps:$4 sm:$0xff]  }
 0x241   :  { %10068 = vmatpush1.bf16.msra.mxu0 %v18938_v26  ;;  %10240 = vmatpush1.bf16.msra.mxu1 %v18941_v27  ;;  %v19024_v26 = vld [vmem:[#allocation2 + $0x24] ss:$112 sps:$4 sm:$0xff]   ;;  %v19027_v27 = vld [vmem:[#allocation2 + $0x2c] ss:$112 sps:$4 sm:$0xff]  }
 0x242   :  { %10069 = vmatprep.subr.bf16.mxu0 %v18946_v28  ;;  %10241 = vmatprep.subr.bf16.mxu1 %v18949_v29  ;;  %v19022_v28 = vld [vmem:[#allocation2 + $0x20] ss:$112 sps:$4 sm:$0xff]   ;;  %v19025_v29 = vld [vmem:[#allocation2 + $0x28] ss:$112 sps:$4 sm:$0xff]  }
 0x245   :  { %10070 = vmatpush1.bf16.msra.mxu0 %v18944_v30  ;;  %10242 = vmatpush1.bf16.msra.mxu1 %v18947_v31  ;;  %v19030_v30 = vld [vmem:[#allocation2 + $0x104] ss:$112 sps:$4 sm:$0xff]   ;;  %v19033_v31 = vld [vmem:[#allocation2 + $0x10c] ss:$112 sps:$4 sm:$0xff]  }
 0x246   :  { %10071 = vmatprep.subr.bf16.mxu0 %v18952_v32  ;;  %10243 = vmatprep.subr.bf16.mxu1 %v18955_v33  ;;  %v20740_v32 = vld [vmem:[%s21713_s0 + $0x18] ss:$28 sps:$4 sm:$0xff]   ;;  %v19028_v33 = vld [vmem:[#allocation2 + $0x100] ss:$112 sps:$4 sm:$0xff]  }
 0x249   :  { %10072 = vmatpush1.bf16.msra.mxu0 %v18950_v34  ;;  %10244 = vmatpush1.bf16.msra.mxu1 %v18953_v35  ;;  %v19031_v34 = vld [vmem:[#allocation2 + $0x108] ss:$112 sps:$4 sm:$0xff]   ;;  %v19036_v35 = vld [vmem:[#allocation2 + $0x1e4] ss:$112 sps:$4 sm:$0xff]  }
 0x24a   :  { %10073 = vmatprep.subr.bf16.mxu0 %v18958_v36  ;;  %10245 = vmatprep.subr.bf16.mxu1 %v18961_v37  ;;  %v19039_v36 = vld [vmem:[#allocation2 + $0x1ec] ss:$112 sps:$4 sm:$0xff]   ;;  %v20741_v37 = vld [vmem:[%s21713_s0 + $0x4] ss:$28 sps:$4 sm:$0xff]  }
 0x24d   :  { %10074 = vmatpush1.bf16.msra.mxu0 %v18956_v38  ;;  %10246 = vmatpush1.bf16.msra.mxu1 %v18959_v39  ;;  %v19034_v38 = vld [vmem:[#allocation2 + $0x1e0] ss:$112 sps:$4 sm:$0xff]   ;;  %v19037_v39 = vld [vmem:[#allocation2 + $0x1e8] ss:$112 sps:$4 sm:$0xff]  }
 0x24e   :  { %10075 = vmatprep.subr.bf16.mxu0 %v18964_v40  ;;  %10247 = vmatprep.subr.bf16.mxu1 %v18967_v41  ;;  %v19042_v40 = vld [vmem:[#allocation2 + $0x2c4] ss:$112 sps:$4 sm:$0xff]   ;;  %v19045_v41 = vld [vmem:[#allocation2 + $0x2cc] ss:$112 sps:$4 sm:$0xff]  }
 0x251   :  { %10076 = vmatpush1.bf16.msra.mxu0 %v18962_v42  ;;  %10248 = vmatpush1.bf16.msra.mxu1 %v18965_v43  ;;  %v19040_v42 = vld [vmem:[#allocation2 + $0x2c0] ss:$112 sps:$4 sm:$0xff]   ;;  %v19043_v43 = vld [vmem:[#allocation2 + $0x2c8] ss:$112 sps:$4 sm:$0xff]  }
 0x252   :  { %10077 = vmatprep.subr.bf16.mxu0 %v18970_v44  ;;  %10249 = vmatprep.subr.bf16.mxu1 %v18973_v45  ;;  %v19048_v44 = vld [vmem:[#allocation2 + $0x3a4] ss:$112 sps:$4 sm:$0xff]   ;;  %v19051_v45 = vld [vmem:[#allocation2 + $0x3ac] ss:$112 sps:$4 sm:$0xff]  }
 0x255   :  { %10078 = vmatpush1.bf16.msra.mxu0 %v18968_v46  ;;  %10250 = vmatpush1.bf16.msra.mxu1 %v18971_v47  ;;  %v19046_v46 = vld [vmem:[#allocation2 + $0x3a0] ss:$112 sps:$4 sm:$0xff]   ;;  %v19049_v47 = vld [vmem:[#allocation2 + $0x3a8] ss:$112 sps:$4 sm:$0xff]  }
 0x256   :  { %10090 = vmatprep.subr.bf16.mxu0 %v18976_v48  ;;  %10262 = vmatprep.subr.bf16.mxu1 %v18979_v49  ;;  %v19054_v48 = vld [vmem:[#allocation2 + $0x484] ss:$112 sps:$4 sm:$0xff]   ;;  %v19057_v49 = vld [vmem:[#allocation2 + $0x48c] ss:$112 sps:$4 sm:$0xff]  }
 0x258   :  { %10080 = vmatmul.mubr.bf16.vlgmr.msra.gmra.mrb[4].mxu0 %v20739_v54  ;;  %10252 = vmatmul.mubr.bf16.vlgmr.msra.gmra.mrb[4].mxu1 %v20739_v54  ;;  %v19058_v54 = vld [vmem:[#allocation2 + $0x560] ss:$112 sps:$4 sm:$0xff]  }
 0x259   :  { %10091 = vmatpush1.bf16.msra.mxu0 %v18974_v50  ;;  %10263 = vmatpush1.bf16.msra.mxu1 %v18977_v51  ;;  %v19052_v50 = vld [vmem:[#allocation2 + $0x480] ss:$112 sps:$4 sm:$0xff]   ;;  %v19055_v51 = vld [vmem:[#allocation2 + $0x488] ss:$112 sps:$4 sm:$0xff]  }
 0x25a   :  { %10092 = vmatprep.subr.bf16.mxu0 %v18982_v52  ;;  %10264 = vmatprep.subr.bf16.mxu1 %v18985_v53  ;;  %v19060_v52 = vld [vmem:[#allocation2 + $0x564] ss:$112 sps:$4 sm:$0xff]   ;;  %v19063_v53 = vld [vmem:[#allocation2 + $0x56c] ss:$112 sps:$4 sm:$0xff]  }
 0x25b   :  { %10122 = vmatprep.mubr.bf16.mxu0 %v21725_v16  ;;  %10294 = vmatprep.mubr.bf16.mxu1 %v21725_v16 }
 0x25d   :  { %10093 = vmatpush1.bf16.msra.mxu0 %v18980_v55  ;;  %10265 = vmatpush1.bf16.msra.mxu1 %v18983_v56  ;;  %v19061_v55 = vld [vmem:[#allocation2 + $0x568] ss:$112 sps:$4 sm:$0xff]   ;;  %v19066_v56 = vld [vmem:[#allocation2 + $0x644] ss:$112 sps:$4 sm:$0xff]  }
 0x25e   :  { %10094 = vmatprep.subr.bf16.mxu0 %v18988_v57  ;;  %10266 = vmatprep.subr.bf16.mxu1 %v18991_v58  ;;  %v19069_v57 = vld [vmem:[#allocation2 + $0x64c] ss:$112 sps:$4 sm:$0xff]   ;;  %v19064_v58 = vld [vmem:[#allocation2 + $0x640] ss:$112 sps:$4 sm:$0xff]  }
 0x261   :  { %10095 = vmatpush1.bf16.msra.mxu0 %v18986_v59  ;;  %10267 = vmatpush1.bf16.msra.mxu1 %v18989_v60  ;;  %v19067_v59 = vld [vmem:[#allocation2 + $0x648] ss:$112 sps:$4 sm:$0xff]   ;;  %v19072_v60 = vld [vmem:[#allocation2 + $0x724] ss:$112 sps:$4 sm:$0xff]  }
 0x262   :  { %10096 = vmatprep.subr.bf16.mxu0 %v18994_v61  ;;  %10268 = vmatprep.subr.bf16.mxu1 %v18997_v62  ;;  %v19075_v61 = vld [vmem:[#allocation2 + $0x72c] ss:$112 sps:$4 sm:$0xff]   ;;  %v19070_v62 = vld [vmem:[#allocation2 + $0x720] ss:$112 sps:$4 sm:$0xff]  }
 0x265   :  { %10097 = vmatpush1.bf16.msra.mxu0 %v18992_v63  ;;  %10269 = vmatpush1.bf16.msra.mxu1 %v18995_v0  ;;  %v19073_v63 = vld [vmem:[#allocation2 + $0x728] ss:$112 sps:$4 sm:$0xff]   ;;  %v19078_v0 = vld [vmem:[#allocation2 + $0x804] ss:$112 sps:$4 sm:$0xff]  }
 0x266   :  { %10098 = vmatprep.subr.bf16.mxu0 %v19000_v1  ;;  %10270 = vmatprep.subr.bf16.mxu1 %v19003_v2  ;;  %v19081_v1 = vld [vmem:[#allocation2 + $0x80c] ss:$112 sps:$4 sm:$0xff]   ;;  %v19076_v2 = vld [vmem:[#allocation2 + $0x800] ss:$112 sps:$4 sm:$0xff]  }
 0x269   :  { %10099 = vmatpush1.bf16.msra.mxu0 %v18998_v3  ;;  %10271 = vmatpush1.bf16.msra.mxu1 %v19001_v4  ;;  %v19079_v3 = vld [vmem:[#allocation2 + $0x808] ss:$112 sps:$4 sm:$0xff]   ;;  %v19084_v4 = vld [vmem:[#allocation2 + $0x8e4] ss:$112 sps:$4 sm:$0xff]  }
 0x26a   :  { %10100 = vmatprep.subr.bf16.mxu0 %v19006_v5  ;;  %10272 = vmatprep.subr.bf16.mxu1 %v19009_v6  ;;  %v19087_v5 = vld [vmem:[#allocation2 + $0x8ec] ss:$112 sps:$4 sm:$0xff]   ;;  %v19082_v6 = vld [vmem:[#allocation2 + $0x8e0] ss:$112 sps:$4 sm:$0xff]  }
 0x26b   :  { %v21252_v11 = vpop.f32.mrb[0].mxu0  ;;  %v21254_v12 = vpop.f32.mrb[0].mxu1 }
 0x26c   :  { %v21256_v13 = vpop.f32.mrb[1].mxu0  ;;  %v21258_v14 = vpop.f32.mrb[1].mxu1 }
 0x26d   :  { %v21260_v15 = vpop.f32.mrb[2].mxu0  ;;  %v21262_v17 = vpop.f32.mrb[2].mxu1  ;;  %10101 = vmatpush1.bf16.msra.mxu0 %v19004_v7  ;;  %10273 = vmatpush1.bf16.msra.mxu1 %v19007_v8  ;;  %v19085_v7 = vld [vmem:[#allocation2 + $0x8e8] ss:$112 sps:$4 sm:$0xff]   ;;  %v19090_v8 = vld [vmem:[#allocation2 + $0x9c4] ss:$112 sps:$4 sm:$0xff]  }
 0x26e   :  { %v21264_v20 = vpop.f32.mrb[3].mxu0  ;;  %v21266_v21 = vpop.f32.mrb[3].mxu1  ;;  %10102 = vmatprep.subr.bf16.mxu0 %v19012_v9  ;;  %10274 = vmatprep.subr.bf16.mxu1 %v19015_v10  ;;  %v19093_v9 = vld [vmem:[#allocation2 + $0x9cc] ss:$112 sps:$4 sm:$0xff]   ;;  %v19088_v10 = vld [vmem:[#allocation2 + $0x9c0] ss:$112 sps:$4 sm:$0xff]  }
 0x271   :  { %10103 = vmatpush1.bf16.msra.mxu0 %v19010_v18  ;;  %10275 = vmatpush1.bf16.msra.mxu1 %v19013_v19  ;;  %v19091_v18 = vld [vmem:[#allocation2 + $0x9c8] ss:$112 sps:$4 sm:$0xff]   ;;  %v19096_v19 = vld [vmem:[#allocation2 + $0xaa4] ss:$112 sps:$4 sm:$0xff]  }
 0x272   :  { %10104 = vmatprep.subr.bf16.mxu0 %v19018_v22  ;;  %10276 = vmatprep.subr.bf16.mxu1 %v19021_v23  ;;  %v19099_v22 = vld [vmem:[#allocation2 + $0xaac] ss:$112 sps:$4 sm:$0xff]   ;;  %v19094_v23 = vld [vmem:[#allocation2 + $0xaa0] ss:$112 sps:$4 sm:$0xff]  }
 0x275   :  { %10105 = vmatpush1.bf16.msra.mxu0 %v19016_v24  ;;  %10277 = vmatpush1.bf16.msra.mxu1 %v19019_v25  ;;  %v19097_v24 = vld [vmem:[#allocation2 + $0xaa8] ss:$112 sps:$4 sm:$0xff]   ;;  %v19102_v25 = vld [vmem:[#allocation2 + $0xb84] ss:$112 sps:$4 sm:$0xff]  }
 0x276   :  { %10305 = vmatprep.subr.bf16.mxu0 %v19024_v26  ;;  %10477 = vmatprep.subr.bf16.mxu1 %v19027_v27  ;;  %v19105_v26 = vld [vmem:[#allocation2 + $0xb8c] ss:$112 sps:$4 sm:$0xff]   ;;  %v19100_v27 = vld [vmem:[#allocation2 + $0xb80] ss:$112 sps:$4 sm:$0xff]  }
 0x278   :  { %10123 = vmatmul.mubr.bf16.vlgmr.msra.gmra.mrb[4].mxu0 %v20740_v32  ;;  %10295 = vmatmul.mubr.bf16.vlgmr.msra.gmra.mrb[4].mxu1 %v20740_v32  ;;  %v19109_v32 = vld [vmem:[#allocation2 + $0xc68] ss:$112 sps:$4 sm:$0xff]  }
 0x279   :  { %10306 = vmatpush1.bf16.msra.mxu0 %v19022_v28  ;;  %10478 = vmatpush1.bf16.msra.mxu1 %v19025_v29  ;;  %v19103_v28 = vld [vmem:[#allocation2 + $0xb88] ss:$112 sps:$4 sm:$0xff]   ;;  %v19108_v29 = vld [vmem:[#allocation2 + $0xc64] ss:$112 sps:$4 sm:$0xff]  }
 0x27a   :  { %10307 = vmatprep.subr.bf16.mxu0 %v19030_v30  ;;  %10479 = vmatprep.subr.bf16.mxu1 %v19033_v31  ;;  %v19111_v30 = vld [vmem:[#allocation2 + $0xc6c] ss:$112 sps:$4 sm:$0xff]   ;;  %v19106_v31 = vld [vmem:[#allocation2 + $0xc60] ss:$112 sps:$4 sm:$0xff]  }
 0x27b   :  { %10337 = vmatprep.mubr.bf16.mxu0 %v20741_v37  ;;  %10509 = vmatprep.mubr.bf16.mxu1 %v20741_v37  ;;  %v19120_v37 = vld [vmem:[#allocation2 + $0xe24] ss:$112 sps:$4 sm:$0xff]  }
 0x27d   :  { %10308 = vmatpush1.bf16.msra.mxu0 %v19028_v33  ;;  %10480 = vmatpush1.bf16.msra.mxu1 %v19031_v34  ;;  %v19114_v33 = vld [vmem:[#allocation2 + $0xd44] ss:$112 sps:$4 sm:$0xff]   ;;  %v19117_v34 = vld [vmem:[#allocation2 + $0xd4c] ss:$112 sps:$4 sm:$0xff]  }
 0x27e   :  { %10309 = vmatprep.subr.bf16.mxu0 %v19036_v35  ;;  %10481 = vmatprep.subr.bf16.mxu1 %v19039_v36  ;;  %v19112_v35 = vld [vmem:[#allocation2 + $0xd40] ss:$112 sps:$4 sm:$0xff]   ;;  %v19115_v36 = vld [vmem:[#allocation2 + $0xd48] ss:$112 sps:$4 sm:$0xff]  }
 0x281   :  { %10310 = vmatpush1.bf16.msra.mxu0 %v19034_v38  ;;  %10482 = vmatpush1.bf16.msra.mxu1 %v19037_v39  ;;  %v19123_v38 = vld [vmem:[#allocation2 + $0xe2c] ss:$112 sps:$4 sm:$0xff]   ;;  %v19118_v39 = vld [vmem:[#allocation2 + $0xe20] ss:$112 sps:$4 sm:$0xff]  }
 0x282   :  { %10311 = vmatprep.subr.bf16.mxu0 %v19042_v40  ;;  %10483 = vmatprep.subr.bf16.mxu1 %v19045_v41  ;;  %v19121_v40 = vld [vmem:[#allocation2 + $0xe28] ss:$112 sps:$4 sm:$0xff]   ;;  %v19126_v41 = vld [vmem:[#allocation2 + $0xf04] ss:$112 sps:$4 sm:$0xff]  }
 0x285   :  { %10312 = vmatpush1.bf16.msra.mxu0 %v19040_v42  ;;  %10484 = vmatpush1.bf16.msra.mxu1 %v19043_v43  ;;  %v19129_v42 = vld [vmem:[#allocation2 + $0xf0c] ss:$112 sps:$4 sm:$0xff]  }
 0x286   :  { %10313 = vmatprep.subr.bf16.mxu0 %v19048_v44  ;;  %10485 = vmatprep.subr.bf16.mxu1 %v19051_v45  ;;  %v20742_v43 = vld [vmem:[%s21713_s0] ss:$28 sps:$4 sm:$0xff]   ;;  %v19127_v45 = vld [vmem:[#allocation2 + $0xf08] ss:$112 sps:$4 sm:$0xff]  }
 0x287   :  { %v19124_v44 = vld [vmem:[#allocation2 + $0xf00] ss:$112 sps:$4 sm:$0xff]  }
 0x289   :  { %10314 = vmatpush1.bf16.msra.mxu0 %v19046_v46  ;;  %10486 = vmatpush1.bf16.msra.mxu1 %v19049_v47  ;;  %v19132_v46 = vld [vmem:[#allocation2 + $0xfe4] ss:$112 sps:$4 sm:$0xff]   ;;  %v19135_v47 = vld [vmem:[#allocation2 + $0xfec] ss:$112 sps:$4 sm:$0xff]  }
 0x28a   :  { %10315 = vmatprep.subr.bf16.mxu0 %v19054_v48  ;;  %10487 = vmatprep.subr.bf16.mxu1 %v19057_v49  ;;  %v20743_v48 = vld [vmem:[%s21713_s0 + $0xc] ss:$28 sps:$4 sm:$0xff]   ;;  %v19130_v49 = vld [vmem:[#allocation2 + $0xfe0] ss:$112 sps:$4 sm:$0xff]  }
 0x28d   :  { %10316 = vmatpush1.bf16.msra.mxu0 %v19052_v50  ;;  %10488 = vmatpush1.bf16.msra.mxu1 %v19055_v51  ;;  %v19133_v50 = vld [vmem:[#allocation2 + $0xfe8] ss:$112 sps:$4 sm:$0xff]   ;;  %v19138_v51 = vld [vmem:[#allocation2 + $0x10c4] ss:$112 sps:$4 sm:$0xff]  }
 0x28e   :  { %10317 = vmatprep.subr.bf16.mxu0 %v19060_v52  ;;  %10489 = vmatprep.subr.bf16.mxu1 %v19063_v53  ;;  %v19141_v52 = vld [vmem:[#allocation2 + $0x10cc] ss:$112 sps:$4 sm:$0xff]   ;;  %v19136_v53 = vld [vmem:[#allocation2 + $0x10c0] ss:$112 sps:$4 sm:$0xff]  }
 0x291   :  { %10318 = vmatpush1.bf16.msra.mxu0 %v19058_v54  ;;  %10490 = vmatpush1.bf16.msra.mxu1 %v19061_v55  ;;  %v19139_v54 = vld [vmem:[#allocation2 + $0x10c8] ss:$112 sps:$4 sm:$0xff]   ;;  %v19144_v55 = vld [vmem:[#allocation2 + $0x11a4] ss:$112 sps:$4 sm:$0xff]  }
 0x292   :  { %10319 = vmatprep.subr.bf16.mxu0 %v19066_v56  ;;  %10491 = vmatprep.subr.bf16.mxu1 %v19069_v57  ;;  %v19147_v56 = vld [vmem:[#allocation2 + $0x11ac] ss:$112 sps:$4 sm:$0xff]   ;;  %v19142_v57 = vld [vmem:[#allocation2 + $0x11a0] ss:$112 sps:$4 sm:$0xff]  }
 0x295   :  { %10320 = vmatpush1.bf16.msra.mxu0 %v19064_v58  ;;  %10492 = vmatpush1.bf16.msra.mxu1 %v19067_v59  ;;  %v19145_v58 = vld [vmem:[#allocation2 + $0x11a8] ss:$112 sps:$4 sm:$0xff]   ;;  %v19150_v59 = vld [vmem:[#allocation2 + $0x1284] ss:$112 sps:$4 sm:$0xff]  }
 0x296   :  { %10321 = vmatprep.subr.bf16.mxu0 %v19072_v60  ;;  %10493 = vmatprep.subr.bf16.mxu1 %v19075_v61  ;;  %v19153_v60 = vld [vmem:[#allocation2 + $0x128c] ss:$112 sps:$4 sm:$0xff]   ;;  %v19148_v61 = vld [vmem:[#allocation2 + $0x1280] ss:$112 sps:$4 sm:$0xff]  }
 0x299   :  { %10322 = vmatpush1.bf16.msra.mxu0 %v19070_v62  ;;  %10494 = vmatpush1.bf16.msra.mxu1 %v19073_v63  ;;  %v19151_v62 = vld [vmem:[#allocation2 + $0x1288] ss:$112 sps:$4 sm:$0xff]   ;;  %v19156_v63 = vld [vmem:[#allocation2 + $0x1364] ss:$112 sps:$4 sm:$0xff]  }
 0x29a   :  { %10323 = vmatprep.subr.bf16.mxu0 %v19078_v0  ;;  %10495 = vmatprep.subr.bf16.mxu1 %v19081_v1  ;;  %v19159_v0 = vld [vmem:[#allocation2 + $0x136c] ss:$112 sps:$4 sm:$0xff]   ;;  %v19154_v1 = vld [vmem:[#allocation2 + $0x1360] ss:$112 sps:$4 sm:$0xff]  }
 0x29d   :  { %10324 = vmatpush1.bf16.msra.mxu0 %v19076_v2  ;;  %10496 = vmatpush1.bf16.msra.mxu1 %v19079_v3  ;;  %v19157_v2 = vld [vmem:[#allocation2 + $0x1368] ss:$112 sps:$4 sm:$0xff]   ;;  %v19162_v3 = vld [vmem:[#allocation2 + $0x1444] ss:$112 sps:$4 sm:$0xff]  }
 0x29e   :  { %10325 = vmatprep.subr.bf16.mxu0 %v19084_v4  ;;  %10497 = vmatprep.subr.bf16.mxu1 %v19087_v5  ;;  %v19165_v4 = vld [vmem:[#allocation2 + $0x144c] ss:$112 sps:$4 sm:$0xff]   ;;  %v19160_v5 = vld [vmem:[#allocation2 + $0x1440] ss:$112 sps:$4 sm:$0xff]  }
 0x2a1   :  { %10326 = vmatpush1.bf16.msra.mxu0 %v19082_v6  ;;  %10498 = vmatpush1.bf16.msra.mxu1 %v19085_v7  ;;  %v19163_v6 = vld [vmem:[#allocation2 + $0x1448] ss:$112 sps:$4 sm:$0xff]   ;;  %v19168_v7 = vld [vmem:[#allocation2 + $0x1524] ss:$112 sps:$4 sm:$0xff]  }
 0x2a2   :  { %10327 = vmatprep.subr.bf16.mxu0 %v19090_v8  ;;  %10499 = vmatprep.subr.bf16.mxu1 %v19093_v9  ;;  %v19171_v8 = vld [vmem:[#allocation2 + $0x152c] ss:$112 sps:$4 sm:$0xff]   ;;  %v19166_v9 = vld [vmem:[#allocation2 + $0x1520] ss:$112 sps:$4 sm:$0xff]  }
 0x2a5   :  { %10328 = vmatpush1.bf16.msra.mxu0 %v19088_v10  ;;  %10500 = vmatpush1.bf16.msra.mxu1 %v19091_v18  ;;  %v19169_v10 = vld [vmem:[#allocation2 + $0x1528] ss:$112 sps:$4 sm:$0xff]   ;;  %v19174_v18 = vld [vmem:[#allocation2 + $0x1604] ss:$112 sps:$4 sm:$0xff]  }
 0x2a6   :  { %10329 = vmatprep.subr.bf16.mxu0 %v19096_v19  ;;  %10501 = vmatprep.subr.bf16.mxu1 %v19099_v22  ;;  %v19177_v19 = vld [vmem:[#allocation2 + $0x160c] ss:$112 sps:$4 sm:$0xff]   ;;  %v19172_v22 = vld [vmem:[#allocation2 + $0x1600] ss:$112 sps:$4 sm:$0xff]  }
 0x2a9   :  { %10330 = vmatpush1.bf16.msra.mxu0 %v19094_v23  ;;  %10502 = vmatpush1.bf16.msra.mxu1 %v19097_v24  ;;  %v19175_v23 = vld [vmem:[#allocation2 + $0x1608] ss:$112 sps:$4 sm:$0xff]   ;;  %v19180_v24 = vld [vmem:[#allocation2 + $0x16e4] ss:$112 sps:$4 sm:$0xff]  }
 0x2aa   :  { %10331 = vmatprep.subr.bf16.mxu0 %v19102_v25  ;;  %10503 = vmatprep.subr.bf16.mxu1 %v19105_v26  ;;  %v19183_v25 = vld [vmem:[#allocation2 + $0x16ec] ss:$112 sps:$4 sm:$0xff]   ;;  %v19178_v26 = vld [vmem:[#allocation2 + $0x16e0] ss:$112 sps:$4 sm:$0xff]  }
 0x2ad   :  { %10332 = vmatpush1.bf16.msra.mxu0 %v19100_v27  ;;  %10504 = vmatpush1.bf16.msra.mxu1 %v19103_v28  ;;  %v19181_v27 = vld [vmem:[#allocation2 + $0x16e8] ss:$112 sps:$4 sm:$0xff]   ;;  %v19186_v28 = vld [vmem:[#allocation2 + $0x17c4] ss:$112 sps:$4 sm:$0xff]  }
 0x2ae   :  { %10333 = vmatprep.subr.bf16.mxu0 %v19108_v29  ;;  %10505 = vmatprep.subr.bf16.mxu1 %v19111_v30  ;;  %v19189_v29 = vld [vmem:[#allocation2 + $0x17cc] ss:$112 sps:$4 sm:$0xff]   ;;  %v19184_v30 = vld [vmem:[#allocation2 + $0x17c0] ss:$112 sps:$4 sm:$0xff]  }
 0x2b1   :  { %10334 = vmatpush1.bf16.msra.mxu0 %v19106_v31  ;;  %10506 = vmatpush1.bf16.msra.mxu1 %v19109_v32  ;;  %v19187_v31 = vld [vmem:[#allocation2 + $0x17c8] ss:$112 sps:$4 sm:$0xff]   ;;  %v19192_v32 = vld [vmem:[#allocation2 + $0x18a4] ss:$112 sps:$4 sm:$0xff]  }
 0x2b2   :  { %10335 = vmatprep.subr.bf16.mxu0 %v19114_v33  ;;  %10507 = vmatprep.subr.bf16.mxu1 %v19117_v34  ;;  %v19195_v33 = vld [vmem:[#allocation2 + $0x18ac] ss:$112 sps:$4 sm:$0xff]   ;;  %v19190_v34 = vld [vmem:[#allocation2 + $0x18a0] ss:$112 sps:$4 sm:$0xff]  }
 0x2b5   :  { %10336 = vmatpush1.bf16.msra.mxu0 %v19112_v35  ;;  %10508 = vmatpush1.bf16.msra.mxu1 %v19115_v36  ;;  %v19193_v35 = vld [vmem:[#allocation2 + $0x18a8] ss:$112 sps:$4 sm:$0xff]   ;;  %v19198_v36 = vld [vmem:[#allocation2 + $0x1984] ss:$112 sps:$4 sm:$0xff]  }
 0x2b6   :  { %10348 = vmatprep.subr.bf16.mxu0 %v19120_v37  ;;  %10520 = vmatprep.subr.bf16.mxu1 %v19123_v38  ;;  %v19201_v37 = vld [vmem:[#allocation2 + $0x198c] ss:$112 sps:$4 sm:$0xff]   ;;  %v19196_v38 = vld [vmem:[#allocation2 + $0x1980] ss:$112 sps:$4 sm:$0xff]  }
 0x2b8   :  { %10338 = vmatmul.mubr.bf16.vlgmr.msra.gmra.mrb[8].mxu0 %v20742_v43  ;;  %10510 = vmatmul.mubr.bf16.vlgmr.msra.gmra.mrb[8].mxu1 %v20742_v43  ;;  %v19205_v43 = vld [vmem:[#allocation2 + $0x1a68] ss:$112 sps:$4 sm:$0xff]  }
 0x2b9   :  { %10349 = vmatpush1.bf16.msra.mxu0 %v19118_v39  ;;  %10521 = vmatpush1.bf16.msra.mxu1 %v19121_v40  ;;  %v19199_v39 = vld [vmem:[#allocation2 + $0x1988] ss:$112 sps:$4 sm:$0xff]   ;;  %v19204_v40 = vld [vmem:[#allocation2 + $0x1a64] ss:$112 sps:$4 sm:$0xff]  }
 0x2ba   :  { %10350 = vmatprep.subr.bf16.mxu0 %v19126_v41  ;;  %10522 = vmatprep.subr.bf16.mxu1 %v19129_v42  ;;  %v19207_v41 = vld [vmem:[#allocation2 + $0x1a6c] ss:$112 sps:$4 sm:$0xff]   ;;  %v19202_v42 = vld [vmem:[#allocation2 + $0x1a60] ss:$112 sps:$4 sm:$0xff]  }
 0x2bb   :  { %10380 = vmatprep.mubr.bf16.mxu0 %v20743_v48  ;;  %10552 = vmatprep.mubr.bf16.mxu1 %v20743_v48  ;;  %v19216_v48 = vld [vmem:[#allocation2 + $0x1c24] ss:$112 sps:$4 sm:$0xff]  }
 0x2bd   :  { %10351 = vmatpush1.bf16.msra.mxu0 %v19124_v44  ;;  %10523 = vmatpush1.bf16.msra.mxu1 %v19127_v45  ;;  %v19210_v44 = vld [vmem:[#allocation2 + $0x1b44] ss:$112 sps:$4 sm:$0xff]   ;;  %v19213_v45 = vld [vmem:[#allocation2 + $0x1b4c] ss:$112 sps:$4 sm:$0xff]  }
 0x2be   :  { %10352 = vmatprep.subr.bf16.mxu0 %v19132_v46  ;;  %10524 = vmatprep.subr.bf16.mxu1 %v19135_v47  ;;  %v19208_v46 = vld [vmem:[#allocation2 + $0x1b40] ss:$112 sps:$4 sm:$0xff]   ;;  %v19211_v47 = vld [vmem:[#allocation2 + $0x1b48] ss:$112 sps:$4 sm:$0xff]  }
 0x2c1   :  { %10353 = vmatpush1.bf16.msra.mxu0 %v19130_v49  ;;  %10525 = vmatpush1.bf16.msra.mxu1 %v19133_v50  ;;  %v19219_v49 = vld [vmem:[#allocation2 + $0x1c2c] ss:$112 sps:$4 sm:$0xff]   ;;  %v19214_v50 = vld [vmem:[#allocation2 + $0x1c20] ss:$112 sps:$4 sm:$0xff]  }
 0x2c2   :  { %10354 = vmatprep.subr.bf16.mxu0 %v19138_v51  ;;  %10526 = vmatprep.subr.bf16.mxu1 %v19141_v52  ;;  %v19217_v51 = vld [vmem:[#allocation2 + $0x1c28] ss:$112 sps:$4 sm:$0xff]   ;;  %v19222_v52 = vld [vmem:[#allocation2 + $0x1d04] ss:$112 sps:$4 sm:$0xff]  }
 0x2c5   :  { %10355 = vmatpush1.bf16.msra.mxu0 %v19136_v53  ;;  %10527 = vmatpush1.bf16.msra.mxu1 %v19139_v54  ;;  %v19225_v53 = vld [vmem:[#allocation2 + $0x1d0c] ss:$112 sps:$4 sm:$0xff]   ;;  %v20744_v54 = vld [vmem:[%s21713_s0 + $0x8] ss:$28 sps:$4 sm:$0xff]  }
 0x2c6   :  { %10356 = vmatprep.subr.bf16.mxu0 %v19144_v55  ;;  %10528 = vmatprep.subr.bf16.mxu1 %v19147_v56  ;;  %v19220_v55 = vld [vmem:[#allocation2 + $0x1d00] ss:$112 sps:$4 sm:$0xff]   ;;  %v19223_v56 = vld [vmem:[#allocation2 + $0x1d08] ss:$112 sps:$4 sm:$0xff]  }
 0x2c9   :  { %10357 = vmatpush1.bf16.msra.mxu0 %v19142_v57  ;;  %10529 = vmatpush1.bf16.msra.mxu1 %v19145_v58  ;;  %v19228_v57 = vld [vmem:[#allocation2 + $0x1de4] ss:$112 sps:$4 sm:$0xff]   ;;  %v19231_v58 = vld [vmem:[#allocation2 + $0x1dec] ss:$112 sps:$4 sm:$0xff]  }
 0x2ca   :  { %10358 = vmatprep.subr.bf16.mxu0 %v19150_v59  ;;  %10530 = vmatprep.subr.bf16.mxu1 %v19153_v60  ;;  %v20745_v59 = vld [vmem:[%s21713_s0 + $0x14] ss:$28 sps:$4 sm:$0xff]  }
 0x2cb   :  { %v19226_v60 = vld [vmem:[#allocation2 + $0x1de0] ss:$112 sps:$4 sm:$0xff]  }
 0x2cd   :  { %10359 = vmatpush1.bf16.msra.mxu0 %v19148_v61  ;;  %10531 = vmatpush1.bf16.msra.mxu1 %v19151_v62  ;;  %v19229_v61 = vld [vmem:[#allocation2 + $0x1de8] ss:$112 sps:$4 sm:$0xff]   ;;  %v19234_v62 = vld [vmem:[#allocation2 + $0x1ec4] ss:$112 sps:$4 sm:$0xff]  }
 0x2ce   :  { %10360 = vmatprep.subr.bf16.mxu0 %v19156_v63  ;;  %10532 = vmatprep.subr.bf16.mxu1 %v19159_v0  ;;  %v19237_v63 = vld [vmem:[#allocation2 + $0x1ecc] ss:$112 sps:$4 sm:$0xff]   ;;  %v19232_v0 = vld [vmem:[#allocation2 + $0x1ec0] ss:$112 sps:$4 sm:$0xff]  }
 0x2d1   :  { %10361 = vmatpush1.bf16.msra.mxu0 %v19154_v1  ;;  %10533 = vmatpush1.bf16.msra.mxu1 %v19157_v2  ;;  %v19235_v1 = vld [vmem:[#allocation2 + $0x1ec8] ss:$112 sps:$4 sm:$0xff]   ;;  %v19240_v2 = vld [vmem:[#allocation2 + $0x1fa4] ss:$112 sps:$4 sm:$0xff]  }
 0x2d2   :  { %10362 = vmatprep.subr.bf16.mxu0 %v19162_v3  ;;  %10534 = vmatprep.subr.bf16.mxu1 %v19165_v4  ;;  %v19243_v3 = vld [vmem:[#allocation2 + $0x1fac] ss:$112 sps:$4 sm:$0xff]   ;;  %v19238_v4 = vld [vmem:[#allocation2 + $0x1fa0] ss:$112 sps:$4 sm:$0xff]  }
 0x2d5   :  { %10363 = vmatpush1.bf16.msra.mxu0 %v19160_v5  ;;  %10535 = vmatpush1.bf16.msra.mxu1 %v19163_v6  ;;  %v19241_v5 = vld [vmem:[#allocation2 + $0x1fa8] ss:$112 sps:$4 sm:$0xff]   ;;  %v19246_v6 = vld [vmem:[#allocation2 + $0x2084] ss:$112 sps:$4 sm:$0xff]  }
 0x2d6   :  { %10364 = vmatprep.subr.bf16.mxu0 %v19168_v7  ;;  %10536 = vmatprep.subr.bf16.mxu1 %v19171_v8  ;;  %v19249_v7 = vld [vmem:[#allocation2 + $0x208c] ss:$112 sps:$4 sm:$0xff]   ;;  %v19244_v8 = vld [vmem:[#allocation2 + $0x2080] ss:$112 sps:$4 sm:$0xff]  }
 0x2d9   :  { %10365 = vmatpush1.bf16.msra.mxu0 %v19166_v9  ;;  %10537 = vmatpush1.bf16.msra.mxu1 %v19169_v10  ;;  %v19247_v9 = vld [vmem:[#allocation2 + $0x2088] ss:$112 sps:$4 sm:$0xff]   ;;  %v19252_v10 = vld [vmem:[#allocation2 + $0x2164] ss:$112 sps:$4 sm:$0xff]  }
 0x2da   :  { %10366 = vmatprep.subr.bf16.mxu0 %v19174_v18  ;;  %10538 = vmatprep.subr.bf16.mxu1 %v19177_v19  ;;  %v19255_v18 = vld [vmem:[#allocation2 + $0x216c] ss:$112 sps:$4 sm:$0xff]   ;;  %v19250_v19 = vld [vmem:[#allocation2 + $0x2160] ss:$112 sps:$4 sm:$0xff]  }
 0x2dd   :  { %10367 = vmatpush1.bf16.msra.mxu0 %v19172_v22  ;;  %10539 = vmatpush1.bf16.msra.mxu1 %v19175_v23  ;;  %v19253_v22 = vld [vmem:[#allocation2 + $0x2168] ss:$112 sps:$4 sm:$0xff]   ;;  %v19258_v23 = vld [vmem:[#allocation2 + $0x2244] ss:$112 sps:$4 sm:$0xff]  }
 0x2de   :  { %10368 = vmatprep.subr.bf16.mxu0 %v19180_v24  ;;  %10540 = vmatprep.subr.bf16.mxu1 %v19183_v25  ;;  %v19261_v24 = vld [vmem:[#allocation2 + $0x224c] ss:$112 sps:$4 sm:$0xff]   ;;  %v19256_v25 = vld [vmem:[#allocation2 + $0x2240] ss:$112 sps:$4 sm:$0xff]  }
 0x2e1   :  { %10369 = vmatpush1.bf16.msra.mxu0 %v19178_v26  ;;  %10541 = vmatpush1.bf16.msra.mxu1 %v19181_v27  ;;  %v19259_v26 = vld [vmem:[#allocation2 + $0x2248] ss:$112 sps:$4 sm:$0xff]   ;;  %v19264_v27 = vld [vmem:[#allocation2 + $0x2324] ss:$112 sps:$4 sm:$0xff]  }
 0x2e2   :  { %10370 = vmatprep.subr.bf16.mxu0 %v19186_v28  ;;  %10542 = vmatprep.subr.bf16.mxu1 %v19189_v29  ;;  %v19267_v28 = vld [vmem:[#allocation2 + $0x232c] ss:$112 sps:$4 sm:$0xff]   ;;  %v19262_v29 = vld [vmem:[#allocation2 + $0x2320] ss:$112 sps:$4 sm:$0xff]  }
 0x2e5   :  { %10371 = vmatpush1.bf16.msra.mxu0 %v19184_v30  ;;  %10543 = vmatpush1.bf16.msra.mxu1 %v19187_v31  ;;  %v19265_v30 = vld [vmem:[#allocation2 + $0x2328] ss:$112 sps:$4 sm:$0xff]   ;;  %v19270_v31 = vld [vmem:[#allocation2 + $0x2404] ss:$112 sps:$4 sm:$0xff]  }
 0x2e6   :  { %10372 = vmatprep.subr.bf16.mxu0 %v19192_v32  ;;  %10544 = vmatprep.subr.bf16.mxu1 %v19195_v33  ;;  %v19273_v32 = vld [vmem:[#allocation2 + $0x240c] ss:$112 sps:$4 sm:$0xff]   ;;  %v19268_v33 = vld [vmem:[#allocation2 + $0x2400] ss:$112 sps:$4 sm:$0xff]  }
 0x2e9   :  { %10373 = vmatpush1.bf16.msra.mxu0 %v19190_v34  ;;  %10545 = vmatpush1.bf16.msra.mxu1 %v19193_v35  ;;  %v19271_v34 = vld [vmem:[#allocation2 + $0x2408] ss:$112 sps:$4 sm:$0xff]   ;;  %v19276_v35 = vld [vmem:[#allocation2 + $0x24e4] ss:$112 sps:$4 sm:$0xff]  }
 0x2ea   :  { %10374 = vmatprep.subr.bf16.mxu0 %v19198_v36  ;;  %10546 = vmatprep.subr.bf16.mxu1 %v19201_v37  ;;  %v19279_v36 = vld [vmem:[#allocation2 + $0x24ec] ss:$112 sps:$4 sm:$0xff]   ;;  %v19274_v37 = vld [vmem:[#allocation2 + $0x24e0] ss:$112 sps:$4 sm:$0xff]  }
 0x2ed   :  { %10375 = vmatpush1.bf16.msra.mxu0 %v19196_v38  ;;  %10547 = vmatpush1.bf16.msra.mxu1 %v19199_v39  ;;  %v19277_v38 = vld [vmem:[#allocation2 + $0x24e8] ss:$112 sps:$4 sm:$0xff]   ;;  %v19282_v39 = vld [vmem:[#allocation2 + $0x25c4] ss:$112 sps:$4 sm:$0xff]  }
 0x2ee   :  { %10376 = vmatprep.subr.bf16.mxu0 %v19204_v40  ;;  %10548 = vmatprep.subr.bf16.mxu1 %v19207_v41  ;;  %v19285_v40 = vld [vmem:[#allocation2 + $0x25cc] ss:$112 sps:$4 sm:$0xff]   ;;  %v19280_v41 = vld [vmem:[#allocation2 + $0x25c0] ss:$112 sps:$4 sm:$0xff]  }
 0x2f1   :  { %10377 = vmatpush1.bf16.msra.mxu0 %v19202_v42  ;;  %10549 = vmatpush1.bf16.msra.mxu1 %v19205_v43  ;;  %v19283_v42 = vld [vmem:[#allocation2 + $0x25c8] ss:$112 sps:$4 sm:$0xff]   ;;  %v19288_v43 = vld [vmem:[#allocation2 + $0x26a4] ss:$112 sps:$4 sm:$0xff]  }
 0x2f2   :  { %10378 = vmatprep.subr.bf16.mxu0 %v19210_v44  ;;  %10550 = vmatprep.subr.bf16.mxu1 %v19213_v45  ;;  %v19291_v44 = vld [vmem:[#allocation2 + $0x26ac] ss:$112 sps:$4 sm:$0xff]   ;;  %v19286_v45 = vld [vmem:[#allocation2 + $0x26a0] ss:$112 sps:$4 sm:$0xff]  }
 0x2f5   :  { %10379 = vmatpush1.bf16.msra.mxu0 %v19208_v46  ;;  %10551 = vmatpush1.bf16.msra.mxu1 %v19211_v47  ;;  %v19289_v46 = vld [vmem:[#allocation2 + $0x26a8] ss:$112 sps:$4 sm:$0xff]   ;;  %v19294_v47 = vld [vmem:[#allocation2 + $0x2784] ss:$112 sps:$4 sm:$0xff]  }
 0x2f6   :  { %10391 = vmatprep.subr.bf16.mxu0 %v19216_v48  ;;  %10563 = vmatprep.subr.bf16.mxu1 %v19219_v49  ;;  %v19297_v48 = vld [vmem:[#allocation2 + $0x278c] ss:$112 sps:$4 sm:$0xff]   ;;  %v19292_v49 = vld [vmem:[#allocation2 + $0x2780] ss:$112 sps:$4 sm:$0xff]  }
 0x2f8   :  { %10381 = vmatmul.mubr.bf16.vlgmr.msra.gmra.mrb[8].mxu0 %v20744_v54  ;;  %10553 = vmatmul.mubr.bf16.vlgmr.msra.gmra.mrb[8].mxu1 %v20744_v54  ;;  %v19301_v54 = vld [vmem:[#allocation2 + $0x2868] ss:$112 sps:$4 sm:$0xff]  }
 0x2f9   :  { %10392 = vmatpush1.bf16.msra.mxu0 %v19214_v50  ;;  %10564 = vmatpush1.bf16.msra.mxu1 %v19217_v51  ;;  %v19295_v50 = vld [vmem:[#allocation2 + $0x2788] ss:$112 sps:$4 sm:$0xff]   ;;  %v19300_v51 = vld [vmem:[#allocation2 + $0x2864] ss:$112 sps:$4 sm:$0xff]  }
 0x2fa   :  { %10393 = vmatprep.subr.bf16.mxu0 %v19222_v52  ;;  %10565 = vmatprep.subr.bf16.mxu1 %v19225_v53  ;;  %v19303_v52 = vld [vmem:[#allocation2 + $0x286c] ss:$112 sps:$4 sm:$0xff]   ;;  %v19298_v53 = vld [vmem:[#allocation2 + $0x2860] ss:$112 sps:$4 sm:$0xff]  }
 0x2fb   :  { %10423 = vmatprep.mubr.bf16.mxu0 %v20745_v59  ;;  %10595 = vmatprep.mubr.bf16.mxu1 %v20745_v59  ;;  %v19312_v59 = vld [vmem:[#allocation2 + $0x2a24] ss:$112 sps:$4 sm:$0xff]  }
 0x2fd   :  { %10394 = vmatpush1.bf16.msra.mxu0 %v19220_v55  ;;  %10566 = vmatpush1.bf16.msra.mxu1 %v19223_v56  ;;  %v19306_v55 = vld [vmem:[#allocation2 + $0x2944] ss:$112 sps:$4 sm:$0xff]   ;;  %v19309_v56 = vld [vmem:[#allocation2 + $0x294c] ss:$112 sps:$4 sm:$0xff]  }
 0x2fe   :  { %10395 = vmatprep.subr.bf16.mxu0 %v19228_v57  ;;  %10567 = vmatprep.subr.bf16.mxu1 %v19231_v58  ;;  %v19304_v57 = vld [vmem:[#allocation2 + $0x2940] ss:$112 sps:$4 sm:$0xff]   ;;  %v19307_v58 = vld [vmem:[#allocation2 + $0x2948] ss:$112 sps:$4 sm:$0xff]  }
 0x301   :  { %10396 = vmatpush1.bf16.msra.mxu0 %v19226_v60  ;;  %10568 = vmatpush1.bf16.msra.mxu1 %v19229_v61  ;;  %v19315_v60 = vld [vmem:[#allocation2 + $0x2a2c] ss:$112 sps:$4 sm:$0xff]   ;;  %v19310_v61 = vld [vmem:[#allocation2 + $0x2a20] ss:$112 sps:$4 sm:$0xff]  }
 0x302   :  { %10397 = vmatprep.subr.bf16.mxu0 %v19234_v62  ;;  %10569 = vmatprep.subr.bf16.mxu1 %v19237_v63  ;;  %v19313_v62 = vld [vmem:[#allocation2 + $0x2a28] ss:$112 sps:$4 sm:$0xff]   ;;  %v19318_v63 = vld [vmem:[#allocation2 + $0x2b04] ss:$112 sps:$4 sm:$0xff]  }
 0x305   :  { %10398 = vmatpush1.bf16.msra.mxu0 %v19232_v0  ;;  %10570 = vmatpush1.bf16.msra.mxu1 %v19235_v1  ;;  %v19321_v0 = vld [vmem:[#allocation2 + $0x2b0c] ss:$112 sps:$4 sm:$0xff]  }
 0x306   :  { %10399 = vmatprep.subr.bf16.mxu0 %v19240_v2  ;;  %10571 = vmatprep.subr.bf16.mxu1 %v19243_v3  ;;  %v20746_v1 = vld [vmem:[%s21713_s0 + $0x10] ss:$28 sps:$4 sm:$0xff]   ;;  %v19319_v3 = vld [vmem:[#allocation2 + $0x2b08] ss:$112 sps:$4 sm:$0xff]  }
 0x307   :  { %v19316_v2 = vld [vmem:[#allocation2 + $0x2b00] ss:$112 sps:$4 sm:$0xff]  }
 0x309   :  { %10400 = vmatpush1.bf16.msra.mxu0 %v19238_v4  ;;  %10572 = vmatpush1.bf16.msra.mxu1 %v19241_v5  ;;  %v19324_v4 = vld [vmem:[#allocation2 + $0x2be4] ss:$112 sps:$4 sm:$0xff]   ;;  %v19327_v5 = vld [vmem:[#allocation2 + $0x2bec] ss:$112 sps:$4 sm:$0xff]  }
 0x30a   :  { %10401 = vmatprep.subr.bf16.mxu0 %v19246_v6  ;;  %10573 = vmatprep.subr.bf16.mxu1 %v19249_v7  ;;  %v19322_v6 = vld [vmem:[#allocation2 + $0x2be0] ss:$112 sps:$4 sm:$0xff]   ;;  %v19325_v7 = vld [vmem:[#allocation2 + $0x2be8] ss:$112 sps:$4 sm:$0xff]  }
 0x30d   :  { %10402 = vmatpush1.bf16.msra.mxu0 %v19244_v8  ;;  %10574 = vmatpush1.bf16.msra.mxu1 %v19247_v9  ;;  %v19330_v8 = vld [vmem:[#allocation2 + $0x2cc4] ss:$112 sps:$4 sm:$0xff]   ;;  %v19333_v9 = vld [vmem:[#allocation2 + $0x2ccc] ss:$112 sps:$4 sm:$0xff]  }
 0x30e   :  { %10403 = vmatprep.subr.bf16.mxu0 %v19252_v10  ;;  %10575 = vmatprep.subr.bf16.mxu1 %v19255_v18  ;;  %v19328_v10 = vld [vmem:[#allocation2 + $0x2cc0] ss:$112 sps:$4 sm:$0xff]   ;;  %v19331_v18 = vld [vmem:[#allocation2 + $0x2cc8] ss:$112 sps:$4 sm:$0xff]  }
 0x311   :  { %10404 = vmatpush1.bf16.msra.mxu0 %v19250_v19  ;;  %10576 = vmatpush1.bf16.msra.mxu1 %v19253_v22  ;;  %v19336_v19 = vld [vmem:[#allocation2 + $0x2da4] ss:$112 sps:$4 sm:$0xff]   ;;  %v19339_v22 = vld [vmem:[#allocation2 + $0x2dac] ss:$112 sps:$4 sm:$0xff]  }
 0x312   :  { %10405 = vmatprep.subr.bf16.mxu0 %v19258_v23  ;;  %10577 = vmatprep.subr.bf16.mxu1 %v19261_v24  ;;  %v19334_v23 = vld [vmem:[#allocation2 + $0x2da0] ss:$112 sps:$4 sm:$0xff]   ;;  %v19337_v24 = vld [vmem:[#allocation2 + $0x2da8] ss:$112 sps:$4 sm:$0xff]  }
 0x315   :  { %10406 = vmatpush1.bf16.msra.mxu0 %v19256_v25  ;;  %10578 = vmatpush1.bf16.msra.mxu1 %v19259_v26  ;;  %v19342_v25 = vld [vmem:[#allocation2 + $0x2e84] ss:$112 sps:$4 sm:$0xff]   ;;  %v19345_v26 = vld [vmem:[#allocation2 + $0x2e8c] ss:$112 sps:$4 sm:$0xff]  }
 0x316   :  { %10407 = vmatprep.subr.bf16.mxu0 %v19264_v27  ;;  %10579 = vmatprep.subr.bf16.mxu1 %v19267_v28  ;;  %v19340_v27 = vld [vmem:[#allocation2 + $0x2e80] ss:$112 sps:$4 sm:$0xff]   ;;  %v19343_v28 = vld [vmem:[#allocation2 + $0x2e88] ss:$112 sps:$4 sm:$0xff]  }
 0x319   :  { %10408 = vmatpush1.bf16.msra.mxu0 %v19262_v29  ;;  %10580 = vmatpush1.bf16.msra.mxu1 %v19265_v30  ;;  %v19348_v29 = vld [vmem:[#allocation2 + $0x2f64] ss:$112 sps:$4 sm:$0xff]   ;;  %v19351_v30 = vld [vmem:[#allocation2 + $0x2f6c] ss:$112 sps:$4 sm:$0xff]  }
 0x31a   :  { %10409 = vmatprep.subr.bf16.mxu0 %v19270_v31  ;;  %10581 = vmatprep.subr.bf16.mxu1 %v19273_v32 }
 0x31d   :  { %10410 = vmatpush1.bf16.msra.mxu0 %v19268_v33  ;;  %10582 = vmatpush1.bf16.msra.mxu1 %v19271_v34 }
 0x31e   :  { %10411 = vmatprep.subr.bf16.mxu0 %v19276_v35  ;;  %10583 = vmatprep.subr.bf16.mxu1 %v19279_v36 }
 0x321   :  { %10412 = vmatpush1.bf16.msra.mxu0 %v19274_v37  ;;  %10584 = vmatpush1.bf16.msra.mxu1 %v19277_v38  ;;  %v19346_v38 = vld [vmem:[#allocation2 + $0x2f60] ss:$112 sps:$4 sm:$0xff]  }
 0x322   :  { %10413 = vmatprep.subr.bf16.mxu0 %v19282_v39  ;;  %10585 = vmatprep.subr.bf16.mxu1 %v19285_v40  ;;  %v19349_v39 = vld [vmem:[#allocation2 + $0x2f68] ss:$112 sps:$4 sm:$0xff]  }
 0x325   :  { %10414 = vmatpush1.bf16.msra.mxu0 %v19280_v41  ;;  %10586 = vmatpush1.bf16.msra.mxu1 %v19283_v42  ;;  %v19354_v42 = vld [vmem:[#allocation2 + $0x3044] ss:$112 sps:$4 sm:$0xff]  }
 0x326   :  { %10415 = vmatprep.subr.bf16.mxu0 %v19288_v43  ;;  %10587 = vmatprep.subr.bf16.mxu1 %v19291_v44  ;;  %v19357_v43 = vld [vmem:[#allocation2 + $0x304c] ss:$112 sps:$4 sm:$0xff]  }
 0x329   :  { %10416 = vmatpush1.bf16.msra.mxu0 %v19286_v45  ;;  %10588 = vmatpush1.bf16.msra.mxu1 %v19289_v46  ;;  %v19352_v45 = vld [vmem:[#allocation2 + $0x3040] ss:$112 sps:$4 sm:$0xff]   ;;  %v19355_v46 = vld [vmem:[#allocation2 + $0x3048] ss:$112 sps:$4 sm:$0xff]  }
 0x32a   :  { %10417 = vmatprep.subr.bf16.mxu0 %v19294_v47  ;;  %10589 = vmatprep.subr.bf16.mxu1 %v19297_v48  ;;  %v19360_v47 = vld [vmem:[#allocation2 + $0x34] ss:$112 sps:$4 sm:$0xff]   ;;  %v19363_v48 = vld [vmem:[#allocation2 + $0x3c] ss:$112 sps:$4 sm:$0xff]  }
 0x32d   :  { %10418 = vmatpush1.bf16.msra.mxu0 %v19292_v49  ;;  %10590 = vmatpush1.bf16.msra.mxu1 %v19295_v50  ;;  %v19358_v49 = vld [vmem:[#allocation2 + $0x30] ss:$112 sps:$4 sm:$0xff]   ;;  %v19361_v50 = vld [vmem:[#allocation2 + $0x38] ss:$112 sps:$4 sm:$0xff]  }
 0x32e   :  { %10419 = vmatprep.subr.bf16.mxu0 %v19300_v51  ;;  %10591 = vmatprep.subr.bf16.mxu1 %v19303_v52  ;;  %v19366_v51 = vld [vmem:[#allocation2 + $0x114] ss:$112 sps:$4 sm:$0xff]   ;;  %v19369_v52 = vld [vmem:[#allocation2 + $0x11c] ss:$112 sps:$4 sm:$0xff]  }
 0x331   :  { %10420 = vmatpush1.bf16.msra.mxu0 %v19298_v53  ;;  %10592 = vmatpush1.bf16.msra.mxu1 %v19301_v54  ;;  %v20747_v53 = vld [vmem:[%s21713_s0 + $0x18] ss:$28 sps:$4 sm:$0xff]   ;;  %v19364_v54 = vld [vmem:[#allocation2 + $0x110] ss:$112 sps:$4 sm:$0xff]  }
 0x332   :  { %10421 = vmatprep.subr.bf16.mxu0 %v19306_v55  ;;  %10593 = vmatprep.subr.bf16.mxu1 %v19309_v56  ;;  %v19367_v55 = vld [vmem:[#allocation2 + $0x118] ss:$112 sps:$4 sm:$0xff]   ;;  %v19372_v56 = vld [vmem:[#allocation2 + $0x1f4] ss:$112 sps:$4 sm:$0xff]  }
 0x335   :  { %10422 = vmatpush1.bf16.msra.mxu0 %v19304_v57  ;;  %10594 = vmatpush1.bf16.msra.mxu1 %v19307_v58  ;;  %v19375_v57 = vld [vmem:[#allocation2 + $0x1fc] ss:$112 sps:$4 sm:$0xff]   ;;  %v20748_v58 = vld [vmem:[%s21713_s0 + $0x4] ss:$28 sps:$4 sm:$0xff]  }
 0x336   :  { %10434 = vmatprep.subr.bf16.mxu0 %v19312_v59  ;;  %10606 = vmatprep.subr.bf16.mxu1 %v19315_v60  ;;  %v19370_v59 = vld [vmem:[#allocation2 + $0x1f0] ss:$112 sps:$4 sm:$0xff]   ;;  %v19373_v60 = vld [vmem:[#allocation2 + $0x1f8] ss:$112 sps:$4 sm:$0xff]  }
 0x338   :  { %10424 = vmatmul.mubr.bf16.vlgmr.msra.gmra.mrb[8].mxu0 %v20746_v1  ;;  %10596 = vmatmul.mubr.bf16.vlgmr.msra.gmra.mrb[8].mxu1 %v20746_v1  ;;  %v19384_v1 = vld [vmem:[#allocation2 + $0x3b4] ss:$112 sps:$4 sm:$0xff]  }
 0x339   :  { %10435 = vmatpush1.bf16.msra.mxu0 %v19310_v61  ;;  %10607 = vmatpush1.bf16.msra.mxu1 %v19313_v62  ;;  %v19378_v61 = vld [vmem:[#allocation2 + $0x2d4] ss:$112 sps:$4 sm:$0xff]   ;;  %v19381_v62 = vld [vmem:[#allocation2 + $0x2dc] ss:$112 sps:$4 sm:$0xff]  }
 0x33a   :  { %10436 = vmatprep.subr.bf16.mxu0 %v19318_v63  ;;  %10608 = vmatprep.subr.bf16.mxu1 %v19321_v0  ;;  %v19376_v63 = vld [vmem:[#allocation2 + $0x2d0] ss:$112 sps:$4 sm:$0xff]   ;;  %v19379_v0 = vld [vmem:[#allocation2 + $0x2d8] ss:$112 sps:$4 sm:$0xff]  }
 0x33b   :  { %10466 = vmatprep.mubr.bf16.mxu0 %v21725_v16  ;;  %10638 = vmatprep.mubr.bf16.mxu1 %v21725_v16 }
 0x33d   :  { %10437 = vmatpush1.bf16.msra.mxu0 %v19316_v2  ;;  %10609 = vmatpush1.bf16.msra.mxu1 %v19319_v3  ;;  %v19387_v2 = vld [vmem:[#allocation2 + $0x3bc] ss:$112 sps:$4 sm:$0xff]   ;;  %v19382_v3 = vld [vmem:[#allocation2 + $0x3b0] ss:$112 sps:$4 sm:$0xff]  }
 0x33e   :  { %10438 = vmatprep.subr.bf16.mxu0 %v19324_v4  ;;  %10610 = vmatprep.subr.bf16.mxu1 %v19327_v5  ;;  %v19385_v4 = vld [vmem:[#allocation2 + $0x3b8] ss:$112 sps:$4 sm:$0xff]   ;;  %v19390_v5 = vld [vmem:[#allocation2 + $0x494] ss:$112 sps:$4 sm:$0xff]  }
 0x341   :  { %10439 = vmatpush1.bf16.msra.mxu0 %v19322_v6  ;;  %10611 = vmatpush1.bf16.msra.mxu1 %v19325_v7  ;;  %v19393_v6 = vld [vmem:[#allocation2 + $0x49c] ss:$112 sps:$4 sm:$0xff]   ;;  %v19388_v7 = vld [vmem:[#allocation2 + $0x490] ss:$112 sps:$4 sm:$0xff]  }
 0x342   :  { %10440 = vmatprep.subr.bf16.mxu0 %v19330_v8  ;;  %10612 = vmatprep.subr.bf16.mxu1 %v19333_v9  ;;  %v19391_v8 = vld [vmem:[#allocation2 + $0x498] ss:$112 sps:$4 sm:$0xff]   ;;  %v19396_v9 = vld [vmem:[#allocation2 + $0x574] ss:$112 sps:$4 sm:$0xff]  }
 0x345   :  { %10441 = vmatpush1.bf16.msra.mxu0 %v19328_v10  ;;  %10613 = vmatpush1.bf16.msra.mxu1 %v19331_v18  ;;  %v19399_v10 = vld [vmem:[#allocation2 + $0x57c] ss:$112 sps:$4 sm:$0xff]   ;;  %v19394_v18 = vld [vmem:[#allocation2 + $0x570] ss:$112 sps:$4 sm:$0xff]  }
 0x346   :  { %10442 = vmatprep.subr.bf16.mxu0 %v19336_v19  ;;  %10614 = vmatprep.subr.bf16.mxu1 %v19339_v22  ;;  %v19397_v19 = vld [vmem:[#allocation2 + $0x578] ss:$112 sps:$4 sm:$0xff]   ;;  %v19402_v22 = vld [vmem:[#allocation2 + $0x654] ss:$112 sps:$4 sm:$0xff]  }
 0x349   :  { %10443 = vmatpush1.bf16.msra.mxu0 %v19334_v23  ;;  %10615 = vmatpush1.bf16.msra.mxu1 %v19337_v24  ;;  %v19405_v23 = vld [vmem:[#allocation2 + $0x65c] ss:$112 sps:$4 sm:$0xff]   ;;  %v19400_v24 = vld [vmem:[#allocation2 + $0x650] ss:$112 sps:$4 sm:$0xff]  }
 0x34a   :  { %10444 = vmatprep.subr.bf16.mxu0 %v19342_v25  ;;  %10616 = vmatprep.subr.bf16.mxu1 %v19345_v26  ;;  %v19403_v25 = vld [vmem:[#allocation2 + $0x658] ss:$112 sps:$4 sm:$0xff]   ;;  %v19408_v26 = vld [vmem:[#allocation2 + $0x734] ss:$112 sps:$4 sm:$0xff]  }
 0x34b   :  { %v21291_v31 = vpop.f32.mrb[4].mxu0  ;;  %v21293_v32 = vpop.f32.mrb[4].mxu1 }
 0x34c   :  { %v21295_v33 = vpop.f32.mrb[5].mxu0  ;;  %v21297_v34 = vpop.f32.mrb[5].mxu1 }
 0x34d   :  { %v12025_v35 = vmax.f32 %v21252_v11, %v21297_v34  ;;  %v21301_v36 = vpop.f32.mrb[6].mxu0  ;;  %v21303_v37 = vpop.f32.mrb[6].mxu1  ;;  %10445 = vmatpush1.bf16.msra.mxu0 %v19340_v27  ;;  %10617 = vmatpush1.bf16.msra.mxu1 %v19343_v28  ;;  %v19411_v27 = vld [vmem:[#allocation2 + $0x73c] ss:$112 sps:$4 sm:$0xff]   ;;  %v19406_v28 = vld [vmem:[#allocation2 + $0x730] ss:$112 sps:$4 sm:$0xff]  }
 0x34e   :  { %v21305_v40 = vpop.f32.mrb[7].mxu0  ;;  %v21307_v41 = vpop.f32.mrb[7].mxu1  ;;  %10446 = vmatprep.subr.bf16.mxu0 %v19348_v29  ;;  %10618 = vmatprep.subr.bf16.mxu1 %v19351_v30  ;;  %v19409_v29 = vld [vmem:[#allocation2 + $0x738] ss:$112 sps:$4 sm:$0xff]   ;;  %v19414_v30 = vld [vmem:[#allocation2 + $0x814] ss:$112 sps:$4 sm:$0xff]  }
 0x351   :  { %10447 = vmatpush1.bf16.msra.mxu0 %v19346_v38  ;;  %10619 = vmatpush1.bf16.msra.mxu1 %v19349_v39  ;;  %v19417_v38 = vld [vmem:[#allocation2 + $0x81c] ss:$112 sps:$4 sm:$0xff]   ;;  %v19412_v39 = vld [vmem:[#allocation2 + $0x810] ss:$112 sps:$4 sm:$0xff]  }
 0x352   :  { %10448 = vmatprep.subr.bf16.mxu0 %v19354_v42  ;;  %10620 = vmatprep.subr.bf16.mxu1 %v19357_v43  ;;  %v19415_v42 = vld [vmem:[#allocation2 + $0x818] ss:$112 sps:$4 sm:$0xff]   ;;  %v19420_v43 = vld [vmem:[#allocation2 + $0x8f4] ss:$112 sps:$4 sm:$0xff]  }
 0x355   :  { %10449 = vmatpush1.bf16.msra.mxu0 %v19352_v45  ;;  %10621 = vmatpush1.bf16.msra.mxu1 %v19355_v46  ;;  %v19423_v45 = vld [vmem:[#allocation2 + $0x8fc] ss:$112 sps:$4 sm:$0xff]   ;;  %v19418_v46 = vld [vmem:[#allocation2 + $0x8f0] ss:$112 sps:$4 sm:$0xff]  }
 0x356   :  { %10649 = vmatprep.subr.bf16.mxu0 %v19360_v47  ;;  %10821 = vmatprep.subr.bf16.mxu1 %v19363_v48  ;;  %v19421_v47 = vld [vmem:[#allocation2 + $0x8f8] ss:$112 sps:$4 sm:$0xff]   ;;  %v19426_v48 = vld [vmem:[#allocation2 + $0x9d4] ss:$112 sps:$4 sm:$0xff]  }
 0x358   :  { %10467 = vmatmul.mubr.bf16.vlgmr.msra.gmra.mrb[8].mxu0 %v20747_v53  ;;  %10639 = vmatmul.mubr.bf16.vlgmr.msra.gmra.mrb[8].mxu1 %v20747_v53  ;;  %v19435_v53 = vld [vmem:[#allocation2 + $0xabc] ss:$112 sps:$4 sm:$0xff]  }
 0x359   :  { %10650 = vmatpush1.bf16.msra.mxu0 %v19358_v49  ;;  %10822 = vmatpush1.bf16.msra.mxu1 %v19361_v50  ;;  %v19429_v49 = vld [vmem:[#allocation2 + $0x9dc] ss:$112 sps:$4 sm:$0xff]   ;;  %v19424_v50 = vld [vmem:[#allocation2 + $0x9d0] ss:$112 sps:$4 sm:$0xff]  }
 0x35a   :  { %10651 = vmatprep.subr.bf16.mxu0 %v19366_v51  ;;  %10823 = vmatprep.subr.bf16.mxu1 %v19369_v52  ;;  %v19427_v51 = vld [vmem:[#allocation2 + $0x9d8] ss:$112 sps:$4 sm:$0xff]   ;;  %v19432_v52 = vld [vmem:[#allocation2 + $0xab4] ss:$112 sps:$4 sm:$0xff]  }
 0x35b   :  { %10681 = vmatprep.mubr.bf16.mxu0 %v20748_v58  ;;  %10853 = vmatprep.mubr.bf16.mxu1 %v20748_v58  ;;  %v19436_v58 = vld [vmem:[#allocation2 + $0xb90] ss:$112 sps:$4 sm:$0xff]  }
 0x35d   :  { %10652 = vmatpush1.bf16.msra.mxu0 %v19364_v54  ;;  %10824 = vmatpush1.bf16.msra.mxu1 %v19367_v55  ;;  %v19430_v54 = vld [vmem:[#allocation2 + $0xab0] ss:$112 sps:$4 sm:$0xff]   ;;  %v19433_v55 = vld [vmem:[#allocation2 + $0xab8] ss:$112 sps:$4 sm:$0xff]  }
 0x35e   :  { %10653 = vmatprep.subr.bf16.mxu0 %v19372_v56  ;;  %10825 = vmatprep.subr.bf16.mxu1 %v19375_v57  ;;  %v19438_v56 = vld [vmem:[#allocation2 + $0xb94] ss:$112 sps:$4 sm:$0xff]   ;;  %v19441_v57 = vld [vmem:[#allocation2 + $0xb9c] ss:$112 sps:$4 sm:$0xff]  }
 0x361   :  { %10654 = vmatpush1.bf16.msra.mxu0 %v19370_v59  ;;  %10826 = vmatpush1.bf16.msra.mxu1 %v19373_v60  ;;  %v19439_v59 = vld [vmem:[#allocation2 + $0xb98] ss:$112 sps:$4 sm:$0xff]   ;;  %v19444_v60 = vld [vmem:[#allocation2 + $0xc74] ss:$112 sps:$4 sm:$0xff]  }
 0x362   :  { %10655 = vmatprep.subr.bf16.mxu0 %v19378_v61  ;;  %10827 = vmatprep.subr.bf16.mxu1 %v19381_v62  ;;  %v19447_v61 = vld [vmem:[#allocation2 + $0xc7c] ss:$112 sps:$4 sm:$0xff]   ;;  %v19442_v62 = vld [vmem:[#allocation2 + $0xc70] ss:$112 sps:$4 sm:$0xff]  }
 0x365   :  { %10656 = vmatpush1.bf16.msra.mxu0 %v19376_v63  ;;  %10828 = vmatpush1.bf16.msra.mxu1 %v19379_v0  ;;  %v19445_v63 = vld [vmem:[#allocation2 + $0xc78] ss:$112 sps:$4 sm:$0xff]   ;;  %v19450_v0 = vld [vmem:[#allocation2 + $0xd54] ss:$112 sps:$4 sm:$0xff]  }
 0x366   :  { %10657 = vmatprep.subr.bf16.mxu0 %v19384_v1  ;;  %10829 = vmatprep.subr.bf16.mxu1 %v19387_v2  ;;  %v19453_v1 = vld [vmem:[#allocation2 + $0xd5c] ss:$112 sps:$4 sm:$0xff]   ;;  %v19448_v2 = vld [vmem:[#allocation2 + $0xd50] ss:$112 sps:$4 sm:$0xff]  }
 0x369   :  { %10658 = vmatpush1.bf16.msra.mxu0 %v19382_v3  ;;  %10830 = vmatpush1.bf16.msra.mxu1 %v19385_v4  ;;  %v19451_v3 = vld [vmem:[#allocation2 + $0xd58] ss:$112 sps:$4 sm:$0xff]   ;;  %v19456_v4 = vld [vmem:[#allocation2 + $0xe34] ss:$112 sps:$4 sm:$0xff]  }
 0x36a   :  { %10659 = vmatprep.subr.bf16.mxu0 %v19390_v5  ;;  %10831 = vmatprep.subr.bf16.mxu1 %v19393_v6  ;;  %v19459_v5 = vld [vmem:[#allocation2 + $0xe3c] ss:$112 sps:$4 sm:$0xff]   ;;  %v19454_v6 = vld [vmem:[#allocation2 + $0xe30] ss:$112 sps:$4 sm:$0xff]  }
 0x36d   :  { %10660 = vmatpush1.bf16.msra.mxu0 %v19388_v7  ;;  %10832 = vmatpush1.bf16.msra.mxu1 %v19391_v8  ;;  %v19457_v7 = vld [vmem:[#allocation2 + $0xe38] ss:$112 sps:$4 sm:$0xff]   ;;  %v19462_v8 = vld [vmem:[#allocation2 + $0xf14] ss:$112 sps:$4 sm:$0xff]  }
 0x36e   :  { %10661 = vmatprep.subr.bf16.mxu0 %v19396_v9  ;;  %10833 = vmatprep.subr.bf16.mxu1 %v19399_v10  ;;  %v19465_v9 = vld [vmem:[#allocation2 + $0xf1c] ss:$112 sps:$4 sm:$0xff]  }
 0x36f   :  { %v20749_v10 = vld [vmem:[%s21713_s0] ss:$28 sps:$4 sm:$0xff]  }
 0x371   :  { %10662 = vmatpush1.bf16.msra.mxu0 %v19394_v18  ;;  %10834 = vmatpush1.bf16.msra.mxu1 %v19397_v19  ;;  %v19460_v18 = vld [vmem:[#allocation2 + $0xf10] ss:$112 sps:$4 sm:$0xff]   ;;  %v19463_v19 = vld [vmem:[#allocation2 + $0xf18] ss:$112 sps:$4 sm:$0xff]  }
 0x372   :  { %10663 = vmatprep.subr.bf16.mxu0 %v19402_v22  ;;  %10835 = vmatprep.subr.bf16.mxu1 %v19405_v23  ;;  %v19468_v22 = vld [vmem:[#allocation2 + $0xff4] ss:$112 sps:$4 sm:$0xff]   ;;  %v19471_v23 = vld [vmem:[#allocation2 + $0xffc] ss:$112 sps:$4 sm:$0xff]  }
 0x375   :  { %10664 = vmatpush1.bf16.msra.mxu0 %v19400_v24  ;;  %10836 = vmatpush1.bf16.msra.mxu1 %v19403_v25  ;;  %v20750_v24 = vld [vmem:[%s21713_s0 + $0xc] ss:$28 sps:$4 sm:$0xff]   ;;  %v19466_v25 = vld [vmem:[#allocation2 + $0xff0] ss:$112 sps:$4 sm:$0xff]  }
 0x376   :  { %10665 = vmatprep.subr.bf16.mxu0 %v19408_v26  ;;  %10837 = vmatprep.subr.bf16.mxu1 %v19411_v27  ;;  %v19469_v26 = vld [vmem:[#allocation2 + $0xff8] ss:$112 sps:$4 sm:$0xff]   ;;  %v19474_v27 = vld [vmem:[#allocation2 + $0x10d4] ss:$112 sps:$4 sm:$0xff]  }
 0x379   :  { %10666 = vmatpush1.bf16.msra.mxu0 %v19406_v28  ;;  %10838 = vmatpush1.bf16.msra.mxu1 %v19409_v29  ;;  %v19477_v28 = vld [vmem:[#allocation2 + $0x10dc] ss:$112 sps:$4 sm:$0xff]   ;;  %v19472_v29 = vld [vmem:[#allocation2 + $0x10d0] ss:$112 sps:$4 sm:$0xff]  }
 0x37a   :  { %10667 = vmatprep.subr.bf16.mxu0 %v19414_v30  ;;  %10839 = vmatprep.subr.bf16.mxu1 %v19417_v38  ;;  %v19475_v30 = vld [vmem:[#allocation2 + $0x10d8] ss:$112 sps:$4 sm:$0xff]   ;;  %v19480_v38 = vld [vmem:[#allocation2 + $0x11b4] ss:$112 sps:$4 sm:$0xff]  }
 0x37d   :  { %10668 = vmatpush1.bf16.msra.mxu0 %v19412_v39  ;;  %10840 = vmatpush1.bf16.msra.mxu1 %v19415_v42  ;;  %v19483_v39 = vld [vmem:[#allocation2 + $0x11bc] ss:$112 sps:$4 sm:$0xff]   ;;  %v19478_v42 = vld [vmem:[#allocation2 + $0x11b0] ss:$112 sps:$4 sm:$0xff]  }
 0x37e   :  { %10669 = vmatprep.subr.bf16.mxu0 %v19420_v43  ;;  %10841 = vmatprep.subr.bf16.mxu1 %v19423_v45  ;;  %v19481_v43 = vld [vmem:[#allocation2 + $0x11b8] ss:$112 sps:$4 sm:$0xff]   ;;  %v19486_v45 = vld [vmem:[#allocation2 + $0x1294] ss:$112 sps:$4 sm:$0xff]  }
 0x381   :  { %10670 = vmatpush1.bf16.msra.mxu0 %v19418_v46  ;;  %10842 = vmatpush1.bf16.msra.mxu1 %v19421_v47  ;;  %v19489_v46 = vld [vmem:[#allocation2 + $0x129c] ss:$112 sps:$4 sm:$0xff]   ;;  %v19484_v47 = vld [vmem:[#allocation2 + $0x1290] ss:$112 sps:$4 sm:$0xff]  }
 0x382   :  { %10671 = vmatprep.subr.bf16.mxu0 %v19426_v48  ;;  %10843 = vmatprep.subr.bf16.mxu1 %v19429_v49  ;;  %v19487_v48 = vld [vmem:[#allocation2 + $0x1298] ss:$112 sps:$4 sm:$0xff]   ;;  %v19492_v49 = vld [vmem:[#allocation2 + $0x1374] ss:$112 sps:$4 sm:$0xff]  }
 0x385   :  { %10672 = vmatpush1.bf16.msra.mxu0 %v19424_v50  ;;  %10844 = vmatpush1.bf16.msra.mxu1 %v19427_v51  ;;  %v19495_v50 = vld [vmem:[#allocation2 + $0x137c] ss:$112 sps:$4 sm:$0xff]   ;;  %v19490_v51 = vld [vmem:[#allocation2 + $0x1370] ss:$112 sps:$4 sm:$0xff]  }
 0x386   :  { %10673 = vmatprep.subr.bf16.mxu0 %v19432_v52  ;;  %10845 = vmatprep.subr.bf16.mxu1 %v19435_v53  ;;  %v19493_v52 = vld [vmem:[#allocation2 + $0x1378] ss:$112 sps:$4 sm:$0xff]   ;;  %v19498_v53 = vld [vmem:[#allocation2 + $0x1454] ss:$112 sps:$4 sm:$0xff]  }
 0x389   :  { %10674 = vmatpush1.bf16.msra.mxu0 %v19430_v54  ;;  %10846 = vmatpush1.bf16.msra.mxu1 %v19433_v55  ;;  %v19501_v54 = vld [vmem:[#allocation2 + $0x145c] ss:$112 sps:$4 sm:$0xff]   ;;  %v19496_v55 = vld [vmem:[#allocation2 + $0x1450] ss:$112 sps:$4 sm:$0xff]  }
 0x38a   :  { %10675 = vmatprep.subr.bf16.mxu0 %v19438_v56  ;;  %10847 = vmatprep.subr.bf16.mxu1 %v19441_v57  ;;  %v19499_v56 = vld [vmem:[#allocation2 + $0x1458] ss:$112 sps:$4 sm:$0xff]   ;;  %v19504_v57 = vld [vmem:[#allocation2 + $0x1534] ss:$112 sps:$4 sm:$0xff]  }
 0x38d   :  { %10676 = vmatpush1.bf16.msra.mxu0 %v19436_v58  ;;  %10848 = vmatpush1.bf16.msra.mxu1 %v19439_v59  ;;  %v19507_v58 = vld [vmem:[#allocation2 + $0x153c] ss:$112 sps:$4 sm:$0xff]   ;;  %v19502_v59 = vld [vmem:[#allocation2 + $0x1530] ss:$112 sps:$4 sm:$0xff]  }
 0x38e   :  { %10677 = vmatprep.subr.bf16.mxu0 %v19444_v60  ;;  %10849 = vmatprep.subr.bf16.mxu1 %v19447_v61  ;;  %v19505_v60 = vld [vmem:[#allocation2 + $0x1538] ss:$112 sps:$4 sm:$0xff]   ;;  %v19510_v61 = vld [vmem:[#allocation2 + $0x1614] ss:$112 sps:$4 sm:$0xff]  }
 0x391   :  { %10678 = vmatpush1.bf16.msra.mxu0 %v19442_v62  ;;  %10850 = vmatpush1.bf16.msra.mxu1 %v19445_v63  ;;  %v19513_v62 = vld [vmem:[#allocation2 + $0x161c] ss:$112 sps:$4 sm:$0xff]   ;;  %v19508_v63 = vld [vmem:[#allocation2 + $0x1610] ss:$112 sps:$4 sm:$0xff]  }
 0x392   :  { %10679 = vmatprep.subr.bf16.mxu0 %v19450_v0  ;;  %10851 = vmatprep.subr.bf16.mxu1 %v19453_v1  ;;  %v19511_v0 = vld [vmem:[#allocation2 + $0x1618] ss:$112 sps:$4 sm:$0xff]   ;;  %v19516_v1 = vld [vmem:[#allocation2 + $0x16f4] ss:$112 sps:$4 sm:$0xff]  }
 0x395   :  { %10680 = vmatpush1.bf16.msra.mxu0 %v19448_v2  ;;  %10852 = vmatpush1.bf16.msra.mxu1 %v19451_v3  ;;  %v19519_v2 = vld [vmem:[#allocation2 + $0x16fc] ss:$112 sps:$4 sm:$0xff]   ;;  %v19514_v3 = vld [vmem:[#allocation2 + $0x16f0] ss:$112 sps:$4 sm:$0xff]  }
 0x396   :  { %10692 = vmatprep.subr.bf16.mxu0 %v19456_v4  ;;  %10864 = vmatprep.subr.bf16.mxu1 %v19459_v5  ;;  %v19517_v4 = vld [vmem:[#allocation2 + $0x16f8] ss:$112 sps:$4 sm:$0xff]   ;;  %v19522_v5 = vld [vmem:[#allocation2 + $0x17d4] ss:$112 sps:$4 sm:$0xff]  }
 0x398   :  { %10682 = vmatmul.mubr.bf16.vlgmr.msra.gmra.mrb[12].mxu0 %v20749_v10  ;;  %10854 = vmatmul.mubr.bf16.vlgmr.msra.gmra.mrb[12].mxu1 %v20749_v10  ;;  %v19531_v10 = vld [vmem:[#allocation2 + $0x18bc] ss:$112 sps:$4 sm:$0xff]  }
 0x399   :  { %10693 = vmatpush1.bf16.msra.mxu0 %v19454_v6  ;;  %10865 = vmatpush1.bf16.msra.mxu1 %v19457_v7  ;;  %v19525_v6 = vld [vmem:[#allocation2 + $0x17dc] ss:$112 sps:$4 sm:$0xff]   ;;  %v19520_v7 = vld [vmem:[#allocation2 + $0x17d0] ss:$112 sps:$4 sm:$0xff]  }
 0x39a   :  { %10694 = vmatprep.subr.bf16.mxu0 %v19462_v8  ;;  %10866 = vmatprep.subr.bf16.mxu1 %v19465_v9  ;;  %v19523_v8 = vld [vmem:[#allocation2 + $0x17d8] ss:$112 sps:$4 sm:$0xff]   ;;  %v19528_v9 = vld [vmem:[#allocation2 + $0x18b4] ss:$112 sps:$4 sm:$0xff]  }
 0x39b   :  { %10724 = vmatprep.mubr.bf16.mxu0 %v20750_v24  ;;  %10896 = vmatprep.mubr.bf16.mxu1 %v20750_v24  ;;  %v19532_v24 = vld [vmem:[#allocation2 + $0x1990] ss:$112 sps:$4 sm:$0xff]  }
 0x39d   :  { %10695 = vmatpush1.bf16.msra.mxu0 %v19460_v18  ;;  %10867 = vmatpush1.bf16.msra.mxu1 %v19463_v19  ;;  %v19526_v18 = vld [vmem:[#allocation2 + $0x18b0] ss:$112 sps:$4 sm:$0xff]   ;;  %v19529_v19 = vld [vmem:[#allocation2 + $0x18b8] ss:$112 sps:$4 sm:$0xff]  }
 0x39e   :  { %10696 = vmatprep.subr.bf16.mxu0 %v19468_v22  ;;  %10868 = vmatprep.subr.bf16.mxu1 %v19471_v23  ;;  %v19534_v22 = vld [vmem:[#allocation2 + $0x1994] ss:$112 sps:$4 sm:$0xff]   ;;  %v19537_v23 = vld [vmem:[#allocation2 + $0x199c] ss:$112 sps:$4 sm:$0xff]  }
 0x3a1   :  { %10697 = vmatpush1.bf16.msra.mxu0 %v19466_v25  ;;  %10869 = vmatpush1.bf16.msra.mxu1 %v19469_v26  ;;  %v19535_v25 = vld [vmem:[#allocation2 + $0x1998] ss:$112 sps:$4 sm:$0xff]   ;;  %v19540_v26 = vld [vmem:[#allocation2 + $0x1a74] ss:$112 sps:$4 sm:$0xff]  }
 0x3a2   :  { %10698 = vmatprep.subr.bf16.mxu0 %v19474_v27  ;;  %10870 = vmatprep.subr.bf16.mxu1 %v19477_v28  ;;  %v19543_v27 = vld [vmem:[#allocation2 + $0x1a7c] ss:$112 sps:$4 sm:$0xff]   ;;  %v19538_v28 = vld [vmem:[#allocation2 + $0x1a70] ss:$112 sps:$4 sm:$0xff]  }
 0x3a5   :  { %10699 = vmatpush1.bf16.msra.mxu0 %v19472_v29  ;;  %10871 = vmatpush1.bf16.msra.mxu1 %v19475_v30  ;;  %v19541_v29 = vld [vmem:[#allocation2 + $0x1a78] ss:$112 sps:$4 sm:$0xff]   ;;  %v19546_v30 = vld [vmem:[#allocation2 + $0x1b54] ss:$112 sps:$4 sm:$0xff]  }
 0x3a6   :  { %10700 = vmatprep.subr.bf16.mxu0 %v19480_v38  ;;  %10872 = vmatprep.subr.bf16.mxu1 %v19483_v39  ;;  %v19549_v38 = vld [vmem:[#allocation2 + $0x1b5c] ss:$112 sps:$4 sm:$0xff]   ;;  %v19544_v39 = vld [vmem:[#allocation2 + $0x1b50] ss:$112 sps:$4 sm:$0xff]  }
 0x3a9   :  { %10701 = vmatpush1.bf16.msra.mxu0 %v19478_v42  ;;  %10873 = vmatpush1.bf16.msra.mxu1 %v19481_v43  ;;  %v19547_v42 = vld [vmem:[#allocation2 + $0x1b58] ss:$112 sps:$4 sm:$0xff]   ;;  %v19552_v43 = vld [vmem:[#allocation2 + $0x1c34] ss:$112 sps:$4 sm:$0xff]  }
 0x3aa   :  { %10702 = vmatprep.subr.bf16.mxu0 %v19486_v45  ;;  %10874 = vmatprep.subr.bf16.mxu1 %v19489_v46  ;;  %v19555_v45 = vld [vmem:[#allocation2 + $0x1c3c] ss:$112 sps:$4 sm:$0xff]   ;;  %v19550_v46 = vld [vmem:[#allocation2 + $0x1c30] ss:$112 sps:$4 sm:$0xff]  }
 0x3ad   :  { %10703 = vmatpush1.bf16.msra.mxu0 %v19484_v47  ;;  %10875 = vmatpush1.bf16.msra.mxu1 %v19487_v48  ;;  %v19553_v47 = vld [vmem:[#allocation2 + $0x1c38] ss:$112 sps:$4 sm:$0xff]   ;;  %v19558_v48 = vld [vmem:[#allocation2 + $0x1d14] ss:$112 sps:$4 sm:$0xff]  }
 0x3ae   :  { %10704 = vmatprep.subr.bf16.mxu0 %v19492_v49  ;;  %10876 = vmatprep.subr.bf16.mxu1 %v19495_v50  ;;  %v19561_v49 = vld [vmem:[#allocation2 + $0x1d1c] ss:$112 sps:$4 sm:$0xff]   ;;  %v20751_v50 = vld [vmem:[%s21713_s0 + $0x8] ss:$28 sps:$4 sm:$0xff]  }
 0x3b1   :  { %10705 = vmatpush1.bf16.msra.mxu0 %v19490_v51  ;;  %10877 = vmatpush1.bf16.msra.mxu1 %v19493_v52  ;;  %v19556_v51 = vld [vmem:[#allocation2 + $0x1d10] ss:$112 sps:$4 sm:$0xff]   ;;  %v19559_v52 = vld [vmem:[#allocation2 + $0x1d18] ss:$112 sps:$4 sm:$0xff]  }
 0x3b2   :  { %10706 = vmatprep.subr.bf16.mxu0 %v19498_v53  ;;  %10878 = vmatprep.subr.bf16.mxu1 %v19501_v54  ;;  %v19564_v53 = vld [vmem:[#allocation2 + $0x1df4] ss:$112 sps:$4 sm:$0xff]   ;;  %v19567_v54 = vld [vmem:[#allocation2 + $0x1dfc] ss:$112 sps:$4 sm:$0xff]  }
 0x3b5   :  { %10707 = vmatpush1.bf16.msra.mxu0 %v19496_v55  ;;  %10879 = vmatpush1.bf16.msra.mxu1 %v19499_v56  ;;  %v20752_v55 = vld [vmem:[%s21713_s0 + $0x14] ss:$28 sps:$4 sm:$0xff]  }
 0x3b6   :  { %10708 = vmatprep.subr.bf16.mxu0 %v19504_v57  ;;  %10880 = vmatprep.subr.bf16.mxu1 %v19507_v58  ;;  %v19562_v56 = vld [vmem:[#allocation2 + $0x1df0] ss:$112 sps:$4 sm:$0xff]   ;;  %v19565_v57 = vld [vmem:[#allocation2 + $0x1df8] ss:$112 sps:$4 sm:$0xff]   ;;  %v19570_v58 = vld [vmem:[#allocation2 + $0x1ed4] ss:$112 sps:$4 sm:$0xff]  }
 0x3b9   :  { %10709 = vmatpush1.bf16.msra.mxu0 %v19502_v59  ;;  %10881 = vmatpush1.bf16.msra.mxu1 %v19505_v60  ;;  %v19573_v59 = vld [vmem:[#allocation2 + $0x1edc] ss:$112 sps:$4 sm:$0xff]   ;;  %v19568_v60 = vld [vmem:[#allocation2 + $0x1ed0] ss:$112 sps:$4 sm:$0xff]  }
 0x3ba   :  { %10710 = vmatprep.subr.bf16.mxu0 %v19510_v61  ;;  %10882 = vmatprep.subr.bf16.mxu1 %v19513_v62  ;;  %v19571_v61 = vld [vmem:[#allocation2 + $0x1ed8] ss:$112 sps:$4 sm:$0xff]   ;;  %v19576_v62 = vld [vmem:[#allocation2 + $0x1fb4] ss:$112 sps:$4 sm:$0xff]  }
 0x3bd   :  { %10711 = vmatpush1.bf16.msra.mxu0 %v19508_v63  ;;  %10883 = vmatpush1.bf16.msra.mxu1 %v19511_v0  ;;  %v19579_v63 = vld [vmem:[#allocation2 + $0x1fbc] ss:$112 sps:$4 sm:$0xff]   ;;  %v19574_v0 = vld [vmem:[#allocation2 + $0x1fb0] ss:$112 sps:$4 sm:$0xff]  }
 0x3be   :  { %10712 = vmatprep.subr.bf16.mxu0 %v19516_v1  ;;  %10884 = vmatprep.subr.bf16.mxu1 %v19519_v2  ;;  %v19577_v1 = vld [vmem:[#allocation2 + $0x1fb8] ss:$112 sps:$4 sm:$0xff]   ;;  %v19582_v2 = vld [vmem:[#allocation2 + $0x2094] ss:$112 sps:$4 sm:$0xff]  }
 0x3c1   :  { %10713 = vmatpush1.bf16.msra.mxu0 %v19514_v3  ;;  %10885 = vmatpush1.bf16.msra.mxu1 %v19517_v4  ;;  %v19585_v3 = vld [vmem:[#allocation2 + $0x209c] ss:$112 sps:$4 sm:$0xff]   ;;  %v19580_v4 = vld [vmem:[#allocation2 + $0x2090] ss:$112 sps:$4 sm:$0xff]  }
 0x3c2   :  { %10714 = vmatprep.subr.bf16.mxu0 %v19522_v5  ;;  %10886 = vmatprep.subr.bf16.mxu1 %v19525_v6  ;;  %v19583_v5 = vld [vmem:[#allocation2 + $0x2098] ss:$112 sps:$4 sm:$0xff]   ;;  %v19588_v6 = vld [vmem:[#allocation2 + $0x2174] ss:$112 sps:$4 sm:$0xff]  }
 0x3c5   :  { %10715 = vmatpush1.bf16.msra.mxu0 %v19520_v7  ;;  %10887 = vmatpush1.bf16.msra.mxu1 %v19523_v8  ;;  %v19591_v7 = vld [vmem:[#allocation2 + $0x217c] ss:$112 sps:$4 sm:$0xff]   ;;  %v19586_v8 = vld [vmem:[#allocation2 + $0x2170] ss:$112 sps:$4 sm:$0xff]  }
 0x3c6   :  { %10716 = vmatprep.subr.bf16.mxu0 %v19528_v9  ;;  %10888 = vmatprep.subr.bf16.mxu1 %v19531_v10  ;;  %v19589_v9 = vld [vmem:[#allocation2 + $0x2178] ss:$112 sps:$4 sm:$0xff]   ;;  %v19594_v10 = vld [vmem:[#allocation2 + $0x2254] ss:$112 sps:$4 sm:$0xff]  }
 0x3c9   :  { %10717 = vmatpush1.bf16.msra.mxu0 %v19526_v18  ;;  %10889 = vmatpush1.bf16.msra.mxu1 %v19529_v19  ;;  %v19597_v18 = vld [vmem:[#allocation2 + $0x225c] ss:$112 sps:$4 sm:$0xff]   ;;  %v19592_v19 = vld [vmem:[#allocation2 + $0x2250] ss:$112 sps:$4 sm:$0xff]  }
 0x3ca   :  { %10718 = vmatprep.subr.bf16.mxu0 %v19534_v22  ;;  %10890 = vmatprep.subr.bf16.mxu1 %v19537_v23  ;;  %v19595_v22 = vld [vmem:[#allocation2 + $0x2258] ss:$112 sps:$4 sm:$0xff]   ;;  %v19600_v23 = vld [vmem:[#allocation2 + $0x2334] ss:$112 sps:$4 sm:$0xff]  }
 0x3cd   :  { %10719 = vmatpush1.bf16.msra.mxu0 %v19532_v24  ;;  %10891 = vmatpush1.bf16.msra.mxu1 %v19535_v25  ;;  %v19603_v24 = vld [vmem:[#allocation2 + $0x233c] ss:$112 sps:$4 sm:$0xff]   ;;  %v19598_v25 = vld [vmem:[#allocation2 + $0x2330] ss:$112 sps:$4 sm:$0xff]  }
 0x3ce   :  { %10720 = vmatprep.subr.bf16.mxu0 %v19540_v26  ;;  %10892 = vmatprep.subr.bf16.mxu1 %v19543_v27  ;;  %v19601_v26 = vld [vmem:[#allocation2 + $0x2338] ss:$112 sps:$4 sm:$0xff]   ;;  %v19606_v27 = vld [vmem:[#allocation2 + $0x2414] ss:$112 sps:$4 sm:$0xff]  }
 0x3d1   :  { %10721 = vmatpush1.bf16.msra.mxu0 %v19538_v28  ;;  %10893 = vmatpush1.bf16.msra.mxu1 %v19541_v29  ;;  %v19609_v28 = vld [vmem:[#allocation2 + $0x241c] ss:$112 sps:$4 sm:$0xff]   ;;  %v19604_v29 = vld [vmem:[#allocation2 + $0x2410] ss:$112 sps:$4 sm:$0xff]  }
 0x3d2   :  { %10722 = vmatprep.subr.bf16.mxu0 %v19546_v30  ;;  %10894 = vmatprep.subr.bf16.mxu1 %v19549_v38  ;;  %v19607_v30 = vld [vmem:[#allocation2 + $0x2418] ss:$112 sps:$4 sm:$0xff]   ;;  %v19612_v38 = vld [vmem:[#allocation2 + $0x24f4] ss:$112 sps:$4 sm:$0xff]  }
 0x3d5   :  { %10723 = vmatpush1.bf16.msra.mxu0 %v19544_v39  ;;  %10895 = vmatpush1.bf16.msra.mxu1 %v19547_v42  ;;  %v19615_v39 = vld [vmem:[#allocation2 + $0x24fc] ss:$112 sps:$4 sm:$0xff]   ;;  %v19610_v42 = vld [vmem:[#allocation2 + $0x24f0] ss:$112 sps:$4 sm:$0xff]  }
 0x3d6   :  { %10735 = vmatprep.subr.bf16.mxu0 %v19552_v43  ;;  %10907 = vmatprep.subr.bf16.mxu1 %v19555_v45  ;;  %v19613_v43 = vld [vmem:[#allocation2 + $0x24f8] ss:$112 sps:$4 sm:$0xff]   ;;  %v19618_v45 = vld [vmem:[#allocation2 + $0x25d4] ss:$112 sps:$4 sm:$0xff]  }
 0x3d8   :  { %10725 = vmatmul.mubr.bf16.vlgmr.msra.gmra.mrb[12].mxu0 %v20751_v50  ;;  %10897 = vmatmul.mubr.bf16.vlgmr.msra.gmra.mrb[12].mxu1 %v20751_v50  ;;  %v19627_v50 = vld [vmem:[#allocation2 + $0x26bc] ss:$112 sps:$4 sm:$0xff]  }
 0x3d9   :  { %10736 = vmatpush1.bf16.msra.mxu0 %v19550_v46  ;;  %10908 = vmatpush1.bf16.msra.mxu1 %v19553_v47  ;;  %v19621_v46 = vld [vmem:[#allocation2 + $0x25dc] ss:$112 sps:$4 sm:$0xff]   ;;  %v19616_v47 = vld [vmem:[#allocation2 + $0x25d0] ss:$112 sps:$4 sm:$0xff]  }
 0x3da   :  { %10737 = vmatprep.subr.bf16.mxu0 %v19558_v48  ;;  %10909 = vmatprep.subr.bf16.mxu1 %v19561_v49  ;;  %v19619_v48 = vld [vmem:[#allocation2 + $0x25d8] ss:$112 sps:$4 sm:$0xff]   ;;  %v19624_v49 = vld [vmem:[#allocation2 + $0x26b4] ss:$112 sps:$4 sm:$0xff]  }
 0x3db   :  { %10767 = vmatprep.mubr.bf16.mxu0 %v20752_v55  ;;  %10939 = vmatprep.mubr.bf16.mxu1 %v20752_v55  ;;  %v19628_v55 = vld [vmem:[#allocation2 + $0x2790] ss:$112 sps:$4 sm:$0xff]  }
 0x3dd   :  { %10738 = vmatpush1.bf16.msra.mxu0 %v19556_v51  ;;  %10910 = vmatpush1.bf16.msra.mxu1 %v19559_v52  ;;  %v19622_v51 = vld [vmem:[#allocation2 + $0x26b0] ss:$112 sps:$4 sm:$0xff]   ;;  %v19625_v52 = vld [vmem:[#allocation2 + $0x26b8] ss:$112 sps:$4 sm:$0xff]  }
 0x3de   :  { %10739 = vmatprep.subr.bf16.mxu0 %v19564_v53  ;;  %10911 = vmatprep.subr.bf16.mxu1 %v19567_v54  ;;  %v19630_v53 = vld [vmem:[#allocation2 + $0x2794] ss:$112 sps:$4 sm:$0xff]   ;;  %v19633_v54 = vld [vmem:[#allocation2 + $0x279c] ss:$112 sps:$4 sm:$0xff]  }
 0x3e1   :  { %10740 = vmatpush1.bf16.msra.mxu0 %v19562_v56  ;;  %10912 = vmatpush1.bf16.msra.mxu1 %v19565_v57  ;;  %v19631_v56 = vld [vmem:[#allocation2 + $0x2798] ss:$112 sps:$4 sm:$0xff]   ;;  %v19636_v57 = vld [vmem:[#allocation2 + $0x2874] ss:$112 sps:$4 sm:$0xff]  }
 0x3e2   :  { %10741 = vmatprep.subr.bf16.mxu0 %v19570_v58  ;;  %10913 = vmatprep.subr.bf16.mxu1 %v19573_v59  ;;  %v19639_v58 = vld [vmem:[#allocation2 + $0x287c] ss:$112 sps:$4 sm:$0xff]   ;;  %v19634_v59 = vld [vmem:[#allocation2 + $0x2870] ss:$112 sps:$4 sm:$0xff]  }
 0x3e5   :  { %10742 = vmatpush1.bf16.msra.mxu0 %v19568_v60  ;;  %10914 = vmatpush1.bf16.msra.mxu1 %v19571_v61  ;;  %v19637_v60 = vld [vmem:[#allocation2 + $0x2878] ss:$112 sps:$4 sm:$0xff]   ;;  %v19642_v61 = vld [vmem:[#allocation2 + $0x2954] ss:$112 sps:$4 sm:$0xff]  }
 0x3e6   :  { %10743 = vmatprep.subr.bf16.mxu0 %v19576_v62  ;;  %10915 = vmatprep.subr.bf16.mxu1 %v19579_v63  ;;  %v19645_v62 = vld [vmem:[#allocation2 + $0x295c] ss:$112 sps:$4 sm:$0xff]   ;;  %v19640_v63 = vld [vmem:[#allocation2 + $0x2950] ss:$112 sps:$4 sm:$0xff]  }
 0x3e9   :  { %10744 = vmatpush1.bf16.msra.mxu0 %v19574_v0  ;;  %10916 = vmatpush1.bf16.msra.mxu1 %v19577_v1  ;;  %v19643_v0 = vld [vmem:[#allocation2 + $0x2958] ss:$112 sps:$4 sm:$0xff]   ;;  %v19648_v1 = vld [vmem:[#allocation2 + $0x2a34] ss:$112 sps:$4 sm:$0xff]  }
 0x3ea   :  { %10745 = vmatprep.subr.bf16.mxu0 %v19582_v2  ;;  %10917 = vmatprep.subr.bf16.mxu1 %v19585_v3  ;;  %v19651_v2 = vld [vmem:[#allocation2 + $0x2a3c] ss:$112 sps:$4 sm:$0xff]   ;;  %v19646_v3 = vld [vmem:[#allocation2 + $0x2a30] ss:$112 sps:$4 sm:$0xff]  }
 0x3ed   :  { %10746 = vmatpush1.bf16.msra.mxu0 %v19580_v4  ;;  %10918 = vmatpush1.bf16.msra.mxu1 %v19583_v5  ;;  %v19649_v4 = vld [vmem:[#allocation2 + $0x2a38] ss:$112 sps:$4 sm:$0xff]   ;;  %v19654_v5 = vld [vmem:[#allocation2 + $0x2b14] ss:$112 sps:$4 sm:$0xff]  }
 0x3ee   :  { %10747 = vmatprep.subr.bf16.mxu0 %v19588_v6  ;;  %10919 = vmatprep.subr.bf16.mxu1 %v19591_v7  ;;  %v19657_v6 = vld [vmem:[#allocation2 + $0x2b1c] ss:$112 sps:$4 sm:$0xff]  }
 0x3ef   :  { %v20753_v7 = vld [vmem:[%s21713_s0 + $0x10] ss:$28 sps:$4 sm:$0xff]  }
 0x3f1   :  { %10748 = vmatpush1.bf16.msra.mxu0 %v19586_v8  ;;  %10920 = vmatpush1.bf16.msra.mxu1 %v19589_v9  ;;  %v19652_v8 = vld [vmem:[#allocation2 + $0x2b10] ss:$112 sps:$4 sm:$0xff]   ;;  %v19655_v9 = vld [vmem:[#allocation2 + $0x2b18] ss:$112 sps:$4 sm:$0xff]  }
 0x3f2   :  { %10749 = vmatprep.subr.bf16.mxu0 %v19594_v10  ;;  %10921 = vmatprep.subr.bf16.mxu1 %v19597_v18  ;;  %v19660_v10 = vld [vmem:[#allocation2 + $0x2bf4] ss:$112 sps:$4 sm:$0xff]   ;;  %v19663_v18 = vld [vmem:[#allocation2 + $0x2bfc] ss:$112 sps:$4 sm:$0xff]  }
 0x3f5   :  { %10750 = vmatpush1.bf16.msra.mxu0 %v19592_v19  ;;  %10922 = vmatpush1.bf16.msra.mxu1 %v19595_v22  ;;  %v19658_v19 = vld [vmem:[#allocation2 + $0x2bf0] ss:$112 sps:$4 sm:$0xff]   ;;  %v19661_v22 = vld [vmem:[#allocation2 + $0x2bf8] ss:$112 sps:$4 sm:$0xff]  }
 0x3f6   :  { %10751 = vmatprep.subr.bf16.mxu0 %v19600_v23  ;;  %10923 = vmatprep.subr.bf16.mxu1 %v19603_v24  ;;  %v19666_v23 = vld [vmem:[#allocation2 + $0x2cd4] ss:$112 sps:$4 sm:$0xff]   ;;  %v19669_v24 = vld [vmem:[#allocation2 + $0x2cdc] ss:$112 sps:$4 sm:$0xff]  }
 0x3f9   :  { %10752 = vmatpush1.bf16.msra.mxu0 %v19598_v25  ;;  %10924 = vmatpush1.bf16.msra.mxu1 %v19601_v26  ;;  %v19664_v25 = vld [vmem:[#allocation2 + $0x2cd0] ss:$112 sps:$4 sm:$0xff]   ;;  %v19667_v26 = vld [vmem:[#allocation2 + $0x2cd8] ss:$112 sps:$4 sm:$0xff]  }
 0x3fa   :  { %10753 = vmatprep.subr.bf16.mxu0 %v19606_v27  ;;  %10925 = vmatprep.subr.bf16.mxu1 %v19609_v28  ;;  %v19672_v27 = vld [vmem:[#allocation2 + $0x2db4] ss:$112 sps:$4 sm:$0xff]   ;;  %v19675_v28 = vld [vmem:[#allocation2 + $0x2dbc] ss:$112 sps:$4 sm:$0xff]  }
 0x3fd   :  { %10754 = vmatpush1.bf16.msra.mxu0 %v19604_v29  ;;  %10926 = vmatpush1.bf16.msra.mxu1 %v19607_v30  ;;  %v19670_v29 = vld [vmem:[#allocation2 + $0x2db0] ss:$112 sps:$4 sm:$0xff]   ;;  %v19673_v30 = vld [vmem:[#allocation2 + $0x2db8] ss:$112 sps:$4 sm:$0xff]  }
 0x3fe   :  { %10755 = vmatprep.subr.bf16.mxu0 %v19612_v38  ;;  %10927 = vmatprep.subr.bf16.mxu1 %v19615_v39  ;;  %v19678_v38 = vld [vmem:[#allocation2 + $0x2e94] ss:$112 sps:$4 sm:$0xff]   ;;  %v19681_v39 = vld [vmem:[#allocation2 + $0x2e9c] ss:$112 sps:$4 sm:$0xff]  }
 0x401   :  { %10756 = vmatpush1.bf16.msra.mxu0 %v19610_v42  ;;  %10928 = vmatpush1.bf16.msra.mxu1 %v19613_v43  ;;  %v19676_v42 = vld [vmem:[#allocation2 + $0x2e90] ss:$112 sps:$4 sm:$0xff]   ;;  %v19679_v43 = vld [vmem:[#allocation2 + $0x2e98] ss:$112 sps:$4 sm:$0xff]  }
 0x402   :  { %10757 = vmatprep.subr.bf16.mxu0 %v19618_v45  ;;  %10929 = vmatprep.subr.bf16.mxu1 %v19621_v46  ;;  %v19684_v45 = vld [vmem:[#allocation2 + $0x2f74] ss:$112 sps:$4 sm:$0xff]   ;;  %v19687_v46 = vld [vmem:[#allocation2 + $0x2f7c] ss:$112 sps:$4 sm:$0xff]  }
 0x405   :  { %10758 = vmatpush1.bf16.msra.mxu0 %v19616_v47  ;;  %10930 = vmatpush1.bf16.msra.mxu1 %v19619_v48 }
 0x406   :  { %10759 = vmatprep.subr.bf16.mxu0 %v19624_v49  ;;  %10931 = vmatprep.subr.bf16.mxu1 %v19627_v50 }
 0x409   :  { %10760 = vmatpush1.bf16.msra.mxu0 %v19622_v51  ;;  %10932 = vmatpush1.bf16.msra.mxu1 %v19625_v52 }
 0x40a   :  { %10761 = vmatprep.subr.bf16.mxu0 %v19630_v53  ;;  %10933 = vmatprep.subr.bf16.mxu1 %v19633_v54 }
 0x40d   :  { %10762 = vmatpush1.bf16.msra.mxu0 %v19628_v55  ;;  %10934 = vmatpush1.bf16.msra.mxu1 %v19631_v56 }
 0x40e   :  { %10763 = vmatprep.subr.bf16.mxu0 %v19636_v57  ;;  %10935 = vmatprep.subr.bf16.mxu1 %v19639_v58  ;;  %v19682_v57 = vld [vmem:[#allocation2 + $0x2f70] ss:$112 sps:$4 sm:$0xff]   ;;  %v19685_v58 = vld [vmem:[#allocation2 + $0x2f78] ss:$112 sps:$4 sm:$0xff]  }
 0x411   :  { %10764 = vmatpush1.bf16.msra.mxu0 %v19634_v59  ;;  %10936 = vmatpush1.bf16.msra.mxu1 %v19637_v60  ;;  %v20374_v60 = vld [vmem:[#allocation2 + $0x144] ss:$112 sps:$4 sm:$0xff]  }
 0x412   :  { %10765 = vmatprep.subr.bf16.mxu0 %v19642_v61  ;;  %10937 = vmatprep.subr.bf16.mxu1 %v19645_v62 }
 0x415   :  { %10766 = vmatpush1.bf16.msra.mxu0 %v19640_v63  ;;  %10938 = vmatpush1.bf16.msra.mxu1 %v19643_v0  ;;  %v19690_v63 = vld [vmem:[#allocation2 + $0x3054] ss:$112 sps:$4 sm:$0xff]   ;;  %v19693_v0 = vld [vmem:[#allocation2 + $0x305c] ss:$112 sps:$4 sm:$0xff]  }
 0x416   :  { %10778 = vmatprep.subr.bf16.mxu0 %v19648_v1  ;;  %10950 = vmatprep.subr.bf16.mxu1 %v19651_v2  ;;  %v20030_v2 = vld [vmem:[#allocation2 + $0x50] ss:$112 sps:$4 sm:$0xff]  }
 0x418   :  { %10768 = vmatmul.mubr.bf16.vlgmr.msra.gmra.mrb[12].mxu0 %v20753_v7  ;;  %10940 = vmatmul.mubr.bf16.vlgmr.msra.gmra.mrb[12].mxu1 %v20753_v7  ;;  %v19694_v7 = vld [vmem:[#allocation2 + $0x40] ss:$112 sps:$4 sm:$0xff]  }
 0x419   :  { %10779 = vmatpush1.bf16.msra.mxu0 %v19646_v3  ;;  %10951 = vmatpush1.bf16.msra.mxu1 %v19649_v4  ;;  %v19688_v3 = vld [vmem:[#allocation2 + $0x3050] ss:$112 sps:$4 sm:$0xff]   ;;  %v19691_v4 = vld [vmem:[#allocation2 + $0x3058] ss:$112 sps:$4 sm:$0xff]  }
 0x41a   :  { %10780 = vmatprep.subr.bf16.mxu0 %v19654_v5  ;;  %10952 = vmatprep.subr.bf16.mxu1 %v19657_v6  ;;  %v19696_v5 = vld [vmem:[#allocation2 + $0x44] ss:$112 sps:$4 sm:$0xff]   ;;  %v19699_v6 = vld [vmem:[#allocation2 + $0x4c] ss:$112 sps:$4 sm:$0xff]  }
 0x41b   :  { %10810 = vmatprep.mubr.bf16.mxu0 %v21725_v16  ;;  %10982 = vmatprep.mubr.bf16.mxu1 %v21725_v16 }
 0x41d   :  { %10781 = vmatpush1.bf16.msra.mxu0 %v19652_v8  ;;  %10953 = vmatpush1.bf16.msra.mxu1 %v19655_v9  ;;  %v19697_v8 = vld [vmem:[#allocation2 + $0x48] ss:$112 sps:$4 sm:$0xff]   ;;  %v19702_v9 = vld [vmem:[#allocation2 + $0x124] ss:$112 sps:$4 sm:$0xff]  }
 0x41e   :  { %10782 = vmatprep.subr.bf16.mxu0 %v19660_v10  ;;  %10954 = vmatprep.subr.bf16.mxu1 %v19663_v18  ;;  %v19705_v10 = vld [vmem:[#allocation2 + $0x12c] ss:$112 sps:$4 sm:$0xff]   ;;  %v21369_v18 = vld [vmem:[%s21713_s0 + $0x18] ss:$28 sps:$4 sm:$0xff]  }
 0x421   :  { %10783 = vmatpush1.bf16.msra.mxu0 %v19658_v19  ;;  %10955 = vmatpush1.bf16.msra.mxu1 %v19661_v22  ;;  %v19700_v19 = vld [vmem:[#allocation2 + $0x120] ss:$112 sps:$4 sm:$0xff]   ;;  %v19703_v22 = vld [vmem:[#allocation2 + $0x128] ss:$112 sps:$4 sm:$0xff]  }
 0x422   :  { %10784 = vmatprep.subr.bf16.mxu0 %v19666_v23  ;;  %10956 = vmatprep.subr.bf16.mxu1 %v19669_v24  ;;  %v19708_v23 = vld [vmem:[#allocation2 + $0x204] ss:$112 sps:$4 sm:$0xff]   ;;  %v19711_v24 = vld [vmem:[#allocation2 + $0x20c] ss:$112 sps:$4 sm:$0xff]  }
 0x425   :  { %10785 = vmatpush1.bf16.msra.mxu0 %v19664_v25  ;;  %10957 = vmatpush1.bf16.msra.mxu1 %v19667_v26  ;;  %v21376_v25 = vld [vmem:[%s21713_s0 + $0x4] ss:$28 sps:$4 sm:$0xff]  }
 0x426   :  { %10786 = vmatprep.subr.bf16.mxu0 %v19672_v27  ;;  %10958 = vmatprep.subr.bf16.mxu1 %v19675_v28  ;;  %v19706_v26 = vld [vmem:[#allocation2 + $0x200] ss:$112 sps:$4 sm:$0xff]   ;;  %v19709_v27 = vld [vmem:[#allocation2 + $0x208] ss:$112 sps:$4 sm:$0xff]   ;;  %v19714_v28 = vld [vmem:[#allocation2 + $0x2e4] ss:$112 sps:$4 sm:$0xff]  }
 0x429   :  { %10787 = vmatpush1.bf16.msra.mxu0 %v19670_v29  ;;  %10959 = vmatpush1.bf16.msra.mxu1 %v19673_v30  ;;  %v19717_v29 = vld [vmem:[#allocation2 + $0x2ec] ss:$112 sps:$4 sm:$0xff]   ;;  %v19712_v30 = vld [vmem:[#allocation2 + $0x2e0] ss:$112 sps:$4 sm:$0xff]  }
 0x42a   :  { %10788 = vmatprep.subr.bf16.mxu0 %v19678_v38  ;;  %10960 = vmatprep.subr.bf16.mxu1 %v19681_v39  ;;  %v19715_v38 = vld [vmem:[#allocation2 + $0x2e8] ss:$112 sps:$4 sm:$0xff]   ;;  %v19720_v39 = vld [vmem:[#allocation2 + $0x3c4] ss:$112 sps:$4 sm:$0xff]  }
 0x42b   :  { %v21334_v47 = vpop.f32.mrb[8].mxu0  ;;  %v21336_v48 = vpop.f32.mrb[8].mxu1 }
 0x42c   :  { %v12026_v49 = vmax.f32 %v21256_v13, %v21334_v47  ;;  %v21342_v51 = vpop.f32.mrb[9].mxu0  ;;  %v21344_v52 = vpop.f32.mrb[9].mxu1  ;;  %v20701_v47 = vld [vmem:[#allocation2 + $0x308c] ss:$112 sps:$4 sm:$0xff]  }
 0x42d   :  { %v21350_v55 = vpop.f32.mrb[10].mxu0  ;;  %v21352_v56 = vpop.f32.mrb[10].mxu1  ;;  %10789 = vmatpush1.bf16.msra.mxu0 %v19676_v42  ;;  %10961 = vmatpush1.bf16.msra.mxu1 %v19679_v43  ;;  %v19723_v42 = vld [vmem:[#allocation2 + $0x3cc] ss:$112 sps:$4 sm:$0xff]   ;;  %v19718_v43 = vld [vmem:[#allocation2 + $0x3c0] ss:$112 sps:$4 sm:$0xff]  }
 0x42e   :  { %v21358_v61 = vpop.f32.mrb[11].mxu0  ;;  %v21360_v62 = vpop.f32.mrb[11].mxu1  ;;  %10790 = vmatprep.subr.bf16.mxu0 %v19684_v45  ;;  %10962 = vmatprep.subr.bf16.mxu1 %v19687_v46  ;;  %v19721_v45 = vld [vmem:[#allocation2 + $0x3c8] ss:$112 sps:$4 sm:$0xff]   ;;  %v19726_v46 = vld [vmem:[#allocation2 + $0x4a4] ss:$112 sps:$4 sm:$0xff]  }
 0x431   :  { %10791 = vmatpush1.bf16.msra.mxu0 %v19682_v57  ;;  %10963 = vmatpush1.bf16.msra.mxu1 %v19685_v58  ;;  %v19729_v57 = vld [vmem:[#allocation2 + $0x4ac] ss:$112 sps:$4 sm:$0xff]   ;;  %v19724_v58 = vld [vmem:[#allocation2 + $0x4a0] ss:$112 sps:$4 sm:$0xff]  }
 0x432   :  { %10792 = vmatprep.subr.bf16.mxu0 %v19690_v63  ;;  %10964 = vmatprep.subr.bf16.mxu1 %v19693_v0  ;;  %v19727_v63 = vld [vmem:[#allocation2 + $0x4a8] ss:$112 sps:$4 sm:$0xff]   ;;  %v19732_v0 = vld [vmem:[#allocation2 + $0x584] ss:$112 sps:$4 sm:$0xff]  }
 0x435   :  { %10793 = vmatpush1.bf16.msra.mxu0 %v19688_v3  ;;  %10965 = vmatpush1.bf16.msra.mxu1 %v19691_v4  ;;  %v19735_v3 = vld [vmem:[#allocation2 + $0x58c] ss:$112 sps:$4 sm:$0xff]   ;;  %v19730_v4 = vld [vmem:[#allocation2 + $0x580] ss:$112 sps:$4 sm:$0xff]  }
 0x436   :  { %10993 = vmatprep.subr.bf16.mxu0 %v19696_v5  ;;  %11165 = vmatprep.subr.bf16.mxu1 %v19699_v6  ;;  %v19733_v5 = vld [vmem:[#allocation2 + $0x588] ss:$112 sps:$4 sm:$0xff]   ;;  %v19738_v6 = vld [vmem:[#allocation2 + $0x664] ss:$112 sps:$4 sm:$0xff]  }
 0x438   :  { %10811 = vmatmul.mubr.bf16.vlgmr.msra.gmra.mrb[12].mxu0 %v21369_v18  ;;  %10983 = vmatmul.mubr.bf16.vlgmr.msra.gmra.mrb[12].mxu1 %v21369_v18 }
 0x439   :  { %10994 = vmatpush1.bf16.msra.mxu0 %v19694_v7  ;;  %11166 = vmatpush1.bf16.msra.mxu1 %v19697_v8  ;;  %v19741_v7 = vld [vmem:[#allocation2 + $0x66c] ss:$112 sps:$4 sm:$0xff]   ;;  %v19736_v8 = vld [vmem:[#allocation2 + $0x660] ss:$112 sps:$4 sm:$0xff]  }
 0x43a   :  { %10995 = vmatprep.subr.bf16.mxu0 %v19702_v9  ;;  %11167 = vmatprep.subr.bf16.mxu1 %v19705_v10  ;;  %v19739_v9 = vld [vmem:[#allocation2 + $0x668] ss:$112 sps:$4 sm:$0xff]   ;;  %v19744_v10 = vld [vmem:[#allocation2 + $0x744] ss:$112 sps:$4 sm:$0xff]  }
 0x43b   :  { %11025 = vmatprep.mubr.bf16.mxu0 %v21376_v25  ;;  %11197 = vmatprep.mubr.bf16.mxu1 %v21376_v25 }
 0x43d   :  { %10996 = vmatpush1.bf16.msra.mxu0 %v19700_v19  ;;  %11168 = vmatpush1.bf16.msra.mxu1 %v19703_v22  ;;  %v19747_v19 = vld [vmem:[#allocation2 + $0x74c] ss:$112 sps:$4 sm:$0xff]   ;;  %v19742_v22 = vld [vmem:[#allocation2 + $0x740] ss:$112 sps:$4 sm:$0xff]  }
 0x43e   :  { %10997 = vmatprep.subr.bf16.mxu0 %v19708_v23  ;;  %11169 = vmatprep.subr.bf16.mxu1 %v19711_v24  ;;  %v19745_v23 = vld [vmem:[#allocation2 + $0x748] ss:$112 sps:$4 sm:$0xff]   ;;  %v19750_v24 = vld [vmem:[#allocation2 + $0x824] ss:$112 sps:$4 sm:$0xff]  }
 0x441   :  { %10998 = vmatpush1.bf16.msra.mxu0 %v19706_v26  ;;  %11170 = vmatpush1.bf16.msra.mxu1 %v19709_v27  ;;  %v19753_v26 = vld [vmem:[#allocation2 + $0x82c] ss:$112 sps:$4 sm:$0xff]   ;;  %v19748_v27 = vld [vmem:[#allocation2 + $0x820] ss:$112 sps:$4 sm:$0xff]  }
 0x442   :  { %10999 = vmatprep.subr.bf16.mxu0 %v19714_v28  ;;  %11171 = vmatprep.subr.bf16.mxu1 %v19717_v29  ;;  %v19751_v28 = vld [vmem:[#allocation2 + $0x828] ss:$112 sps:$4 sm:$0xff]   ;;  %v19756_v29 = vld [vmem:[#allocation2 + $0x904] ss:$112 sps:$4 sm:$0xff]  }
 0x445   :  { %11000 = vmatpush1.bf16.msra.mxu0 %v19712_v30  ;;  %11172 = vmatpush1.bf16.msra.mxu1 %v19715_v38  ;;  %v19759_v30 = vld [vmem:[#allocation2 + $0x90c] ss:$112 sps:$4 sm:$0xff]   ;;  %v19754_v38 = vld [vmem:[#allocation2 + $0x900] ss:$112 sps:$4 sm:$0xff]  }
 0x446   :  { %11001 = vmatprep.subr.bf16.mxu0 %v19720_v39  ;;  %11173 = vmatprep.subr.bf16.mxu1 %v19723_v42  ;;  %v19757_v39 = vld [vmem:[#allocation2 + $0x908] ss:$112 sps:$4 sm:$0xff]   ;;  %v19762_v42 = vld [vmem:[#allocation2 + $0x9e4] ss:$112 sps:$4 sm:$0xff]  }
 0x449   :  { %11002 = vmatpush1.bf16.msra.mxu0 %v19718_v43  ;;  %11174 = vmatpush1.bf16.msra.mxu1 %v19721_v45  ;;  %v19765_v43 = vld [vmem:[#allocation2 + $0x9ec] ss:$112 sps:$4 sm:$0xff]   ;;  %v19760_v45 = vld [vmem:[#allocation2 + $0x9e0] ss:$112 sps:$4 sm:$0xff]  }
 0x44a   :  { %11003 = vmatprep.subr.bf16.mxu0 %v19726_v46  ;;  %11175 = vmatprep.subr.bf16.mxu1 %v19729_v57  ;;  %v19763_v46 = vld [vmem:[#allocation2 + $0x9e8] ss:$112 sps:$4 sm:$0xff]   ;;  %v19768_v57 = vld [vmem:[#allocation2 + $0xac4] ss:$112 sps:$4 sm:$0xff]  }
 0x44d   :  { %11004 = vmatpush1.bf16.msra.mxu0 %v19724_v58  ;;  %11176 = vmatpush1.bf16.msra.mxu1 %v19727_v63  ;;  %v19771_v58 = vld [vmem:[#allocation2 + $0xacc] ss:$112 sps:$4 sm:$0xff]   ;;  %v19766_v63 = vld [vmem:[#allocation2 + $0xac0] ss:$112 sps:$4 sm:$0xff]  }
 0x44e   :  { %11005 = vmatprep.subr.bf16.mxu0 %v19732_v0  ;;  %11177 = vmatprep.subr.bf16.mxu1 %v19735_v3  ;;  %v19769_v0 = vld [vmem:[#allocation2 + $0xac8] ss:$112 sps:$4 sm:$0xff]   ;;  %v19774_v3 = vld [vmem:[#allocation2 + $0xba4] ss:$112 sps:$4 sm:$0xff]  }
 0x451   :  { %11006 = vmatpush1.bf16.msra.mxu0 %v19730_v4  ;;  %11178 = vmatpush1.bf16.msra.mxu1 %v19733_v5  ;;  %v19777_v4 = vld [vmem:[#allocation2 + $0xbac] ss:$112 sps:$4 sm:$0xff]   ;;  %v19772_v5 = vld [vmem:[#allocation2 + $0xba0] ss:$112 sps:$4 sm:$0xff]  }
 0x452   :  { %11007 = vmatprep.subr.bf16.mxu0 %v19738_v6  ;;  %11179 = vmatprep.subr.bf16.mxu1 %v19741_v7  ;;  %v19775_v6 = vld [vmem:[#allocation2 + $0xba8] ss:$112 sps:$4 sm:$0xff]   ;;  %v19780_v7 = vld [vmem:[#allocation2 + $0xc84] ss:$112 sps:$4 sm:$0xff]  }
 0x455   :  { %11008 = vmatpush1.bf16.msra.mxu0 %v19736_v8  ;;  %11180 = vmatpush1.bf16.msra.mxu1 %v19739_v9  ;;  %v19783_v8 = vld [vmem:[#allocation2 + $0xc8c] ss:$112 sps:$4 sm:$0xff]   ;;  %v19778_v9 = vld [vmem:[#allocation2 + $0xc80] ss:$112 sps:$4 sm:$0xff]  }
 0x456   :  { %11009 = vmatprep.subr.bf16.mxu0 %v19744_v10  ;;  %11181 = vmatprep.subr.bf16.mxu1 %v19747_v19  ;;  %v19781_v10 = vld [vmem:[#allocation2 + $0xc88] ss:$112 sps:$4 sm:$0xff]   ;;  %v19786_v19 = vld [vmem:[#allocation2 + $0xd64] ss:$112 sps:$4 sm:$0xff]  }
 0x459   :  { %11010 = vmatpush1.bf16.msra.mxu0 %v19742_v22  ;;  %11182 = vmatpush1.bf16.msra.mxu1 %v19745_v23  ;;  %v19789_v22 = vld [vmem:[#allocation2 + $0xd6c] ss:$112 sps:$4 sm:$0xff]   ;;  %v19784_v23 = vld [vmem:[#allocation2 + $0xd60] ss:$112 sps:$4 sm:$0xff]  }
 0x45a   :  { %11011 = vmatprep.subr.bf16.mxu0 %v19750_v24  ;;  %11183 = vmatprep.subr.bf16.mxu1 %v19753_v26  ;;  %v19787_v24 = vld [vmem:[#allocation2 + $0xd68] ss:$112 sps:$4 sm:$0xff]   ;;  %v19792_v26 = vld [vmem:[#allocation2 + $0xe44] ss:$112 sps:$4 sm:$0xff]  }
 0x45d   :  { %11012 = vmatpush1.bf16.msra.mxu0 %v19748_v27  ;;  %11184 = vmatpush1.bf16.msra.mxu1 %v19751_v28  ;;  %v19795_v27 = vld [vmem:[#allocation2 + $0xe4c] ss:$112 sps:$4 sm:$0xff]   ;;  %v19790_v28 = vld [vmem:[#allocation2 + $0xe40] ss:$112 sps:$4 sm:$0xff]  }
 0x45e   :  { %11013 = vmatprep.subr.bf16.mxu0 %v19756_v29  ;;  %11185 = vmatprep.subr.bf16.mxu1 %v19759_v30  ;;  %v19793_v29 = vld [vmem:[#allocation2 + $0xe48] ss:$112 sps:$4 sm:$0xff]   ;;  %v19798_v30 = vld [vmem:[#allocation2 + $0xf24] ss:$112 sps:$4 sm:$0xff]  }
 0x461   :  { %11014 = vmatpush1.bf16.msra.mxu0 %v19754_v38  ;;  %11186 = vmatpush1.bf16.msra.mxu1 %v19757_v39  ;;  %v19801_v38 = vld [vmem:[#allocation2 + $0xf2c] ss:$112 sps:$4 sm:$0xff]  }
 0x462   :  { %11015 = vmatprep.subr.bf16.mxu0 %v19762_v42  ;;  %11187 = vmatprep.subr.bf16.mxu1 %v19765_v43  ;;  %v21383_v39 = vld [vmem:[%s21713_s0] ss:$28 sps:$4 sm:$0xff]   ;;  %v19799_v43 = vld [vmem:[#allocation2 + $0xf28] ss:$112 sps:$4 sm:$0xff]  }
 0x463   :  { %v19796_v42 = vld [vmem:[#allocation2 + $0xf20] ss:$112 sps:$4 sm:$0xff]  }
 0x465   :  { %11016 = vmatpush1.bf16.msra.mxu0 %v19760_v45  ;;  %11188 = vmatpush1.bf16.msra.mxu1 %v19763_v46  ;;  %v19804_v45 = vld [vmem:[#allocation2 + $0x1004] ss:$112 sps:$4 sm:$0xff]   ;;  %v19807_v46 = vld [vmem:[#allocation2 + $0x100c] ss:$112 sps:$4 sm:$0xff]  }
 0x466   :  { %11017 = vmatprep.subr.bf16.mxu0 %v19768_v57  ;;  %11189 = vmatprep.subr.bf16.mxu1 %v19771_v58  ;;  %v21390_v57 = vld [vmem:[%s21713_s0 + $0xc] ss:$28 sps:$4 sm:$0xff]   ;;  %v19802_v58 = vld [vmem:[#allocation2 + $0x1000] ss:$112 sps:$4 sm:$0xff]  }
 0x469   :  { %11018 = vmatpush1.bf16.msra.mxu0 %v19766_v63  ;;  %11190 = vmatpush1.bf16.msra.mxu1 %v19769_v0  ;;  %v19805_v63 = vld [vmem:[#allocation2 + $0x1008] ss:$112 sps:$4 sm:$0xff]   ;;  %v19810_v0 = vld [vmem:[#allocation2 + $0x10e4] ss:$112 sps:$4 sm:$0xff]  }
 0x46a   :  { %11019 = vmatprep.subr.bf16.mxu0 %v19774_v3  ;;  %11191 = vmatprep.subr.bf16.mxu1 %v19777_v4  ;;  %v19813_v3 = vld [vmem:[#allocation2 + $0x10ec] ss:$112 sps:$4 sm:$0xff]   ;;  %v19808_v4 = vld [vmem:[#allocation2 + $0x10e0] ss:$112 sps:$4 sm:$0xff]  }
 0x46d   :  { %11020 = vmatpush1.bf16.msra.mxu0 %v19772_v5  ;;  %11192 = vmatpush1.bf16.msra.mxu1 %v19775_v6  ;;  %v19811_v5 = vld [vmem:[#allocation2 + $0x10e8] ss:$112 sps:$4 sm:$0xff]   ;;  %v19816_v6 = vld [vmem:[#allocation2 + $0x11c4] ss:$112 sps:$4 sm:$0xff]  }
 0x46e   :  { %11021 = vmatprep.subr.bf16.mxu0 %v19780_v7  ;;  %11193 = vmatprep.subr.bf16.mxu1 %v19783_v8  ;;  %v19819_v7 = vld [vmem:[#allocation2 + $0x11cc] ss:$112 sps:$4 sm:$0xff]   ;;  %v19814_v8 = vld [vmem:[#allocation2 + $0x11c0] ss:$112 sps:$4 sm:$0xff]  }
 0x471   :  { %11022 = vmatpush1.bf16.msra.mxu0 %v19778_v9  ;;  %11194 = vmatpush1.bf16.msra.mxu1 %v19781_v10  ;;  %v19817_v9 = vld [vmem:[#allocation2 + $0x11c8] ss:$112 sps:$4 sm:$0xff]   ;;  %v19822_v10 = vld [vmem:[#allocation2 + $0x12a4] ss:$112 sps:$4 sm:$0xff]  }
 0x472   :  { %11023 = vmatprep.subr.bf16.mxu0 %v19786_v19  ;;  %11195 = vmatprep.subr.bf16.mxu1 %v19789_v22  ;;  %v19825_v19 = vld [vmem:[#allocation2 + $0x12ac] ss:$112 sps:$4 sm:$0xff]   ;;  %v19820_v22 = vld [vmem:[#allocation2 + $0x12a0] ss:$112 sps:$4 sm:$0xff]  }
 0x475   :  { %11024 = vmatpush1.bf16.msra.mxu0 %v19784_v23  ;;  %11196 = vmatpush1.bf16.msra.mxu1 %v19787_v24  ;;  %v19823_v23 = vld [vmem:[#allocation2 + $0x12a8] ss:$112 sps:$4 sm:$0xff]   ;;  %v19828_v24 = vld [vmem:[#allocation2 + $0x1384] ss:$112 sps:$4 sm:$0xff]  }
 0x476   :  { %11036 = vmatprep.subr.bf16.mxu0 %v19792_v26  ;;  %11208 = vmatprep.subr.bf16.mxu1 %v19795_v27  ;;  %v19831_v26 = vld [vmem:[#allocation2 + $0x138c] ss:$112 sps:$4 sm:$0xff]   ;;  %v19826_v27 = vld [vmem:[#allocation2 + $0x1380] ss:$112 sps:$4 sm:$0xff]  }
 0x478   :  { %11026 = vmatmul.mubr.bf16.vlgmr.msra.gmra.mrb[16].mxu0 %v21383_v39  ;;  %11198 = vmatmul.mubr.bf16.vlgmr.msra.gmra.mrb[16].mxu1 %v21383_v39 }
 0x479   :  { %11037 = vmatpush1.bf16.msra.mxu0 %v19790_v28  ;;  %11209 = vmatpush1.bf16.msra.mxu1 %v19793_v29  ;;  %v19829_v28 = vld [vmem:[#allocation2 + $0x1388] ss:$112 sps:$4 sm:$0xff]   ;;  %v19834_v29 = vld [vmem:[#allocation2 + $0x1464] ss:$112 sps:$4 sm:$0xff]  }
 0x47a   :  { %11038 = vmatprep.subr.bf16.mxu0 %v19798_v30  ;;  %11210 = vmatprep.subr.bf16.mxu1 %v19801_v38  ;;  %v19837_v30 = vld [vmem:[#allocation2 + $0x146c] ss:$112 sps:$4 sm:$0xff]   ;;  %v19832_v38 = vld [vmem:[#allocation2 + $0x1460] ss:$112 sps:$4 sm:$0xff]  }
 0x47b   :  { %11068 = vmatprep.mubr.bf16.mxu0 %v21390_v57  ;;  %11240 = vmatprep.mubr.bf16.mxu1 %v21390_v57 }
 0x47d   :  { %11039 = vmatpush1.bf16.msra.mxu0 %v19796_v42  ;;  %11211 = vmatpush1.bf16.msra.mxu1 %v19799_v43  ;;  %v19835_v42 = vld [vmem:[#allocation2 + $0x1468] ss:$112 sps:$4 sm:$0xff]   ;;  %v19840_v43 = vld [vmem:[#allocation2 + $0x1544] ss:$112 sps:$4 sm:$0xff]  }
 0x47e   :  { %11040 = vmatprep.subr.bf16.mxu0 %v19804_v45  ;;  %11212 = vmatprep.subr.bf16.mxu1 %v19807_v46  ;;  %v19843_v45 = vld [vmem:[#allocation2 + $0x154c] ss:$112 sps:$4 sm:$0xff]   ;;  %v19838_v46 = vld [vmem:[#allocation2 + $0x1540] ss:$112 sps:$4 sm:$0xff]  }
 0x481   :  { %11041 = vmatpush1.bf16.msra.mxu0 %v19802_v58  ;;  %11213 = vmatpush1.bf16.msra.mxu1 %v19805_v63  ;;  %v19841_v58 = vld [vmem:[#allocation2 + $0x1548] ss:$112 sps:$4 sm:$0xff]   ;;  %v19846_v63 = vld [vmem:[#allocation2 + $0x1624] ss:$112 sps:$4 sm:$0xff]  }
 0x482   :  { %11042 = vmatprep.subr.bf16.mxu0 %v19810_v0  ;;  %11214 = vmatprep.subr.bf16.mxu1 %v19813_v3  ;;  %v19849_v0 = vld [vmem:[#allocation2 + $0x162c] ss:$112 sps:$4 sm:$0xff]   ;;  %v19844_v3 = vld [vmem:[#allocation2 + $0x1620] ss:$112 sps:$4 sm:$0xff]  }
 0x485   :  { %11043 = vmatpush1.bf16.msra.mxu0 %v19808_v4  ;;  %11215 = vmatpush1.bf16.msra.mxu1 %v19811_v5  ;;  %v19847_v4 = vld [vmem:[#allocation2 + $0x1628] ss:$112 sps:$4 sm:$0xff]   ;;  %v19852_v5 = vld [vmem:[#allocation2 + $0x1704] ss:$112 sps:$4 sm:$0xff]  }
 0x486   :  { %11044 = vmatprep.subr.bf16.mxu0 %v19816_v6  ;;  %11216 = vmatprep.subr.bf16.mxu1 %v19819_v7  ;;  %v19855_v6 = vld [vmem:[#allocation2 + $0x170c] ss:$112 sps:$4 sm:$0xff]   ;;  %v19850_v7 = vld [vmem:[#allocation2 + $0x1700] ss:$112 sps:$4 sm:$0xff]  }
 0x489   :  { %11045 = vmatpush1.bf16.msra.mxu0 %v19814_v8  ;;  %11217 = vmatpush1.bf16.msra.mxu1 %v19817_v9  ;;  %v19853_v8 = vld [vmem:[#allocation2 + $0x1708] ss:$112 sps:$4 sm:$0xff]   ;;  %v19858_v9 = vld [vmem:[#allocation2 + $0x17e4] ss:$112 sps:$4 sm:$0xff]  }
 0x48a   :  { %11046 = vmatprep.subr.bf16.mxu0 %v19822_v10  ;;  %11218 = vmatprep.subr.bf16.mxu1 %v19825_v19  ;;  %v19861_v10 = vld [vmem:[#allocation2 + $0x17ec] ss:$112 sps:$4 sm:$0xff]   ;;  %v19856_v19 = vld [vmem:[#allocation2 + $0x17e0] ss:$112 sps:$4 sm:$0xff]  }
 0x48d   :  { %11047 = vmatpush1.bf16.msra.mxu0 %v19820_v22  ;;  %11219 = vmatpush1.bf16.msra.mxu1 %v19823_v23  ;;  %v19859_v22 = vld [vmem:[#allocation2 + $0x17e8] ss:$112 sps:$4 sm:$0xff]   ;;  %v19864_v23 = vld [vmem:[#allocation2 + $0x18c4] ss:$112 sps:$4 sm:$0xff]  }
 0x48e   :  { %11048 = vmatprep.subr.bf16.mxu0 %v19828_v24  ;;  %11220 = vmatprep.subr.bf16.mxu1 %v19831_v26  ;;  %v19867_v24 = vld [vmem:[#allocation2 + $0x18cc] ss:$112 sps:$4 sm:$0xff]   ;;  %v19862_v26 = vld [vmem:[#allocation2 + $0x18c0] ss:$112 sps:$4 sm:$0xff]  }
 0x491   :  { %11049 = vmatpush1.bf16.msra.mxu0 %v19826_v27  ;;  %11221 = vmatpush1.bf16.msra.mxu1 %v19829_v28  ;;  %v19865_v27 = vld [vmem:[#allocation2 + $0x18c8] ss:$112 sps:$4 sm:$0xff]   ;;  %v19870_v28 = vld [vmem:[#allocation2 + $0x19a4] ss:$112 sps:$4 sm:$0xff]  }
 0x492   :  { %11050 = vmatprep.subr.bf16.mxu0 %v19834_v29  ;;  %11222 = vmatprep.subr.bf16.mxu1 %v19837_v30  ;;  %v19873_v29 = vld [vmem:[#allocation2 + $0x19ac] ss:$112 sps:$4 sm:$0xff]   ;;  %v19868_v30 = vld [vmem:[#allocation2 + $0x19a0] ss:$112 sps:$4 sm:$0xff]  }
 0x495   :  { %11051 = vmatpush1.bf16.msra.mxu0 %v19832_v38  ;;  %11223 = vmatpush1.bf16.msra.mxu1 %v19835_v42  ;;  %v19871_v38 = vld [vmem:[#allocation2 + $0x19a8] ss:$112 sps:$4 sm:$0xff]   ;;  %v19876_v42 = vld [vmem:[#allocation2 + $0x1a84] ss:$112 sps:$4 sm:$0xff]  }
 0x496   :  { %11052 = vmatprep.subr.bf16.mxu0 %v19840_v43  ;;  %11224 = vmatprep.subr.bf16.mxu1 %v19843_v45  ;;  %v19879_v43 = vld [vmem:[#allocation2 + $0x1a8c] ss:$112 sps:$4 sm:$0xff]   ;;  %v19874_v45 = vld [vmem:[#allocation2 + $0x1a80] ss:$112 sps:$4 sm:$0xff]  }
 0x499   :  { %11053 = vmatpush1.bf16.msra.mxu0 %v19838_v46  ;;  %11225 = vmatpush1.bf16.msra.mxu1 %v19841_v58  ;;  %v19877_v46 = vld [vmem:[#allocation2 + $0x1a88] ss:$112 sps:$4 sm:$0xff]   ;;  %v19882_v58 = vld [vmem:[#allocation2 + $0x1b64] ss:$112 sps:$4 sm:$0xff]  }
 0x49a   :  { %11054 = vmatprep.subr.bf16.mxu0 %v19846_v63  ;;  %11226 = vmatprep.subr.bf16.mxu1 %v19849_v0  ;;  %v19885_v63 = vld [vmem:[#allocation2 + $0x1b6c] ss:$112 sps:$4 sm:$0xff]   ;;  %v19880_v0 = vld [vmem:[#allocation2 + $0x1b60] ss:$112 sps:$4 sm:$0xff]  }
 0x49d   :  { %11055 = vmatpush1.bf16.msra.mxu0 %v19844_v3  ;;  %11227 = vmatpush1.bf16.msra.mxu1 %v19847_v4  ;;  %v19883_v3 = vld [vmem:[#allocation2 + $0x1b68] ss:$112 sps:$4 sm:$0xff]   ;;  %v19888_v4 = vld [vmem:[#allocation2 + $0x1c44] ss:$112 sps:$4 sm:$0xff]  }
 0x49e   :  { %11056 = vmatprep.subr.bf16.mxu0 %v19852_v5  ;;  %11228 = vmatprep.subr.bf16.mxu1 %v19855_v6  ;;  %v19891_v5 = vld [vmem:[#allocation2 + $0x1c4c] ss:$112 sps:$4 sm:$0xff]   ;;  %v19886_v6 = vld [vmem:[#allocation2 + $0x1c40] ss:$112 sps:$4 sm:$0xff]  }
 0x4a1   :  { %11057 = vmatpush1.bf16.msra.mxu0 %v19850_v7  ;;  %11229 = vmatpush1.bf16.msra.mxu1 %v19853_v8  ;;  %v19889_v7 = vld [vmem:[#allocation2 + $0x1c48] ss:$112 sps:$4 sm:$0xff]   ;;  %v19894_v8 = vld [vmem:[#allocation2 + $0x1d24] ss:$112 sps:$4 sm:$0xff]  }
 0x4a2   :  { %11058 = vmatprep.subr.bf16.mxu0 %v19858_v9  ;;  %11230 = vmatprep.subr.bf16.mxu1 %v19861_v10  ;;  %v19897_v9 = vld [vmem:[#allocation2 + $0x1d2c] ss:$112 sps:$4 sm:$0xff]   ;;  %v21397_v10 = vld [vmem:[%s21713_s0 + $0x8] ss:$28 sps:$4 sm:$0xff]  }
 0x4a5   :  { %11059 = vmatpush1.bf16.msra.mxu0 %v19856_v19  ;;  %11231 = vmatpush1.bf16.msra.mxu1 %v19859_v22  ;;  %v19892_v19 = vld [vmem:[#allocation2 + $0x1d20] ss:$112 sps:$4 sm:$0xff]   ;;  %v19895_v22 = vld [vmem:[#allocation2 + $0x1d28] ss:$112 sps:$4 sm:$0xff]  }
 0x4a6   :  { %11060 = vmatprep.subr.bf16.mxu0 %v19864_v23  ;;  %11232 = vmatprep.subr.bf16.mxu1 %v19867_v24  ;;  %v19900_v23 = vld [vmem:[#allocation2 + $0x1e04] ss:$112 sps:$4 sm:$0xff]   ;;  %v19903_v24 = vld [vmem:[#allocation2 + $0x1e0c] ss:$112 sps:$4 sm:$0xff]  }
 0x4a9   :  { %11061 = vmatpush1.bf16.msra.mxu0 %v19862_v26  ;;  %11233 = vmatpush1.bf16.msra.mxu1 %v19865_v27  ;;  %v21404_v26 = vld [vmem:[%s21713_s0 + $0x14] ss:$28 sps:$4 sm:$0xff]  }
 0x4aa   :  { %11062 = vmatprep.subr.bf16.mxu0 %v19870_v28  ;;  %11234 = vmatprep.subr.bf16.mxu1 %v19873_v29  ;;  %v19898_v27 = vld [vmem:[#allocation2 + $0x1e00] ss:$112 sps:$4 sm:$0xff]   ;;  %v19901_v28 = vld [vmem:[#allocation2 + $0x1e08] ss:$112 sps:$4 sm:$0xff]   ;;  %v19906_v29 = vld [vmem:[#allocation2 + $0x1ee4] ss:$112 sps:$4 sm:$0xff]  }
 0x4ad   :  { %11063 = vmatpush1.bf16.msra.mxu0 %v19868_v30  ;;  %11235 = vmatpush1.bf16.msra.mxu1 %v19871_v38  ;;  %v19909_v30 = vld [vmem:[#allocation2 + $0x1eec] ss:$112 sps:$4 sm:$0xff]   ;;  %v19904_v38 = vld [vmem:[#allocation2 + $0x1ee0] ss:$112 sps:$4 sm:$0xff]  }
 0x4ae   :  { %11064 = vmatprep.subr.bf16.mxu0 %v19876_v42  ;;  %11236 = vmatprep.subr.bf16.mxu1 %v19879_v43  ;;  %v19907_v42 = vld [vmem:[#allocation2 + $0x1ee8] ss:$112 sps:$4 sm:$0xff]   ;;  %v19912_v43 = vld [vmem:[#allocation2 + $0x1fc4] ss:$112 sps:$4 sm:$0xff]  }
 0x4b1   :  { %11065 = vmatpush1.bf16.msra.mxu0 %v19874_v45  ;;  %11237 = vmatpush1.bf16.msra.mxu1 %v19877_v46  ;;  %v19915_v45 = vld [vmem:[#allocation2 + $0x1fcc] ss:$112 sps:$4 sm:$0xff]   ;;  %v19910_v46 = vld [vmem:[#allocation2 + $0x1fc0] ss:$112 sps:$4 sm:$0xff]  }
 0x4b2   :  { %11066 = vmatprep.subr.bf16.mxu0 %v19882_v58  ;;  %11238 = vmatprep.subr.bf16.mxu1 %v19885_v63  ;;  %v19913_v58 = vld [vmem:[#allocation2 + $0x1fc8] ss:$112 sps:$4 sm:$0xff]   ;;  %v19918_v63 = vld [vmem:[#allocation2 + $0x20a4] ss:$112 sps:$4 sm:$0xff]  }
 0x4b5   :  { %11067 = vmatpush1.bf16.msra.mxu0 %v19880_v0  ;;  %11239 = vmatpush1.bf16.msra.mxu1 %v19883_v3  ;;  %v19921_v0 = vld [vmem:[#allocation2 + $0x20ac] ss:$112 sps:$4 sm:$0xff]   ;;  %v19916_v3 = vld [vmem:[#allocation2 + $0x20a0] ss:$112 sps:$4 sm:$0xff]  }
 0x4b6   :  { %11079 = vmatprep.subr.bf16.mxu0 %v19888_v4  ;;  %11251 = vmatprep.subr.bf16.mxu1 %v19891_v5  ;;  %v19919_v4 = vld [vmem:[#allocation2 + $0x20a8] ss:$112 sps:$4 sm:$0xff]   ;;  %v19924_v5 = vld [vmem:[#allocation2 + $0x2184] ss:$112 sps:$4 sm:$0xff]  }
 0x4b8   :  { %11069 = vmatmul.mubr.bf16.vlgmr.msra.gmra.mrb[16].mxu0 %v21397_v10  ;;  %11241 = vmatmul.mubr.bf16.vlgmr.msra.gmra.mrb[16].mxu1 %v21397_v10 }
 0x4b9   :  { %11080 = vmatpush1.bf16.msra.mxu0 %v19886_v6  ;;  %11252 = vmatpush1.bf16.msra.mxu1 %v19889_v7  ;;  %v19927_v6 = vld [vmem:[#allocation2 + $0x218c] ss:$112 sps:$4 sm:$0xff]   ;;  %v19922_v7 = vld [vmem:[#allocation2 + $0x2180] ss:$112 sps:$4 sm:$0xff]  }
 0x4ba   :  { %11081 = vmatprep.subr.bf16.mxu0 %v19894_v8  ;;  %11253 = vmatprep.subr.bf16.mxu1 %v19897_v9  ;;  %v19925_v8 = vld [vmem:[#allocation2 + $0x2188] ss:$112 sps:$4 sm:$0xff]   ;;  %v19930_v9 = vld [vmem:[#allocation2 + $0x2264] ss:$112 sps:$4 sm:$0xff]  }
 0x4bb   :  { %11111 = vmatprep.mubr.bf16.mxu0 %v21404_v26  ;;  %11283 = vmatprep.mubr.bf16.mxu1 %v21404_v26 }
 0x4bd   :  { %11082 = vmatpush1.bf16.msra.mxu0 %v19892_v19  ;;  %11254 = vmatpush1.bf16.msra.mxu1 %v19895_v22  ;;  %v19933_v19 = vld [vmem:[#allocation2 + $0x226c] ss:$112 sps:$4 sm:$0xff]   ;;  %v19928_v22 = vld [vmem:[#allocation2 + $0x2260] ss:$112 sps:$4 sm:$0xff]  }
 0x4be   :  { %11083 = vmatprep.subr.bf16.mxu0 %v19900_v23  ;;  %11255 = vmatprep.subr.bf16.mxu1 %v19903_v24  ;;  %v19931_v23 = vld [vmem:[#allocation2 + $0x2268] ss:$112 sps:$4 sm:$0xff]   ;;  %v19936_v24 = vld [vmem:[#allocation2 + $0x2344] ss:$112 sps:$4 sm:$0xff]  }
 0x4c1   :  { %11084 = vmatpush1.bf16.msra.mxu0 %v19898_v27  ;;  %11256 = vmatpush1.bf16.msra.mxu1 %v19901_v28  ;;  %v19939_v27 = vld [vmem:[#allocation2 + $0x234c] ss:$112 sps:$4 sm:$0xff]   ;;  %v19934_v28 = vld [vmem:[#allocation2 + $0x2340] ss:$112 sps:$4 sm:$0xff]  }
 0x4c2   :  { %11085 = vmatprep.subr.bf16.mxu0 %v19906_v29  ;;  %11257 = vmatprep.subr.bf16.mxu1 %v19909_v30  ;;  %v19937_v29 = vld [vmem:[#allocation2 + $0x2348] ss:$112 sps:$4 sm:$0xff]   ;;  %v19942_v30 = vld [vmem:[#allocation2 + $0x2424] ss:$112 sps:$4 sm:$0xff]  }
 0x4c5   :  { %11086 = vmatpush1.bf16.msra.mxu0 %v19904_v38  ;;  %11258 = vmatpush1.bf16.msra.mxu1 %v19907_v42  ;;  %v19945_v38 = vld [vmem:[#allocation2 + $0x242c] ss:$112 sps:$4 sm:$0xff]   ;;  %v19940_v42 = vld [vmem:[#allocation2 + $0x2420] ss:$112 sps:$4 sm:$0xff]  }
 0x4c6   :  { %11087 = vmatprep.subr.bf16.mxu0 %v19912_v43  ;;  %11259 = vmatprep.subr.bf16.mxu1 %v19915_v45  ;;  %v19943_v43 = vld [vmem:[#allocation2 + $0x2428] ss:$112 sps:$4 sm:$0xff]   ;;  %v19948_v45 = vld [vmem:[#allocation2 + $0x2504] ss:$112 sps:$4 sm:$0xff]  }
 0x4c9   :  { %11088 = vmatpush1.bf16.msra.mxu0 %v19910_v46  ;;  %11260 = vmatpush1.bf16.msra.mxu1 %v19913_v58  ;;  %v19951_v46 = vld [vmem:[#allocation2 + $0x250c] ss:$112 sps:$4 sm:$0xff]   ;;  %v19946_v58 = vld [vmem:[#allocation2 + $0x2500] ss:$112 sps:$4 sm:$0xff]  }
 0x4ca   :  { %11089 = vmatprep.subr.bf16.mxu0 %v19918_v63  ;;  %11261 = vmatprep.subr.bf16.mxu1 %v19921_v0  ;;  %v19949_v63 = vld [vmem:[#allocation2 + $0x2508] ss:$112 sps:$4 sm:$0xff]   ;;  %v19954_v0 = vld [vmem:[#allocation2 + $0x25e4] ss:$112 sps:$4 sm:$0xff]  }
 0x4cd   :  { %11090 = vmatpush1.bf16.msra.mxu0 %v19916_v3  ;;  %11262 = vmatpush1.bf16.msra.mxu1 %v19919_v4  ;;  %v19957_v3 = vld [vmem:[#allocation2 + $0x25ec] ss:$112 sps:$4 sm:$0xff]   ;;  %v19952_v4 = vld [vmem:[#allocation2 + $0x25e0] ss:$112 sps:$4 sm:$0xff]  }
 0x4ce   :  { %11091 = vmatprep.subr.bf16.mxu0 %v19924_v5  ;;  %11263 = vmatprep.subr.bf16.mxu1 %v19927_v6  ;;  %v19955_v5 = vld [vmem:[#allocation2 + $0x25e8] ss:$112 sps:$4 sm:$0xff]   ;;  %v19960_v6 = vld [vmem:[#allocation2 + $0x26c4] ss:$112 sps:$4 sm:$0xff]  }
 0x4d1   :  { %11092 = vmatpush1.bf16.msra.mxu0 %v19922_v7  ;;  %11264 = vmatpush1.bf16.msra.mxu1 %v19925_v8  ;;  %v19963_v7 = vld [vmem:[#allocation2 + $0x26cc] ss:$112 sps:$4 sm:$0xff]   ;;  %v19958_v8 = vld [vmem:[#allocation2 + $0x26c0] ss:$112 sps:$4 sm:$0xff]  }
 0x4d2   :  { %11093 = vmatprep.subr.bf16.mxu0 %v19930_v9  ;;  %11265 = vmatprep.subr.bf16.mxu1 %v19933_v19  ;;  %v19961_v9 = vld [vmem:[#allocation2 + $0x26c8] ss:$112 sps:$4 sm:$0xff]   ;;  %v19966_v19 = vld [vmem:[#allocation2 + $0x27a4] ss:$112 sps:$4 sm:$0xff]  }
 0x4d5   :  { %11094 = vmatpush1.bf16.msra.mxu0 %v19928_v22  ;;  %11266 = vmatpush1.bf16.msra.mxu1 %v19931_v23  ;;  %v19969_v22 = vld [vmem:[#allocation2 + $0x27ac] ss:$112 sps:$4 sm:$0xff]   ;;  %v19964_v23 = vld [vmem:[#allocation2 + $0x27a0] ss:$112 sps:$4 sm:$0xff]  }
 0x4d6   :  { %11095 = vmatprep.subr.bf16.mxu0 %v19936_v24  ;;  %11267 = vmatprep.subr.bf16.mxu1 %v19939_v27  ;;  %v19967_v24 = vld [vmem:[#allocation2 + $0x27a8] ss:$112 sps:$4 sm:$0xff]   ;;  %v19972_v27 = vld [vmem:[#allocation2 + $0x2884] ss:$112 sps:$4 sm:$0xff]  }
 0x4d9   :  { %11096 = vmatpush1.bf16.msra.mxu0 %v19934_v28  ;;  %11268 = vmatpush1.bf16.msra.mxu1 %v19937_v29  ;;  %v19975_v28 = vld [vmem:[#allocation2 + $0x288c] ss:$112 sps:$4 sm:$0xff]   ;;  %v19970_v29 = vld [vmem:[#allocation2 + $0x2880] ss:$112 sps:$4 sm:$0xff]  }
 0x4da   :  { %11097 = vmatprep.subr.bf16.mxu0 %v19942_v30  ;;  %11269 = vmatprep.subr.bf16.mxu1 %v19945_v38  ;;  %v19973_v30 = vld [vmem:[#allocation2 + $0x2888] ss:$112 sps:$4 sm:$0xff]   ;;  %v19978_v38 = vld [vmem:[#allocation2 + $0x2964] ss:$112 sps:$4 sm:$0xff]  }
 0x4dd   :  { %11098 = vmatpush1.bf16.msra.mxu0 %v19940_v42  ;;  %11270 = vmatpush1.bf16.msra.mxu1 %v19943_v43  ;;  %v19981_v42 = vld [vmem:[#allocation2 + $0x296c] ss:$112 sps:$4 sm:$0xff]   ;;  %v19976_v43 = vld [vmem:[#allocation2 + $0x2960] ss:$112 sps:$4 sm:$0xff]  }
 0x4de   :  { %11099 = vmatprep.subr.bf16.mxu0 %v19948_v45  ;;  %11271 = vmatprep.subr.bf16.mxu1 %v19951_v46  ;;  %v19979_v45 = vld [vmem:[#allocation2 + $0x2968] ss:$112 sps:$4 sm:$0xff]   ;;  %v19984_v46 = vld [vmem:[#allocation2 + $0x2a44] ss:$112 sps:$4 sm:$0xff]  }
 0x4e1   :  { %11100 = vmatpush1.bf16.msra.mxu0 %v19946_v58  ;;  %11272 = vmatpush1.bf16.msra.mxu1 %v19949_v63  ;;  %v19987_v58 = vld [vmem:[#allocation2 + $0x2a4c] ss:$112 sps:$4 sm:$0xff]   ;;  %v19982_v63 = vld [vmem:[#allocation2 + $0x2a40] ss:$112 sps:$4 sm:$0xff]  }
 0x4e2   :  { %11101 = vmatprep.subr.bf16.mxu0 %v19954_v0  ;;  %11273 = vmatprep.subr.bf16.mxu1 %v19957_v3  ;;  %v19985_v0 = vld [vmem:[#allocation2 + $0x2a48] ss:$112 sps:$4 sm:$0xff]   ;;  %v19990_v3 = vld [vmem:[#allocation2 + $0x2b24] ss:$112 sps:$4 sm:$0xff]  }
 0x4e5   :  { %11102 = vmatpush1.bf16.msra.mxu0 %v19952_v4  ;;  %11274 = vmatpush1.bf16.msra.mxu1 %v19955_v5  ;;  %v19993_v4 = vld [vmem:[#allocation2 + $0x2b2c] ss:$112 sps:$4 sm:$0xff]  }
 0x4e6   :  { %11103 = vmatprep.subr.bf16.mxu0 %v19960_v6  ;;  %11275 = vmatprep.subr.bf16.mxu1 %v19963_v7  ;;  %v21411_v5 = vld [vmem:[%s21713_s0 + $0x10] ss:$28 sps:$4 sm:$0xff]   ;;  %v19991_v7 = vld [vmem:[#allocation2 + $0x2b28] ss:$112 sps:$4 sm:$0xff]  }
 0x4e7   :  { %v19988_v6 = vld [vmem:[#allocation2 + $0x2b20] ss:$112 sps:$4 sm:$0xff]  }
 0x4e9   :  { %11104 = vmatpush1.bf16.msra.mxu0 %v19958_v8  ;;  %11276 = vmatpush1.bf16.msra.mxu1 %v19961_v9  ;;  %v19996_v8 = vld [vmem:[#allocation2 + $0x2c04] ss:$112 sps:$4 sm:$0xff]   ;;  %v19999_v9 = vld [vmem:[#allocation2 + $0x2c0c] ss:$112 sps:$4 sm:$0xff]  }
 0x4ea   :  { %11105 = vmatprep.subr.bf16.mxu0 %v19966_v19  ;;  %11277 = vmatprep.subr.bf16.mxu1 %v19969_v22  ;;  %v19994_v19 = vld [vmem:[#allocation2 + $0x2c00] ss:$112 sps:$4 sm:$0xff]   ;;  %v19997_v22 = vld [vmem:[#allocation2 + $0x2c08] ss:$112 sps:$4 sm:$0xff]  }
 0x4ed   :  { %11106 = vmatpush1.bf16.msra.mxu0 %v19964_v23  ;;  %11278 = vmatpush1.bf16.msra.mxu1 %v19967_v24  ;;  %v20002_v23 = vld [vmem:[#allocation2 + $0x2ce4] ss:$112 sps:$4 sm:$0xff]   ;;  %v20005_v24 = vld [vmem:[#allocation2 + $0x2cec] ss:$112 sps:$4 sm:$0xff]  }
 0x4ee   :  { %11107 = vmatprep.subr.bf16.mxu0 %v19972_v27  ;;  %11279 = vmatprep.subr.bf16.mxu1 %v19975_v28  ;;  %v20000_v27 = vld [vmem:[#allocation2 + $0x2ce0] ss:$112 sps:$4 sm:$0xff]   ;;  %v20003_v28 = vld [vmem:[#allocation2 + $0x2ce8] ss:$112 sps:$4 sm:$0xff]  }
 0x4f1   :  { %11108 = vmatpush1.bf16.msra.mxu0 %v19970_v29  ;;  %11280 = vmatpush1.bf16.msra.mxu1 %v19973_v30  ;;  %v20008_v29 = vld [vmem:[#allocation2 + $0x2dc4] ss:$112 sps:$4 sm:$0xff]   ;;  %v20011_v30 = vld [vmem:[#allocation2 + $0x2dcc] ss:$112 sps:$4 sm:$0xff]  }
 0x4f2   :  { %11109 = vmatprep.subr.bf16.mxu0 %v19978_v38  ;;  %11281 = vmatprep.subr.bf16.mxu1 %v19981_v42  ;;  %v20006_v38 = vld [vmem:[#allocation2 + $0x2dc0] ss:$112 sps:$4 sm:$0xff]   ;;  %v20009_v42 = vld [vmem:[#allocation2 + $0x2dc8] ss:$112 sps:$4 sm:$0xff]  }
 0x4f5   :  { %11110 = vmatpush1.bf16.msra.mxu0 %v19976_v43  ;;  %11282 = vmatpush1.bf16.msra.mxu1 %v19979_v45  ;;  %v20014_v43 = vld [vmem:[#allocation2 + $0x2ea4] ss:$112 sps:$4 sm:$0xff]   ;;  %v20017_v45 = vld [vmem:[#allocation2 + $0x2eac] ss:$112 sps:$4 sm:$0xff]  }
 0x4f6   :  { %11122 = vmatprep.subr.bf16.mxu0 %v19984_v46  ;;  %11294 = vmatprep.subr.bf16.mxu1 %v19987_v58  ;;  %v20012_v46 = vld [vmem:[#allocation2 + $0x2ea0] ss:$112 sps:$4 sm:$0xff]   ;;  %v20015_v58 = vld [vmem:[#allocation2 + $0x2ea8] ss:$112 sps:$4 sm:$0xff]  }
 0x4f8   :  { %11112 = vmatmul.mubr.bf16.vlgmr.msra.gmra.mrb[16].mxu0 %v21411_v5  ;;  %11284 = vmatmul.mubr.bf16.vlgmr.msra.gmra.mrb[16].mxu1 %v21411_v5 }
 0x4f9   :  { %11123 = vmatpush1.bf16.msra.mxu0 %v19982_v63  ;;  %11295 = vmatpush1.bf16.msra.mxu1 %v19985_v0  ;;  %v20020_v63 = vld [vmem:[#allocation2 + $0x2f84] ss:$112 sps:$4 sm:$0xff]   ;;  %v20023_v0 = vld [vmem:[#allocation2 + $0x2f8c] ss:$112 sps:$4 sm:$0xff]  }
 0x4fa   :  { %11124 = vmatprep.subr.bf16.mxu0 %v19990_v3  ;;  %11296 = vmatprep.subr.bf16.mxu1 %v19993_v4 }
 0x4fb   :  { %11154 = vmatprep.mubr.bf16.mxu0 %v21725_v16  ;;  %11326 = vmatprep.mubr.bf16.mxu1 %v21725_v16 }
 0x4fd   :  { %11125 = vmatpush1.bf16.msra.mxu0 %v19988_v6  ;;  %11297 = vmatpush1.bf16.msra.mxu1 %v19991_v7 }
 0x4fe   :  { %11126 = vmatprep.subr.bf16.mxu0 %v19996_v8  ;;  %11298 = vmatprep.subr.bf16.mxu1 %v19999_v9  ;;  %v20377_v9 = vld [vmem:[#allocation2 + $0x14c] ss:$112 sps:$4 sm:$0xff]  }
 0x501   :  { %11127 = vmatpush1.bf16.msra.mxu0 %v19994_v19  ;;  %11299 = vmatpush1.bf16.msra.mxu1 %v19997_v22 }
 0x502   :  { %11128 = vmatprep.subr.bf16.mxu0 %v20002_v23  ;;  %11300 = vmatprep.subr.bf16.mxu1 %v20005_v24  ;;  %v20018_v23 = vld [vmem:[#allocation2 + $0x2f80] ss:$112 sps:$4 sm:$0xff]   ;;  %v20021_v24 = vld [vmem:[#allocation2 + $0x2f88] ss:$112 sps:$4 sm:$0xff]  }
 0x505   :  { %11129 = vmatpush1.bf16.msra.mxu0 %v20000_v27  ;;  %11301 = vmatpush1.bf16.msra.mxu1 %v20003_v28  ;;  %v20033_v27 = vld [vmem:[#allocation2 + $0x58] ss:$112 sps:$4 sm:$0xff]  }
 0x506   :  { %11130 = vmatprep.subr.bf16.mxu0 %v20008_v29  ;;  %11302 = vmatprep.subr.bf16.mxu1 %v20011_v30  ;;  %v20026_v30 = vld [vmem:[#allocation2 + $0x3064] ss:$112 sps:$4 sm:$0xff]  }
 0x509   :  { %11131 = vmatpush1.bf16.msra.mxu0 %v20006_v38  ;;  %11303 = vmatpush1.bf16.msra.mxu1 %v20009_v42  ;;  %v20029_v38 = vld [vmem:[#allocation2 + $0x306c] ss:$112 sps:$4 sm:$0xff]  }
 0x50a   :  { %11132 = vmatprep.subr.bf16.mxu0 %v20014_v43  ;;  %11304 = vmatprep.subr.bf16.mxu1 %v20017_v45  ;;  %v20024_v43 = vld [vmem:[#allocation2 + $0x3060] ss:$112 sps:$4 sm:$0xff]   ;;  %v20027_v45 = vld [vmem:[#allocation2 + $0x3068] ss:$112 sps:$4 sm:$0xff]   ;;  %v20371_v42 = vld [vmem:[#allocation2 + $0x6c] ss:$112 sps:$4 sm:$0xff]  }
 0x50b   :  { %v21417_v3 = vpop.f32.mrb[12].mxu0  ;;  %v21419_v4 = vpop.f32.mrb[12].mxu1 }
 0x50c   :  { %v21423_v7 = vpop.f32.mrb[13].mxu0  ;;  %v21425_v8 = vpop.f32.mrb[13].mxu1 }
 0x50d   :  { %v21429_v19 = vpop.f32.mrb[14].mxu0  ;;  %v21431_v22 = vpop.f32.mrb[14].mxu1  ;;  %11133 = vmatpush1.bf16.msra.mxu0 %v20012_v46  ;;  %11305 = vmatpush1.bf16.msra.mxu1 %v20015_v58  ;;  %v20032_v46 = vld [vmem:[#allocation2 + $0x54] ss:$112 sps:$4 sm:$0xff]   ;;  %v20035_v58 = vld [vmem:[#allocation2 + $0x5c] ss:$112 sps:$4 sm:$0xff]  }
 0x50e   :  { %v21435_v28 = vpop.f32.mrb[15].mxu0  ;;  %v21437_v29 = vpop.f32.mrb[15].mxu1  ;;  %11134 = vmatprep.subr.bf16.mxu0 %v20020_v63  ;;  %11306 = vmatprep.subr.bf16.mxu1 %v20023_v0  ;;  %v20038_v63 = vld [vmem:[#allocation2 + $0x134] ss:$112 sps:$4 sm:$0xff]   ;;  %v20041_v0 = vld [vmem:[#allocation2 + $0x13c] ss:$112 sps:$4 sm:$0xff]  }
 0x511   :  { %11135 = vmatpush1.bf16.msra.mxu0 %v20018_v23  ;;  %11307 = vmatpush1.bf16.msra.mxu1 %v20021_v24  ;;  %v20036_v23 = vld [vmem:[#allocation2 + $0x130] ss:$112 sps:$4 sm:$0xff]   ;;  %v20039_v24 = vld [vmem:[#allocation2 + $0x138] ss:$112 sps:$4 sm:$0xff]  }
 0x512   :  { %11136 = vmatprep.subr.bf16.mxu0 %v20026_v30  ;;  %11308 = vmatprep.subr.bf16.mxu1 %v20029_v38  ;;  %v20044_v30 = vld [vmem:[#allocation2 + $0x214] ss:$112 sps:$4 sm:$0xff]   ;;  %v20047_v38 = vld [vmem:[#allocation2 + $0x21c] ss:$112 sps:$4 sm:$0xff]  }
 0x515   :  { %11137 = vmatpush1.bf16.msra.mxu0 %v20024_v43  ;;  %11309 = vmatpush1.bf16.msra.mxu1 %v20027_v45  ;;  %v20042_v43 = vld [vmem:[#allocation2 + $0x210] ss:$112 sps:$4 sm:$0xff]   ;;  %v20045_v45 = vld [vmem:[#allocation2 + $0x218] ss:$112 sps:$4 sm:$0xff]  }
 0x516   :  { %11337 = vmatprep.subr.bf16.mxu0 %v20032_v46  ;;  %11509 = vmatprep.subr.bf16.mxu1 %v20035_v58  ;;  %v20050_v46 = vld [vmem:[#allocation2 + $0x2f4] ss:$112 sps:$4 sm:$0xff]  }
 0x517   :  { %v20056_v58 = vld [vmem:[#allocation2 + $0x3d4] ss:$112 sps:$4 sm:$0xff]  }
 0x518   :  { %11155 = vmatmul.mubr.bf16.vlgmr.msra.gmra.mrb[16].mxu0 %v21369_v18  ;;  %11327 = vmatmul.mubr.bf16.vlgmr.msra.gmra.mrb[16].mxu1 %v21369_v18  ;;  %v20053_v18 = vld [vmem:[#allocation2 + $0x2fc] ss:$112 sps:$4 sm:$0xff]  }
 0x519   :  { %11338 = vmatpush1.bf16.msra.mxu0 %v20030_v2  ;;  %11510 = vmatpush1.bf16.msra.mxu1 %v20033_v27  ;;  %v20048_v2 = vld [vmem:[#allocation2 + $0x2f0] ss:$112 sps:$4 sm:$0xff]   ;;  %v20051_v27 = vld [vmem:[#allocation2 + $0x2f8] ss:$112 sps:$4 sm:$0xff]  }
 0x51a   :  { %11339 = vmatprep.subr.bf16.mxu0 %v20038_v63  ;;  %11511 = vmatprep.subr.bf16.mxu1 %v20041_v0  ;;  %v20059_v63 = vld [vmem:[#allocation2 + $0x3dc] ss:$112 sps:$4 sm:$0xff]   ;;  %v20054_v0 = vld [vmem:[#allocation2 + $0x3d0] ss:$112 sps:$4 sm:$0xff]  }
 0x51b   :  { %11369 = vmatprep.mubr.bf16.mxu0 %v21376_v25  ;;  %11541 = vmatprep.mubr.bf16.mxu1 %v21376_v25  ;;  %v20057_v25 = vld [vmem:[#allocation2 + $0x3d8] ss:$112 sps:$4 sm:$0xff]  }
 0x51d   :  { %11340 = vmatpush1.bf16.msra.mxu0 %v20036_v23  ;;  %11512 = vmatpush1.bf16.msra.mxu1 %v20039_v24  ;;  %v20062_v23 = vld [vmem:[#allocation2 + $0x4b4] ss:$112 sps:$4 sm:$0xff]   ;;  %v20065_v24 = vld [vmem:[#allocation2 + $0x4bc] ss:$112 sps:$4 sm:$0xff]  }
 0x51e   :  { %11341 = vmatprep.subr.bf16.mxu0 %v20044_v30  ;;  %11513 = vmatprep.subr.bf16.mxu1 %v20047_v38  ;;  %v20060_v30 = vld [vmem:[#allocation2 + $0x4b0] ss:$112 sps:$4 sm:$0xff]   ;;  %v20063_v38 = vld [vmem:[#allocation2 + $0x4b8] ss:$112 sps:$4 sm:$0xff]  }
 0x521   :  { %11342 = vmatpush1.bf16.msra.mxu0 %v20042_v43  ;;  %11514 = vmatpush1.bf16.msra.mxu1 %v20045_v45  ;;  %v20068_v43 = vld [vmem:[#allocation2 + $0x594] ss:$112 sps:$4 sm:$0xff]   ;;  %v20071_v45 = vld [vmem:[#allocation2 + $0x59c] ss:$112 sps:$4 sm:$0xff]  }
 0x522   :  { %11343 = vmatprep.subr.bf16.mxu0 %v20050_v46  ;;  %11515 = vmatprep.subr.bf16.mxu1 %v20053_v18  ;;  %v20066_v46 = vld [vmem:[#allocation2 + $0x590] ss:$112 sps:$4 sm:$0xff]   ;;  %v20069_v18 = vld [vmem:[#allocation2 + $0x598] ss:$112 sps:$4 sm:$0xff]  }
 0x525   :  { %11344 = vmatpush1.bf16.msra.mxu0 %v20048_v2  ;;  %11516 = vmatpush1.bf16.msra.mxu1 %v20051_v27  ;;  %v20074_v2 = vld [vmem:[#allocation2 + $0x674] ss:$112 sps:$4 sm:$0xff]   ;;  %v20077_v27 = vld [vmem:[#allocation2 + $0x67c] ss:$112 sps:$4 sm:$0xff]  }
 0x526   :  { %11345 = vmatprep.subr.bf16.mxu0 %v20056_v58  ;;  %11517 = vmatprep.subr.bf16.mxu1 %v20059_v63  ;;  %v20072_v58 = vld [vmem:[#allocation2 + $0x670] ss:$112 sps:$4 sm:$0xff]   ;;  %v20075_v63 = vld [vmem:[#allocation2 + $0x678] ss:$112 sps:$4 sm:$0xff]  }
 0x529   :  { %11346 = vmatpush1.bf16.msra.mxu0 %v20054_v0  ;;  %11518 = vmatpush1.bf16.msra.mxu1 %v20057_v25  ;;  %v20080_v0 = vld [vmem:[#allocation2 + $0x754] ss:$112 sps:$4 sm:$0xff]   ;;  %v20083_v25 = vld [vmem:[#allocation2 + $0x75c] ss:$112 sps:$4 sm:$0xff]  }
 0x52a   :  { %11347 = vmatprep.subr.bf16.mxu0 %v20062_v23  ;;  %11519 = vmatprep.subr.bf16.mxu1 %v20065_v24  ;;  %v20078_v23 = vld [vmem:[#allocation2 + $0x750] ss:$112 sps:$4 sm:$0xff]   ;;  %v20081_v24 = vld [vmem:[#allocation2 + $0x758] ss:$112 sps:$4 sm:$0xff]  }
 0x52d   :  { %11348 = vmatpush1.bf16.msra.mxu0 %v20060_v30  ;;  %11520 = vmatpush1.bf16.msra.mxu1 %v20063_v38  ;;  %v20086_v30 = vld [vmem:[#allocation2 + $0x834] ss:$112 sps:$4 sm:$0xff]   ;;  %v20089_v38 = vld [vmem:[#allocation2 + $0x83c] ss:$112 sps:$4 sm:$0xff]  }
 0x52e   :  { %11349 = vmatprep.subr.bf16.mxu0 %v20068_v43  ;;  %11521 = vmatprep.subr.bf16.mxu1 %v20071_v45  ;;  %v20084_v43 = vld [vmem:[#allocation2 + $0x830] ss:$112 sps:$4 sm:$0xff]   ;;  %v20087_v45 = vld [vmem:[#allocation2 + $0x838] ss:$112 sps:$4 sm:$0xff]  }
 0x531   :  { %11350 = vmatpush1.bf16.msra.mxu0 %v20066_v46  ;;  %11522 = vmatpush1.bf16.msra.mxu1 %v20069_v18  ;;  %v20092_v46 = vld [vmem:[#allocation2 + $0x914] ss:$112 sps:$4 sm:$0xff]   ;;  %v20095_v18 = vld [vmem:[#allocation2 + $0x91c] ss:$112 sps:$4 sm:$0xff]  }
 0x532   :  { %11351 = vmatprep.subr.bf16.mxu0 %v20074_v2  ;;  %11523 = vmatprep.subr.bf16.mxu1 %v20077_v27  ;;  %v20090_v2 = vld [vmem:[#allocation2 + $0x910] ss:$112 sps:$4 sm:$0xff]   ;;  %v20093_v27 = vld [vmem:[#allocation2 + $0x918] ss:$112 sps:$4 sm:$0xff]  }
 0x535   :  { %11352 = vmatpush1.bf16.msra.mxu0 %v20072_v58  ;;  %11524 = vmatpush1.bf16.msra.mxu1 %v20075_v63  ;;  %v20098_v58 = vld [vmem:[#allocation2 + $0x9f4] ss:$112 sps:$4 sm:$0xff]   ;;  %v20101_v63 = vld [vmem:[#allocation2 + $0x9fc] ss:$112 sps:$4 sm:$0xff]  }
 0x536   :  { %11353 = vmatprep.subr.bf16.mxu0 %v20080_v0  ;;  %11525 = vmatprep.subr.bf16.mxu1 %v20083_v25  ;;  %v20096_v0 = vld [vmem:[#allocation2 + $0x9f0] ss:$112 sps:$4 sm:$0xff]   ;;  %v20099_v25 = vld [vmem:[#allocation2 + $0x9f8] ss:$112 sps:$4 sm:$0xff]  }
 0x539   :  { %11354 = vmatpush1.bf16.msra.mxu0 %v20078_v23  ;;  %11526 = vmatpush1.bf16.msra.mxu1 %v20081_v24  ;;  %v20104_v23 = vld [vmem:[#allocation2 + $0xad4] ss:$112 sps:$4 sm:$0xff]   ;;  %v20107_v24 = vld [vmem:[#allocation2 + $0xadc] ss:$112 sps:$4 sm:$0xff]  }
 0x53a   :  { %11355 = vmatprep.subr.bf16.mxu0 %v20086_v30  ;;  %11527 = vmatprep.subr.bf16.mxu1 %v20089_v38  ;;  %v20102_v30 = vld [vmem:[#allocation2 + $0xad0] ss:$112 sps:$4 sm:$0xff]   ;;  %v20105_v38 = vld [vmem:[#allocation2 + $0xad8] ss:$112 sps:$4 sm:$0xff]  }
 0x53d   :  { %11356 = vmatpush1.bf16.msra.mxu0 %v20084_v43  ;;  %11528 = vmatpush1.bf16.msra.mxu1 %v20087_v45  ;;  %v20110_v43 = vld [vmem:[#allocation2 + $0xbb4] ss:$112 sps:$4 sm:$0xff]   ;;  %v20113_v45 = vld [vmem:[#allocation2 + $0xbbc] ss:$112 sps:$4 sm:$0xff]  }
 0x53e   :  { %11357 = vmatprep.subr.bf16.mxu0 %v20092_v46  ;;  %11529 = vmatprep.subr.bf16.mxu1 %v20095_v18  ;;  %v20108_v46 = vld [vmem:[#allocation2 + $0xbb0] ss:$112 sps:$4 sm:$0xff]   ;;  %v20111_v18 = vld [vmem:[#allocation2 + $0xbb8] ss:$112 sps:$4 sm:$0xff]  }
 0x541   :  { %11358 = vmatpush1.bf16.msra.mxu0 %v20090_v2  ;;  %11530 = vmatpush1.bf16.msra.mxu1 %v20093_v27  ;;  %v20116_v2 = vld [vmem:[#allocation2 + $0xc94] ss:$112 sps:$4 sm:$0xff]   ;;  %v20119_v27 = vld [vmem:[#allocation2 + $0xc9c] ss:$112 sps:$4 sm:$0xff]  }
 0x542   :  { %11359 = vmatprep.subr.bf16.mxu0 %v20098_v58  ;;  %11531 = vmatprep.subr.bf16.mxu1 %v20101_v63  ;;  %v20114_v58 = vld [vmem:[#allocation2 + $0xc90] ss:$112 sps:$4 sm:$0xff]   ;;  %v20117_v63 = vld [vmem:[#allocation2 + $0xc98] ss:$112 sps:$4 sm:$0xff]  }
 0x545   :  { %11360 = vmatpush1.bf16.msra.mxu0 %v20096_v0  ;;  %11532 = vmatpush1.bf16.msra.mxu1 %v20099_v25  ;;  %v20122_v0 = vld [vmem:[#allocation2 + $0xd74] ss:$112 sps:$4 sm:$0xff]   ;;  %v20125_v25 = vld [vmem:[#allocation2 + $0xd7c] ss:$112 sps:$4 sm:$0xff]  }
 0x546   :  { %11361 = vmatprep.subr.bf16.mxu0 %v20104_v23  ;;  %11533 = vmatprep.subr.bf16.mxu1 %v20107_v24  ;;  %v20120_v23 = vld [vmem:[#allocation2 + $0xd70] ss:$112 sps:$4 sm:$0xff]   ;;  %v20123_v24 = vld [vmem:[#allocation2 + $0xd78] ss:$112 sps:$4 sm:$0xff]  }
 0x549   :  { %11362 = vmatpush1.bf16.msra.mxu0 %v20102_v30  ;;  %11534 = vmatpush1.bf16.msra.mxu1 %v20105_v38  ;;  %v20128_v30 = vld [vmem:[#allocation2 + $0xe54] ss:$112 sps:$4 sm:$0xff]   ;;  %v20131_v38 = vld [vmem:[#allocation2 + $0xe5c] ss:$112 sps:$4 sm:$0xff]  }
 0x54a   :  { %11363 = vmatprep.subr.bf16.mxu0 %v20110_v43  ;;  %11535 = vmatprep.subr.bf16.mxu1 %v20113_v45  ;;  %v20126_v43 = vld [vmem:[#allocation2 + $0xe50] ss:$112 sps:$4 sm:$0xff]   ;;  %v20129_v45 = vld [vmem:[#allocation2 + $0xe58] ss:$112 sps:$4 sm:$0xff]  }
 0x54d   :  { %11364 = vmatpush1.bf16.msra.mxu0 %v20108_v46  ;;  %11536 = vmatpush1.bf16.msra.mxu1 %v20111_v18  ;;  %v20134_v46 = vld [vmem:[#allocation2 + $0xf34] ss:$112 sps:$4 sm:$0xff]   ;;  %v20137_v18 = vld [vmem:[#allocation2 + $0xf3c] ss:$112 sps:$4 sm:$0xff]  }
 0x54e   :  { %11365 = vmatprep.subr.bf16.mxu0 %v20116_v2  ;;  %11537 = vmatprep.subr.bf16.mxu1 %v20119_v27  ;;  %v20132_v2 = vld [vmem:[#allocation2 + $0xf30] ss:$112 sps:$4 sm:$0xff]   ;;  %v20135_v27 = vld [vmem:[#allocation2 + $0xf38] ss:$112 sps:$4 sm:$0xff]  }
 0x551   :  { %11366 = vmatpush1.bf16.msra.mxu0 %v20114_v58  ;;  %11538 = vmatpush1.bf16.msra.mxu1 %v20117_v63  ;;  %v20140_v58 = vld [vmem:[#allocation2 + $0x1014] ss:$112 sps:$4 sm:$0xff]   ;;  %v20143_v63 = vld [vmem:[#allocation2 + $0x101c] ss:$112 sps:$4 sm:$0xff]  }
 0x552   :  { %11367 = vmatprep.subr.bf16.mxu0 %v20122_v0  ;;  %11539 = vmatprep.subr.bf16.mxu1 %v20125_v25  ;;  %v20138_v0 = vld [vmem:[#allocation2 + $0x1010] ss:$112 sps:$4 sm:$0xff]   ;;  %v20141_v25 = vld [vmem:[#allocation2 + $0x1018] ss:$112 sps:$4 sm:$0xff]  }
 0x555   :  { %11368 = vmatpush1.bf16.msra.mxu0 %v20120_v23  ;;  %11540 = vmatpush1.bf16.msra.mxu1 %v20123_v24  ;;  %v20146_v23 = vld [vmem:[#allocation2 + $0x10f4] ss:$112 sps:$4 sm:$0xff]   ;;  %v20144_v24 = vld [vmem:[#allocation2 + $0x10f0] ss:$112 sps:$4 sm:$0xff]  }
 0x556   :  { %11380 = vmatprep.subr.bf16.mxu0 %v20128_v30  ;;  %11552 = vmatprep.subr.bf16.mxu1 %v20131_v38  ;;  %v20147_v30 = vld [vmem:[#allocation2 + $0x10f8] ss:$112 sps:$4 sm:$0xff]   ;;  %v20152_v38 = vld [vmem:[#allocation2 + $0x11d4] ss:$112 sps:$4 sm:$0xff]  }
 0x558   :  { %11370 = vmatmul.mubr.bf16.vlgmr.msra.gmra.mrb[20].mxu0 %v21383_v39  ;;  %11542 = vmatmul.mubr.bf16.vlgmr.msra.gmra.mrb[20].mxu1 %v21383_v39  ;;  %v20149_v39 = vld [vmem:[#allocation2 + $0x10fc] ss:$112 sps:$4 sm:$0xff]  }
 0x559   :  { %11381 = vmatpush1.bf16.msra.mxu0 %v20126_v43  ;;  %11553 = vmatpush1.bf16.msra.mxu1 %v20129_v45  ;;  %v20155_v43 = vld [vmem:[#allocation2 + $0x11dc] ss:$112 sps:$4 sm:$0xff]   ;;  %v20150_v45 = vld [vmem:[#allocation2 + $0x11d0] ss:$112 sps:$4 sm:$0xff]  }
 0x55a   :  { %11382 = vmatprep.subr.bf16.mxu0 %v20134_v46  ;;  %11554 = vmatprep.subr.bf16.mxu1 %v20137_v18  ;;  %v20158_v46 = vld [vmem:[#allocation2 + $0x12b4] ss:$112 sps:$4 sm:$0xff]   ;;  %v20161_v18 = vld [vmem:[#allocation2 + $0x12bc] ss:$112 sps:$4 sm:$0xff]  }
 0x55b   :  { %11412 = vmatprep.mubr.bf16.mxu0 %v21390_v57  ;;  %11584 = vmatprep.mubr.bf16.mxu1 %v21390_v57  ;;  %v20153_v57 = vld [vmem:[#allocation2 + $0x11d8] ss:$112 sps:$4 sm:$0xff]  }
 0x55d   :  { %11383 = vmatpush1.bf16.msra.mxu0 %v20132_v2  ;;  %11555 = vmatpush1.bf16.msra.mxu1 %v20135_v27  ;;  %v20156_v2 = vld [vmem:[#allocation2 + $0x12b0] ss:$112 sps:$4 sm:$0xff]   ;;  %v20159_v27 = vld [vmem:[#allocation2 + $0x12b8] ss:$112 sps:$4 sm:$0xff]  }
 0x55e   :  { %11384 = vmatprep.subr.bf16.mxu0 %v20140_v58  ;;  %11556 = vmatprep.subr.bf16.mxu1 %v20143_v63  ;;  %v20164_v58 = vld [vmem:[#allocation2 + $0x1394] ss:$112 sps:$4 sm:$0xff]   ;;  %v20167_v63 = vld [vmem:[#allocation2 + $0x139c] ss:$112 sps:$4 sm:$0xff]  }
 0x561   :  { %11385 = vmatpush1.bf16.msra.mxu0 %v20138_v0  ;;  %11557 = vmatpush1.bf16.msra.mxu1 %v20141_v25  ;;  %v20162_v0 = vld [vmem:[#allocation2 + $0x1390] ss:$112 sps:$4 sm:$0xff]   ;;  %v20165_v25 = vld [vmem:[#allocation2 + $0x1398] ss:$112 sps:$4 sm:$0xff]  }
 0x562   :  { %11386 = vmatprep.subr.bf16.mxu0 %v20146_v23  ;;  %11558 = vmatprep.subr.bf16.mxu1 %v20149_v39  ;;  %v20170_v23 = vld [vmem:[#allocation2 + $0x1474] ss:$112 sps:$4 sm:$0xff]   ;;  %v20173_v39 = vld [vmem:[#allocation2 + $0x147c] ss:$112 sps:$4 sm:$0xff]  }
 0x565   :  { %11387 = vmatpush1.bf16.msra.mxu0 %v20144_v24  ;;  %11559 = vmatpush1.bf16.msra.mxu1 %v20147_v30  ;;  %v20168_v24 = vld [vmem:[#allocation2 + $0x1470] ss:$112 sps:$4 sm:$0xff]   ;;  %v20171_v30 = vld [vmem:[#allocation2 + $0x1478] ss:$112 sps:$4 sm:$0xff]  }
 0x566   :  { %11388 = vmatprep.subr.bf16.mxu0 %v20152_v38  ;;  %11560 = vmatprep.subr.bf16.mxu1 %v20155_v43  ;;  %v20176_v38 = vld [vmem:[#allocation2 + $0x1554] ss:$112 sps:$4 sm:$0xff]   ;;  %v20179_v43 = vld [vmem:[#allocation2 + $0x155c] ss:$112 sps:$4 sm:$0xff]  }
 0x569   :  { %11389 = vmatpush1.bf16.msra.mxu0 %v20150_v45  ;;  %11561 = vmatpush1.bf16.msra.mxu1 %v20153_v57  ;;  %v20174_v45 = vld [vmem:[#allocation2 + $0x1550] ss:$112 sps:$4 sm:$0xff]   ;;  %v20177_v57 = vld [vmem:[#allocation2 + $0x1558] ss:$112 sps:$4 sm:$0xff]  }
 0x56a   :  { %11390 = vmatprep.subr.bf16.mxu0 %v20158_v46  ;;  %11562 = vmatprep.subr.bf16.mxu1 %v20161_v18  ;;  %v20182_v46 = vld [vmem:[#allocation2 + $0x1634] ss:$112 sps:$4 sm:$0xff]   ;;  %v20185_v18 = vld [vmem:[#allocation2 + $0x163c] ss:$112 sps:$4 sm:$0xff]  }
 0x56d   :  { %11391 = vmatpush1.bf16.msra.mxu0 %v20156_v2  ;;  %11563 = vmatpush1.bf16.msra.mxu1 %v20159_v27  ;;  %v20180_v2 = vld [vmem:[#allocation2 + $0x1630] ss:$112 sps:$4 sm:$0xff]   ;;  %v20183_v27 = vld [vmem:[#allocation2 + $0x1638] ss:$112 sps:$4 sm:$0xff]  }
 0x56e   :  { %11392 = vmatprep.subr.bf16.mxu0 %v20164_v58  ;;  %11564 = vmatprep.subr.bf16.mxu1 %v20167_v63  ;;  %v20188_v58 = vld [vmem:[#allocation2 + $0x1714] ss:$112 sps:$4 sm:$0xff]   ;;  %v20191_v63 = vld [vmem:[#allocation2 + $0x171c] ss:$112 sps:$4 sm:$0xff]  }
 0x571   :  { %11393 = vmatpush1.bf16.msra.mxu0 %v20162_v0  ;;  %11565 = vmatpush1.bf16.msra.mxu1 %v20165_v25  ;;  %v20186_v0 = vld [vmem:[#allocation2 + $0x1710] ss:$112 sps:$4 sm:$0xff]   ;;  %v20189_v25 = vld [vmem:[#allocation2 + $0x1718] ss:$112 sps:$4 sm:$0xff]  }
 0x572   :  { %11394 = vmatprep.subr.bf16.mxu0 %v20170_v23  ;;  %11566 = vmatprep.subr.bf16.mxu1 %v20173_v39  ;;  %v20194_v23 = vld [vmem:[#allocation2 + $0x17f4] ss:$112 sps:$4 sm:$0xff]   ;;  %v20197_v39 = vld [vmem:[#allocation2 + $0x17fc] ss:$112 sps:$4 sm:$0xff]  }
 0x575   :  { %11395 = vmatpush1.bf16.msra.mxu0 %v20168_v24  ;;  %11567 = vmatpush1.bf16.msra.mxu1 %v20171_v30  ;;  %v20192_v24 = vld [vmem:[#allocation2 + $0x17f0] ss:$112 sps:$4 sm:$0xff]   ;;  %v20195_v30 = vld [vmem:[#allocation2 + $0x17f8] ss:$112 sps:$4 sm:$0xff]  }
 0x576   :  { %11396 = vmatprep.subr.bf16.mxu0 %v20176_v38  ;;  %11568 = vmatprep.subr.bf16.mxu1 %v20179_v43  ;;  %v20200_v38 = vld [vmem:[#allocation2 + $0x18d4] ss:$112 sps:$4 sm:$0xff]   ;;  %v20203_v43 = vld [vmem:[#allocation2 + $0x18dc] ss:$112 sps:$4 sm:$0xff]  }
 0x579   :  { %11397 = vmatpush1.bf16.msra.mxu0 %v20174_v45  ;;  %11569 = vmatpush1.bf16.msra.mxu1 %v20177_v57  ;;  %v20198_v45 = vld [vmem:[#allocation2 + $0x18d0] ss:$112 sps:$4 sm:$0xff]   ;;  %v20201_v57 = vld [vmem:[#allocation2 + $0x18d8] ss:$112 sps:$4 sm:$0xff]  }
 0x57a   :  { %11398 = vmatprep.subr.bf16.mxu0 %v20182_v46  ;;  %11570 = vmatprep.subr.bf16.mxu1 %v20185_v18  ;;  %v20206_v46 = vld [vmem:[#allocation2 + $0x19b4] ss:$112 sps:$4 sm:$0xff]   ;;  %v20209_v18 = vld [vmem:[#allocation2 + $0x19bc] ss:$112 sps:$4 sm:$0xff]  }
 0x57d   :  { %11399 = vmatpush1.bf16.msra.mxu0 %v20180_v2  ;;  %11571 = vmatpush1.bf16.msra.mxu1 %v20183_v27  ;;  %v20204_v2 = vld [vmem:[#allocation2 + $0x19b0] ss:$112 sps:$4 sm:$0xff]   ;;  %v20207_v27 = vld [vmem:[#allocation2 + $0x19b8] ss:$112 sps:$4 sm:$0xff]  }
 0x57e   :  { %11400 = vmatprep.subr.bf16.mxu0 %v20188_v58  ;;  %11572 = vmatprep.subr.bf16.mxu1 %v20191_v63  ;;  %v20212_v58 = vld [vmem:[#allocation2 + $0x1a94] ss:$112 sps:$4 sm:$0xff]   ;;  %v20215_v63 = vld [vmem:[#allocation2 + $0x1a9c] ss:$112 sps:$4 sm:$0xff]  }
 0x581   :  { %11401 = vmatpush1.bf16.msra.mxu0 %v20186_v0  ;;  %11573 = vmatpush1.bf16.msra.mxu1 %v20189_v25  ;;  %v20210_v0 = vld [vmem:[#allocation2 + $0x1a90] ss:$112 sps:$4 sm:$0xff]   ;;  %v20213_v25 = vld [vmem:[#allocation2 + $0x1a98] ss:$112 sps:$4 sm:$0xff]  }
 0x582   :  { %11402 = vmatprep.subr.bf16.mxu0 %v20194_v23  ;;  %11574 = vmatprep.subr.bf16.mxu1 %v20197_v39  ;;  %v20218_v23 = vld [vmem:[#allocation2 + $0x1b74] ss:$112 sps:$4 sm:$0xff]   ;;  %v20221_v39 = vld [vmem:[#allocation2 + $0x1b7c] ss:$112 sps:$4 sm:$0xff]  }
 0x585   :  { %11403 = vmatpush1.bf16.msra.mxu0 %v20192_v24  ;;  %11575 = vmatpush1.bf16.msra.mxu1 %v20195_v30  ;;  %v20216_v24 = vld [vmem:[#allocation2 + $0x1b70] ss:$112 sps:$4 sm:$0xff]   ;;  %v20219_v30 = vld [vmem:[#allocation2 + $0x1b78] ss:$112 sps:$4 sm:$0xff]  }
 0x586   :  { %11404 = vmatprep.subr.bf16.mxu0 %v20200_v38  ;;  %11576 = vmatprep.subr.bf16.mxu1 %v20203_v43  ;;  %v20224_v38 = vld [vmem:[#allocation2 + $0x1c54] ss:$112 sps:$4 sm:$0xff]   ;;  %v20227_v43 = vld [vmem:[#allocation2 + $0x1c5c] ss:$112 sps:$4 sm:$0xff]  }
 0x589   :  { %11405 = vmatpush1.bf16.msra.mxu0 %v20198_v45  ;;  %11577 = vmatpush1.bf16.msra.mxu1 %v20201_v57  ;;  %v20222_v45 = vld [vmem:[#allocation2 + $0x1c50] ss:$112 sps:$4 sm:$0xff]   ;;  %v20225_v57 = vld [vmem:[#allocation2 + $0x1c58] ss:$112 sps:$4 sm:$0xff]  }
 0x58a   :  { %11406 = vmatprep.subr.bf16.mxu0 %v20206_v46  ;;  %11578 = vmatprep.subr.bf16.mxu1 %v20209_v18  ;;  %v20230_v46 = vld [vmem:[#allocation2 + $0x1d34] ss:$112 sps:$4 sm:$0xff]   ;;  %v20233_v18 = vld [vmem:[#allocation2 + $0x1d3c] ss:$112 sps:$4 sm:$0xff]  }
 0x58d   :  { %11407 = vmatpush1.bf16.msra.mxu0 %v20204_v2  ;;  %11579 = vmatpush1.bf16.msra.mxu1 %v20207_v27  ;;  %v20228_v2 = vld [vmem:[#allocation2 + $0x1d30] ss:$112 sps:$4 sm:$0xff]   ;;  %v20231_v27 = vld [vmem:[#allocation2 + $0x1d38] ss:$112 sps:$4 sm:$0xff]  }
 0x58e   :  { %11408 = vmatprep.subr.bf16.mxu0 %v20212_v58  ;;  %11580 = vmatprep.subr.bf16.mxu1 %v20215_v63  ;;  %v20236_v58 = vld [vmem:[#allocation2 + $0x1e14] ss:$112 sps:$4 sm:$0xff]   ;;  %v20239_v63 = vld [vmem:[#allocation2 + $0x1e1c] ss:$112 sps:$4 sm:$0xff]  }
 0x591   :  { %11409 = vmatpush1.bf16.msra.mxu0 %v20210_v0  ;;  %11581 = vmatpush1.bf16.msra.mxu1 %v20213_v25  ;;  %v20234_v0 = vld [vmem:[#allocation2 + $0x1e10] ss:$112 sps:$4 sm:$0xff]   ;;  %v20237_v25 = vld [vmem:[#allocation2 + $0x1e18] ss:$112 sps:$4 sm:$0xff]  }
 0x592   :  { %11410 = vmatprep.subr.bf16.mxu0 %v20218_v23  ;;  %11582 = vmatprep.subr.bf16.mxu1 %v20221_v39  ;;  %v20242_v23 = vld [vmem:[#allocation2 + $0x1ef4] ss:$112 sps:$4 sm:$0xff]   ;;  %v20240_v39 = vld [vmem:[#allocation2 + $0x1ef0] ss:$112 sps:$4 sm:$0xff]  }
 0x595   :  { %11411 = vmatpush1.bf16.msra.mxu0 %v20216_v24  ;;  %11583 = vmatpush1.bf16.msra.mxu1 %v20219_v30  ;;  %v20243_v24 = vld [vmem:[#allocation2 + $0x1ef8] ss:$112 sps:$4 sm:$0xff]   ;;  %v20248_v30 = vld [vmem:[#allocation2 + $0x1fd4] ss:$112 sps:$4 sm:$0xff]  }
 0x596   :  { %11423 = vmatprep.subr.bf16.mxu0 %v20224_v38  ;;  %11595 = vmatprep.subr.bf16.mxu1 %v20227_v43  ;;  %v20251_v38 = vld [vmem:[#allocation2 + $0x1fdc] ss:$112 sps:$4 sm:$0xff]   ;;  %v20246_v43 = vld [vmem:[#allocation2 + $0x1fd0] ss:$112 sps:$4 sm:$0xff]  }
 0x598   :  { %11413 = vmatmul.mubr.bf16.vlgmr.msra.gmra.mrb[20].mxu0 %v21397_v10  ;;  %11585 = vmatmul.mubr.bf16.vlgmr.msra.gmra.mrb[20].mxu1 %v21397_v10  ;;  %v20245_v10 = vld [vmem:[#allocation2 + $0x1efc] ss:$112 sps:$4 sm:$0xff]  }
 0x599   :  { %11424 = vmatpush1.bf16.msra.mxu0 %v20222_v45  ;;  %11596 = vmatpush1.bf16.msra.mxu1 %v20225_v57  ;;  %v20254_v45 = vld [vmem:[#allocation2 + $0x20b4] ss:$112 sps:$4 sm:$0xff]   ;;  %v20257_v57 = vld [vmem:[#allocation2 + $0x20bc] ss:$112 sps:$4 sm:$0xff]  }
 0x59a   :  { %11425 = vmatprep.subr.bf16.mxu0 %v20230_v46  ;;  %11597 = vmatprep.subr.bf16.mxu1 %v20233_v18  ;;  %v20252_v46 = vld [vmem:[#allocation2 + $0x20b0] ss:$112 sps:$4 sm:$0xff]   ;;  %v20255_v18 = vld [vmem:[#allocation2 + $0x20b8] ss:$112 sps:$4 sm:$0xff]  }
 0x59b   :  { %11455 = vmatprep.mubr.bf16.mxu0 %v21404_v26  ;;  %11627 = vmatprep.mubr.bf16.mxu1 %v21404_v26  ;;  %v20249_v26 = vld [vmem:[#allocation2 + $0x1fd8] ss:$112 sps:$4 sm:$0xff]  }
 0x59d   :  { %11426 = vmatpush1.bf16.msra.mxu0 %v20228_v2  ;;  %11598 = vmatpush1.bf16.msra.mxu1 %v20231_v27  ;;  %v20260_v2 = vld [vmem:[#allocation2 + $0x2194] ss:$112 sps:$4 sm:$0xff]   ;;  %v20263_v27 = vld [vmem:[#allocation2 + $0x219c] ss:$112 sps:$4 sm:$0xff]  }
 0x59e   :  { %11427 = vmatprep.subr.bf16.mxu0 %v20236_v58  ;;  %11599 = vmatprep.subr.bf16.mxu1 %v20239_v63  ;;  %v20258_v58 = vld [vmem:[#allocation2 + $0x2190] ss:$112 sps:$4 sm:$0xff]   ;;  %v20261_v63 = vld [vmem:[#allocation2 + $0x2198] ss:$112 sps:$4 sm:$0xff]  }
 0x5a1   :  { %11428 = vmatpush1.bf16.msra.mxu0 %v20234_v0  ;;  %11600 = vmatpush1.bf16.msra.mxu1 %v20237_v25  ;;  %v20266_v0 = vld [vmem:[#allocation2 + $0x2274] ss:$112 sps:$4 sm:$0xff]   ;;  %v20269_v25 = vld [vmem:[#allocation2 + $0x227c] ss:$112 sps:$4 sm:$0xff]  }
 0x5a2   :  { %11429 = vmatprep.subr.bf16.mxu0 %v20242_v23  ;;  %11601 = vmatprep.subr.bf16.mxu1 %v20245_v10  ;;  %v20264_v23 = vld [vmem:[#allocation2 + $0x2270] ss:$112 sps:$4 sm:$0xff]   ;;  %v20267_v10 = vld [vmem:[#allocation2 + $0x2278] ss:$112 sps:$4 sm:$0xff]  }
 0x5a5   :  { %11430 = vmatpush1.bf16.msra.mxu0 %v20240_v39  ;;  %11602 = vmatpush1.bf16.msra.mxu1 %v20243_v24  ;;  %v20272_v39 = vld [vmem:[#allocation2 + $0x2354] ss:$112 sps:$4 sm:$0xff]   ;;  %v20275_v24 = vld [vmem:[#allocation2 + $0x235c] ss:$112 sps:$4 sm:$0xff]  }
 0x5a6   :  { %11431 = vmatprep.subr.bf16.mxu0 %v20248_v30  ;;  %11603 = vmatprep.subr.bf16.mxu1 %v20251_v38  ;;  %v20270_v30 = vld [vmem:[#allocation2 + $0x2350] ss:$112 sps:$4 sm:$0xff]   ;;  %v20273_v38 = vld [vmem:[#allocation2 + $0x2358] ss:$112 sps:$4 sm:$0xff]  }
 0x5a9   :  { %11432 = vmatpush1.bf16.msra.mxu0 %v20246_v43  ;;  %11604 = vmatpush1.bf16.msra.mxu1 %v20249_v26  ;;  %v20278_v43 = vld [vmem:[#allocation2 + $0x2434] ss:$112 sps:$4 sm:$0xff]   ;;  %v20281_v26 = vld [vmem:[#allocation2 + $0x243c] ss:$112 sps:$4 sm:$0xff]  }
 0x5aa   :  { %11433 = vmatprep.subr.bf16.mxu0 %v20254_v45  ;;  %11605 = vmatprep.subr.bf16.mxu1 %v20257_v57  ;;  %v20276_v45 = vld [vmem:[#allocation2 + $0x2430] ss:$112 sps:$4 sm:$0xff]   ;;  %v20279_v57 = vld [vmem:[#allocation2 + $0x2438] ss:$112 sps:$4 sm:$0xff]  }
 0x5ad   :  { %11434 = vmatpush1.bf16.msra.mxu0 %v20252_v46  ;;  %11606 = vmatpush1.bf16.msra.mxu1 %v20255_v18  ;;  %v20284_v46 = vld [vmem:[#allocation2 + $0x2514] ss:$112 sps:$4 sm:$0xff]   ;;  %v20287_v18 = vld [vmem:[#allocation2 + $0x251c] ss:$112 sps:$4 sm:$0xff]  }
 0x5ae   :  { %11435 = vmatprep.subr.bf16.mxu0 %v20260_v2  ;;  %11607 = vmatprep.subr.bf16.mxu1 %v20263_v27  ;;  %v20282_v2 = vld [vmem:[#allocation2 + $0x2510] ss:$112 sps:$4 sm:$0xff]   ;;  %v20285_v27 = vld [vmem:[#allocation2 + $0x2518] ss:$112 sps:$4 sm:$0xff]  }
 0x5b1   :  { %11436 = vmatpush1.bf16.msra.mxu0 %v20258_v58  ;;  %11608 = vmatpush1.bf16.msra.mxu1 %v20261_v63  ;;  %v20290_v58 = vld [vmem:[#allocation2 + $0x25f4] ss:$112 sps:$4 sm:$0xff]   ;;  %v20293_v63 = vld [vmem:[#allocation2 + $0x25fc] ss:$112 sps:$4 sm:$0xff]  }
 0x5b2   :  { %11437 = vmatprep.subr.bf16.mxu0 %v20266_v0  ;;  %11609 = vmatprep.subr.bf16.mxu1 %v20269_v25  ;;  %v20288_v0 = vld [vmem:[#allocation2 + $0x25f0] ss:$112 sps:$4 sm:$0xff]   ;;  %v20291_v25 = vld [vmem:[#allocation2 + $0x25f8] ss:$112 sps:$4 sm:$0xff]  }
 0x5b5   :  { %11438 = vmatpush1.bf16.msra.mxu0 %v20264_v23  ;;  %11610 = vmatpush1.bf16.msra.mxu1 %v20267_v10  ;;  %v20296_v23 = vld [vmem:[#allocation2 + $0x26d4] ss:$112 sps:$4 sm:$0xff]   ;;  %v20299_v10 = vld [vmem:[#allocation2 + $0x26dc] ss:$112 sps:$4 sm:$0xff]  }
 0x5b6   :  { %11439 = vmatprep.subr.bf16.mxu0 %v20272_v39  ;;  %11611 = vmatprep.subr.bf16.mxu1 %v20275_v24  ;;  %v20294_v39 = vld [vmem:[#allocation2 + $0x26d0] ss:$112 sps:$4 sm:$0xff]   ;;  %v20297_v24 = vld [vmem:[#allocation2 + $0x26d8] ss:$112 sps:$4 sm:$0xff]  }
 0x5b9   :  { %11440 = vmatpush1.bf16.msra.mxu0 %v20270_v30  ;;  %11612 = vmatpush1.bf16.msra.mxu1 %v20273_v38  ;;  %v20302_v30 = vld [vmem:[#allocation2 + $0x27b4] ss:$112 sps:$4 sm:$0xff]   ;;  %v20305_v38 = vld [vmem:[#allocation2 + $0x27bc] ss:$112 sps:$4 sm:$0xff]  }
 0x5ba   :  { %11441 = vmatprep.subr.bf16.mxu0 %v20278_v43  ;;  %11613 = vmatprep.subr.bf16.mxu1 %v20281_v26  ;;  %v20300_v43 = vld [vmem:[#allocation2 + $0x27b0] ss:$112 sps:$4 sm:$0xff]   ;;  %v20303_v26 = vld [vmem:[#allocation2 + $0x27b8] ss:$112 sps:$4 sm:$0xff]  }
 0x5bd   :  { %11442 = vmatpush1.bf16.msra.mxu0 %v20276_v45  ;;  %11614 = vmatpush1.bf16.msra.mxu1 %v20279_v57  ;;  %v20308_v45 = vld [vmem:[#allocation2 + $0x2894] ss:$112 sps:$4 sm:$0xff]   ;;  %v20311_v57 = vld [vmem:[#allocation2 + $0x289c] ss:$112 sps:$4 sm:$0xff]  }
 0x5be   :  { %11443 = vmatprep.subr.bf16.mxu0 %v20284_v46  ;;  %11615 = vmatprep.subr.bf16.mxu1 %v20287_v18  ;;  %v20306_v46 = vld [vmem:[#allocation2 + $0x2890] ss:$112 sps:$4 sm:$0xff]   ;;  %v20309_v18 = vld [vmem:[#allocation2 + $0x2898] ss:$112 sps:$4 sm:$0xff]  }
 0x5c1   :  { %11444 = vmatpush1.bf16.msra.mxu0 %v20282_v2  ;;  %11616 = vmatpush1.bf16.msra.mxu1 %v20285_v27  ;;  %v20314_v2 = vld [vmem:[#allocation2 + $0x2974] ss:$112 sps:$4 sm:$0xff]   ;;  %v20317_v27 = vld [vmem:[#allocation2 + $0x297c] ss:$112 sps:$4 sm:$0xff]  }
 0x5c2   :  { %11445 = vmatprep.subr.bf16.mxu0 %v20290_v58  ;;  %11617 = vmatprep.subr.bf16.mxu1 %v20293_v63  ;;  %v20312_v58 = vld [vmem:[#allocation2 + $0x2970] ss:$112 sps:$4 sm:$0xff]   ;;  %v20315_v63 = vld [vmem:[#allocation2 + $0x2978] ss:$112 sps:$4 sm:$0xff]  }
 0x5c5   :  { %11446 = vmatpush1.bf16.msra.mxu0 %v20288_v0  ;;  %11618 = vmatpush1.bf16.msra.mxu1 %v20291_v25  ;;  %v20320_v0 = vld [vmem:[#allocation2 + $0x2a54] ss:$112 sps:$4 sm:$0xff]   ;;  %v20323_v25 = vld [vmem:[#allocation2 + $0x2a5c] ss:$112 sps:$4 sm:$0xff]  }
 0x5c6   :  { %11447 = vmatprep.subr.bf16.mxu0 %v20296_v23  ;;  %11619 = vmatprep.subr.bf16.mxu1 %v20299_v10  ;;  %v20318_v23 = vld [vmem:[#allocation2 + $0x2a50] ss:$112 sps:$4 sm:$0xff]   ;;  %v20321_v10 = vld [vmem:[#allocation2 + $0x2a58] ss:$112 sps:$4 sm:$0xff]  }
 0x5c9   :  { %11448 = vmatpush1.bf16.msra.mxu0 %v20294_v39  ;;  %11620 = vmatpush1.bf16.msra.mxu1 %v20297_v24  ;;  %v20326_v39 = vld [vmem:[#allocation2 + $0x2b34] ss:$112 sps:$4 sm:$0xff]   ;;  %v20329_v24 = vld [vmem:[#allocation2 + $0x2b3c] ss:$112 sps:$4 sm:$0xff]  }
 0x5ca   :  { %11449 = vmatprep.subr.bf16.mxu0 %v20302_v30  ;;  %11621 = vmatprep.subr.bf16.mxu1 %v20305_v38  ;;  %v20324_v30 = vld [vmem:[#allocation2 + $0x2b30] ss:$112 sps:$4 sm:$0xff]   ;;  %v20327_v38 = vld [vmem:[#allocation2 + $0x2b38] ss:$112 sps:$4 sm:$0xff]  }
 0x5cd   :  { %11450 = vmatpush1.bf16.msra.mxu0 %v20300_v43  ;;  %11622 = vmatpush1.bf16.msra.mxu1 %v20303_v26  ;;  %v20332_v43 = vld [vmem:[#allocation2 + $0x2c14] ss:$112 sps:$4 sm:$0xff]   ;;  %v20335_v26 = vld [vmem:[#allocation2 + $0x2c1c] ss:$112 sps:$4 sm:$0xff]  }
 0x5ce   :  { %11451 = vmatprep.subr.bf16.mxu0 %v20308_v45  ;;  %11623 = vmatprep.subr.bf16.mxu1 %v20311_v57  ;;  %v20330_v45 = vld [vmem:[#allocation2 + $0x2c10] ss:$112 sps:$4 sm:$0xff]   ;;  %v20333_v57 = vld [vmem:[#allocation2 + $0x2c18] ss:$112 sps:$4 sm:$0xff]  }
 0x5d1   :  { %11452 = vmatpush1.bf16.msra.mxu0 %v20306_v46  ;;  %11624 = vmatpush1.bf16.msra.mxu1 %v20309_v18  ;;  %v20338_v46 = vld [vmem:[#allocation2 + $0x2cf4] ss:$112 sps:$4 sm:$0xff]   ;;  %v20336_v18 = vld [vmem:[#allocation2 + $0x2cf0] ss:$112 sps:$4 sm:$0xff]  }
 0x5d2   :  { %11453 = vmatprep.subr.bf16.mxu0 %v20314_v2  ;;  %11625 = vmatprep.subr.bf16.mxu1 %v20317_v27  ;;  %v20339_v2 = vld [vmem:[#allocation2 + $0x2cf8] ss:$112 sps:$4 sm:$0xff]   ;;  %v20344_v27 = vld [vmem:[#allocation2 + $0x2dd4] ss:$112 sps:$4 sm:$0xff]  }
 0x5d5   :  { %11454 = vmatpush1.bf16.msra.mxu0 %v20312_v58  ;;  %11626 = vmatpush1.bf16.msra.mxu1 %v20315_v63  ;;  %v20347_v58 = vld [vmem:[#allocation2 + $0x2ddc] ss:$112 sps:$4 sm:$0xff]   ;;  %v20342_v63 = vld [vmem:[#allocation2 + $0x2dd0] ss:$112 sps:$4 sm:$0xff]  }
 0x5d6   :  { %11466 = vmatprep.subr.bf16.mxu0 %v20320_v0  ;;  %11638 = vmatprep.subr.bf16.mxu1 %v20323_v25  ;;  %v20345_v0 = vld [vmem:[#allocation2 + $0x2dd8] ss:$112 sps:$4 sm:$0xff]   ;;  %v20350_v25 = vld [vmem:[#allocation2 + $0x2eb4] ss:$112 sps:$4 sm:$0xff]  }
 0x5d8   :  { %11456 = vmatmul.mubr.bf16.vlgmr.msra.gmra.mrb[20].mxu0 %v21411_v5  ;;  %11628 = vmatmul.mubr.bf16.vlgmr.msra.gmra.mrb[20].mxu1 %v21411_v5  ;;  %v20341_v5 = vld [vmem:[#allocation2 + $0x2cfc] ss:$112 sps:$4 sm:$0xff]  }
 0x5d9   :  { %11467 = vmatpush1.bf16.msra.mxu0 %v20318_v23  ;;  %11639 = vmatpush1.bf16.msra.mxu1 %v20321_v10  ;;  %v20353_v23 = vld [vmem:[#allocation2 + $0x2ebc] ss:$112 sps:$4 sm:$0xff]   ;;  %v20348_v10 = vld [vmem:[#allocation2 + $0x2eb0] ss:$112 sps:$4 sm:$0xff]  }
 0x5da   :  { %11468 = vmatprep.subr.bf16.mxu0 %v20326_v39  ;;  %11640 = vmatprep.subr.bf16.mxu1 %v20329_v24  ;;  %v20351_v39 = vld [vmem:[#allocation2 + $0x2eb8] ss:$112 sps:$4 sm:$0xff]   ;;  %v20356_v24 = vld [vmem:[#allocation2 + $0x2f94] ss:$112 sps:$4 sm:$0xff]  }
 0x5db   :  { %11498 = vmatprep.mubr.bf16.mxu0 %v21725_v16  ;;  %11670 = vmatprep.mubr.bf16.mxu1 %v21725_v16 }
 0x5dd   :  { %11469 = vmatpush1.bf16.msra.mxu0 %v20324_v30  ;;  %11641 = vmatpush1.bf16.msra.mxu1 %v20327_v38  ;;  %v20359_v30 = vld [vmem:[#allocation2 + $0x2f9c] ss:$112 sps:$4 sm:$0xff]  }
 0x5de   :  { %11470 = vmatprep.subr.bf16.mxu0 %v20332_v43  ;;  %11642 = vmatprep.subr.bf16.mxu1 %v20335_v26 }
 0x5e1   :  { %11471 = vmatpush1.bf16.msra.mxu0 %v20330_v45  ;;  %11643 = vmatpush1.bf16.msra.mxu1 %v20333_v57 }
 0x5e2   :  { %11472 = vmatprep.subr.bf16.mxu0 %v20338_v46  ;;  %11644 = vmatprep.subr.bf16.mxu1 %v20341_v5  ;;  %v20354_v5 = vld [vmem:[#allocation2 + $0x2f90] ss:$112 sps:$4 sm:$0xff]  }
 0x5e5   :  { %11473 = vmatpush1.bf16.msra.mxu0 %v20336_v18  ;;  %11645 = vmatpush1.bf16.msra.mxu1 %v20339_v2  ;;  %v20357_v18 = vld [vmem:[#allocation2 + $0x2f98] ss:$112 sps:$4 sm:$0xff]  }
 0x5e6   :  { %11474 = vmatprep.subr.bf16.mxu0 %v20344_v27  ;;  %11646 = vmatprep.subr.bf16.mxu1 %v20347_v58  ;;  %v20362_v58 = vld [vmem:[#allocation2 + $0x3074] ss:$112 sps:$4 sm:$0xff]  }
 0x5e9   :  { %11475 = vmatpush1.bf16.msra.mxu0 %v20342_v63  ;;  %11647 = vmatpush1.bf16.msra.mxu1 %v20345_v0  ;;  %v20365_v63 = vld [vmem:[#allocation2 + $0x307c] ss:$112 sps:$4 sm:$0xff]   ;;  %v20360_v0 = vld [vmem:[#allocation2 + $0x3070] ss:$112 sps:$4 sm:$0xff]  }
 0x5ea   :  { %11476 = vmatprep.subr.bf16.mxu0 %v20350_v25  ;;  %11648 = vmatprep.subr.bf16.mxu1 %v20353_v23  ;;  %v20363_v25 = vld [vmem:[#allocation2 + $0x3078] ss:$112 sps:$4 sm:$0xff]   ;;  %v20368_v23 = vld [vmem:[#allocation2 + $0x64] ss:$112 sps:$4 sm:$0xff]  }
 0x5eb   :  { %v21457_v38 = vpop.f32.mrb[16].mxu0  ;;  %v21459_v43 = vpop.f32.mrb[16].mxu1 }
 0x5ec   :  { %v21461_v26 = vpop.f32.mrb[17].mxu0  ;;  %v21463_v45 = vpop.f32.mrb[17].mxu1 }
 0x5ed   :  { %v21465_v57 = vpop.f32.mrb[18].mxu0  ;;  %v21467_v46 = vpop.f32.mrb[18].mxu1  ;;  %11477 = vmatpush1.bf16.msra.mxu0 %v20348_v10  ;;  %11649 = vmatpush1.bf16.msra.mxu1 %v20351_v39  ;;  %v20366_v10 = vld [vmem:[#allocation2 + $0x60] ss:$112 sps:$4 sm:$0xff]   ;;  %v20369_v39 = vld [vmem:[#allocation2 + $0x68] ss:$112 sps:$4 sm:$0xff]  }
 0x5ee   :  { %v21469_v2 = vpop.f32.mrb[19].mxu0  ;;  %v21471_v27 = vpop.f32.mrb[19].mxu1  ;;  %11478 = vmatprep.subr.bf16.mxu0 %v20356_v24  ;;  %11650 = vmatprep.subr.bf16.mxu1 %v20359_v30  ;;  %v20761_v24 = vld [vmem:[%s21713_s0 + $0x18] ss:$28 sps:$4 sm:$0xff]   ;;  %v20372_v30 = vld [vmem:[#allocation2 + $0x140] ss:$112 sps:$4 sm:$0xff]  }
 0x5f1   :  { %11479 = vmatpush1.bf16.msra.mxu0 %v20354_v5  ;;  %11651 = vmatpush1.bf16.msra.mxu1 %v20357_v18  ;;  %v20375_v5 = vld [vmem:[#allocation2 + $0x148] ss:$112 sps:$4 sm:$0xff]   ;;  %v20380_v18 = vld [vmem:[#allocation2 + $0x224] ss:$112 sps:$4 sm:$0xff]  }
 0x5f2   :  { %11480 = vmatprep.subr.bf16.mxu0 %v20362_v58  ;;  %11652 = vmatprep.subr.bf16.mxu1 %v20365_v63  ;;  %v20383_v58 = vld [vmem:[#allocation2 + $0x22c] ss:$112 sps:$4 sm:$0xff]   ;;  %v20378_v63 = vld [vmem:[#allocation2 + $0x220] ss:$112 sps:$4 sm:$0xff]  }
 0x5f5   :  { %11481 = vmatpush1.bf16.msra.mxu0 %v20360_v0  ;;  %11653 = vmatpush1.bf16.msra.mxu1 %v20363_v25  ;;  %v20381_v0 = vld [vmem:[#allocation2 + $0x228] ss:$112 sps:$4 sm:$0xff]   ;;  %v20386_v25 = vld [vmem:[#allocation2 + $0x304] ss:$112 sps:$4 sm:$0xff]  }
 0x5f6   :  { %11681 = vmatprep.subr.bf16.mxu0 %v20368_v23  ;;  %11853 = vmatprep.subr.bf16.mxu1 %v20371_v42  ;;  %v20762_v42 = vld [vmem:[%s21713_s0 + $0x4] ss:$28 sps:$4 sm:$0xff]   ;;  %v20389_v23 = vld [vmem:[#allocation2 + $0x30c] ss:$112 sps:$4 sm:$0xff]  }
 0x5f8   :  { %11499 = vmatmul.mubr.bf16.vlgmr.msra.gmra.mrb[20].mxu0 %v20761_v24  ;;  %11671 = vmatmul.mubr.bf16.vlgmr.msra.gmra.mrb[20].mxu1 %v20761_v24  ;;  %v20390_v24 = vld [vmem:[#allocation2 + $0x3e0] ss:$112 sps:$4 sm:$0xff]  }
 0x5f9   :  { %11682 = vmatpush1.bf16.msra.mxu0 %v20366_v10  ;;  %11854 = vmatpush1.bf16.msra.mxu1 %v20369_v39  ;;  %v20392_v10 = vld [vmem:[#allocation2 + $0x3e4] ss:$112 sps:$4 sm:$0xff]   ;;  %v20395_v39 = vld [vmem:[#allocation2 + $0x3ec] ss:$112 sps:$4 sm:$0xff]  }
 0x5fa   :  { %11683 = vmatprep.subr.bf16.mxu0 %v20374_v60  ;;  %11855 = vmatprep.subr.bf16.mxu1 %v20377_v9  ;;  %v20384_v60 = vld [vmem:[#allocation2 + $0x300] ss:$112 sps:$4 sm:$0xff]   ;;  %v20387_v9 = vld [vmem:[#allocation2 + $0x308] ss:$112 sps:$4 sm:$0xff]  }
 0x5fb   :  { %11713 = vmatprep.mubr.bf16.mxu0 %v20762_v42  ;;  %11885 = vmatprep.mubr.bf16.mxu1 %v20762_v42  ;;  %v20393_v42 = vld [vmem:[#allocation2 + $0x3e8] ss:$112 sps:$4 sm:$0xff]  }
 0x5fd   :  { %11684 = vmatpush1.bf16.msra.mxu0 %v20372_v30  ;;  %11856 = vmatpush1.bf16.msra.mxu1 %v20375_v5  ;;  %v20398_v30 = vld [vmem:[#allocation2 + $0x4c4] ss:$112 sps:$4 sm:$0xff]   ;;  %v20401_v5 = vld [vmem:[#allocation2 + $0x4cc] ss:$112 sps:$4 sm:$0xff]  }
 0x5fe   :  { %11685 = vmatprep.subr.bf16.mxu0 %v20380_v18  ;;  %11857 = vmatprep.subr.bf16.mxu1 %v20383_v58  ;;  %v20396_v18 = vld [vmem:[#allocation2 + $0x4c0] ss:$112 sps:$4 sm:$0xff]   ;;  %v20399_v58 = vld [vmem:[#allocation2 + $0x4c8] ss:$112 sps:$4 sm:$0xff]  }
 0x601   :  { %11686 = vmatpush1.bf16.msra.mxu0 %v20378_v63  ;;  %11858 = vmatpush1.bf16.msra.mxu1 %v20381_v0  ;;  %v20404_v63 = vld [vmem:[#allocation2 + $0x5a4] ss:$112 sps:$4 sm:$0xff]   ;;  %v20407_v0 = vld [vmem:[#allocation2 + $0x5ac] ss:$112 sps:$4 sm:$0xff]  }
 0x602   :  { %11687 = vmatprep.subr.bf16.mxu0 %v20386_v25  ;;  %11859 = vmatprep.subr.bf16.mxu1 %v20389_v23  ;;  %v20402_v25 = vld [vmem:[#allocation2 + $0x5a0] ss:$112 sps:$4 sm:$0xff]   ;;  %v20405_v23 = vld [vmem:[#allocation2 + $0x5a8] ss:$112 sps:$4 sm:$0xff]  }
 0x605   :  { %11688 = vmatpush1.bf16.msra.mxu0 %v20384_v60  ;;  %11860 = vmatpush1.bf16.msra.mxu1 %v20387_v9  ;;  %v20410_v60 = vld [vmem:[#allocation2 + $0x684] ss:$112 sps:$4 sm:$0xff]   ;;  %v20413_v9 = vld [vmem:[#allocation2 + $0x68c] ss:$112 sps:$4 sm:$0xff]  }
 0x606   :  { %11689 = vmatprep.subr.bf16.mxu0 %v20392_v10  ;;  %11861 = vmatprep.subr.bf16.mxu1 %v20395_v39  ;;  %v20408_v10 = vld [vmem:[#allocation2 + $0x680] ss:$112 sps:$4 sm:$0xff]   ;;  %v20411_v39 = vld [vmem:[#allocation2 + $0x688] ss:$112 sps:$4 sm:$0xff]  }
 0x609   :  { %11690 = vmatpush1.bf16.msra.mxu0 %v20390_v24  ;;  %11862 = vmatpush1.bf16.msra.mxu1 %v20393_v42  ;;  %v20416_v24 = vld [vmem:[#allocation2 + $0x764] ss:$112 sps:$4 sm:$0xff]   ;;  %v20419_v42 = vld [vmem:[#allocation2 + $0x76c] ss:$112 sps:$4 sm:$0xff]  }
 0x60a   :  { %11691 = vmatprep.subr.bf16.mxu0 %v20398_v30  ;;  %11863 = vmatprep.subr.bf16.mxu1 %v20401_v5  ;;  %v20414_v30 = vld [vmem:[#allocation2 + $0x760] ss:$112 sps:$4 sm:$0xff]   ;;  %v20417_v5 = vld [vmem:[#allocation2 + $0x768] ss:$112 sps:$4 sm:$0xff]  }
 0x60d   :  { %11692 = vmatpush1.bf16.msra.mxu0 %v20396_v18  ;;  %11864 = vmatpush1.bf16.msra.mxu1 %v20399_v58  ;;  %v20422_v18 = vld [vmem:[#allocation2 + $0x844] ss:$112 sps:$4 sm:$0xff]   ;;  %v20425_v58 = vld [vmem:[#allocation2 + $0x84c] ss:$112 sps:$4 sm:$0xff]  }
 0x60e   :  { %11693 = vmatprep.subr.bf16.mxu0 %v20404_v63  ;;  %11865 = vmatprep.subr.bf16.mxu1 %v20407_v0  ;;  %v20420_v63 = vld [vmem:[#allocation2 + $0x840] ss:$112 sps:$4 sm:$0xff]   ;;  %v20423_v0 = vld [vmem:[#allocation2 + $0x848] ss:$112 sps:$4 sm:$0xff]  }
 0x611   :  { %11694 = vmatpush1.bf16.msra.mxu0 %v20402_v25  ;;  %11866 = vmatpush1.bf16.msra.mxu1 %v20405_v23  ;;  %v20428_v25 = vld [vmem:[#allocation2 + $0x924] ss:$112 sps:$4 sm:$0xff]   ;;  %v20431_v23 = vld [vmem:[#allocation2 + $0x92c] ss:$112 sps:$4 sm:$0xff]  }
 0x612   :  { %11695 = vmatprep.subr.bf16.mxu0 %v20410_v60  ;;  %11867 = vmatprep.subr.bf16.mxu1 %v20413_v9  ;;  %v20426_v60 = vld [vmem:[#allocation2 + $0x920] ss:$112 sps:$4 sm:$0xff]   ;;  %v20429_v9 = vld [vmem:[#allocation2 + $0x928] ss:$112 sps:$4 sm:$0xff]  }
 0x615   :  { %11696 = vmatpush1.bf16.msra.mxu0 %v20408_v10  ;;  %11868 = vmatpush1.bf16.msra.mxu1 %v20411_v39  ;;  %v20434_v10 = vld [vmem:[#allocation2 + $0xa04] ss:$112 sps:$4 sm:$0xff]   ;;  %v20437_v39 = vld [vmem:[#allocation2 + $0xa0c] ss:$112 sps:$4 sm:$0xff]  }
 0x616   :  { %11697 = vmatprep.subr.bf16.mxu0 %v20416_v24  ;;  %11869 = vmatprep.subr.bf16.mxu1 %v20419_v42  ;;  %v20432_v24 = vld [vmem:[#allocation2 + $0xa00] ss:$112 sps:$4 sm:$0xff]   ;;  %v20435_v42 = vld [vmem:[#allocation2 + $0xa08] ss:$112 sps:$4 sm:$0xff]  }
 0x619   :  { %11698 = vmatpush1.bf16.msra.mxu0 %v20414_v30  ;;  %11870 = vmatpush1.bf16.msra.mxu1 %v20417_v5  ;;  %v20440_v30 = vld [vmem:[#allocation2 + $0xae4] ss:$112 sps:$4 sm:$0xff]   ;;  %v20443_v5 = vld [vmem:[#allocation2 + $0xaec] ss:$112 sps:$4 sm:$0xff]  }
 0x61a   :  { %11699 = vmatprep.subr.bf16.mxu0 %v20422_v18  ;;  %11871 = vmatprep.subr.bf16.mxu1 %v20425_v58  ;;  %v20438_v18 = vld [vmem:[#allocation2 + $0xae0] ss:$112 sps:$4 sm:$0xff]   ;;  %v20441_v58 = vld [vmem:[#allocation2 + $0xae8] ss:$112 sps:$4 sm:$0xff]  }
 0x61d   :  { %11700 = vmatpush1.bf16.msra.mxu0 %v20420_v63  ;;  %11872 = vmatpush1.bf16.msra.mxu1 %v20423_v0  ;;  %v20446_v63 = vld [vmem:[#allocation2 + $0xbc4] ss:$112 sps:$4 sm:$0xff]   ;;  %v20449_v0 = vld [vmem:[#allocation2 + $0xbcc] ss:$112 sps:$4 sm:$0xff]  }
 0x61e   :  { %11701 = vmatprep.subr.bf16.mxu0 %v20428_v25  ;;  %11873 = vmatprep.subr.bf16.mxu1 %v20431_v23  ;;  %v20444_v25 = vld [vmem:[#allocation2 + $0xbc0] ss:$112 sps:$4 sm:$0xff]   ;;  %v20447_v23 = vld [vmem:[#allocation2 + $0xbc8] ss:$112 sps:$4 sm:$0xff]  }
 0x621   :  { %11702 = vmatpush1.bf16.msra.mxu0 %v20426_v60  ;;  %11874 = vmatpush1.bf16.msra.mxu1 %v20429_v9  ;;  %v20452_v60 = vld [vmem:[#allocation2 + $0xca4] ss:$112 sps:$4 sm:$0xff]   ;;  %v20455_v9 = vld [vmem:[#allocation2 + $0xcac] ss:$112 sps:$4 sm:$0xff]  }
 0x622   :  { %11703 = vmatprep.subr.bf16.mxu0 %v20434_v10  ;;  %11875 = vmatprep.subr.bf16.mxu1 %v20437_v39  ;;  %v20450_v10 = vld [vmem:[#allocation2 + $0xca0] ss:$112 sps:$4 sm:$0xff]   ;;  %v20453_v39 = vld [vmem:[#allocation2 + $0xca8] ss:$112 sps:$4 sm:$0xff]  }
 0x625   :  { %11704 = vmatpush1.bf16.msra.mxu0 %v20432_v24  ;;  %11876 = vmatpush1.bf16.msra.mxu1 %v20435_v42  ;;  %v20458_v24 = vld [vmem:[#allocation2 + $0xd84] ss:$112 sps:$4 sm:$0xff]   ;;  %v20461_v42 = vld [vmem:[#allocation2 + $0xd8c] ss:$112 sps:$4 sm:$0xff]  }
 0x626   :  { %11705 = vmatprep.subr.bf16.mxu0 %v20440_v30  ;;  %11877 = vmatprep.subr.bf16.mxu1 %v20443_v5  ;;  %v20456_v30 = vld [vmem:[#allocation2 + $0xd80] ss:$112 sps:$4 sm:$0xff]   ;;  %v20459_v5 = vld [vmem:[#allocation2 + $0xd88] ss:$112 sps:$4 sm:$0xff]  }
 0x629   :  { %11706 = vmatpush1.bf16.msra.mxu0 %v20438_v18  ;;  %11878 = vmatpush1.bf16.msra.mxu1 %v20441_v58  ;;  %v20464_v18 = vld [vmem:[#allocation2 + $0xe64] ss:$112 sps:$4 sm:$0xff]   ;;  %v20467_v58 = vld [vmem:[#allocation2 + $0xe6c] ss:$112 sps:$4 sm:$0xff]  }
 0x62a   :  { %11707 = vmatprep.subr.bf16.mxu0 %v20446_v63  ;;  %11879 = vmatprep.subr.bf16.mxu1 %v20449_v0  ;;  %v20462_v63 = vld [vmem:[#allocation2 + $0xe60] ss:$112 sps:$4 sm:$0xff]   ;;  %v20465_v0 = vld [vmem:[#allocation2 + $0xe68] ss:$112 sps:$4 sm:$0xff]  }
 0x62d   :  { %11708 = vmatpush1.bf16.msra.mxu0 %v20444_v25  ;;  %11880 = vmatpush1.bf16.msra.mxu1 %v20447_v23  ;;  %v20470_v25 = vld [vmem:[#allocation2 + $0xf44] ss:$112 sps:$4 sm:$0xff]   ;;  %v20473_v23 = vld [vmem:[#allocation2 + $0xf4c] ss:$112 sps:$4 sm:$0xff]  }
 0x62e   :  { %11709 = vmatprep.subr.bf16.mxu0 %v20452_v60  ;;  %11881 = vmatprep.subr.bf16.mxu1 %v20455_v9  ;;  %v20763_v60 = vld [vmem:[%s21713_s0] ss:$28 sps:$4 sm:$0xff]  }
 0x62f   :  { %v20468_v9 = vld [vmem:[#allocation2 + $0xf40] ss:$112 sps:$4 sm:$0xff]  }
 0x631   :  { %11710 = vmatpush1.bf16.msra.mxu0 %v20450_v10  ;;  %11882 = vmatpush1.bf16.msra.mxu1 %v20453_v39  ;;  %v20471_v10 = vld [vmem:[#allocation2 + $0xf48] ss:$112 sps:$4 sm:$0xff]   ;;  %v20476_v39 = vld [vmem:[#allocation2 + $0x1024] ss:$112 sps:$4 sm:$0xff]  }
 0x632   :  { %11711 = vmatprep.subr.bf16.mxu0 %v20458_v24  ;;  %11883 = vmatprep.subr.bf16.mxu1 %v20461_v42  ;;  %v20479_v24 = vld [vmem:[#allocation2 + $0x102c] ss:$112 sps:$4 sm:$0xff]  }
 0x633   :  { %v20764_v42 = vld [vmem:[%s21713_s0 + $0xc] ss:$28 sps:$4 sm:$0xff]  }
 0x635   :  { %11712 = vmatpush1.bf16.msra.mxu0 %v20456_v30  ;;  %11884 = vmatpush1.bf16.msra.mxu1 %v20459_v5  ;;  %v20474_v30 = vld [vmem:[#allocation2 + $0x1020] ss:$112 sps:$4 sm:$0xff]   ;;  %v20477_v5 = vld [vmem:[#allocation2 + $0x1028] ss:$112 sps:$4 sm:$0xff]  }
 0x636   :  { %11724 = vmatprep.subr.bf16.mxu0 %v20464_v18  ;;  %11896 = vmatprep.subr.bf16.mxu1 %v20467_v58  ;;  %v20482_v18 = vld [vmem:[#allocation2 + $0x1104] ss:$112 sps:$4 sm:$0xff]   ;;  %v20485_v58 = vld [vmem:[#allocation2 + $0x110c] ss:$112 sps:$4 sm:$0xff]  }
 0x638   :  { %11714 = vmatmul.mubr.bf16.vlgmr.msra.gmra.mrb[24].mxu0 %v20763_v60  ;;  %11886 = vmatmul.mubr.bf16.vlgmr.msra.gmra.mrb[24].mxu1 %v20763_v60  ;;  %v20486_v60 = vld [vmem:[#allocation2 + $0x11e0] ss:$112 sps:$4 sm:$0xff]  }
 0x639   :  { %11725 = vmatpush1.bf16.msra.mxu0 %v20462_v63  ;;  %11897 = vmatpush1.bf16.msra.mxu1 %v20465_v0  ;;  %v20480_v63 = vld [vmem:[#allocation2 + $0x1100] ss:$112 sps:$4 sm:$0xff]   ;;  %v20483_v0 = vld [vmem:[#allocation2 + $0x1108] ss:$112 sps:$4 sm:$0xff]  }
 0x63a   :  { %11726 = vmatprep.subr.bf16.mxu0 %v20470_v25  ;;  %11898 = vmatprep.subr.bf16.mxu1 %v20473_v23  ;;  %v20488_v25 = vld [vmem:[#allocation2 + $0x11e4] ss:$112 sps:$4 sm:$0xff]   ;;  %v20491_v23 = vld [vmem:[#allocation2 + $0x11ec] ss:$112 sps:$4 sm:$0xff]  }
 0x63b   :  { %11756 = vmatprep.mubr.bf16.mxu0 %v20764_v42  ;;  %11928 = vmatprep.mubr.bf16.mxu1 %v20764_v42  ;;  %v20489_v42 = vld [vmem:[#allocation2 + $0x11e8] ss:$112 sps:$4 sm:$0xff]  }
 0x63d   :  { %11727 = vmatpush1.bf16.msra.mxu0 %v20468_v9  ;;  %11899 = vmatpush1.bf16.msra.mxu1 %v20471_v10  ;;  %v20494_v9 = vld [vmem:[#allocation2 + $0x12c4] ss:$112 sps:$4 sm:$0xff]   ;;  %v20497_v10 = vld [vmem:[#allocation2 + $0x12cc] ss:$112 sps:$4 sm:$0xff]  }
 0x63e   :  { %11728 = vmatprep.subr.bf16.mxu0 %v20476_v39  ;;  %11900 = vmatprep.subr.bf16.mxu1 %v20479_v24  ;;  %v20492_v39 = vld [vmem:[#allocation2 + $0x12c0] ss:$112 sps:$4 sm:$0xff]   ;;  %v20495_v24 = vld [vmem:[#allocation2 + $0x12c8] ss:$112 sps:$4 sm:$0xff]  }
 0x641   :  { %11729 = vmatpush1.bf16.msra.mxu0 %v20474_v30  ;;  %11901 = vmatpush1.bf16.msra.mxu1 %v20477_v5  ;;  %v20500_v30 = vld [vmem:[#allocation2 + $0x13a4] ss:$112 sps:$4 sm:$0xff]   ;;  %v20503_v5 = vld [vmem:[#allocation2 + $0x13ac] ss:$112 sps:$4 sm:$0xff]  }
 0x642   :  { %11730 = vmatprep.subr.bf16.mxu0 %v20482_v18  ;;  %11902 = vmatprep.subr.bf16.mxu1 %v20485_v58  ;;  %v20498_v18 = vld [vmem:[#allocation2 + $0x13a0] ss:$112 sps:$4 sm:$0xff]   ;;  %v20501_v58 = vld [vmem:[#allocation2 + $0x13a8] ss:$112 sps:$4 sm:$0xff]  }
 0x645   :  { %11731 = vmatpush1.bf16.msra.mxu0 %v20480_v63  ;;  %11903 = vmatpush1.bf16.msra.mxu1 %v20483_v0  ;;  %v20506_v63 = vld [vmem:[#allocation2 + $0x1484] ss:$112 sps:$4 sm:$0xff]   ;;  %v20509_v0 = vld [vmem:[#allocation2 + $0x148c] ss:$112 sps:$4 sm:$0xff]  }
 0x646   :  { %11732 = vmatprep.subr.bf16.mxu0 %v20488_v25  ;;  %11904 = vmatprep.subr.bf16.mxu1 %v20491_v23  ;;  %v20504_v25 = vld [vmem:[#allocation2 + $0x1480] ss:$112 sps:$4 sm:$0xff]   ;;  %v20507_v23 = vld [vmem:[#allocation2 + $0x1488] ss:$112 sps:$4 sm:$0xff]  }
 0x649   :  { %11733 = vmatpush1.bf16.msra.mxu0 %v20486_v60  ;;  %11905 = vmatpush1.bf16.msra.mxu1 %v20489_v42  ;;  %v20512_v60 = vld [vmem:[#allocation2 + $0x1564] ss:$112 sps:$4 sm:$0xff]   ;;  %v20515_v42 = vld [vmem:[#allocation2 + $0x156c] ss:$112 sps:$4 sm:$0xff]  }
 0x64a   :  { %11734 = vmatprep.subr.bf16.mxu0 %v20494_v9  ;;  %11906 = vmatprep.subr.bf16.mxu1 %v20497_v10  ;;  %v20510_v9 = vld [vmem:[#allocation2 + $0x1560] ss:$112 sps:$4 sm:$0xff]   ;;  %v20513_v10 = vld [vmem:[#allocation2 + $0x1568] ss:$112 sps:$4 sm:$0xff]  }
 0x64d   :  { %11735 = vmatpush1.bf16.msra.mxu0 %v20492_v39  ;;  %11907 = vmatpush1.bf16.msra.mxu1 %v20495_v24  ;;  %v20518_v39 = vld [vmem:[#allocation2 + $0x1644] ss:$112 sps:$4 sm:$0xff]   ;;  %v20521_v24 = vld [vmem:[#allocation2 + $0x164c] ss:$112 sps:$4 sm:$0xff]  }
 0x64e   :  { %11736 = vmatprep.subr.bf16.mxu0 %v20500_v30  ;;  %11908 = vmatprep.subr.bf16.mxu1 %v20503_v5  ;;  %v20516_v30 = vld [vmem:[#allocation2 + $0x1640] ss:$112 sps:$4 sm:$0xff]   ;;  %v20519_v5 = vld [vmem:[#allocation2 + $0x1648] ss:$112 sps:$4 sm:$0xff]  }
 0x651   :  { %11737 = vmatpush1.bf16.msra.mxu0 %v20498_v18  ;;  %11909 = vmatpush1.bf16.msra.mxu1 %v20501_v58  ;;  %v20524_v18 = vld [vmem:[#allocation2 + $0x1724] ss:$112 sps:$4 sm:$0xff]   ;;  %v20527_v58 = vld [vmem:[#allocation2 + $0x172c] ss:$112 sps:$4 sm:$0xff]  }
 0x652   :  { %11738 = vmatprep.subr.bf16.mxu0 %v20506_v63  ;;  %11910 = vmatprep.subr.bf16.mxu1 %v20509_v0  ;;  %v20522_v63 = vld [vmem:[#allocation2 + $0x1720] ss:$112 sps:$4 sm:$0xff]   ;;  %v20525_v0 = vld [vmem:[#allocation2 + $0x1728] ss:$112 sps:$4 sm:$0xff]  }
 0x655   :  { %11739 = vmatpush1.bf16.msra.mxu0 %v20504_v25  ;;  %11911 = vmatpush1.bf16.msra.mxu1 %v20507_v23  ;;  %v20530_v25 = vld [vmem:[#allocation2 + $0x1804] ss:$112 sps:$4 sm:$0xff]   ;;  %v20533_v23 = vld [vmem:[#allocation2 + $0x180c] ss:$112 sps:$4 sm:$0xff]  }
 0x656   :  { %11740 = vmatprep.subr.bf16.mxu0 %v20512_v60  ;;  %11912 = vmatprep.subr.bf16.mxu1 %v20515_v42  ;;  %v20528_v60 = vld [vmem:[#allocation2 + $0x1800] ss:$112 sps:$4 sm:$0xff]   ;;  %v20531_v42 = vld [vmem:[#allocation2 + $0x1808] ss:$112 sps:$4 sm:$0xff]  }
 0x659   :  { %11741 = vmatpush1.bf16.msra.mxu0 %v20510_v9  ;;  %11913 = vmatpush1.bf16.msra.mxu1 %v20513_v10  ;;  %v20536_v9 = vld [vmem:[#allocation2 + $0x18e4] ss:$112 sps:$4 sm:$0xff]   ;;  %v20539_v10 = vld [vmem:[#allocation2 + $0x18ec] ss:$112 sps:$4 sm:$0xff]  }
 0x65a   :  { %11742 = vmatprep.subr.bf16.mxu0 %v20518_v39  ;;  %11914 = vmatprep.subr.bf16.mxu1 %v20521_v24  ;;  %v20534_v39 = vld [vmem:[#allocation2 + $0x18e0] ss:$112 sps:$4 sm:$0xff]   ;;  %v20537_v24 = vld [vmem:[#allocation2 + $0x18e8] ss:$112 sps:$4 sm:$0xff]  }
 0x65d   :  { %11743 = vmatpush1.bf16.msra.mxu0 %v20516_v30  ;;  %11915 = vmatpush1.bf16.msra.mxu1 %v20519_v5  ;;  %v20542_v30 = vld [vmem:[#allocation2 + $0x19c4] ss:$112 sps:$4 sm:$0xff]   ;;  %v20545_v5 = vld [vmem:[#allocation2 + $0x19cc] ss:$112 sps:$4 sm:$0xff]  }
 0x65e   :  { %11744 = vmatprep.subr.bf16.mxu0 %v20524_v18  ;;  %11916 = vmatprep.subr.bf16.mxu1 %v20527_v58  ;;  %v20540_v18 = vld [vmem:[#allocation2 + $0x19c0] ss:$112 sps:$4 sm:$0xff]   ;;  %v20543_v58 = vld [vmem:[#allocation2 + $0x19c8] ss:$112 sps:$4 sm:$0xff]  }
 0x661   :  { %11745 = vmatpush1.bf16.msra.mxu0 %v20522_v63  ;;  %11917 = vmatpush1.bf16.msra.mxu1 %v20525_v0  ;;  %v20548_v63 = vld [vmem:[#allocation2 + $0x1aa4] ss:$112 sps:$4 sm:$0xff]   ;;  %v20551_v0 = vld [vmem:[#allocation2 + $0x1aac] ss:$112 sps:$4 sm:$0xff]  }
 0x662   :  { %11746 = vmatprep.subr.bf16.mxu0 %v20530_v25  ;;  %11918 = vmatprep.subr.bf16.mxu1 %v20533_v23  ;;  %v20546_v25 = vld [vmem:[#allocation2 + $0x1aa0] ss:$112 sps:$4 sm:$0xff]   ;;  %v20549_v23 = vld [vmem:[#allocation2 + $0x1aa8] ss:$112 sps:$4 sm:$0xff]  }
 0x665   :  { %11747 = vmatpush1.bf16.msra.mxu0 %v20528_v60  ;;  %11919 = vmatpush1.bf16.msra.mxu1 %v20531_v42  ;;  %v20554_v60 = vld [vmem:[#allocation2 + $0x1b84] ss:$112 sps:$4 sm:$0xff]   ;;  %v20557_v42 = vld [vmem:[#allocation2 + $0x1b8c] ss:$112 sps:$4 sm:$0xff]  }
 0x666   :  { %11748 = vmatprep.subr.bf16.mxu0 %v20536_v9  ;;  %11920 = vmatprep.subr.bf16.mxu1 %v20539_v10  ;;  %v20552_v9 = vld [vmem:[#allocation2 + $0x1b80] ss:$112 sps:$4 sm:$0xff]   ;;  %v20555_v10 = vld [vmem:[#allocation2 + $0x1b88] ss:$112 sps:$4 sm:$0xff]  }
 0x669   :  { %11749 = vmatpush1.bf16.msra.mxu0 %v20534_v39  ;;  %11921 = vmatpush1.bf16.msra.mxu1 %v20537_v24  ;;  %v20560_v39 = vld [vmem:[#allocation2 + $0x1c64] ss:$112 sps:$4 sm:$0xff]   ;;  %v20563_v24 = vld [vmem:[#allocation2 + $0x1c6c] ss:$112 sps:$4 sm:$0xff]  }
 0x66a   :  { %11750 = vmatprep.subr.bf16.mxu0 %v20542_v30  ;;  %11922 = vmatprep.subr.bf16.mxu1 %v20545_v5  ;;  %v20558_v30 = vld [vmem:[#allocation2 + $0x1c60] ss:$112 sps:$4 sm:$0xff]   ;;  %v20561_v5 = vld [vmem:[#allocation2 + $0x1c68] ss:$112 sps:$4 sm:$0xff]  }
 0x66d   :  { %11751 = vmatpush1.bf16.msra.mxu0 %v20540_v18  ;;  %11923 = vmatpush1.bf16.msra.mxu1 %v20543_v58  ;;  %v20566_v18 = vld [vmem:[#allocation2 + $0x1d44] ss:$112 sps:$4 sm:$0xff]   ;;  %v20569_v58 = vld [vmem:[#allocation2 + $0x1d4c] ss:$112 sps:$4 sm:$0xff]  }
 0x66e   :  { %11752 = vmatprep.subr.bf16.mxu0 %v20548_v63  ;;  %11924 = vmatprep.subr.bf16.mxu1 %v20551_v0  ;;  %v20765_v63 = vld [vmem:[%s21713_s0 + $0x8] ss:$28 sps:$4 sm:$0xff]   ;;  %v20564_v0 = vld [vmem:[#allocation2 + $0x1d40] ss:$112 sps:$4 sm:$0xff]  }
 0x671   :  { %11753 = vmatpush1.bf16.msra.mxu0 %v20546_v25  ;;  %11925 = vmatpush1.bf16.msra.mxu1 %v20549_v23  ;;  %v20567_v25 = vld [vmem:[#allocation2 + $0x1d48] ss:$112 sps:$4 sm:$0xff]   ;;  %v20572_v23 = vld [vmem:[#allocation2 + $0x1e24] ss:$112 sps:$4 sm:$0xff]  }
 0x672   :  { %11754 = vmatprep.subr.bf16.mxu0 %v20554_v60  ;;  %11926 = vmatprep.subr.bf16.mxu1 %v20557_v42  ;;  %v20575_v60 = vld [vmem:[#allocation2 + $0x1e2c] ss:$112 sps:$4 sm:$0xff]   ;;  %v20766_v42 = vld [vmem:[%s21713_s0 + $0x14] ss:$28 sps:$4 sm:$0xff]  }
 0x675   :  { %11755 = vmatpush1.bf16.msra.mxu0 %v20552_v9  ;;  %11927 = vmatpush1.bf16.msra.mxu1 %v20555_v10  ;;  %v20570_v9 = vld [vmem:[#allocation2 + $0x1e20] ss:$112 sps:$4 sm:$0xff]   ;;  %v20573_v10 = vld [vmem:[#allocation2 + $0x1e28] ss:$112 sps:$4 sm:$0xff]  }
 0x676   :  { %11767 = vmatprep.subr.bf16.mxu0 %v20560_v39  ;;  %11939 = vmatprep.subr.bf16.mxu1 %v20563_v24  ;;  %v20578_v39 = vld [vmem:[#allocation2 + $0x1f04] ss:$112 sps:$4 sm:$0xff]   ;;  %v20581_v24 = vld [vmem:[#allocation2 + $0x1f0c] ss:$112 sps:$4 sm:$0xff]  }
 0x678   :  { %11757 = vmatmul.mubr.bf16.vlgmr.msra.gmra.mrb[24].mxu0 %v20765_v63  ;;  %11929 = vmatmul.mubr.bf16.vlgmr.msra.gmra.mrb[24].mxu1 %v20765_v63  ;;  %v20582_v63 = vld [vmem:[#allocation2 + $0x1fe0] ss:$112 sps:$4 sm:$0xff]  }
 0x679   :  { %11768 = vmatpush1.bf16.msra.mxu0 %v20558_v30  ;;  %11940 = vmatpush1.bf16.msra.mxu1 %v20561_v5  ;;  %v20576_v30 = vld [vmem:[#allocation2 + $0x1f00] ss:$112 sps:$4 sm:$0xff]   ;;  %v20579_v5 = vld [vmem:[#allocation2 + $0x1f08] ss:$112 sps:$4 sm:$0xff]  }
 0x67a   :  { %11769 = vmatprep.subr.bf16.mxu0 %v20566_v18  ;;  %11941 = vmatprep.subr.bf16.mxu1 %v20569_v58  ;;  %v20584_v18 = vld [vmem:[#allocation2 + $0x1fe4] ss:$112 sps:$4 sm:$0xff]   ;;  %v20587_v58 = vld [vmem:[#allocation2 + $0x1fec] ss:$112 sps:$4 sm:$0xff]  }
 0x67b   :  { %11799 = vmatprep.mubr.bf16.mxu0 %v20766_v42  ;;  %11971 = vmatprep.mubr.bf16.mxu1 %v20766_v42  ;;  %v20585_v42 = vld [vmem:[#allocation2 + $0x1fe8] ss:$112 sps:$4 sm:$0xff]  }
 0x67d   :  { %11770 = vmatpush1.bf16.msra.mxu0 %v20564_v0  ;;  %11942 = vmatpush1.bf16.msra.mxu1 %v20567_v25  ;;  %v20590_v0 = vld [vmem:[#allocation2 + $0x20c4] ss:$112 sps:$4 sm:$0xff]   ;;  %v20593_v25 = vld [vmem:[#allocation2 + $0x20cc] ss:$112 sps:$4 sm:$0xff]  }
 0x67e   :  { %11771 = vmatprep.subr.bf16.mxu0 %v20572_v23  ;;  %11943 = vmatprep.subr.bf16.mxu1 %v20575_v60  ;;  %v20588_v23 = vld [vmem:[#allocation2 + $0x20c0] ss:$112 sps:$4 sm:$0xff]   ;;  %v20591_v60 = vld [vmem:[#allocation2 + $0x20c8] ss:$112 sps:$4 sm:$0xff]  }
 0x681   :  { %11772 = vmatpush1.bf16.msra.mxu0 %v20570_v9  ;;  %11944 = vmatpush1.bf16.msra.mxu1 %v20573_v10  ;;  %v20596_v9 = vld [vmem:[#allocation2 + $0x21a4] ss:$112 sps:$4 sm:$0xff]   ;;  %v20599_v10 = vld [vmem:[#allocation2 + $0x21ac] ss:$112 sps:$4 sm:$0xff]  }
 0x682   :  { %11773 = vmatprep.subr.bf16.mxu0 %v20578_v39  ;;  %11945 = vmatprep.subr.bf16.mxu1 %v20581_v24  ;;  %v20594_v39 = vld [vmem:[#allocation2 + $0x21a0] ss:$112 sps:$4 sm:$0xff]   ;;  %v20597_v24 = vld [vmem:[#allocation2 + $0x21a8] ss:$112 sps:$4 sm:$0xff]  }
 0x685   :  { %11774 = vmatpush1.bf16.msra.mxu0 %v20576_v30  ;;  %11946 = vmatpush1.bf16.msra.mxu1 %v20579_v5  ;;  %v20602_v30 = vld [vmem:[#allocation2 + $0x2284] ss:$112 sps:$4 sm:$0xff]   ;;  %v20605_v5 = vld [vmem:[#allocation2 + $0x228c] ss:$112 sps:$4 sm:$0xff]  }
 0x686   :  { %11775 = vmatprep.subr.bf16.mxu0 %v20584_v18  ;;  %11947 = vmatprep.subr.bf16.mxu1 %v20587_v58  ;;  %v20600_v18 = vld [vmem:[#allocation2 + $0x2280] ss:$112 sps:$4 sm:$0xff]   ;;  %v20603_v58 = vld [vmem:[#allocation2 + $0x2288] ss:$112 sps:$4 sm:$0xff]  }
 0x689   :  { %11776 = vmatpush1.bf16.msra.mxu0 %v20582_v63  ;;  %11948 = vmatpush1.bf16.msra.mxu1 %v20585_v42  ;;  %v20608_v63 = vld [vmem:[#allocation2 + $0x2364] ss:$112 sps:$4 sm:$0xff]   ;;  %v20611_v42 = vld [vmem:[#allocation2 + $0x236c] ss:$112 sps:$4 sm:$0xff]  }
 0x68a   :  { %11777 = vmatprep.subr.bf16.mxu0 %v20590_v0  ;;  %11949 = vmatprep.subr.bf16.mxu1 %v20593_v25  ;;  %v20606_v0 = vld [vmem:[#allocation2 + $0x2360] ss:$112 sps:$4 sm:$0xff]   ;;  %v20609_v25 = vld [vmem:[#allocation2 + $0x2368] ss:$112 sps:$4 sm:$0xff]  }
 0x68d   :  { %11778 = vmatpush1.bf16.msra.mxu0 %v20588_v23  ;;  %11950 = vmatpush1.bf16.msra.mxu1 %v20591_v60  ;;  %v20614_v23 = vld [vmem:[#allocation2 + $0x2444] ss:$112 sps:$4 sm:$0xff]   ;;  %v20617_v60 = vld [vmem:[#allocation2 + $0x244c] ss:$112 sps:$4 sm:$0xff]  }
 0x68e   :  { %11779 = vmatprep.subr.bf16.mxu0 %v20596_v9  ;;  %11951 = vmatprep.subr.bf16.mxu1 %v20599_v10  ;;  %v20612_v9 = vld [vmem:[#allocation2 + $0x2440] ss:$112 sps:$4 sm:$0xff]   ;;  %v20615_v10 = vld [vmem:[#allocation2 + $0x2448] ss:$112 sps:$4 sm:$0xff]  }
 0x691   :  { %11780 = vmatpush1.bf16.msra.mxu0 %v20594_v39  ;;  %11952 = vmatpush1.bf16.msra.mxu1 %v20597_v24  ;;  %v20620_v39 = vld [vmem:[#allocation2 + $0x2524] ss:$112 sps:$4 sm:$0xff]   ;;  %v20623_v24 = vld [vmem:[#allocation2 + $0x252c] ss:$112 sps:$4 sm:$0xff]  }
 0x692   :  { %11781 = vmatprep.subr.bf16.mxu0 %v20602_v30  ;;  %11953 = vmatprep.subr.bf16.mxu1 %v20605_v5  ;;  %v20618_v30 = vld [vmem:[#allocation2 + $0x2520] ss:$112 sps:$4 sm:$0xff]   ;;  %v20621_v5 = vld [vmem:[#allocation2 + $0x2528] ss:$112 sps:$4 sm:$0xff]  }
 0x695   :  { %11782 = vmatpush1.bf16.msra.mxu0 %v20600_v18  ;;  %11954 = vmatpush1.bf16.msra.mxu1 %v20603_v58  ;;  %v20626_v18 = vld [vmem:[#allocation2 + $0x2604] ss:$112 sps:$4 sm:$0xff]   ;;  %v20629_v58 = vld [vmem:[#allocation2 + $0x260c] ss:$112 sps:$4 sm:$0xff]  }
 0x696   :  { %11783 = vmatprep.subr.bf16.mxu0 %v20608_v63  ;;  %11955 = vmatprep.subr.bf16.mxu1 %v20611_v42  ;;  %v20624_v63 = vld [vmem:[#allocation2 + $0x2600] ss:$112 sps:$4 sm:$0xff]   ;;  %v20627_v42 = vld [vmem:[#allocation2 + $0x2608] ss:$112 sps:$4 sm:$0xff]  }
 0x699   :  { %11784 = vmatpush1.bf16.msra.mxu0 %v20606_v0  ;;  %11956 = vmatpush1.bf16.msra.mxu1 %v20609_v25  ;;  %v20632_v0 = vld [vmem:[#allocation2 + $0x26e4] ss:$112 sps:$4 sm:$0xff]   ;;  %v20635_v25 = vld [vmem:[#allocation2 + $0x26ec] ss:$112 sps:$4 sm:$0xff]  }
 0x69a   :  { %11785 = vmatprep.subr.bf16.mxu0 %v20614_v23  ;;  %11957 = vmatprep.subr.bf16.mxu1 %v20617_v60  ;;  %v20630_v23 = vld [vmem:[#allocation2 + $0x26e0] ss:$112 sps:$4 sm:$0xff]   ;;  %v20633_v60 = vld [vmem:[#allocation2 + $0x26e8] ss:$112 sps:$4 sm:$0xff]  }
 0x69d   :  { %11786 = vmatpush1.bf16.msra.mxu0 %v20612_v9  ;;  %11958 = vmatpush1.bf16.msra.mxu1 %v20615_v10  ;;  %v20638_v9 = vld [vmem:[#allocation2 + $0x27c4] ss:$112 sps:$4 sm:$0xff]   ;;  %v20641_v10 = vld [vmem:[#allocation2 + $0x27cc] ss:$112 sps:$4 sm:$0xff]  }
 0x69e   :  { %11787 = vmatprep.subr.bf16.mxu0 %v20620_v39  ;;  %11959 = vmatprep.subr.bf16.mxu1 %v20623_v24  ;;  %v20636_v39 = vld [vmem:[#allocation2 + $0x27c0] ss:$112 sps:$4 sm:$0xff]   ;;  %v20639_v24 = vld [vmem:[#allocation2 + $0x27c8] ss:$112 sps:$4 sm:$0xff]  }
 0x6a1   :  { %11788 = vmatpush1.bf16.msra.mxu0 %v20618_v30  ;;  %11960 = vmatpush1.bf16.msra.mxu1 %v20621_v5  ;;  %v20644_v30 = vld [vmem:[#allocation2 + $0x28a4] ss:$112 sps:$4 sm:$0xff]   ;;  %v20647_v5 = vld [vmem:[#allocation2 + $0x28ac] ss:$112 sps:$4 sm:$0xff]  }
 0x6a2   :  { %11789 = vmatprep.subr.bf16.mxu0 %v20626_v18  ;;  %11961 = vmatprep.subr.bf16.mxu1 %v20629_v58  ;;  %v20642_v18 = vld [vmem:[#allocation2 + $0x28a0] ss:$112 sps:$4 sm:$0xff]   ;;  %v20645_v58 = vld [vmem:[#allocation2 + $0x28a8] ss:$112 sps:$4 sm:$0xff]  }
 0x6a5   :  { %11790 = vmatpush1.bf16.msra.mxu0 %v20624_v63  ;;  %11962 = vmatpush1.bf16.msra.mxu1 %v20627_v42  ;;  %v20650_v63 = vld [vmem:[#allocation2 + $0x2984] ss:$112 sps:$4 sm:$0xff]   ;;  %v20653_v42 = vld [vmem:[#allocation2 + $0x298c] ss:$112 sps:$4 sm:$0xff]  }
 0x6a6   :  { %11791 = vmatprep.subr.bf16.mxu0 %v20632_v0  ;;  %11963 = vmatprep.subr.bf16.mxu1 %v20635_v25  ;;  %v20648_v0 = vld [vmem:[#allocation2 + $0x2980] ss:$112 sps:$4 sm:$0xff]   ;;  %v20651_v25 = vld [vmem:[#allocation2 + $0x2988] ss:$112 sps:$4 sm:$0xff]  }
 0x6a9   :  { %11792 = vmatpush1.bf16.msra.mxu0 %v20630_v23  ;;  %11964 = vmatpush1.bf16.msra.mxu1 %v20633_v60  ;;  %v20656_v23 = vld [vmem:[#allocation2 + $0x2a64] ss:$112 sps:$4 sm:$0xff]   ;;  %v20659_v60 = vld [vmem:[#allocation2 + $0x2a6c] ss:$112 sps:$4 sm:$0xff]  }
 0x6aa   :  { %11793 = vmatprep.subr.bf16.mxu0 %v20638_v9  ;;  %11965 = vmatprep.subr.bf16.mxu1 %v20641_v10  ;;  %v20654_v9 = vld [vmem:[#allocation2 + $0x2a60] ss:$112 sps:$4 sm:$0xff]   ;;  %v20657_v10 = vld [vmem:[#allocation2 + $0x2a68] ss:$112 sps:$4 sm:$0xff]  }
 0x6ad   :  { %11794 = vmatpush1.bf16.msra.mxu0 %v20636_v39  ;;  %11966 = vmatpush1.bf16.msra.mxu1 %v20639_v24  ;;  %v20662_v39 = vld [vmem:[#allocation2 + $0x2b44] ss:$112 sps:$4 sm:$0xff]   ;;  %v20665_v24 = vld [vmem:[#allocation2 + $0x2b4c] ss:$112 sps:$4 sm:$0xff]  }
 0x6ae   :  { %11795 = vmatprep.subr.bf16.mxu0 %v20644_v30  ;;  %11967 = vmatprep.subr.bf16.mxu1 %v20647_v5  ;;  %v20767_v30 = vld [vmem:[%s21713_s0 + $0x10] ss:$28 sps:$4 sm:$0xff]  }
 0x6af   :  { %v20660_v5 = vld [vmem:[#allocation2 + $0x2b40] ss:$112 sps:$4 sm:$0xff]  }
 0x6b1   :  { %11796 = vmatpush1.bf16.msra.mxu0 %v20642_v18  ;;  %11968 = vmatpush1.bf16.msra.mxu1 %v20645_v58  ;;  %v20663_v18 = vld [vmem:[#allocation2 + $0x2b48] ss:$112 sps:$4 sm:$0xff]   ;;  %v20668_v58 = vld [vmem:[#allocation2 + $0x2c24] ss:$112 sps:$4 sm:$0xff]  }
 0x6b2   :  { %11797 = vmatprep.subr.bf16.mxu0 %v20650_v63  ;;  %11969 = vmatprep.subr.bf16.mxu1 %v20653_v42  ;;  %v20671_v63 = vld [vmem:[#allocation2 + $0x2c2c] ss:$112 sps:$4 sm:$0xff]   ;;  %v20666_v42 = vld [vmem:[#allocation2 + $0x2c20] ss:$112 sps:$4 sm:$0xff]  }
 0x6b5   :  { %11798 = vmatpush1.bf16.msra.mxu0 %v20648_v0  ;;  %11970 = vmatpush1.bf16.msra.mxu1 %v20651_v25  ;;  %v20669_v0 = vld [vmem:[#allocation2 + $0x2c28] ss:$112 sps:$4 sm:$0xff]   ;;  %v20674_v25 = vld [vmem:[#allocation2 + $0x2d04] ss:$112 sps:$4 sm:$0xff]  }
 0x6b6   :  { %11810 = vmatprep.subr.bf16.mxu0 %v20656_v23  ;;  %11982 = vmatprep.subr.bf16.mxu1 %v20659_v60  ;;  %v20677_v23 = vld [vmem:[#allocation2 + $0x2d0c] ss:$112 sps:$4 sm:$0xff]   ;;  %v12069_v60 = vlaneseq }
 0x6b8   :  { %11800 = vmatmul.mubr.bf16.vlgmr.msra.gmra.mrb[24].mxu0 %v20767_v30  ;;  %11972 = vmatmul.mubr.bf16.vlgmr.msra.gmra.mrb[24].mxu1 %v20767_v30  ;;  %v21496_v30 = vshrl.u32 %v12069_v60, 7  ;;  %v20687_v60 = vld [vmem:[#allocation2 + $0x2ec8] ss:$112 sps:$4 sm:$0xff]  }
 0x6b9   :  { %11811 = vmatpush1.bf16.msra.mxu0 %v20654_v9  ;;  %11983 = vmatpush1.bf16.msra.mxu1 %v20657_v10  ;;  %v20672_v9 = vld [vmem:[#allocation2 + $0x2d00] ss:$112 sps:$4 sm:$0xff]   ;;  %v20675_v10 = vld [vmem:[#allocation2 + $0x2d08] ss:$112 sps:$4 sm:$0xff]  }
 0x6ba   :  { %11812 = vmatprep.subr.bf16.mxu0 %v20662_v39  ;;  %11984 = vmatprep.subr.bf16.mxu1 %v20665_v24  ;;  %v20680_v39 = vld [vmem:[#allocation2 + $0x2de4] ss:$112 sps:$4 sm:$0xff]   ;;  %v20683_v24 = vld [vmem:[#allocation2 + $0x2dec] ss:$112 sps:$4 sm:$0xff]  }
 0x6bb   :  { %11842 = vmatprep.mubr.bf16.mxu0 %v21725_v16  ;;  %12014 = vmatprep.mubr.bf16.mxu1 %v21725_v16  ;;  %v21727_v16 = vsub.s32 1, %v21496_v30 }
 0x6bd   :  { %11813 = vmatpush1.bf16.msra.mxu0 %v20660_v5  ;;  %11985 = vmatpush1.bf16.msra.mxu1 %v20663_v18  ;;  %v20678_v5 = vld [vmem:[#allocation2 + $0x2de0] ss:$112 sps:$4 sm:$0xff]   ;;  %v20681_v18 = vld [vmem:[#allocation2 + $0x2de8] ss:$112 sps:$4 sm:$0xff]  }
 0x6be   :  { %11814 = vmatprep.subr.bf16.mxu0 %v20668_v58  ;;  %11986 = vmatprep.subr.bf16.mxu1 %v20671_v63  ;;  %v20686_v58 = vld [vmem:[#allocation2 + $0x2ec4] ss:$112 sps:$4 sm:$0xff]   ;;  %v20689_v63 = vld [vmem:[#allocation2 + $0x2ecc] ss:$112 sps:$4 sm:$0xff]  }
 0x6c1   :  { %11815 = vmatpush1.bf16.msra.mxu0 %v20666_v42  ;;  %11987 = vmatpush1.bf16.msra.mxu1 %v20669_v0  ;;  %v21728_v42 = vsub.s32 0, %v21496_v30  ;;  %v21500_v0 = vld [vmem:[#allocation4] sm:$0xff] }
 0x6c2   :  { %11816 = vmatprep.subr.bf16.mxu0 %v20674_v25  ;;  %11988 = vmatprep.subr.bf16.mxu1 %v20677_v23  ;;  %v12079_v25 = vsub.s32 2, %v21496_v30  ;;  %v20684_v23 = vld [vmem:[#allocation2 + $0x2ec0] ss:$112 sps:$4 sm:$0xff]  }
 0x6c3   :  { %v12072_v6 = vrot.slane %v21500_v0, %v21728_v42 }
 0x6c4   :  { %v12080_v1 = vrot.slane %v21500_v0, %v12079_v25  ;;  %v21729_v25 = vmax.f32 %v21254_v12, %v21342_v51  ;;  %v21731_v12 = vmax.f32 %v21260_v15, %v21307_v41  ;;  %v21732_v51 = vmax.f32 %v21262_v17, %v21358_v61  ;;  %v12147_v15 = vld [vmem:[#allocation6 + $0x40] sm:$0xff] }
 0x6c5   :  { %11817 = vmatpush1.bf16.msra.mxu0 %v20672_v9  ;;  %11989 = vmatpush1.bf16.msra.mxu1 %v20675_v10  ;;  %v20692_v9 = vld [vmem:[#allocation2 + $0x2fa4] ss:$112 sps:$4 sm:$0xff]   ;;  %v20695_v10 = vld [vmem:[#allocation2 + $0x2fac] ss:$112 sps:$4 sm:$0xff]  }
 0x6c6   :  { %11818 = vmatprep.subr.bf16.mxu0 %v20680_v39  ;;  %11990 = vmatprep.subr.bf16.mxu1 %v20683_v24  ;;  %v12151_v41 = vld [vmem:[#allocation6 + $0x60] sm:$0xff] }
 0x6c9   :  { %11819 = vmatpush1.bf16.msra.mxu0 %v20678_v5  ;;  %11991 = vmatpush1.bf16.msra.mxu1 %v20681_v18  ;;  %v12076_v5 = vrot.slane %v21500_v0, %v21727_v16 }
 0x6ca   :  { %11820 = vmatprep.subr.bf16.mxu0 %v20686_v58  ;;  %11992 = vmatprep.subr.bf16.mxu1 %v20689_v63 }
 0x6cb   :  { %v21503_v39 = vpop.f32.mrb[20].mxu0  ;;  %v11672_v24 = vpop.f32.mrb[20].mxu1 }
 0x6cc   :  { %v12040_v54 = vmax.f32 %v21425_v8, %v11672_v24  ;;  %v11502_v18 = vpop.f32.mrb[21].mxu0  ;;  %v11674_v50 = vpop.f32.mrb[21].mxu1  ;;  %v20690_v8 = vld [vmem:[#allocation2 + $0x2fa0] ss:$112 sps:$4 sm:$0xff]  }
 0x6cd   :  { %v12039_v58 = vmax.f32 %v21419_v4, %v11502_v18  ;;  %v12041_v63 = vmax.f32 %v21457_v38, %v11674_v50  ;;  %v21515_v44 = vpop.f32.mrb[22].mxu0  ;;  %v11676_v59 = vpop.f32.mrb[22].mxu1  ;;  %11821 = vmatpush1.bf16.msra.mxu0 %v20684_v23  ;;  %11993 = vmatpush1.bf16.msra.mxu1 %v20687_v60  ;;  %v20693_v4 = vld [vmem:[#allocation2 + $0x2fa8] ss:$112 sps:$4 sm:$0xff]   ;;  %v20698_v50 = vld [vmem:[#allocation2 + $0x3084] ss:$112 sps:$4 sm:$0xff]  }
 0x6ce   :  { %v12054_v24 = vmax.f32 %v12026_v49, %v12040_v54  ;;  %v12047_v16 = vmax.f32 %v21437_v29, %v11676_v59  ;;  %v11506_v42 = vpop.f32.mrb[23].mxu0  ;;  %v11678_v53 = vpop.f32.mrb[23].mxu1  ;;  %11822 = vmatprep.subr.bf16.mxu0 %v20692_v9  ;;  %11994 = vmatprep.subr.bf16.mxu1 %v20695_v10  ;;  %v12139_v49 = vld [vmem:[#allocation6] sm:$0xff]  ;;  %v21730_v29 = vmax.f32 %v21264_v20, %v21350_v55  ;;  %v12140_v10 = vld [vmem:[#allocation6 + $0x8] sm:$0xff] }
 0x6cf   :  { %v12053_v38 = vmax.f32 %v12025_v35, %v12039_v58  ;;  %v12055_v23 = vmax.f32 %v21729_v25, %v12041_v63  ;;  %v12046_v60 = vmax.f32 %v21431_v22, %v11506_v42  ;;  %v12048_v13 = vmax.f32 %v21465_v57, %v11678_v53  ;;  %v12143_v54 = vld [vmem:[#allocation6 + $0x20] sm:$0xff]  ;;  %v12144_v18 = vld [vmem:[#allocation6 + $0x28] sm:$0xff] }
 0x6d0   :  { %v12105_v59 = vadd.f32 %v12076_v5, %v12054_v24  ;;  %v12061_v9 = vmax.f32 %v21730_v29, %v12047_v16  ;;  %v20696_v22 = vld [vmem:[#allocation2 + $0x3080] ss:$112 sps:$4 sm:$0xff]   ;;  %v20699_v42 = vld [vmem:[#allocation2 + $0x3088] ss:$112 sps:$4 sm:$0xff]   ;;  %v17543_v20 = vcombine.high %v12139_v49, %v12143_v54  ;;  %v17545_v58 = vcombine.high %v12140_v10, %v12144_v18 }
 0x6d1   :  { %v12104_v11 = vadd.f32 %v12072_v6, %v12053_v38  ;;  %v12106_v34 = vadd.f32 %v12080_v1, %v12055_v23  ;;  %v12060_v35 = vmax.f32 %v21731_v12, %v12046_v60  ;;  %v12062_v53 = vmax.f32 %v21732_v51, %v12048_v13  ;;  %11823 = vmatpush1.bf16.msra.mxu0 %v20690_v8  ;;  %v12148_v8 = vld [vmem:[#allocation6 + $0x48] sm:$0xff]  ;;  %v12155_v13 = vld [vmem:[#allocation6 + $0x80] sm:$0xff] }
 0x6d2   :  { %v12112_v57 = vadd.f32 %v12076_v5, %v12061_v9  ;;  %11995 = vmatpush1.bf16.msra.mxu1 %v20693_v4  ;;  %11824 = vmatprep.subr.bf16.mxu0 %v20698_v50  ;;  %v12119_v63 = vmax.f32 %v12105_v59, 0.0  ;;  %v17542_v38 = vcombine.low %v12139_v49, %v12143_v54  ;;  %v12152_v5 = vld [vmem:[#allocation6 + $0x68] sm:$0xff]  ;;  %v17551_v60 = vcombine.high %v12147_v15, %v12151_v41  ;;  %v12167_v12 = vld [vmem:[#allocation6 + $0xe0] sm:$0xff] }
 0x6d3   :  { %v12111_v16 = vadd.f32 %v12072_v6, %v12060_v35  ;;  %v12113_v55 = vadd.f32 %v12080_v1, %v12062_v53  ;;  %11996 = vmatprep.subr.bf16.mxu1 %v20701_v47  ;;  %v12118_v25 = vmax.f32 %v12104_v11, 0.0  ;;  %v12120_v23 = vmax.f32 %v12106_v34, 0.0  ;;  %v12159_v47 = vld [vmem:[#allocation6 + $0xa0] sm:$0xff]  ;;  %v20768_v49 = vld [vmem:[%s21713_s0 + $0x18] ss:$28 sps:$4 sm:$0xff]  }
 0x6d4   :  { %v12126_v24 = vmax.f32 %v12112_v57, 0.0  ;;  %v17544_v6 = vcombine.low %v12140_v10, %v12144_v18  ;;  %v17553_v54 = vcombine.high %v12148_v8, %v12152_v5  ;;  %v12156_v59 = vld [vmem:[#allocation6 + $0x88] sm:$0xff]  ;;  %v17550_v9 = vcombine.low %v12147_v15, %v12151_v41  ;;  %v12163_v34 = vld [vmem:[#allocation6 + $0xc0] sm:$0xff] }
 0x6d5   :  { %v12125_v17 = vmax.f32 %v12111_v16, 0.0  ;;  %v12127_v61 = vmax.f32 %v12113_v55, 0.0  ;;  %11825 = vmatpush1.bf16.msra.mxu0 %v20696_v22  ;;  %v12160_v29 = vld [vmem:[#allocation6 + $0xa8] sm:$0xff]  ;;  %v17552_v10 = vcombine.low %v12148_v8, %v12152_v5  ;;  %v17559_v18 = vcombine.high %v12155_v13, %v12159_v47  ;;  %v12175_v16 = vld [vmem:[#allocation6 + $0x120] sm:$0xff] }
 0x6d6   :  { %v21538_v4 = vpack.c.bf16 %v12126_v24, %v12119_v63  ;;  %11997 = vmatpush1.bf16.msra.mxu1 %v20699_v42  ;;  %14827 = vmatprep.subr.bf16.mxu0 %v17543_v20  ;;  %v17561_v11 = vcombine.high %v12156_v59, %v12160_v29  ;;  %v12164_v35 = vld [vmem:[#allocation6 + $0xc8] sm:$0xff]  ;;  %v17558_v53 = vcombine.low %v12155_v13, %v12159_v47  ;;  %v12171_v20 = vld [vmem:[#allocation6 + $0x100] sm:$0xff] }
 0x6d7   :  { %v21540_v1 = vpack.c.bf16 %v12125_v17, %v12118_v25  ;;  %v21542_v50 = vpack.c.bf16 %v12127_v61, %v12120_v23  ;;  %14999 = vmatprep.subr.bf16.mxu1 %v17545_v58  ;;  %v12168_v51 = vld [vmem:[#allocation6 + $0xe8] sm:$0xff]  ;;  %v17560_v22 = vcombine.low %v12156_v59, %v12160_v29  ;;  %v17567_v57 = vcombine.high %v12163_v34, %v12167_v12  ;;  %v12179_v41 = vld [vmem:[#allocation6 + $0x140] sm:$0xff] }
 0x6d8   :  { %11843 = vmatmul.mubr.bf16.vlgmr.msra.gmra.mrb[24].mxu0 %v20768_v49  ;;  %v17569_v42 = vcombine.high %v12164_v35, %v12168_v51  ;;  %v12172_v55 = vld [vmem:[#allocation6 + $0x108] sm:$0xff]  ;;  %v17566_v63 = vcombine.low %v12163_v34, %v12167_v12  ;;  %v17568_v24 = vcombine.low %v12164_v35, %v12168_v51  ;;  %v12183_v25 = vld [vmem:[#allocation6 + $0x160] sm:$0xff]  ;;  %v17574_v61 = vcombine.low %v12171_v20, %v12175_v16 }
 0x6d9   :  { %12015 = vmatmul.mubr.bf16.vlgmr.msra.gmra.mrb[24].mxu1 %v20768_v49  ;;  %14828 = vmatpush1.bf16.msra.mxu0 %v17542_v38  ;;  %v12176_v58 = vld [vmem:[#allocation6 + $0x128] sm:$0xff]  ;;  %v17575_v38 = vcombine.high %v12171_v20, %v12175_v16  ;;  %v17583_v5 = vcombine.high %v12179_v41, %v12183_v25  ;;  %v12191_v13 = vld [vmem:[#allocation6 + $0x1a0] sm:$0xff] }
 0x6da   :  { %14859 = vmatprep.mubr.bf16.mxu0 %v21538_v4  ;;  %15000 = vmatpush1.bf16.msra.mxu1 %v17544_v6  ;;  %v17577_v15 = vcombine.high %v12172_v55, %v12176_v58  ;;  %v12180_v23 = vld [vmem:[#allocation6 + $0x148] sm:$0xff]  ;;  %v17576_v8 = vcombine.low %v12172_v55, %v12176_v58 }
 0x6db   :  { %15031 = vmatprep.mubr.bf16.mxu1 %v21538_v4  ;;  %14829 = vmatprep.subr.bf16.mxu0 %v17551_v60  ;;  %v12184_v17 = vld [vmem:[#allocation6 + $0x168] sm:$0xff]  ;;  %v12187_v60 = vld [vmem:[#allocation6 + $0x180] sm:$0xff] }
 0x6dc   :  { %15001 = vmatprep.subr.bf16.mxu1 %v17553_v54  ;;  %v17585_v6 = vcombine.high %v12180_v23, %v12184_v17  ;;  %v12188_v47 = vld [vmem:[#allocation6 + $0x188] sm:$0xff]  ;;  %v17582_v54 = vcombine.low %v12179_v41, %v12183_v25  ;;  %v17584_v59 = vcombine.low %v12180_v23, %v12184_v17  ;;  %v17591_v29 = vcombine.high %v12187_v60, %v12191_v13 }
 0x6dd   :  { %14830 = vmatpush1.bf16.msra.mxu0 %v17550_v9  ;;  %v12192_v49 = vld [vmem:[#allocation6 + $0x1a8] sm:$0xff]  ;;  %v17590_v12 = vcombine.low %v12187_v60, %v12191_v13 }
 0x6de   :  { %15002 = vmatpush1.bf16.msra.mxu1 %v17552_v10  ;;  %14831 = vmatprep.subr.bf16.mxu0 %v17559_v18  ;;  %v17593_v9 = vcombine.high %v12188_v47, %v12192_v49  ;;  %v12195_v10 = vld [vmem:[#allocation6 + $0x1c0] sm:$0xff]  ;;  %v12200_v34 = vld [vmem:[#allocation6 + $0x1e8] sm:$0xff]  ;;  %v17592_v35 = vcombine.low %v12188_v47, %v12192_v49 }
 0x6df   :  { %15003 = vmatprep.subr.bf16.mxu1 %v17561_v11  ;;  %v12199_v18 = vld [vmem:[#allocation6 + $0x1e0] sm:$0xff]  ;;  %v12196_v11 = vld [vmem:[#allocation6 + $0x1c8] sm:$0xff] }
 0x6e0   :  { %v17599_v51 = vcombine.high %v12195_v10, %v12199_v18  ;;  %v12208_v20 = vld [vmem:[#allocation6 + $0x228] sm:$0xff]  ;;  %v17598_v16 = vcombine.low %v12195_v10, %v12199_v18  ;;  %v17600_v55 = vcombine.low %v12196_v11, %v12200_v34 }
 0x6e1   :  { %14832 = vmatpush1.bf16.msra.mxu0 %v17558_v53  ;;  %v17601_v53 = vcombine.high %v12196_v11, %v12200_v34  ;;  %v12216_v41 = vld [vmem:[#allocation6 + $0x268] sm:$0xff] }
 0x6e2   :  { %15004 = vmatpush1.bf16.msra.mxu1 %v17560_v22  ;;  %14833 = vmatprep.subr.bf16.mxu0 %v17567_v57  ;;  %v12203_v22 = vld [vmem:[#allocation6 + $0x200] sm:$0xff]  ;;  %v12224_v60 = vld [vmem:[#allocation6 + $0x2a8] sm:$0xff] }
 0x6e3   :  { %15005 = vmatprep.subr.bf16.mxu1 %v17569_v42  ;;  %v12207_v57 = vld [vmem:[#allocation6 + $0x220] sm:$0xff]  ;;  %v12204_v42 = vld [vmem:[#allocation6 + $0x208] sm:$0xff] }
 0x6e4   :  { %v17607_v58 = vcombine.high %v12203_v22, %v12207_v57  ;;  %v17606_v25 = vcombine.low %v12203_v22, %v12207_v57  ;;  %v17608_v23 = vcombine.low %v12204_v42, %v12208_v20  ;;  %v12232_v10 = vld [vmem:[#allocation6 + $0x2e8] sm:$0xff] }
 0x6e5   :  { %14834 = vmatpush1.bf16.msra.mxu0 %v17566_v63  ;;  %v17609_v63 = vcombine.high %v12204_v42, %v12208_v20  ;;  %v12240_v22 = vld [vmem:[#allocation6 + $0x328] sm:$0xff] }
 0x6e6   :  { %15006 = vmatpush1.bf16.msra.mxu1 %v17568_v24  ;;  %14835 = vmatprep.subr.bf16.mxu0 %v17575_v38  ;;  %v12211_v24 = vld [vmem:[#allocation6 + $0x240] sm:$0xff] }
 0x6e7   :  { %15007 = vmatprep.subr.bf16.mxu1 %v17577_v15  ;;  %v12215_v38 = vld [vmem:[#allocation6 + $0x260] sm:$0xff]  ;;  %v12212_v15 = vld [vmem:[#allocation6 + $0x248] sm:$0xff] }
 0x6e8   :  { %v17615_v17 = vcombine.high %v12211_v24, %v12215_v38  ;;  %v17614_v13 = vcombine.low %v12211_v24, %v12215_v38  ;;  %v17616_v47 = vcombine.low %v12212_v15, %v12216_v41  ;;  %v12248_v24 = vld [vmem:[#allocation6 + $0x368] sm:$0xff] }
 0x6e9   :  { %14836 = vmatpush1.bf16.msra.mxu0 %v17574_v61  ;;  %v17617_v61 = vcombine.high %v12212_v15, %v12216_v41 }
 0x6ea   :  { %15008 = vmatpush1.bf16.msra.mxu1 %v17576_v8  ;;  %14837 = vmatprep.subr.bf16.mxu0 %v17583_v5  ;;  %v12219_v8 = vld [vmem:[#allocation6 + $0x280] sm:$0xff] }
 0x6eb   :  { %15009 = vmatprep.subr.bf16.mxu1 %v17585_v6  ;;  %v12223_v5 = vld [vmem:[#allocation6 + $0x2a0] sm:$0xff]  ;;  %v12220_v6 = vld [vmem:[#allocation6 + $0x288] sm:$0xff] }
 0x6ec   :  { %v17623_v49 = vcombine.high %v12219_v8, %v12223_v5  ;;  %v17622_v18 = vcombine.low %v12219_v8, %v12223_v5  ;;  %v17624_v11 = vcombine.low %v12220_v6, %v12224_v60  ;;  %v12256_v8 = vld [vmem:[#allocation6 + $0x3a8] sm:$0xff] }
 0x6ed   :  { %14838 = vmatpush1.bf16.msra.mxu0 %v17582_v54  ;;  %v17625_v54 = vcombine.high %v12220_v6, %v12224_v60 }
 0x6ee   :  { %15010 = vmatpush1.bf16.msra.mxu1 %v17584_v59  ;;  %14839 = vmatprep.subr.bf16.mxu0 %v17591_v29  ;;  %v12227_v59 = vld [vmem:[#allocation6 + $0x2c0] sm:$0xff] }
 0x6ef   :  { %15011 = vmatprep.subr.bf16.mxu1 %v17593_v9  ;;  %v12231_v29 = vld [vmem:[#allocation6 + $0x2e0] sm:$0xff]  ;;  %v12228_v9 = vld [vmem:[#allocation6 + $0x2c8] sm:$0xff] }
 0x6f0   :  { %v17631_v34 = vcombine.high %v12227_v59, %v12231_v29  ;;  %v17630_v57 = vcombine.low %v12227_v59, %v12231_v29  ;;  %v17632_v42 = vcombine.low %v12228_v9, %v12232_v10  ;;  %v12264_v59 = vld [vmem:[#allocation6 + $0x3e8] sm:$0xff] }
 0x6f1   :  { %14840 = vmatpush1.bf16.msra.mxu0 %v17590_v12  ;;  %v17633_v12 = vcombine.high %v12228_v9, %v12232_v10 }
 0x6f2   :  { %15012 = vmatpush1.bf16.msra.mxu1 %v17592_v35  ;;  %14841 = vmatprep.subr.bf16.mxu0 %v17599_v51  ;;  %v12235_v35 = vld [vmem:[#allocation6 + $0x300] sm:$0xff] }
 0x6f3   :  { %15013 = vmatprep.subr.bf16.mxu1 %v17601_v53  ;;  %v12239_v51 = vld [vmem:[#allocation6 + $0x320] sm:$0xff]  ;;  %v12236_v53 = vld [vmem:[#allocation6 + $0x308] sm:$0xff] }
 0x6f4   :  { %v17639_v20 = vcombine.high %v12235_v35, %v12239_v51  ;;  %v17638_v38 = vcombine.low %v12235_v35, %v12239_v51  ;;  %v17640_v15 = vcombine.low %v12236_v53, %v12240_v22  ;;  %v12272_v35 = vld [vmem:[#allocation6 + $0x428] sm:$0xff] }
 0x6f5   :  { %14842 = vmatpush1.bf16.msra.mxu0 %v17598_v16  ;;  %v17641_v16 = vcombine.high %v12236_v53, %v12240_v22 }
 0x6f6   :  { %15014 = vmatpush1.bf16.msra.mxu1 %v17600_v55  ;;  %14843 = vmatprep.subr.bf16.mxu0 %v17607_v58  ;;  %v12243_v55 = vld [vmem:[#allocation6 + $0x340] sm:$0xff] }
 0x6f7   :  { %15015 = vmatprep.subr.bf16.mxu1 %v17609_v63  ;;  %v12247_v58 = vld [vmem:[#allocation6 + $0x360] sm:$0xff]  ;;  %v12244_v63 = vld [vmem:[#allocation6 + $0x348] sm:$0xff] }
 0x6f8   :  { %v17647_v41 = vcombine.high %v12243_v55, %v12247_v58  ;;  %v17646_v5 = vcombine.low %v12243_v55, %v12247_v58  ;;  %v17648_v6 = vcombine.low %v12244_v63, %v12248_v24  ;;  %v12280_v55 = vld [vmem:[#allocation6 + $0x468] sm:$0xff] }
 0x6f9   :  { %14844 = vmatpush1.bf16.msra.mxu0 %v17606_v25  ;;  %v17649_v25 = vcombine.high %v12244_v63, %v12248_v24 }
 0x6fa   :  { %15016 = vmatpush1.bf16.msra.mxu1 %v17608_v23  ;;  %14845 = vmatprep.subr.bf16.mxu0 %v17615_v17  ;;  %v12251_v23 = vld [vmem:[#allocation6 + $0x380] sm:$0xff] }
 0x6fb   :  { %15017 = vmatprep.subr.bf16.mxu1 %v17617_v61  ;;  %v12255_v17 = vld [vmem:[#allocation6 + $0x3a0] sm:$0xff]  ;;  %v12252_v61 = vld [vmem:[#allocation6 + $0x388] sm:$0xff] }
 0x6fc   :  { %v17655_v60 = vcombine.high %v12251_v23, %v12255_v17  ;;  %v17654_v29 = vcombine.low %v12251_v23, %v12255_v17  ;;  %v17656_v9 = vcombine.low %v12252_v61, %v12256_v8  ;;  %v12288_v23 = vld [vmem:[#allocation6 + $0x4a8] sm:$0xff] }
 0x6fd   :  { %14846 = vmatpush1.bf16.msra.mxu0 %v17614_v13  ;;  %v17657_v13 = vcombine.high %v12252_v61, %v12256_v8 }
 0x6fe   :  { %15018 = vmatpush1.bf16.msra.mxu1 %v17616_v47  ;;  %14847 = vmatprep.subr.bf16.mxu0 %v17623_v49  ;;  %v12259_v47 = vld [vmem:[#allocation6 + $0x3c0] sm:$0xff] }
 0x6ff   :  { %15019 = vmatprep.subr.bf16.mxu1 %v17625_v54  ;;  %v12263_v49 = vld [vmem:[#allocation6 + $0x3e0] sm:$0xff]  ;;  %v12260_v54 = vld [vmem:[#allocation6 + $0x3c8] sm:$0xff] }
 0x700   :  { %v17663_v10 = vcombine.high %v12259_v47, %v12263_v49  ;;  %v17662_v51 = vcombine.low %v12259_v47, %v12263_v49  ;;  %v17664_v53 = vcombine.low %v12260_v54, %v12264_v59  ;;  %v12296_v47 = vld [vmem:[#allocation6 + $0x4e8] sm:$0xff] }
 0x701   :  { %14848 = vmatpush1.bf16.msra.mxu0 %v17622_v18  ;;  %v17665_v18 = vcombine.high %v12260_v54, %v12264_v59 }
 0x702   :  { %15020 = vmatpush1.bf16.msra.mxu1 %v17624_v11  ;;  %14849 = vmatprep.subr.bf16.mxu0 %v17631_v34  ;;  %v12267_v11 = vld [vmem:[#allocation6 + $0x400] sm:$0xff] }
 0x703   :  { %15021 = vmatprep.subr.bf16.mxu1 %v17633_v12  ;;  %v12271_v34 = vld [vmem:[#allocation6 + $0x420] sm:$0xff]  ;;  %v12268_v12 = vld [vmem:[#allocation6 + $0x408] sm:$0xff] }
 0x704   :  { %v17671_v22 = vcombine.high %v12267_v11, %v12271_v34  ;;  %v17670_v58 = vcombine.low %v12267_v11, %v12271_v34  ;;  %v17672_v63 = vcombine.low %v12268_v12, %v12272_v35  ;;  %v12304_v11 = vld [vmem:[#allocation6 + $0x528] sm:$0xff] }
 0x705   :  { %14850 = vmatpush1.bf16.msra.mxu0 %v17630_v57  ;;  %v17673_v57 = vcombine.high %v12268_v12, %v12272_v35 }
 0x706   :  { %15022 = vmatpush1.bf16.msra.mxu1 %v17632_v42  ;;  %14851 = vmatprep.subr.bf16.mxu0 %v17639_v20  ;;  %v12275_v42 = vld [vmem:[#allocation6 + $0x440] sm:$0xff] }
 0x707   :  { %15023 = vmatprep.subr.bf16.mxu1 %v17641_v16  ;;  %v12279_v20 = vld [vmem:[#allocation6 + $0x460] sm:$0xff]  ;;  %v12276_v16 = vld [vmem:[#allocation6 + $0x448] sm:$0xff] }
 0x708   :  { %v17679_v24 = vcombine.high %v12275_v42, %v12279_v20  ;;  %v17678_v17 = vcombine.low %v12275_v42, %v12279_v20  ;;  %v17680_v61 = vcombine.low %v12276_v16, %v12280_v55  ;;  %v12312_v42 = vld [vmem:[#allocation6 + $0x568] sm:$0xff] }
 0x709   :  { %14852 = vmatpush1.bf16.msra.mxu0 %v17638_v38  ;;  %v17681_v38 = vcombine.high %v12276_v16, %v12280_v55 }
 0x70a   :  { %15024 = vmatpush1.bf16.msra.mxu1 %v17640_v15  ;;  %14853 = vmatprep.subr.bf16.mxu0 %v17647_v41  ;;  %v12283_v15 = vld [vmem:[#allocation6 + $0x480] sm:$0xff] }
 0x70b   :  { %15025 = vmatprep.subr.bf16.mxu1 %v17649_v25  ;;  %v12287_v41 = vld [vmem:[#allocation6 + $0x4a0] sm:$0xff]  ;;  %v12284_v25 = vld [vmem:[#allocation6 + $0x488] sm:$0xff] }
 0x70c   :  { %v17687_v8 = vcombine.high %v12283_v15, %v12287_v41  ;;  %v17686_v49 = vcombine.low %v12283_v15, %v12287_v41  ;;  %v17688_v54 = vcombine.low %v12284_v25, %v12288_v23  ;;  %v12320_v15 = vld [vmem:[#allocation6 + $0x5a8] sm:$0xff] }
 0x70d   :  { %14854 = vmatpush1.bf16.msra.mxu0 %v17646_v5  ;;  %v17689_v5 = vcombine.high %v12284_v25, %v12288_v23 }
 0x70e   :  { %15026 = vmatpush1.bf16.msra.mxu1 %v17648_v6  ;;  %14855 = vmatprep.subr.bf16.mxu0 %v17655_v60  ;;  %v12291_v6 = vld [vmem:[#allocation6 + $0x4c0] sm:$0xff] }
 0x70f   :  { %15027 = vmatprep.subr.bf16.mxu1 %v17657_v13  ;;  %v12295_v60 = vld [vmem:[#allocation6 + $0x4e0] sm:$0xff]  ;;  %v12292_v13 = vld [vmem:[#allocation6 + $0x4c8] sm:$0xff] }
 0x710   :  { %v17695_v59 = vcombine.high %v12291_v6, %v12295_v60  ;;  %v17694_v34 = vcombine.low %v12291_v6, %v12295_v60  ;;  %v17696_v12 = vcombine.low %v12292_v13, %v12296_v47  ;;  %v12328_v6 = vld [vmem:[#allocation6 + $0x5e8] sm:$0xff] }
 0x711   :  { %14856 = vmatpush1.bf16.msra.mxu0 %v17654_v29  ;;  %v17697_v29 = vcombine.high %v12292_v13, %v12296_v47 }
 0x712   :  { %15028 = vmatpush1.bf16.msra.mxu1 %v17656_v9  ;;  %14857 = vmatprep.subr.bf16.mxu0 %v17663_v10  ;;  %v12299_v9 = vld [vmem:[#allocation6 + $0x500] sm:$0xff] }
 0x713   :  { %15029 = vmatprep.subr.bf16.mxu1 %v17665_v18  ;;  %v12303_v10 = vld [vmem:[#allocation6 + $0x520] sm:$0xff]  ;;  %v12300_v18 = vld [vmem:[#allocation6 + $0x508] sm:$0xff] }
 0x714   :  { %v17703_v35 = vcombine.high %v12299_v9, %v12303_v10  ;;  %v17702_v20 = vcombine.low %v12299_v9, %v12303_v10  ;;  %v17704_v16 = vcombine.low %v12300_v18, %v12304_v11  ;;  %v12336_v9 = vld [vmem:[#allocation6 + $0x628] sm:$0xff] }
 0x715   :  { %14858 = vmatpush1.bf16.msra.mxu0 %v17662_v51  ;;  %v17705_v51 = vcombine.high %v12300_v18, %v12304_v11 }
 0x716   :  { %15030 = vmatpush1.bf16.msra.mxu1 %v17664_v53  ;;  %14870 = vmatprep.subr.bf16.mxu0 %v17671_v22  ;;  %v12307_v53 = vld [vmem:[#allocation6 + $0x540] sm:$0xff] }
 0x717   :  { %15042 = vmatprep.subr.bf16.mxu1 %v17673_v57  ;;  %v12311_v22 = vld [vmem:[#allocation6 + $0x560] sm:$0xff]  ;;  %v12308_v57 = vld [vmem:[#allocation6 + $0x548] sm:$0xff] }
 0x718   :  { %14860 = vmatmul.mubr.bf16.vlgmr.msra.gmra.mrb[28].mxu0 %v21540_v1  ;;  %v17711_v55 = vcombine.high %v12307_v53, %v12311_v22  ;;  %v17710_v41 = vcombine.low %v12307_v53, %v12311_v22  ;;  %v17712_v25 = vcombine.low %v12308_v57, %v12312_v42  ;;  %v12344_v53 = vld [vmem:[#allocation6 + $0x668] sm:$0xff] }
 0x719   :  { %15032 = vmatmul.mubr.bf16.vlgmr.msra.gmra.mrb[28].mxu1 %v21540_v1  ;;  %14871 = vmatpush1.bf16.msra.mxu0 %v17670_v58  ;;  %v17713_v58 = vcombine.high %v12308_v57, %v12312_v42 }
 0x71a   :  { %15043 = vmatpush1.bf16.msra.mxu1 %v17672_v63  ;;  %14872 = vmatprep.subr.bf16.mxu0 %v17679_v24  ;;  %v12315_v63 = vld [vmem:[#allocation6 + $0x580] sm:$0xff] }
 0x71b   :  { %15044 = vmatprep.subr.bf16.mxu1 %v17681_v38  ;;  %v12319_v24 = vld [vmem:[#allocation6 + $0x5a0] sm:$0xff]  ;;  %v12316_v38 = vld [vmem:[#allocation6 + $0x588] sm:$0xff] }
 0x71c   :  { %v17719_v23 = vcombine.high %v12315_v63, %v12319_v24  ;;  %v17718_v60 = vcombine.low %v12315_v63, %v12319_v24  ;;  %v17720_v13 = vcombine.low %v12316_v38, %v12320_v15  ;;  %v21553_v63 = vld [vmem:[#allocation6 + $0x820] sm:$0xff]  ;;  %v21555_v24 = vld [vmem:[#allocation6 + $0x808] sm:$0xff] }
 0x71d   :  { %14873 = vmatpush1.bf16.msra.mxu0 %v17678_v17  ;;  %v17721_v17 = vcombine.high %v12316_v38, %v12320_v15  ;;  %v12348_v38 = vld [vmem:[#allocation6 + $0x688] sm:$0xff] }
 0x71e   :  { %15045 = vmatpush1.bf16.msra.mxu1 %v17680_v61  ;;  %14874 = vmatprep.subr.bf16.mxu0 %v17687_v8  ;;  %v12323_v61 = vld [vmem:[#allocation6 + $0x5c0] sm:$0xff]  ;;  %v12352_v15 = vld [vmem:[#allocation6 + $0x6a8] sm:$0xff] }
 0x71f   :  { %15046 = vmatprep.subr.bf16.mxu1 %v17689_v5  ;;  %v12327_v8 = vld [vmem:[#allocation6 + $0x5e0] sm:$0xff]  ;;  %v12324_v5 = vld [vmem:[#allocation6 + $0x5c8] sm:$0xff] }
 0x720   :  { %v17727_v47 = vcombine.high %v12323_v61, %v12327_v8  ;;  %v17726_v10 = vcombine.low %v12323_v61, %v12327_v8  ;;  %v17728_v18 = vcombine.low %v12324_v5, %v12328_v6 }
 0x721   :  { %14875 = vmatpush1.bf16.msra.mxu0 %v17686_v49  ;;  %v17729_v49 = vcombine.high %v12324_v5, %v12328_v6  ;;  %v17753_v5 = vcombine.high %v12348_v38, %v12352_v15  ;;  %v12355_v6 = vld [vmem:[#allocation6 + $0x6c0] sm:$0xff] }
 0x722   :  { %15047 = vmatpush1.bf16.msra.mxu1 %v17688_v54  ;;  %14876 = vmatprep.subr.bf16.mxu0 %v17695_v59  ;;  %v12331_v54 = vld [vmem:[#allocation6 + $0x600] sm:$0xff] }
 0x723   :  { %15048 = vmatprep.subr.bf16.mxu1 %v17697_v29  ;;  %v12335_v59 = vld [vmem:[#allocation6 + $0x620] sm:$0xff]  ;;  %v12332_v29 = vld [vmem:[#allocation6 + $0x608] sm:$0xff] }
 0x724   :  { %v17735_v11 = vcombine.high %v12331_v54, %v12335_v59  ;;  %v17734_v22 = vcombine.low %v12331_v54, %v12335_v59  ;;  %v17736_v57 = vcombine.low %v12332_v29, %v12336_v9  ;;  %v17752_v54 = vcombine.low %v12348_v38, %v12352_v15  ;;  %v12379_v15 = vld [vmem:[#allocation6 + $0x780] sm:$0xff] }
 0x725   :  { %14877 = vmatpush1.bf16.msra.mxu0 %v17694_v34  ;;  %v17737_v34 = vcombine.high %v12332_v29, %v12336_v9  ;;  %v12363_v9 = vld [vmem:[#allocation6 + $0x700] sm:$0xff] }
 0x726   :  { %15049 = vmatpush1.bf16.msra.mxu1 %v17696_v12  ;;  %14878 = vmatprep.subr.bf16.mxu0 %v17703_v35  ;;  %v12339_v12 = vld [vmem:[#allocation6 + $0x640] sm:$0xff] }
 0x727   :  { %15050 = vmatprep.subr.bf16.mxu1 %v17705_v51  ;;  %v12343_v35 = vld [vmem:[#allocation6 + $0x660] sm:$0xff]  ;;  %v12340_v51 = vld [vmem:[#allocation6 + $0x648] sm:$0xff] }
 0x728   :  { %v17743_v42 = vcombine.high %v12339_v12, %v12343_v35  ;;  %v17744_v61 = vcombine.low %v12340_v51, %v12344_v53 }
 0x729   :  { %14879 = vmatpush1.bf16.msra.mxu0 %v17702_v20  ;;  %v12347_v20 = vld [vmem:[#allocation6 + $0x680] sm:$0xff] }
 0x72a   :  { %15051 = vmatpush1.bf16.msra.mxu1 %v17704_v16  ;;  %14880 = vmatprep.subr.bf16.mxu0 %v17711_v55  ;;  %v12351_v16 = vld [vmem:[#allocation6 + $0x6a0] sm:$0xff]  ;;  %v17745_v55 = vcombine.high %v12340_v51, %v12344_v53 }
 0x72b   :  { %15052 = vmatprep.subr.bf16.mxu1 %v17713_v58  ;;  %v21551_v58 = vld [vmem:[#allocation6 + $0x800] sm:$0xff]  ;;  %v17751_v8 = vcombine.high %v12347_v20, %v12351_v16 }
 0x72c   :  { %v12371_v53 = vld [vmem:[#allocation6 + $0x740] sm:$0xff] }
 0x72d   :  { %14881 = vmatpush1.bf16.msra.mxu0 %v17710_v41  ;;  %v17798_v41 = vcombine.low %v21551_v58, %v21553_v63 }
 0x72e   :  { %15053 = vmatpush1.bf16.msra.mxu1 %v17712_v25  ;;  %14882 = vmatprep.subr.bf16.mxu0 %v17719_v23  ;;  %v21559_v25 = vld [vmem:[#allocation6 + $0x828] sm:$0xff]  ;;  %v17742_v23 = vcombine.low %v12339_v12, %v12343_v35 }
 0x72f   :  { %15054 = vmatprep.subr.bf16.mxu1 %v17721_v17  ;;  %v17800_v17 = vcombine.low %v21555_v24, %v21559_v25 }
 0x731   :  { %14883 = vmatpush1.bf16.msra.mxu0 %v17718_v60  ;;  %v12359_v60 = vld [vmem:[#allocation6 + $0x6e0] sm:$0xff] }
 0x732   :  { %15055 = vmatpush1.bf16.msra.mxu1 %v17720_v13  ;;  %14884 = vmatprep.subr.bf16.mxu0 %v17727_v47  ;;  %v12356_v13 = vld [vmem:[#allocation6 + $0x6c8] sm:$0xff]  ;;  %v17759_v59 = vcombine.high %v12355_v6, %v12359_v60 }
 0x733   :  { %15056 = vmatprep.subr.bf16.mxu1 %v17729_v49  ;;  %v12360_v47 = vld [vmem:[#allocation6 + $0x6e8] sm:$0xff]  ;;  %v17750_v49 = vcombine.low %v12347_v20, %v12351_v16 }
 0x734   :  { %v17761_v29 = vcombine.high %v12356_v13, %v12360_v47  ;;  %v17760_v12 = vcombine.low %v12356_v13, %v12360_v47  ;;  %v12387_v47 = vld [vmem:[#allocation6 + $0x7c0] sm:$0xff] }
 0x735   :  { %14885 = vmatpush1.bf16.msra.mxu0 %v17726_v10  ;;  %v12367_v10 = vld [vmem:[#allocation6 + $0x720] sm:$0xff] }
 0x736   :  { %15057 = vmatpush1.bf16.msra.mxu1 %v17728_v18  ;;  %14886 = vmatprep.subr.bf16.mxu0 %v17735_v11  ;;  %v12364_v18 = vld [vmem:[#allocation6 + $0x708] sm:$0xff]  ;;  %v17767_v35 = vcombine.high %v12363_v9, %v12367_v10  ;;  %v17766_v20 = vcombine.low %v12363_v9, %v12367_v10 }
 0x737   :  { %15058 = vmatprep.subr.bf16.mxu1 %v17737_v34  ;;  %v12368_v11 = vld [vmem:[#allocation6 + $0x728] sm:$0xff]  ;;  %v17758_v34 = vcombine.low %v12355_v6, %v12359_v60 }
 0x738   :  { %v17769_v51 = vcombine.high %v12364_v18, %v12368_v11  ;;  %v17768_v16 = vcombine.low %v12364_v18, %v12368_v11 }
 0x739   :  { %14887 = vmatpush1.bf16.msra.mxu0 %v17734_v22  ;;  %v12375_v22 = vld [vmem:[#allocation6 + $0x760] sm:$0xff] }
 0x73a   :  { %15059 = vmatpush1.bf16.msra.mxu1 %v17736_v57  ;;  %14888 = vmatprep.subr.bf16.mxu0 %v17743_v42  ;;  %v12372_v57 = vld [vmem:[#allocation6 + $0x748] sm:$0xff] }
 0x73b   :  { %15060 = vmatprep.subr.bf16.mxu1 %v17745_v55  ;;  %v12376_v42 = vld [vmem:[#allocation6 + $0x768] sm:$0xff]  ;;  %v17775_v55 = vcombine.high %v12371_v53, %v12375_v22 }
 0x73c   :  { %v17777_v38 = vcombine.high %v12372_v57, %v12376_v42  ;;  %v17776_v6 = vcombine.low %v12372_v57, %v12376_v42  ;;  %v12095_v57 = vsub.s32 6, %v21496_v30 }
 0x73d   :  { %14889 = vmatpush1.bf16.msra.mxu0 %v17742_v23  ;;  %v12383_v23 = vld [vmem:[#allocation6 + $0x7a0] sm:$0xff] }
 0x73e   :  { %15061 = vmatpush1.bf16.msra.mxu1 %v17744_v61  ;;  %14890 = vmatprep.subr.bf16.mxu0 %v17751_v8  ;;  %v12380_v61 = vld [vmem:[#allocation6 + $0x788] sm:$0xff]  ;;  %v17783_v60 = vcombine.high %v12379_v15, %v12383_v23 }
 0x73f   :  { %15062 = vmatprep.subr.bf16.mxu1 %v17753_v5  ;;  %v12384_v8 = vld [vmem:[#allocation6 + $0x7a8] sm:$0xff]  ;;  %v17774_v5 = vcombine.low %v12371_v53, %v12375_v22  ;;  %v12091_v53 = vsub.s32 5, %v21496_v30  ;;  %v12087_v22 = vsub.s32 4, %v21496_v30 }
 0x740   :  { %v17785_v13 = vcombine.high %v12380_v61, %v12384_v8  ;;  %v17784_v9 = vcombine.low %v12380_v61, %v12384_v8 }
 0x741   :  { %14891 = vmatpush1.bf16.msra.mxu0 %v17750_v49  ;;  %v12391_v49 = vld [vmem:[#allocation6 + $0x7e0] sm:$0xff]  ;;  %v12088_v8 = vrot.slane %v21500_v0, %v12087_v22 }
 0x742   :  { %15063 = vmatpush1.bf16.msra.mxu1 %v17752_v54  ;;  %14892 = vmatprep.subr.bf16.mxu0 %v17759_v59  ;;  %v12388_v54 = vld [vmem:[#allocation6 + $0x7c8] sm:$0xff]  ;;  %v17791_v10 = vcombine.high %v12387_v47, %v12391_v49  ;;  %v17790_v11 = vcombine.low %v12387_v47, %v12391_v49  ;;  %v12096_v47 = vrot.slane %v21500_v0, %v12095_v57  ;;  %v12403_v22 = vld [vmem:[#allocation6 + $0x840] sm:$0xff] }
 0x743   :  { %15064 = vmatprep.subr.bf16.mxu1 %v17761_v29  ;;  %v12392_v59 = vld [vmem:[#allocation6 + $0x7e8] sm:$0xff]  ;;  %v17782_v29 = vcombine.low %v12379_v15, %v12383_v23  ;;  %v12092_v23 = vrot.slane %v21500_v0, %v12091_v53  ;;  %v12407_v57 = vld [vmem:[#allocation6 + $0x860] sm:$0xff] }
 0x744   :  { %v17793_v18 = vcombine.high %v12388_v54, %v12392_v59 }
 0x745   :  { %14893 = vmatpush1.bf16.msra.mxu0 %v17758_v34  ;;  %v17792_v34 = vcombine.low %v12388_v54, %v12392_v59  ;;  %v21734_v59 = vmax.f32 %v21295_v33, %v21417_v3 }
 0x746   :  { %15065 = vmatpush1.bf16.msra.mxu1 %v17760_v12  ;;  %14894 = vmatprep.subr.bf16.mxu0 %v17767_v35  ;;  %v17799_v12 = vcombine.high %v21551_v58, %v21553_v63  ;;  %v17801_v35 = vcombine.high %v21555_v24, %v21559_v25  ;;  %v12427_v25 = vld [vmem:[#allocation6 + $0x900] sm:$0xff] }
 0x747   :  { %15066 = vmatprep.subr.bf16.mxu1 %v17769_v51  ;;  %v12083_v51 = vsub.s32 3, %v21496_v30 }
 0x749   :  { %14895 = vmatpush1.bf16.msra.mxu0 %v17766_v20 }
 0x74a   :  { %15067 = vmatpush1.bf16.msra.mxu1 %v17768_v16  ;;  %14896 = vmatprep.subr.bf16.mxu0 %v17775_v55  ;;  %v12084_v16 = vrot.slane %v21500_v0, %v12083_v51  ;;  %v21736_v0 = vmax.f32 %v21293_v32, %v21423_v7  ;;  %v21740_v32 = vmax.f32 %v21303_v37, %v21435_v28  ;;  %v12411_v28 = vld [vmem:[#allocation6 + $0x880] sm:$0xff] }
 0x74b   :  { %15068 = vmatprep.subr.bf16.mxu1 %v17777_v38 }
 0x74d   :  { %14897 = vmatpush1.bf16.msra.mxu0 %v17774_v5 }
 0x74e   :  { %15069 = vmatpush1.bf16.msra.mxu1 %v17776_v6  ;;  %14898 = vmatprep.subr.bf16.mxu0 %v17783_v60  ;;  %v21733_v60 = vmax.f32 %v21258_v14, %v21336_v48 }
 0x74f   :  { %15070 = vmatprep.subr.bf16.mxu1 %v17785_v13 }
 0x751   :  { %14899 = vmatpush1.bf16.msra.mxu0 %v17782_v29  ;;  %v21735_v29 = vmax.f32 %v21291_v31, %v21344_v52  ;;  %v21738_v31 = vmax.f32 %v21305_v40, %v21429_v19 }
 0x752   :  { %15071 = vmatpush1.bf16.msra.mxu1 %v17784_v9  ;;  %14900 = vmatprep.subr.bf16.mxu0 %v17791_v10 }
 0x753   :  { %15072 = vmatprep.subr.bf16.mxu1 %v17793_v18  ;;  %v21737_v18 = vmax.f32 %v21266_v21, %v21352_v56 }
 0x755   :  { %14901 = vmatpush1.bf16.msra.mxu0 %v17790_v11 }
 0x756   :  { %15073 = vmatpush1.bf16.msra.mxu1 %v17792_v34  ;;  %14913 = vmatprep.subr.bf16.mxu0 %v17799_v12 }
 0x757   :  { %15085 = vmatprep.subr.bf16.mxu1 %v17801_v35 }
 0x7ab   :  { %v11844_v42 = vpop.f32.mrb[24].mxu0 }
 0x7ac   :  { %v12042_v20 = vmax.f32 %v21461_v26, %v11844_v42  ;;  %v12016_v55 = vpop.f32.mrb[24].mxu1  ;;  %v11846_v38 = vpop.f32.mrb[25].mxu0 }
 0x7ad   :  { %v12044_v15 = vmax.f32 %v21463_v45, %v12016_v55  ;;  %v12043_v61 = vmax.f32 %v21459_v43, %v11846_v38  ;;  %v12018_v5 = vpop.f32.mrb[25].mxu1  ;;  %v11848_v6 = vpop.f32.mrb[26].mxu0  ;;  %v12404_v55 = vld [vmem:[#allocation6 + $0x848] sm:$0xff] }
 0x7ae   :  { %v12056_v13 = vmax.f32 %v21733_v60, %v12042_v20  ;;  %v12045_v26 = vmax.f32 %v21503_v39, %v12018_v5  ;;  %v12049_v49 = vmax.f32 %v21469_v2, %v11848_v6  ;;  %v12020_v54 = vpop.f32.mrb[26].mxu1  ;;  %v11850_v45 = vpop.f32.mrb[27].mxu0  ;;  %v12415_v5 = vld [vmem:[#allocation6 + $0x8a0] sm:$0xff]  ;;  %v12412_v6 = vld [vmem:[#allocation6 + $0x888] sm:$0xff] }
 0x7af   :  { %v12058_v43 = vmax.f32 %v21734_v59, %v12044_v15  ;;  %v12057_v9 = vmax.f32 %v21735_v29, %v12043_v61  ;;  %v12051_v10 = vmax.f32 %v21471_v27, %v12020_v54  ;;  %v12050_v14 = vmax.f32 %v21467_v46, %v11850_v45  ;;  %v12022_v48 = vpop.f32.mrb[27].mxu1  ;;  %v12416_v60 = vld [vmem:[#allocation6 + $0x8a8] sm:$0xff]  ;;  %v12419_v54 = vld [vmem:[#allocation6 + $0x8c0] sm:$0xff] }
 0x7b0   :  { %v12107_v39 = vadd.f32 %v12084_v16, %v12056_v13  ;;  %v12059_v2 = vmax.f32 %v21736_v0, %v12045_v26  ;;  %v12063_v11 = vmax.f32 %v21737_v18, %v12049_v49  ;;  %v12052_v33 = vmax.f32 %v21515_v44, %v12022_v48  ;;  %v12423_v45 = vld [vmem:[#allocation6 + $0x8e0] sm:$0xff]  ;;  %v12420_v59 = vld [vmem:[#allocation6 + $0x8c8] sm:$0xff] }
 0x7b1   :  { %v12109_v3 = vadd.f32 %v12092_v23, %v12058_v43  ;;  %v12108_v34 = vadd.f32 %v12088_v8, %v12057_v9  ;;  %v12065_v52 = vmax.f32 %v21738_v31, %v12051_v10  ;;  %v21739_v46 = vmax.f32 %v21301_v36, %v21360_v62  ;;  %v12408_v36 = vld [vmem:[#allocation6 + $0x868] sm:$0xff]  ;;  %v12435_v0 = vld [vmem:[#allocation6 + $0x940] sm:$0xff] }
 0x7b2   :  { %v12110_v12 = vadd.f32 %v12096_v47, %v12059_v2  ;;  %v12114_v35 = vadd.f32 %v12084_v16, %v12063_v11  ;;  %v12066_v7 = vmax.f32 %v21740_v32, %v12052_v33  ;;  %v12121_v51 = vmax.f32 %v12107_v39, 0.0  ;;  %v12424_v43 = vld [vmem:[#allocation6 + $0x8e8] sm:$0xff]  ;;  %v12439_v2 = vld [vmem:[#allocation6 + $0x960] sm:$0xff] }
 0x7b3   :  { %v12064_v27 = vmax.f32 %v21739_v46, %v12050_v14  ;;  %v12116_v21 = vadd.f32 %v12092_v23, %v12065_v52  ;;  %v12123_v42 = vmax.f32 %v12109_v3, 0.0  ;;  %v12122_v40 = vmax.f32 %v12108_v34, 0.0  ;;  %v12428_v29 = vld [vmem:[#allocation6 + $0x908] sm:$0xff]  ;;  %v12443_v52 = vld [vmem:[#allocation6 + $0x980] sm:$0xff] }
 0x7b4   :  { %v12128_v44 = vmax.f32 %v12114_v35, 0.0  ;;  %v12117_v53 = vadd.f32 %v12096_v47, %v12066_v7  ;;  %v12124_v62 = vmax.f32 %v12110_v12, 0.0  ;;  %v17807_v61 = vcombine.high %v12403_v22, %v12407_v57  ;;  %v12432_v9 = vld [vmem:[#allocation6 + $0x928] sm:$0xff]  ;;  %v12447_v46 = vld [vmem:[#allocation6 + $0x9a0] sm:$0xff] }
 0x7b5   :  { %v12115_v56 = vadd.f32 %v12088_v8, %v12064_v27  ;;  %v12130_v19 = vmax.f32 %v12116_v21, 0.0  ;;  %v17809_v8 = vcombine.high %v12404_v55, %v12408_v36  ;;  %v17806_v13 = vcombine.low %v12403_v22, %v12407_v57  ;;  %v12436_v18 = vld [vmem:[#allocation6 + $0x948] sm:$0xff] }
 0x7b6   :  { %v21607_v38 = vpack.c.bf16 %v12128_v44, %v12121_v51  ;;  %v12131_v16 = vmax.f32 %v12117_v53, 0.0  ;;  %v17808_v26 = vcombine.low %v12404_v55, %v12408_v36  ;;  %v17815_v47 = vcombine.high %v12411_v28, %v12415_v5  ;;  %v12440_v11 = vld [vmem:[#allocation6 + $0x968] sm:$0xff]  ;;  %v12455_v51 = vld [vmem:[#allocation6 + $0x9e0] sm:$0xff] }
 0x7b7   :  { %v12129_v20 = vmax.f32 %v12115_v56, 0.0  ;;  %v21609_v15 = vpack.c.bf16 %v12130_v19, %v12123_v42  ;;  %v17817_v49 = vcombine.high %v12412_v6, %v12416_v60  ;;  %v17814_v58 = vcombine.low %v12411_v28, %v12415_v5  ;;  %v12444_v27 = vld [vmem:[#allocation6 + $0x988] sm:$0xff]  ;;  %v12451_v56 = vld [vmem:[#allocation6 + $0x9c0] sm:$0xff] }
 0x7b8   :  { %v21613_v23 = vpack.c.bf16 %v12131_v16, %v12124_v62  ;;  %14902 = vmatprep.mubr.bf16.mxu0 %v21607_v38  ;;  %15074 = vmatprep.mubr.bf16.mxu1 %v21607_v38  ;;  %v17816_v63 = vcombine.low %v12412_v6, %v12416_v60  ;;  %v17823_v24 = vcombine.high %v12419_v54, %v12423_v45  ;;  %v12448_v12 = vld [vmem:[#allocation6 + $0x9a8] sm:$0xff]  ;;  %v12459_v19 = vld [vmem:[#allocation6 + $0xa00] sm:$0xff] }
 0x7b9   :  { %v21611_v37 = vpack.c.bf16 %v12129_v20, %v12122_v40  ;;  %14903 = vmatmul.mubr.bf16.vlgmr.msra.gmra.mrb[28].mxu0 %v21542_v50  ;;  %15075 = vmatmul.mubr.bf16.vlgmr.msra.gmra.mrb[28].mxu1 %v21542_v50  ;;  %v17822_v10 = vcombine.low %v12419_v54, %v12423_v45  ;;  %v17824_v14 = vcombine.low %v12420_v59, %v12424_v43  ;;  %v12452_v44 = vld [vmem:[#allocation6 + $0x9c8] sm:$0xff]  ;;  %v12463_v20 = vld [vmem:[#allocation6 + $0xa20] sm:$0xff] }
 0x7ba   :  { %14914 = vmatpush1.bf16.msra.mxu0 %v17798_v41  ;;  %15086 = vmatpush1.bf16.msra.mxu1 %v17800_v17  ;;  %v17825_v41 = vcombine.high %v12420_v59, %v12424_v43  ;;  %v12431_v17 = vld [vmem:[#allocation6 + $0x920] sm:$0xff]  ;;  %v17833_v39 = vcombine.high %v12428_v29, %v12432_v9  ;;  %v17832_v3 = vcombine.low %v12428_v29, %v12432_v9  ;;  %v12456_v53 = vld [vmem:[#allocation6 + $0x9e8] sm:$0xff] }
 0x7bb   :  { %14945 = vmatprep.mubr.bf16.mxu0 %v21609_v15  ;;  %15117 = vmatprep.mubr.bf16.mxu1 %v21609_v15  ;;  %v17831_v48 = vcombine.high %v12427_v25, %v12431_v17  ;;  %v17830_v33 = vcombine.low %v12427_v25, %v12431_v17  ;;  %v17839_v34 = vcombine.high %v12435_v0, %v12439_v2  ;;  %v12460_v55 = vld [vmem:[#allocation6 + $0xa08] sm:$0xff]  ;;  %v12471_v5 = vld [vmem:[#allocation6 + $0xa60] sm:$0xff] }
 0x7bc   :  { %14915 = vmatprep.subr.bf16.mxu0 %v17807_v61  ;;  %15087 = vmatprep.subr.bf16.mxu1 %v17809_v8  ;;  %v17841_v31 = vcombine.high %v12436_v18, %v12440_v11  ;;  %v17838_v35 = vcombine.low %v12435_v0, %v12439_v2  ;;  %v17840_v32 = vcombine.low %v12436_v18, %v12440_v11  ;;  %v12464_v36 = vld [vmem:[#allocation6 + $0xa28] sm:$0xff]  ;;  %v12467_v8 = vld [vmem:[#allocation6 + $0xa40] sm:$0xff] }
 0x7bd   :  { %v17847_v7 = vcombine.high %v12443_v52, %v12447_v46  ;;  %v17849_v21 = vcombine.high %v12444_v27, %v12448_v12  ;;  %v17846_v22 = vcombine.low %v12443_v52, %v12447_v46  ;;  %v17848_v57 = vcombine.low %v12444_v27, %v12448_v12  ;;  %v12468_v6 = vld [vmem:[#allocation6 + $0xa48] sm:$0xff]  ;;  %v12475_v54 = vld [vmem:[#allocation6 + $0xa80] sm:$0xff] }
 0x7be   :  { %14916 = vmatpush1.bf16.msra.mxu0 %v17806_v13  ;;  %15088 = vmatpush1.bf16.msra.mxu1 %v17808_v26  ;;  %v17855_v42 = vcombine.high %v12451_v56, %v12455_v51  ;;  %v17857_v40 = vcombine.high %v12452_v44, %v12456_v53  ;;  %v17854_v62 = vcombine.low %v12451_v56, %v12455_v51  ;;  %v12472_v60 = vld [vmem:[#allocation6 + $0xa68] sm:$0xff]  ;;  %v12479_v45 = vld [vmem:[#allocation6 + $0xaa0] sm:$0xff] }
 0x7bf   :  { %14917 = vmatprep.subr.bf16.mxu0 %v17815_v47  ;;  %15089 = vmatprep.subr.bf16.mxu1 %v17817_v49  ;;  %v17856_v16 = vcombine.low %v12452_v44, %v12456_v53  ;;  %v17863_v28 = vcombine.high %v12459_v19, %v12463_v20  ;;  %v17865_v61 = vcombine.high %v12460_v55, %v12464_v36  ;;  %v12476_v59 = vld [vmem:[#allocation6 + $0xa88] sm:$0xff]  ;;  %v12483_v25 = vld [vmem:[#allocation6 + $0xac0] sm:$0xff] }
 0x7c0   :  { %v17862_v13 = vcombine.low %v12459_v19, %v12463_v20  ;;  %v17864_v26 = vcombine.low %v12460_v55, %v12464_v36  ;;  %v17871_v47 = vcombine.high %v12467_v8, %v12471_v5  ;;  %v17873_v49 = vcombine.high %v12468_v6, %v12472_v60  ;;  %v12480_v43 = vld [vmem:[#allocation6 + $0xaa8] sm:$0xff]  ;;  %v12487_v17 = vld [vmem:[#allocation6 + $0xae0] sm:$0xff] }
 0x7c1   :  { %v12484_v29 = vld [vmem:[#allocation6 + $0xac8] sm:$0xff]  ;;  %v12491_v0 = vld [vmem:[#allocation6 + $0xb00] sm:$0xff] }
 0x7c2   :  { %14918 = vmatpush1.bf16.msra.mxu0 %v17814_v58  ;;  %15090 = vmatpush1.bf16.msra.mxu1 %v17816_v63  ;;  %v17870_v58 = vcombine.low %v12467_v8, %v12471_v5  ;;  %v17872_v63 = vcombine.low %v12468_v6, %v12472_v60  ;;  %v12488_v9 = vld [vmem:[#allocation6 + $0xae8] sm:$0xff]  ;;  %v12495_v2 = vld [vmem:[#allocation6 + $0xb20] sm:$0xff] }
 0x7c3   :  { %14919 = vmatprep.subr.bf16.mxu0 %v17823_v24  ;;  %15091 = vmatprep.subr.bf16.mxu1 %v17825_v41  ;;  %v17879_v24 = vcombine.high %v12475_v54, %v12479_v45  ;;  %v17881_v41 = vcombine.high %v12476_v59, %v12480_v43  ;;  %v12492_v18 = vld [vmem:[#allocation6 + $0xb08] sm:$0xff]  ;;  %v12499_v52 = vld [vmem:[#allocation6 + $0xb40] sm:$0xff] }
 0x7c4   :  { %v12496_v11 = vld [vmem:[#allocation6 + $0xb28] sm:$0xff]  ;;  %v12503_v46 = vld [vmem:[#allocation6 + $0xb60] sm:$0xff] }
 0x7c5   :  { %v12500_v27 = vld [vmem:[#allocation6 + $0xb48] sm:$0xff]  ;;  %v12507_v56 = vld [vmem:[#allocation6 + $0xb80] sm:$0xff] }
 0x7c6   :  { %14920 = vmatpush1.bf16.msra.mxu0 %v17822_v10  ;;  %15092 = vmatpush1.bf16.msra.mxu1 %v17824_v14  ;;  %v17878_v10 = vcombine.low %v12475_v54, %v12479_v45  ;;  %v17880_v14 = vcombine.low %v12476_v59, %v12480_v43  ;;  %v12504_v12 = vld [vmem:[#allocation6 + $0xb68] sm:$0xff]  ;;  %v12511_v51 = vld [vmem:[#allocation6 + $0xba0] sm:$0xff] }
 0x7c7   :  { %14921 = vmatprep.subr.bf16.mxu0 %v17831_v48  ;;  %15093 = vmatprep.subr.bf16.mxu1 %v17833_v39  ;;  %v17887_v48 = vcombine.high %v12483_v25, %v12487_v17  ;;  %v17889_v39 = vcombine.high %v12484_v29, %v12488_v9  ;;  %v12508_v44 = vld [vmem:[#allocation6 + $0xb88] sm:$0xff]  ;;  %v12515_v19 = vld [vmem:[#allocation6 + $0xbc0] sm:$0xff] }
 0x7c8   :  { %v12512_v53 = vld [vmem:[#allocation6 + $0xba8] sm:$0xff]  ;;  %v12519_v20 = vld [vmem:[#allocation6 + $0xbe0] sm:$0xff] }
 0x7c9   :  { %v12516_v55 = vld [vmem:[#allocation6 + $0xbc8] sm:$0xff]  ;;  %v12523_v8 = vld [vmem:[#allocation6 + $0xc00] sm:$0xff] }
 0x7ca   :  { %14922 = vmatpush1.bf16.msra.mxu0 %v17830_v33  ;;  %15094 = vmatpush1.bf16.msra.mxu1 %v17832_v3  ;;  %v17886_v33 = vcombine.low %v12483_v25, %v12487_v17  ;;  %v17888_v3 = vcombine.low %v12484_v29, %v12488_v9  ;;  %v12520_v36 = vld [vmem:[#allocation6 + $0xbe8] sm:$0xff]  ;;  %v12527_v5 = vld [vmem:[#allocation6 + $0xc20] sm:$0xff] }
 0x7cb   :  { %14923 = vmatprep.subr.bf16.mxu0 %v17839_v34  ;;  %15095 = vmatprep.subr.bf16.mxu1 %v17841_v31  ;;  %v17895_v34 = vcombine.high %v12491_v0, %v12495_v2  ;;  %v17897_v31 = vcombine.high %v12492_v18, %v12496_v11  ;;  %v12524_v6 = vld [vmem:[#allocation6 + $0xc08] sm:$0xff]  ;;  %v12531_v54 = vld [vmem:[#allocation6 + $0xc40] sm:$0xff] }
 0x7cc   :  { %v12528_v60 = vld [vmem:[#allocation6 + $0xc28] sm:$0xff]  ;;  %v12535_v45 = vld [vmem:[#allocation6 + $0xc60] sm:$0xff] }
 0x7cd   :  { %v12532_v59 = vld [vmem:[#allocation6 + $0xc48] sm:$0xff]  ;;  %v12539_v25 = vld [vmem:[#allocation6 + $0xc80] sm:$0xff] }
 0x7ce   :  { %14924 = vmatpush1.bf16.msra.mxu0 %v17838_v35  ;;  %15096 = vmatpush1.bf16.msra.mxu1 %v17840_v32  ;;  %v17894_v35 = vcombine.low %v12491_v0, %v12495_v2  ;;  %v17896_v32 = vcombine.low %v12492_v18, %v12496_v11  ;;  %v12536_v43 = vld [vmem:[#allocation6 + $0xc68] sm:$0xff]  ;;  %v12543_v17 = vld [vmem:[#allocation6 + $0xca0] sm:$0xff] }
 0x7cf   :  { %14925 = vmatprep.subr.bf16.mxu0 %v17847_v7  ;;  %15097 = vmatprep.subr.bf16.mxu1 %v17849_v21  ;;  %v17903_v7 = vcombine.high %v12499_v52, %v12503_v46  ;;  %v17905_v21 = vcombine.high %v12500_v27, %v12504_v12  ;;  %v12540_v29 = vld [vmem:[#allocation6 + $0xc88] sm:$0xff]  ;;  %v12547_v0 = vld [vmem:[#allocation6 + $0xcc0] sm:$0xff] }
 0x7d0   :  { %v12544_v9 = vld [vmem:[#allocation6 + $0xca8] sm:$0xff]  ;;  %v12551_v2 = vld [vmem:[#allocation6 + $0xce0] sm:$0xff] }
 0x7d1   :  { %v12548_v18 = vld [vmem:[#allocation6 + $0xcc8] sm:$0xff] }
 0x7d2   :  { %14926 = vmatpush1.bf16.msra.mxu0 %v17846_v22  ;;  %15098 = vmatpush1.bf16.msra.mxu1 %v17848_v57  ;;  %v17902_v22 = vcombine.low %v12499_v52, %v12503_v46  ;;  %v17904_v57 = vcombine.low %v12500_v27, %v12504_v12  ;;  %v12552_v11 = vld [vmem:[#allocation6 + $0xce8] sm:$0xff]  ;;  %v12555_v46 = vld [vmem:[#allocation6 + $0xd00] sm:$0xff] }
 0x7d3   :  { %14927 = vmatprep.subr.bf16.mxu0 %v17855_v42  ;;  %15099 = vmatprep.subr.bf16.mxu1 %v17857_v40  ;;  %v17911_v42 = vcombine.high %v12507_v56, %v12511_v51  ;;  %v17913_v40 = vcombine.high %v12508_v44, %v12512_v53  ;;  %v17953_v52 = vcombine.high %v12548_v18, %v12552_v11  ;;  %v12559_v27 = vld [vmem:[#allocation6 + $0xd20] sm:$0xff]  ;;  %v12556_v12 = vld [vmem:[#allocation6 + $0xd08] sm:$0xff] }
 0x7d6   :  { %14928 = vmatpush1.bf16.msra.mxu0 %v17854_v62  ;;  %15100 = vmatpush1.bf16.msra.mxu1 %v17856_v16  ;;  %v17910_v62 = vcombine.low %v12507_v56, %v12511_v51  ;;  %v17912_v16 = vcombine.low %v12508_v44, %v12512_v53  ;;  %v12563_v51 = vld [vmem:[#allocation6 + $0xd40] sm:$0xff]  ;;  %v12564_v53 = vld [vmem:[#allocation6 + $0xd48] sm:$0xff] }
 0x7d7   :  { %14929 = vmatprep.subr.bf16.mxu0 %v17863_v28  ;;  %15101 = vmatprep.subr.bf16.mxu1 %v17865_v61  ;;  %v17919_v28 = vcombine.high %v12515_v19, %v12519_v20  ;;  %v17921_v61 = vcombine.high %v12516_v55, %v12520_v36  ;;  %v12567_v44 = vld [vmem:[#allocation6 + $0xd60] sm:$0xff] }
 0x7da   :  { %14930 = vmatpush1.bf16.msra.mxu0 %v17862_v13  ;;  %15102 = vmatpush1.bf16.msra.mxu1 %v17864_v26  ;;  %v17918_v13 = vcombine.low %v12515_v19, %v12519_v20  ;;  %v17920_v26 = vcombine.low %v12516_v55, %v12520_v36  ;;  %v12571_v20 = vld [vmem:[#allocation6 + $0xd80] sm:$0xff]  ;;  %v12572_v36 = vld [vmem:[#allocation6 + $0xd88] sm:$0xff] }
 0x7db   :  { %14931 = vmatprep.subr.bf16.mxu0 %v17871_v47  ;;  %15103 = vmatprep.subr.bf16.mxu1 %v17873_v49  ;;  %v17927_v47 = vcombine.high %v12523_v8, %v12527_v5  ;;  %v17929_v49 = vcombine.high %v12524_v6, %v12528_v60  ;;  %v12575_v55 = vld [vmem:[#allocation6 + $0xda0] sm:$0xff] }
 0x7de   :  { %14932 = vmatpush1.bf16.msra.mxu0 %v17870_v58  ;;  %15104 = vmatpush1.bf16.msra.mxu1 %v17872_v63  ;;  %v17926_v58 = vcombine.low %v12523_v8, %v12527_v5  ;;  %v17928_v63 = vcombine.low %v12524_v6, %v12528_v60  ;;  %v12579_v5 = vld [vmem:[#allocation6 + $0xdc0] sm:$0xff]  ;;  %v12580_v60 = vld [vmem:[#allocation6 + $0xdc8] sm:$0xff] }
 0x7df   :  { %14933 = vmatprep.subr.bf16.mxu0 %v17879_v24  ;;  %15105 = vmatprep.subr.bf16.mxu1 %v17881_v41  ;;  %v17935_v24 = vcombine.high %v12531_v54, %v12535_v45  ;;  %v17937_v41 = vcombine.high %v12532_v59, %v12536_v43  ;;  %v12583_v6 = vld [vmem:[#allocation6 + $0xde0] sm:$0xff] }
 0x7e2   :  { %14934 = vmatpush1.bf16.msra.mxu0 %v17878_v10  ;;  %15106 = vmatpush1.bf16.msra.mxu1 %v17880_v14  ;;  %v17934_v10 = vcombine.low %v12531_v54, %v12535_v45  ;;  %v17936_v14 = vcombine.low %v12532_v59, %v12536_v43  ;;  %v12141_v45 = vld [vmem:[#allocation6 + $0x10] sm:$0xff]  ;;  %v12142_v43 = vld [vmem:[#allocation6 + $0x18] sm:$0xff] }
 0x7e3   :  { %14935 = vmatprep.subr.bf16.mxu0 %v17887_v48  ;;  %15107 = vmatprep.subr.bf16.mxu1 %v17889_v39  ;;  %v17943_v48 = vcombine.high %v12539_v25, %v12543_v17  ;;  %v17945_v39 = vcombine.high %v12540_v29, %v12544_v9  ;;  %v12145_v59 = vld [vmem:[#allocation6 + $0x30] sm:$0xff] }
 0x7e6   :  { %14936 = vmatpush1.bf16.msra.mxu0 %v17886_v33  ;;  %15108 = vmatpush1.bf16.msra.mxu1 %v17888_v3  ;;  %v21741_v33 = vmov 0   ;;  %v17942_v3 = vcombine.low %v12539_v25, %v12543_v17  ;;  %v12149_v17 = vld [vmem:[#allocation6 + $0x50] sm:$0xff] }
 0x7e7   :  { %14937 = vmatprep.subr.bf16.mxu0 %v17895_v34  ;;  %15109 = vmatprep.subr.bf16.mxu1 %v17897_v31  ;;  %v17944_v34 = vcombine.low %v12540_v29, %v12544_v9  ;;  %v17951_v31 = vcombine.high %v12547_v0, %v12551_v2  ;;  %v12153_v29 = vld [vmem:[#allocation6 + $0x70] sm:$0xff]  ;;  %v12150_v9 = vld [vmem:[#allocation6 + $0x58] sm:$0xff] }
 0x7ea   :  { %14938 = vmatpush1.bf16.msra.mxu0 %v17894_v35  ;;  %15110 = vmatpush1.bf16.msra.mxu1 %v17896_v32  ;;  %v12560_v35 = vld [vmem:[#allocation6 + $0xd28] sm:$0xff]  ;;  %v17950_v32 = vcombine.low %v12547_v0, %v12551_v2  ;;  %v12157_v2 = vld [vmem:[#allocation6 + $0x90] sm:$0xff] }
 0x7eb   :  { %14939 = vmatprep.subr.bf16.mxu0 %v17903_v7  ;;  %15111 = vmatprep.subr.bf16.mxu1 %v17905_v21  ;;  %v17952_v7 = vcombine.low %v12548_v18, %v12552_v11  ;;  %v17959_v21 = vcombine.high %v12555_v46, %v12559_v27  ;;  %v17961_v56 = vcombine.high %v12556_v12, %v12560_v35  ;;  %v12161_v18 = vld [vmem:[#allocation6 + $0xb0] sm:$0xff]  ;;  %v12158_v11 = vld [vmem:[#allocation6 + $0x98] sm:$0xff] }
 0x7ee   :  { %14940 = vmatpush1.bf16.msra.mxu0 %v17902_v22  ;;  %15112 = vmatpush1.bf16.msra.mxu1 %v17904_v57  ;;  %v12568_v22 = vld [vmem:[#allocation6 + $0xd68] sm:$0xff]  ;;  %v17958_v57 = vcombine.low %v12555_v46, %v12559_v27  ;;  %v12165_v27 = vld [vmem:[#allocation6 + $0xd0] sm:$0xff] }
 0x7ef   :  { %14941 = vmatprep.subr.bf16.mxu0 %v17911_v42  ;;  %15113 = vmatprep.subr.bf16.mxu1 %v17913_v40  ;;  %v17960_v42 = vcombine.low %v12556_v12, %v12560_v35  ;;  %v17967_v40 = vcombine.high %v12563_v51, %v12567_v44  ;;  %v17969_v19 = vcombine.high %v12564_v53, %v12568_v22  ;;  %v12169_v12 = vld [vmem:[#allocation6 + $0xf0] sm:$0xff]  ;;  %v12166_v35 = vld [vmem:[#allocation6 + $0xd8] sm:$0xff] }
 0x7f2   :  { %14942 = vmatpush1.bf16.msra.mxu0 %v17910_v62  ;;  %15114 = vmatpush1.bf16.msra.mxu1 %v17912_v16  ;;  %v12576_v62 = vld [vmem:[#allocation6 + $0xda8] sm:$0xff]  ;;  %v17966_v16 = vcombine.low %v12563_v51, %v12567_v44  ;;  %v12173_v44 = vld [vmem:[#allocation6 + $0x110] sm:$0xff] }
 0x7f3   :  { %14943 = vmatprep.subr.bf16.mxu0 %v17919_v28  ;;  %15115 = vmatprep.subr.bf16.mxu1 %v17921_v61  ;;  %v17968_v28 = vcombine.low %v12564_v53, %v12568_v22  ;;  %v17975_v61 = vcombine.high %v12571_v20, %v12575_v55  ;;  %v17977_v8 = vcombine.high %v12572_v36, %v12576_v62  ;;  %v12177_v53 = vld [vmem:[#allocation6 + $0x130] sm:$0xff]  ;;  %v12178_v22 = vld [vmem:[#allocation6 + $0x138] sm:$0xff] }
 0x7f6   :  { %14944 = vmatpush1.bf16.msra.mxu0 %v17918_v13  ;;  %15116 = vmatpush1.bf16.msra.mxu1 %v17920_v26  ;;  %v12584_v13 = vld [vmem:[#allocation6 + $0xde8] sm:$0xff]  ;;  %v17974_v26 = vcombine.low %v12571_v20, %v12575_v55  ;;  %v12181_v20 = vld [vmem:[#allocation6 + $0x150] sm:$0xff] }
 0x7f7   :  { %14956 = vmatprep.subr.bf16.mxu0 %v17927_v47  ;;  %15128 = vmatprep.subr.bf16.mxu1 %v17929_v49  ;;  %v17976_v47 = vcombine.low %v12572_v36, %v12576_v62  ;;  %v17983_v49 = vcombine.high %v12579_v5, %v12583_v6  ;;  %v17985_v54 = vcombine.high %v12580_v60, %v12584_v13  ;;  %v12185_v55 = vld [vmem:[#allocation6 + $0x170] sm:$0xff]  ;;  %v12182_v36 = vld [vmem:[#allocation6 + $0x158] sm:$0xff] }
 0x7f8   :  { %v12186_v62 = vld [vmem:[#allocation6 + $0x178] sm:$0xff] }
 0x7f9   :  { %14946 = vmatmul.mubr.bf16.vlgmr.msra.gmra.mrb[28].mxu0 %v21611_v37  ;;  %15118 = vmatmul.mubr.bf16.vlgmr.msra.gmra.mrb[28].mxu1 %v21611_v37 }
 0x7fa   :  { %14957 = vmatpush1.bf16.msra.mxu0 %v17926_v58  ;;  %15129 = vmatpush1.bf16.msra.mxu1 %v17928_v63  ;;  %v12146_v58 = vld [vmem:[#allocation6 + $0x38] sm:$0xff]  ;;  %v17982_v63 = vcombine.low %v12579_v5, %v12583_v6  ;;  %v12189_v5 = vld [vmem:[#allocation6 + $0x190] sm:$0xff] }
 0x7fb   :  { %14958 = vmatprep.subr.bf16.mxu0 %v17935_v24  ;;  %15130 = vmatprep.subr.bf16.mxu1 %v17937_v41  ;;  %v17984_v24 = vcombine.low %v12580_v60, %v12584_v13  ;;  %v17547_v41 = vcombine.high %v12141_v45, %v12145_v59  ;;  %v17549_v25 = vcombine.high %v12142_v43, %v12146_v58  ;;  %v12193_v6 = vld [vmem:[#allocation6 + $0x1b0] sm:$0xff]  ;;  %v12190_v60 = vld [vmem:[#allocation6 + $0x198] sm:$0xff] }
 0x7fc   :  { %14988 = vmatprep.mubr.bf16.mxu0 %v21741_v33  ;;  %15160 = vmatprep.mubr.bf16.mxu1 %v21741_v33  ;;  %v12194_v13 = vld [vmem:[#allocation6 + $0x1b8] sm:$0xff] }
 0x7fe   :  { %14959 = vmatpush1.bf16.msra.mxu0 %v17934_v10  ;;  %15131 = vmatpush1.bf16.msra.mxu1 %v17936_v14  ;;  %v12154_v10 = vld [vmem:[#allocation6 + $0x78] sm:$0xff]  ;;  %v17546_v14 = vcombine.low %v12141_v45, %v12145_v59  ;;  %v12197_v45 = vld [vmem:[#allocation6 + $0x1d0] sm:$0xff] }
 0x7ff   :  { %14960 = vmatprep.subr.bf16.mxu0 %v17943_v48  ;;  %15132 = vmatprep.subr.bf16.mxu1 %v17945_v39  ;;  %v17548_v48 = vcombine.low %v12142_v43, %v12146_v58  ;;  %v17555_v39 = vcombine.high %v12149_v17, %v12153_v29  ;;  %v17557_v0 = vcombine.high %v12150_v9, %v12154_v10  ;;  %v12201_v59 = vld [vmem:[#allocation6 + $0x1f0] sm:$0xff]  ;;  %v12198_v43 = vld [vmem:[#allocation6 + $0x1d8] sm:$0xff] }
 0x800   :  { %v12202_v58 = vld [vmem:[#allocation6 + $0x1f8] sm:$0xff] }
 0x802   :  { %14961 = vmatpush1.bf16.msra.mxu0 %v17942_v3  ;;  %15133 = vmatpush1.bf16.msra.mxu1 %v17944_v34  ;;  %v12162_v3 = vld [vmem:[#allocation6 + $0xb8] sm:$0xff]  ;;  %v17554_v34 = vcombine.low %v12149_v17, %v12153_v29  ;;  %v12205_v17 = vld [vmem:[#allocation6 + $0x210] sm:$0xff] }
 0x803   :  { %14962 = vmatprep.subr.bf16.mxu0 %v17951_v31  ;;  %15134 = vmatprep.subr.bf16.mxu1 %v17953_v52  ;;  %v17556_v31 = vcombine.low %v12150_v9, %v12154_v10  ;;  %v17563_v52 = vcombine.high %v12157_v2, %v12161_v18  ;;  %v17565_v46 = vcombine.high %v12158_v11, %v12162_v3  ;;  %v12209_v29 = vld [vmem:[#allocation6 + $0x230] sm:$0xff]  ;;  %v12206_v9 = vld [vmem:[#allocation6 + $0x218] sm:$0xff] }
 0x804   :  { %v12210_v10 = vld [vmem:[#allocation6 + $0x238] sm:$0xff] }
 0x806   :  { %14963 = vmatpush1.bf16.msra.mxu0 %v17950_v32  ;;  %15135 = vmatpush1.bf16.msra.mxu1 %v17952_v7  ;;  %v12170_v32 = vld [vmem:[#allocation6 + $0xf8] sm:$0xff]  ;;  %v17562_v7 = vcombine.low %v12157_v2, %v12161_v18  ;;  %v12213_v2 = vld [vmem:[#allocation6 + $0x250] sm:$0xff] }
 0x807   :  { %14964 = vmatprep.subr.bf16.mxu0 %v17959_v21  ;;  %15136 = vmatprep.subr.bf16.mxu1 %v17961_v56  ;;  %v17564_v21 = vcombine.low %v12158_v11, %v12162_v3  ;;  %v17571_v56 = vcombine.high %v12165_v27, %v12169_v12  ;;  %v17573_v51 = vcombine.high %v12166_v35, %v12170_v32  ;;  %v12217_v18 = vld [vmem:[#allocation6 + $0x270] sm:$0xff]  ;;  %v12214_v11 = vld [vmem:[#allocation6 + $0x258] sm:$0xff] }
 0x808   :  { %v12218_v3 = vld [vmem:[#allocation6 + $0x278] sm:$0xff] }
 0x80a   :  { %14965 = vmatpush1.bf16.msra.mxu0 %v17958_v57  ;;  %15137 = vmatpush1.bf16.msra.mxu1 %v17960_v42  ;;  %v17570_v57 = vcombine.low %v12165_v27, %v12169_v12  ;;  %v17572_v42 = vcombine.low %v12166_v35, %v12170_v32  ;;  %v12221_v27 = vld [vmem:[#allocation6 + $0x290] sm:$0xff]  ;;  %v12222_v35 = vld [vmem:[#allocation6 + $0x298] sm:$0xff] }
 0x80b   :  { %14966 = vmatprep.subr.bf16.mxu0 %v17967_v40  ;;  %15138 = vmatprep.subr.bf16.mxu1 %v17969_v19  ;;  %v17579_v40 = vcombine.high %v12173_v44, %v12177_v53  ;;  %v12225_v12 = vld [vmem:[#allocation6 + $0x2b0] sm:$0xff]  ;;  %v12226_v32 = vld [vmem:[#allocation6 + $0x2b8] sm:$0xff] }
 0x80e   :  { %14967 = vmatpush1.bf16.msra.mxu0 %v17966_v16  ;;  %15139 = vmatpush1.bf16.msra.mxu1 %v17968_v28  ;;  %v17578_v16 = vcombine.low %v12173_v44, %v12177_v53  ;;  %v12229_v44 = vld [vmem:[#allocation6 + $0x2d0] sm:$0xff] }
 0x80f   :  { %14968 = vmatprep.subr.bf16.mxu0 %v17975_v61  ;;  %15140 = vmatprep.subr.bf16.mxu1 %v17977_v8  ;;  %v17587_v61 = vcombine.high %v12181_v20, %v12185_v55  ;;  %v17589_v8 = vcombine.high %v12182_v36, %v12186_v62  ;;  %v12233_v53 = vld [vmem:[#allocation6 + $0x2f0] sm:$0xff] }
 0x812   :  { %14969 = vmatpush1.bf16.msra.mxu0 %v17974_v26  ;;  %15141 = vmatpush1.bf16.msra.mxu1 %v17976_v47  ;;  %v17586_v26 = vcombine.low %v12181_v20, %v12185_v55  ;;  %v17588_v47 = vcombine.low %v12182_v36, %v12186_v62  ;;  %v12237_v20 = vld [vmem:[#allocation6 + $0x310] sm:$0xff]  ;;  %v12238_v36 = vld [vmem:[#allocation6 + $0x318] sm:$0xff] }
 0x813   :  { %14970 = vmatprep.subr.bf16.mxu0 %v17983_v49  ;;  %15142 = vmatprep.subr.bf16.mxu1 %v17985_v54  ;;  %v17595_v49 = vcombine.high %v12189_v5, %v12193_v6  ;;  %v17597_v54 = vcombine.high %v12190_v60, %v12194_v13  ;;  %v12241_v55 = vld [vmem:[#allocation6 + $0x330] sm:$0xff]  ;;  %v12242_v62 = vld [vmem:[#allocation6 + $0x338] sm:$0xff] }
 0x816   :  { %14971 = vmatpush1.bf16.msra.mxu0 %v17982_v63  ;;  %15143 = vmatpush1.bf16.msra.mxu1 %v17984_v24  ;;  %v17594_v63 = vcombine.low %v12189_v5, %v12193_v6  ;;  %v17596_v24 = vcombine.low %v12190_v60, %v12194_v13  ;;  %v12245_v5 = vld [vmem:[#allocation6 + $0x350] sm:$0xff]  ;;  %v12246_v60 = vld [vmem:[#allocation6 + $0x358] sm:$0xff] }
 0x817   :  { %15171 = vmatprep.subr.bf16.mxu0 %v17547_v41  ;;  %15343 = vmatprep.subr.bf16.mxu1 %v17549_v25  ;;  %v17603_v41 = vcombine.high %v12197_v45, %v12201_v59  ;;  %v17605_v25 = vcombine.high %v12198_v43, %v12202_v58  ;;  %v12249_v6 = vld [vmem:[#allocation6 + $0x370] sm:$0xff]  ;;  %v12250_v13 = vld [vmem:[#allocation6 + $0x378] sm:$0xff] }
 0x819   :  { %14989 = vmatmul.mubr.bf16.vlgmr.msra.gmra.mrb[28].mxu0 %v21613_v23  ;;  %15161 = vmatmul.mubr.bf16.vlgmr.msra.gmra.mrb[28].mxu1 %v21613_v23 }
 0x81a   :  { %15172 = vmatpush1.bf16.msra.mxu0 %v17546_v14  ;;  %15203 = vmatprep.mubr.bf16.mxu0 %v21538_v4  ;;  %v17602_v14 = vcombine.low %v12197_v45, %v12201_v59  ;;  %v12253_v45 = vld [vmem:[#allocation6 + $0x390] sm:$0xff] }
 0x81b   :  { %15344 = vmatpush1.bf16.msra.mxu1 %v17548_v48  ;;  %15375 = vmatprep.mubr.bf16.mxu1 %v21538_v4  ;;  %v12174_v4 = vld [vmem:[#allocation6 + $0x118] sm:$0xff]  ;;  %v17604_v48 = vcombine.low %v12198_v43, %v12202_v58  ;;  %v12257_v59 = vld [vmem:[#allocation6 + $0x3b0] sm:$0xff] }
 0x81c   :  { %15173 = vmatprep.subr.bf16.mxu0 %v17555_v39  ;;  %15345 = vmatprep.subr.bf16.mxu1 %v17557_v0  ;;  %v17581_v19 = vcombine.high %v12174_v4, %v12178_v22  ;;  %v17580_v28 = vcombine.low %v12174_v4, %v12178_v22  ;;  %v17611_v39 = vcombine.high %v12205_v17, %v12209_v29  ;;  %v12230_v4 = vld [vmem:[#allocation6 + $0x2d8] sm:$0xff] }
 0x81d   :  { %v17613_v0 = vcombine.high %v12206_v9, %v12210_v10  ;;  %v12234_v22 = vld [vmem:[#allocation6 + $0x2f8] sm:$0xff] }
 0x81e   :  { %15174 = vmatpush1.bf16.msra.mxu0 %v17554_v34  ;;  %v17610_v34 = vcombine.low %v12205_v17, %v12209_v29  ;;  %v12254_v43 = vld [vmem:[#allocation6 + $0x398] sm:$0xff]  ;;  %v12261_v17 = vld [vmem:[#allocation6 + $0x3d0] sm:$0xff] }
 0x81f   :  { %15346 = vmatpush1.bf16.msra.mxu1 %v17556_v31  ;;  %15175 = vmatprep.subr.bf16.mxu0 %v17563_v52  ;;  %v17612_v31 = vcombine.low %v12206_v9, %v12210_v10  ;;  %v17619_v52 = vcombine.high %v12213_v2, %v12217_v18  ;;  %v12258_v58 = vld [vmem:[#allocation6 + $0x3b8] sm:$0xff]  ;;  %v12265_v29 = vld [vmem:[#allocation6 + $0x3f0] sm:$0xff] }
 0x820   :  { %15347 = vmatprep.subr.bf16.mxu1 %v17565_v46  ;;  %v17621_v46 = vcombine.high %v12214_v11, %v12218_v3  ;;  %v12262_v9 = vld [vmem:[#allocation6 + $0x3d8] sm:$0xff] }
 0x821   :  { %v12266_v10 = vld [vmem:[#allocation6 + $0x3f8] sm:$0xff] }
 0x822   :  { %15176 = vmatpush1.bf16.msra.mxu0 %v17562_v7  ;;  %v17618_v7 = vcombine.low %v12213_v2, %v12217_v18  ;;  %v12269_v2 = vld [vmem:[#allocation6 + $0x410] sm:$0xff] }
 0x823   :  { %15348 = vmatpush1.bf16.msra.mxu1 %v17564_v21  ;;  %15177 = vmatprep.subr.bf16.mxu0 %v17571_v56  ;;  %v17620_v21 = vcombine.low %v12214_v11, %v12218_v3  ;;  %v17627_v56 = vcombine.high %v12221_v27, %v12225_v12  ;;  %v12273_v18 = vld [vmem:[#allocation6 + $0x430] sm:$0xff]  ;;  %v12270_v11 = vld [vmem:[#allocation6 + $0x418] sm:$0xff] }
 0x824   :  { %15349 = vmatprep.subr.bf16.mxu1 %v17573_v51  ;;  %v17629_v51 = vcombine.high %v12222_v35, %v12226_v32  ;;  %v12274_v3 = vld [vmem:[#allocation6 + $0x438] sm:$0xff] }
 0x826   :  { %15178 = vmatpush1.bf16.msra.mxu0 %v17570_v57  ;;  %v17626_v57 = vcombine.low %v12221_v27, %v12225_v12  ;;  %v12277_v27 = vld [vmem:[#allocation6 + $0x450] sm:$0xff] }
 0x827   :  { %15350 = vmatpush1.bf16.msra.mxu1 %v17572_v42  ;;  %15179 = vmatprep.subr.bf16.mxu0 %v17579_v40  ;;  %v17628_v42 = vcombine.low %v12222_v35, %v12226_v32  ;;  %v17635_v40 = vcombine.high %v12229_v44, %v12233_v53  ;;  %v12281_v12 = vld [vmem:[#allocation6 + $0x470] sm:$0xff]  ;;  %v17674_v35 = vcombine.low %v12269_v2, %v12273_v18  ;;  %v12278_v32 = vld [vmem:[#allocation6 + $0x458] sm:$0xff] }
 0x828   :  { %15351 = vmatprep.subr.bf16.mxu1 %v17581_v19  ;;  %v17637_v19 = vcombine.high %v12230_v4, %v12234_v22 }
 0x82a   :  { %15180 = vmatpush1.bf16.msra.mxu0 %v17578_v16  ;;  %v17634_v16 = vcombine.low %v12229_v44, %v12233_v53  ;;  %v12289_v44 = vld [vmem:[#allocation6 + $0x4b0] sm:$0xff] }
 0x82b   :  { %15352 = vmatpush1.bf16.msra.mxu1 %v17580_v28  ;;  %15181 = vmatprep.subr.bf16.mxu0 %v17587_v61  ;;  %v17636_v28 = vcombine.low %v12230_v4, %v12234_v22  ;;  %v17643_v61 = vcombine.high %v12237_v20, %v12241_v55  ;;  %v12286_v4 = vld [vmem:[#allocation6 + $0x498] sm:$0xff] }
 0x82c   :  { %15353 = vmatprep.subr.bf16.mxu1 %v17589_v8  ;;  %v17645_v8 = vcombine.high %v12238_v36, %v12242_v62  ;;  %v12290_v22 = vld [vmem:[#allocation6 + $0x4b8] sm:$0xff] }
 0x82e   :  { %15182 = vmatpush1.bf16.msra.mxu0 %v17586_v26  ;;  %v17642_v26 = vcombine.low %v12237_v20, %v12241_v55  ;;  %v12293_v20 = vld [vmem:[#allocation6 + $0x4d0] sm:$0xff] }
 0x82f   :  { %15354 = vmatpush1.bf16.msra.mxu1 %v17588_v47  ;;  %15183 = vmatprep.subr.bf16.mxu0 %v17595_v49  ;;  %v17644_v47 = vcombine.low %v12238_v36, %v12242_v62  ;;  %v17651_v49 = vcombine.high %v12245_v5, %v12249_v6  ;;  %v12297_v55 = vld [vmem:[#allocation6 + $0x4f0] sm:$0xff]  ;;  %v12294_v36 = vld [vmem:[#allocation6 + $0x4d8] sm:$0xff] }
 0x830   :  { %15355 = vmatprep.subr.bf16.mxu1 %v17597_v54  ;;  %v17653_v54 = vcombine.high %v12246_v60, %v12250_v13  ;;  %v12298_v62 = vld [vmem:[#allocation6 + $0x4f8] sm:$0xff] }
 0x832   :  { %15184 = vmatpush1.bf16.msra.mxu0 %v17594_v63  ;;  %v17650_v63 = vcombine.low %v12245_v5, %v12249_v6  ;;  %v12305_v5 = vld [vmem:[#allocation6 + $0x530] sm:$0xff]  ;;  %v12302_v6 = vld [vmem:[#allocation6 + $0x518] sm:$0xff] }
 0x833   :  { %15356 = vmatpush1.bf16.msra.mxu1 %v17596_v24  ;;  %15185 = vmatprep.subr.bf16.mxu0 %v17603_v41  ;;  %v17652_v24 = vcombine.low %v12246_v60, %v12250_v13  ;;  %v17659_v41 = vcombine.high %v12253_v45, %v12257_v59  ;;  %v12306_v60 = vld [vmem:[#allocation6 + $0x538] sm:$0xff]  ;;  %v17700_v13 = vcombine.low %v12294_v36, %v12298_v62 }
 0x834   :  { %15357 = vmatprep.subr.bf16.mxu1 %v17605_v25  ;;  %v17661_v25 = vcombine.high %v12254_v43, %v12258_v58 }
 0x836   :  { %15186 = vmatpush1.bf16.msra.mxu0 %v17602_v14  ;;  %v17658_v14 = vcombine.low %v12253_v45, %v12257_v59  ;;  %v12310_v45 = vld [vmem:[#allocation6 + $0x558] sm:$0xff] }
 0x837   :  { %15358 = vmatpush1.bf16.msra.mxu1 %v17604_v48  ;;  %15187 = vmatprep.subr.bf16.mxu0 %v17611_v39  ;;  %v17660_v48 = vcombine.low %v12254_v43, %v12258_v58  ;;  %v17667_v39 = vcombine.high %v12261_v17, %v12265_v29  ;;  %v12314_v59 = vld [vmem:[#allocation6 + $0x578] sm:$0xff]  ;;  %v17708_v58 = vcombine.low %v12302_v6, %v12306_v60 }
 0x838   :  { %15359 = vmatprep.subr.bf16.mxu1 %v17613_v0  ;;  %v17669_v0 = vcombine.high %v12262_v9, %v12266_v10 }
 0x83a   :  { %15188 = vmatpush1.bf16.msra.mxu0 %v17610_v34  ;;  %v17666_v34 = vcombine.low %v12261_v17, %v12265_v29  ;;  %v12318_v17 = vld [vmem:[#allocation6 + $0x598] sm:$0xff] }
 0x83b   :  { %15360 = vmatpush1.bf16.msra.mxu1 %v17612_v31  ;;  %15189 = vmatprep.subr.bf16.mxu0 %v17619_v52  ;;  %v17668_v31 = vcombine.low %v12262_v9, %v12266_v10  ;;  %v17675_v52 = vcombine.high %v12269_v2, %v12273_v18  ;;  %v12322_v29 = vld [vmem:[#allocation6 + $0x5b8] sm:$0xff]  ;;  %v17716_v10 = vcombine.low %v12310_v45, %v12314_v59 }
 0x83c   :  { %15361 = vmatprep.subr.bf16.mxu1 %v17621_v46  ;;  %v17677_v46 = vcombine.high %v12270_v11, %v12274_v3  ;;  %v12326_v2 = vld [vmem:[#allocation6 + $0x5d8] sm:$0xff] }
 0x83d   :  { %v12330_v18 = vld [vmem:[#allocation6 + $0x5f8] sm:$0xff] }
 0x83e   :  { %15190 = vmatpush1.bf16.msra.mxu0 %v17618_v7  ;;  %v12282_v7 = vld [vmem:[#allocation6 + $0x478] sm:$0xff] }
 0x83f   :  { %15362 = vmatpush1.bf16.msra.mxu1 %v17620_v21  ;;  %15191 = vmatprep.subr.bf16.mxu0 %v17627_v56  ;;  %v17676_v21 = vcombine.low %v12270_v11, %v12274_v3  ;;  %v17683_v56 = vcombine.high %v12277_v27, %v12281_v12  ;;  %v17685_v53 = vcombine.high %v12278_v32, %v12282_v7 }
 0x840   :  { %15363 = vmatprep.subr.bf16.mxu1 %v17629_v51  ;;  %v12285_v51 = vld [vmem:[#allocation6 + $0x490] sm:$0xff]  ;;  %v17724_v3 = vcombine.low %v12318_v17, %v12322_v29 }
 0x842   :  { %15192 = vmatpush1.bf16.msra.mxu0 %v17626_v57  ;;  %v17682_v57 = vcombine.low %v12277_v27, %v12281_v12  ;;  %v12334_v27 = vld [vmem:[#allocation6 + $0x618] sm:$0xff] }
 0x843   :  { %15364 = vmatpush1.bf16.msra.mxu1 %v17628_v42  ;;  %15193 = vmatprep.subr.bf16.mxu0 %v17635_v40  ;;  %v17684_v42 = vcombine.low %v12278_v32, %v12282_v7  ;;  %v17691_v40 = vcombine.high %v12285_v51, %v12289_v44  ;;  %v12338_v12 = vld [vmem:[#allocation6 + $0x638] sm:$0xff]  ;;  %v17732_v32 = vcombine.low %v12326_v2, %v12330_v18 }
 0x844   :  { %15365 = vmatprep.subr.bf16.mxu1 %v17637_v19  ;;  %v17693_v19 = vcombine.high %v12286_v4, %v12290_v22 }
 0x846   :  { %15194 = vmatpush1.bf16.msra.mxu0 %v17634_v16  ;;  %v17690_v16 = vcombine.low %v12285_v51, %v12289_v44  ;;  %v12345_v51 = vld [vmem:[#allocation6 + $0x670] sm:$0xff]  ;;  %v12342_v44 = vld [vmem:[#allocation6 + $0x658] sm:$0xff] }
 0x847   :  { %15366 = vmatpush1.bf16.msra.mxu1 %v17636_v28  ;;  %15195 = vmatprep.subr.bf16.mxu0 %v17643_v61  ;;  %v17699_v28 = vcombine.high %v12293_v20, %v12297_v55  ;;  %v17701_v61 = vcombine.high %v12294_v36, %v12298_v62 }
 0x848   :  { %15367 = vmatprep.subr.bf16.mxu1 %v17645_v8  ;;  %v12301_v8 = vld [vmem:[#allocation6 + $0x510] sm:$0xff] }
 0x849   :  { %v17706_v43 = vcombine.low %v12301_v8, %v12305_v5 }
 0x84a   :  { %15196 = vmatpush1.bf16.msra.mxu0 %v17642_v26  ;;  %v17707_v26 = vcombine.high %v12301_v8, %v12305_v5  ;;  %v12358_v8 = vld [vmem:[#allocation6 + $0x6d8] sm:$0xff] }
 0x84b   :  { %15368 = vmatpush1.bf16.msra.mxu1 %v17644_v47  ;;  %15197 = vmatprep.subr.bf16.mxu0 %v17651_v49  ;;  %v17709_v47 = vcombine.high %v12302_v6, %v12306_v60  ;;  %v12309_v49 = vld [vmem:[#allocation6 + $0x550] sm:$0xff]  ;;  %v12362_v5 = vld [vmem:[#allocation6 + $0x6f8] sm:$0xff] }
 0x84c   :  { %15369 = vmatprep.subr.bf16.mxu1 %v17653_v54  ;;  %v12313_v54 = vld [vmem:[#allocation6 + $0x570] sm:$0xff] }
 0x84d   :  { %v17714_v9 = vcombine.low %v12309_v49, %v12313_v54 }
 0x84e   :  { %15198 = vmatpush1.bf16.msra.mxu0 %v17650_v63  ;;  %v17715_v63 = vcombine.high %v12309_v49, %v12313_v54  ;;  %v12366_v49 = vld [vmem:[#allocation6 + $0x718] sm:$0xff] }
 0x84f   :  { %15370 = vmatpush1.bf16.msra.mxu1 %v17652_v24  ;;  %15199 = vmatprep.subr.bf16.mxu0 %v17659_v41  ;;  %v17717_v24 = vcombine.high %v12310_v45, %v12314_v59  ;;  %v12317_v41 = vld [vmem:[#allocation6 + $0x590] sm:$0xff]  ;;  %v12370_v54 = vld [vmem:[#allocation6 + $0x738] sm:$0xff]  ;;  %v17764_v59 = vcombine.low %v12358_v8, %v12362_v5 }
 0x850   :  { %15371 = vmatprep.subr.bf16.mxu1 %v17661_v25  ;;  %v12321_v25 = vld [vmem:[#allocation6 + $0x5b0] sm:$0xff] }
 0x851   :  { %v17722_v11 = vcombine.low %v12317_v41, %v12321_v25 }
 0x852   :  { %15200 = vmatpush1.bf16.msra.mxu0 %v17658_v14  ;;  %v17723_v14 = vcombine.high %v12317_v41, %v12321_v25  ;;  %v12374_v41 = vld [vmem:[#allocation6 + $0x758] sm:$0xff] }
 0x853   :  { %15372 = vmatpush1.bf16.msra.mxu1 %v17660_v48  ;;  %15201 = vmatprep.subr.bf16.mxu0 %v17667_v39  ;;  %v17725_v48 = vcombine.high %v12318_v17, %v12322_v29  ;;  %v12325_v39 = vld [vmem:[#allocation6 + $0x5d0] sm:$0xff]  ;;  %v12378_v25 = vld [vmem:[#allocation6 + $0x778] sm:$0xff]  ;;  %v17772_v29 = vcombine.low %v12366_v49, %v12370_v54 }
 0x854   :  { %15373 = vmatprep.subr.bf16.mxu1 %v17669_v0  ;;  %v12329_v0 = vld [vmem:[#allocation6 + $0x5f0] sm:$0xff] }
 0x856   :  { %15202 = vmatpush1.bf16.msra.mxu0 %v17666_v34  ;;  %v17731_v34 = vcombine.high %v12325_v39, %v12329_v0 }
 0x857   :  { %15374 = vmatpush1.bf16.msra.mxu1 %v17668_v31  ;;  %15214 = vmatprep.subr.bf16.mxu0 %v17675_v52  ;;  %v17733_v31 = vcombine.high %v12326_v2, %v12330_v18  ;;  %v12333_v52 = vld [vmem:[#allocation6 + $0x610] sm:$0xff]  ;;  %v17780_v18 = vcombine.low %v12374_v41, %v12378_v25 }
 0x858   :  { %15386 = vmatprep.subr.bf16.mxu1 %v17677_v46  ;;  %v12337_v46 = vld [vmem:[#allocation6 + $0x630] sm:$0xff] }
 0x859   :  { %15204 = vmatmul.mubr.bf16.vlgmr.msra.gmra.mrb[32].mxu0 %v21540_v1  ;;  %v17739_v7 = vcombine.high %v12333_v52, %v12337_v46 }
 0x85a   :  { %15376 = vmatmul.mubr.bf16.vlgmr.msra.gmra.mrb[32].mxu1 %v21540_v1  ;;  %15215 = vmatpush1.bf16.msra.mxu0 %v17674_v35  ;;  %v17692_v1 = vcombine.low %v12286_v4, %v12290_v22  ;;  %v17730_v35 = vcombine.low %v12325_v39, %v12329_v0  ;;  %v17738_v4 = vcombine.low %v12333_v52, %v12337_v46  ;;  %v12382_v39 = vld [vmem:[#allocation6 + $0x798] sm:$0xff] }
 0x85b   :  { %15246 = vmatprep.mubr.bf16.mxu0 %v21607_v38  ;;  %15387 = vmatpush1.bf16.msra.mxu1 %v17676_v21  ;;  %v17741_v21 = vcombine.high %v12334_v27, %v12338_v12  ;;  %v17740_v22 = vcombine.low %v12334_v27, %v12338_v12  ;;  %v12386_v0 = vld [vmem:[#allocation6 + $0x7b8] sm:$0xff] }
 0x85c   :  { %15418 = vmatprep.mubr.bf16.mxu1 %v21607_v38  ;;  %15216 = vmatprep.subr.bf16.mxu0 %v17683_v56  ;;  %v17698_v38 = vcombine.low %v12293_v20, %v12297_v55  ;;  %v12341_v56 = vld [vmem:[#allocation6 + $0x650] sm:$0xff]  ;;  %v12350_v20 = vld [vmem:[#allocation6 + $0x698] sm:$0xff]  ;;  %v17788_v12 = vcombine.low %v12382_v39, %v12386_v0 }
 0x85d   :  { %15388 = vmatprep.subr.bf16.mxu1 %v17685_v53  ;;  %v12346_v53 = vld [vmem:[#allocation6 + $0x678] sm:$0xff]  ;;  %v17746_v36 = vcombine.low %v12341_v56, %v12345_v51 }
 0x85e   :  { %15217 = vmatpush1.bf16.msra.mxu0 %v17682_v57  ;;  %v17747_v57 = vcombine.high %v12341_v56, %v12345_v51  ;;  %v12354_v55 = vld [vmem:[#allocation6 + $0x6b8] sm:$0xff]  ;;  %v17748_v62 = vcombine.low %v12342_v44, %v12346_v53 }
 0x85f   :  { %15389 = vmatpush1.bf16.msra.mxu1 %v17684_v42  ;;  %15218 = vmatprep.subr.bf16.mxu0 %v17691_v40  ;;  %v17749_v42 = vcombine.high %v12342_v44, %v12346_v53  ;;  %v12349_v40 = vld [vmem:[#allocation6 + $0x690] sm:$0xff]  ;;  %v17756_v60 = vcombine.low %v12350_v20, %v12354_v55  ;;  %v12390_v52 = vld [vmem:[#allocation6 + $0x7d8] sm:$0xff] }
 0x860   :  { %15390 = vmatprep.subr.bf16.mxu1 %v17693_v19  ;;  %v12353_v19 = vld [vmem:[#allocation6 + $0x6b0] sm:$0xff]  ;;  %v12394_v46 = vld [vmem:[#allocation6 + $0x7f8] sm:$0xff] }
 0x861   :  { %v17754_v6 = vcombine.low %v12349_v40, %v12353_v19  ;;  %v12398_v56 = vld [vmem:[#allocation6 + $0x818] sm:$0xff]  ;;  %v17796_v53 = vcombine.low %v12390_v52, %v12394_v46 }
 0x862   :  { %15219 = vmatpush1.bf16.msra.mxu0 %v17690_v16  ;;  %v17755_v16 = vcombine.high %v12349_v40, %v12353_v19  ;;  %v12402_v51 = vld [vmem:[#allocation6 + $0x838] sm:$0xff] }
 0x863   :  { %15391 = vmatpush1.bf16.msra.mxu1 %v17692_v1  ;;  %15220 = vmatprep.subr.bf16.mxu0 %v17699_v28  ;;  %v17757_v1 = vcombine.high %v12350_v20, %v12354_v55  ;;  %v12357_v28 = vld [vmem:[#allocation6 + $0x6d0] sm:$0xff]  ;;  %v12406_v19 = vld [vmem:[#allocation6 + $0x858] sm:$0xff]  ;;  %v17804_v55 = vcombine.low %v12398_v56, %v12402_v51 }
 0x864   :  { %15392 = vmatprep.subr.bf16.mxu1 %v17701_v61  ;;  %v12361_v61 = vld [vmem:[#allocation6 + $0x6f0] sm:$0xff]  ;;  %v12410_v20 = vld [vmem:[#allocation6 + $0x878] sm:$0xff] }
 0x865   :  { %v17762_v45 = vcombine.low %v12357_v28, %v12361_v61 }
 0x866   :  { %15221 = vmatpush1.bf16.msra.mxu0 %v17698_v38  ;;  %v17763_v38 = vcombine.high %v12357_v28, %v12361_v61  ;;  %v12414_v28 = vld [vmem:[#allocation6 + $0x898] sm:$0xff] }
 0x867   :  { %15393 = vmatpush1.bf16.msra.mxu1 %v17700_v13  ;;  %15222 = vmatprep.subr.bf16.mxu0 %v17707_v26  ;;  %v17765_v13 = vcombine.high %v12358_v8, %v12362_v5  ;;  %v12365_v26 = vld [vmem:[#allocation6 + $0x710] sm:$0xff]  ;;  %v12418_v61 = vld [vmem:[#allocation6 + $0x8b8] sm:$0xff]  ;;  %v17812_v5 = vcombine.low %v12406_v19, %v12410_v20 }
 0x868   :  { %15394 = vmatprep.subr.bf16.mxu1 %v17709_v47  ;;  %v12369_v47 = vld [vmem:[#allocation6 + $0x730] sm:$0xff] }
 0x869   :  { %v17770_v17 = vcombine.low %v12365_v26, %v12369_v47 }
 0x86a   :  { %15223 = vmatpush1.bf16.msra.mxu0 %v17706_v43  ;;  %v17771_v43 = vcombine.high %v12365_v26, %v12369_v47  ;;  %v12422_v26 = vld [vmem:[#allocation6 + $0x8d8] sm:$0xff] }
 0x86b   :  { %15395 = vmatpush1.bf16.msra.mxu1 %v17708_v58  ;;  %15224 = vmatprep.subr.bf16.mxu0 %v17715_v63  ;;  %v17773_v58 = vcombine.high %v12366_v49, %v12370_v54  ;;  %v12373_v63 = vld [vmem:[#allocation6 + $0x750] sm:$0xff]  ;;  %v12426_v47 = vld [vmem:[#allocation6 + $0x8f8] sm:$0xff] }
 0x86c   :  { %15396 = vmatprep.subr.bf16.mxu1 %v17717_v24  ;;  %v12377_v24 = vld [vmem:[#allocation6 + $0x770] sm:$0xff] }
 0x86d   :  { %v17778_v2 = vcombine.low %v12373_v63, %v12377_v24 }
 0x86e   :  { %15225 = vmatpush1.bf16.msra.mxu0 %v17714_v9  ;;  %v17779_v9 = vcombine.high %v12373_v63, %v12377_v24  ;;  %v12434_v63 = vld [vmem:[#allocation6 + $0x938] sm:$0xff]  ;;  %v17828_v24 = vcombine.low %v12422_v26, %v12426_v47 }
 0x86f   :  { %15397 = vmatpush1.bf16.msra.mxu1 %v17716_v10  ;;  %15226 = vmatprep.subr.bf16.mxu0 %v17723_v14  ;;  %v17781_v10 = vcombine.high %v12374_v41, %v12378_v25  ;;  %v12381_v14 = vld [vmem:[#allocation6 + $0x790] sm:$0xff] }
 0x870   :  { %15398 = vmatprep.subr.bf16.mxu1 %v17725_v48  ;;  %v12385_v48 = vld [vmem:[#allocation6 + $0x7b0] sm:$0xff] }
 0x871   :  { %v17786_v27 = vcombine.low %v12381_v14, %v12385_v48 }
 0x872   :  { %15227 = vmatpush1.bf16.msra.mxu0 %v17722_v11  ;;  %v17787_v11 = vcombine.high %v12381_v14, %v12385_v48 }
 0x873   :  { %15399 = vmatpush1.bf16.msra.mxu1 %v17724_v3  ;;  %15228 = vmatprep.subr.bf16.mxu0 %v17731_v34  ;;  %v17789_v3 = vcombine.high %v12382_v39, %v12386_v0  ;;  %v12389_v34 = vld [vmem:[#allocation6 + $0x7d0] sm:$0xff] }
 0x874   :  { %15400 = vmatprep.subr.bf16.mxu1 %v17733_v31  ;;  %v12393_v31 = vld [vmem:[#allocation6 + $0x7f0] sm:$0xff] }
 0x875   :  { %v17794_v44 = vcombine.low %v12389_v34, %v12393_v31 }
 0x876   :  { %15229 = vmatpush1.bf16.msra.mxu0 %v17730_v35  ;;  %v17795_v35 = vcombine.high %v12389_v34, %v12393_v31 }
 0x877   :  { %15401 = vmatpush1.bf16.msra.mxu1 %v17732_v32  ;;  %15230 = vmatprep.subr.bf16.mxu0 %v17739_v7  ;;  %v17797_v32 = vcombine.high %v12390_v52, %v12394_v46  ;;  %v12397_v7 = vld [vmem:[#allocation6 + $0x810] sm:$0xff] }
 0x878   :  { %15402 = vmatprep.subr.bf16.mxu1 %v17741_v21  ;;  %v12401_v21 = vld [vmem:[#allocation6 + $0x830] sm:$0xff] }
 0x879   :  { %v17802_v40 = vcombine.low %v12397_v7, %v12401_v21 }
 0x87a   :  { %15231 = vmatpush1.bf16.msra.mxu0 %v17738_v4  ;;  %v17803_v4 = vcombine.high %v12397_v7, %v12401_v21 }
 0x87b   :  { %15403 = vmatpush1.bf16.msra.mxu1 %v17740_v22  ;;  %15232 = vmatprep.subr.bf16.mxu0 %v17747_v57  ;;  %v17805_v22 = vcombine.high %v12398_v56, %v12402_v51  ;;  %v12405_v57 = vld [vmem:[#allocation6 + $0x850] sm:$0xff] }
 0x87c   :  { %15404 = vmatprep.subr.bf16.mxu1 %v17749_v42  ;;  %v12409_v42 = vld [vmem:[#allocation6 + $0x870] sm:$0xff] }
 0x87d   :  { %v17810_v8 = vcombine.low %v12405_v57, %v12409_v42 }
 0x87e   :  { %15233 = vmatpush1.bf16.msra.mxu0 %v17746_v36  ;;  %v17811_v36 = vcombine.high %v12405_v57, %v12409_v42 }
 0x87f   :  { %15405 = vmatpush1.bf16.msra.mxu1 %v17748_v62  ;;  %15234 = vmatprep.subr.bf16.mxu0 %v17755_v16  ;;  %v12413_v62 = vld [vmem:[#allocation6 + $0x890] sm:$0xff] }
 0x880   :  { %15406 = vmatprep.subr.bf16.mxu1 %v17757_v1  ;;  %v12417_v16 = vld [vmem:[#allocation6 + $0x8b0] sm:$0xff]  ;;  %v17813_v1 = vcombine.high %v12406_v19, %v12410_v20 }
 0x881   :  { %v17818_v49 = vcombine.low %v12413_v62, %v12417_v16  ;;  %v12469_v20 = vld [vmem:[#allocation6 + $0xa50] sm:$0xff] }
 0x882   :  { %15235 = vmatpush1.bf16.msra.mxu0 %v17754_v6  ;;  %v17819_v6 = vcombine.high %v12413_v62, %v12417_v16  ;;  %v12474_v62 = vld [vmem:[#allocation6 + $0xa78] sm:$0xff] }
 0x883   :  { %15407 = vmatpush1.bf16.msra.mxu1 %v17756_v60  ;;  %15236 = vmatprep.subr.bf16.mxu0 %v17763_v38  ;;  %v17821_v60 = vcombine.high %v12414_v28, %v12418_v61  ;;  %v12421_v38 = vld [vmem:[#allocation6 + $0x8d0] sm:$0xff] }
 0x884   :  { %15408 = vmatprep.subr.bf16.mxu1 %v17765_v13  ;;  %v12425_v13 = vld [vmem:[#allocation6 + $0x8f0] sm:$0xff] }
 0x885   :  { %v17827_v54 = vcombine.high %v12421_v38, %v12425_v13 }
 0x886   :  { %15237 = vmatpush1.bf16.msra.mxu0 %v17762_v45  ;;  %v17829_v45 = vcombine.high %v12422_v26, %v12426_v47 }
 0x887   :  { %15409 = vmatpush1.bf16.msra.mxu1 %v17764_v59  ;;  %15238 = vmatprep.subr.bf16.mxu0 %v17771_v43  ;;  %v12429_v59 = vld [vmem:[#allocation6 + $0x910] sm:$0xff] }
 0x888   :  { %15410 = vmatprep.subr.bf16.mxu1 %v17773_v58  ;;  %v12433_v43 = vld [vmem:[#allocation6 + $0x930] sm:$0xff]  ;;  %v12430_v58 = vld [vmem:[#allocation6 + $0x918] sm:$0xff] }
 0x889   :  { %v17835_v41 = vcombine.high %v12429_v59, %v12433_v43  ;;  %v17837_v25 = vcombine.high %v12430_v58, %v12434_v63  ;;  %v17834_v14 = vcombine.low %v12429_v59, %v12433_v43  ;;  %v17836_v48 = vcombine.low %v12430_v58, %v12434_v63 }
 0x88a   :  { %15239 = vmatpush1.bf16.msra.mxu0 %v17770_v17  ;;  %v12437_v17 = vld [vmem:[#allocation6 + $0x950] sm:$0xff] }
 0x88b   :  { %15411 = vmatpush1.bf16.msra.mxu1 %v17772_v29  ;;  %15240 = vmatprep.subr.bf16.mxu0 %v17779_v9  ;;  %v12441_v29 = vld [vmem:[#allocation6 + $0x970] sm:$0xff]  ;;  %v12438_v9 = vld [vmem:[#allocation6 + $0x958] sm:$0xff] }
 0x88c   :  { %15412 = vmatprep.subr.bf16.mxu1 %v17781_v10  ;;  %v12442_v10 = vld [vmem:[#allocation6 + $0x978] sm:$0xff]  ;;  %v17843_v39 = vcombine.high %v12437_v17, %v12441_v29  ;;  %v17842_v34 = vcombine.low %v12437_v17, %v12441_v29 }
 0x88d   :  { %v17845_v0 = vcombine.high %v12438_v9, %v12442_v10  ;;  %v17844_v31 = vcombine.low %v12438_v9, %v12442_v10 }
 0x88e   :  { %15241 = vmatpush1.bf16.msra.mxu0 %v17778_v2  ;;  %v12445_v2 = vld [vmem:[#allocation6 + $0x990] sm:$0xff] }
 0x88f   :  { %15413 = vmatpush1.bf16.msra.mxu1 %v17780_v18  ;;  %15242 = vmatprep.subr.bf16.mxu0 %v17787_v11  ;;  %v12449_v18 = vld [vmem:[#allocation6 + $0x9b0] sm:$0xff]  ;;  %v12446_v11 = vld [vmem:[#allocation6 + $0x998] sm:$0xff] }
 0x890   :  { %15414 = vmatprep.subr.bf16.mxu1 %v17789_v3  ;;  %v12450_v3 = vld [vmem:[#allocation6 + $0x9b8] sm:$0xff]  ;;  %v17851_v52 = vcombine.high %v12445_v2, %v12449_v18  ;;  %v17850_v7 = vcombine.low %v12445_v2, %v12449_v18 }
 0x891   :  { %v17853_v46 = vcombine.high %v12446_v11, %v12450_v3  ;;  %v17852_v21 = vcombine.low %v12446_v11, %v12450_v3 }
 0x892   :  { %15243 = vmatpush1.bf16.msra.mxu0 %v17786_v27  ;;  %v12453_v27 = vld [vmem:[#allocation6 + $0x9d0] sm:$0xff] }
 0x893   :  { %15415 = vmatpush1.bf16.msra.mxu1 %v17788_v12  ;;  %15244 = vmatprep.subr.bf16.mxu0 %v17795_v35  ;;  %v12457_v12 = vld [vmem:[#allocation6 + $0x9f0] sm:$0xff]  ;;  %v12454_v35 = vld [vmem:[#allocation6 + $0x9d8] sm:$0xff] }
 0x894   :  { %15416 = vmatprep.subr.bf16.mxu1 %v17797_v32  ;;  %v12458_v32 = vld [vmem:[#allocation6 + $0x9f8] sm:$0xff]  ;;  %v17859_v56 = vcombine.high %v12453_v27, %v12457_v12  ;;  %v17858_v57 = vcombine.low %v12453_v27, %v12457_v12 }
 0x895   :  { %v17861_v51 = vcombine.high %v12454_v35, %v12458_v32  ;;  %v17860_v42 = vcombine.low %v12454_v35, %v12458_v32 }
 0x896   :  { %15245 = vmatpush1.bf16.msra.mxu0 %v17794_v44  ;;  %v12461_v44 = vld [vmem:[#allocation6 + $0xa10] sm:$0xff] }
 0x897   :  { %15417 = vmatpush1.bf16.msra.mxu1 %v17796_v53  ;;  %15257 = vmatprep.subr.bf16.mxu0 %v17803_v4  ;;  %v12465_v53 = vld [vmem:[#allocation6 + $0xa30] sm:$0xff]  ;;  %v12462_v4 = vld [vmem:[#allocation6 + $0xa18] sm:$0xff] }
 0x898   :  { %15429 = vmatprep.subr.bf16.mxu1 %v17805_v22  ;;  %v12466_v22 = vld [vmem:[#allocation6 + $0xa38] sm:$0xff]  ;;  %v17866_v16 = vcombine.low %v12461_v44, %v12465_v53 }
 0x899   :  { %15247 = vmatmul.mubr.bf16.vlgmr.msra.gmra.mrb[32].mxu0 %v21542_v50  ;;  %v17869_v19 = vcombine.high %v12462_v4, %v12466_v22 }
 0x89a   :  { %15419 = vmatmul.mubr.bf16.vlgmr.msra.gmra.mrb[32].mxu1 %v21542_v50  ;;  %15258 = vmatpush1.bf16.msra.mxu0 %v17802_v40  ;;  %v17820_v50 = vcombine.low %v12414_v28, %v12418_v61  ;;  %v17867_v40 = vcombine.high %v12461_v44, %v12465_v53 }
 0x89b   :  { %15289 = vmatprep.mubr.bf16.mxu0 %v21609_v15  ;;  %15430 = vmatpush1.bf16.msra.mxu1 %v17804_v55  ;;  %v12473_v55 = vld [vmem:[#allocation6 + $0xa70] sm:$0xff] }
 0x89c   :  { %15461 = vmatprep.mubr.bf16.mxu1 %v21609_v15  ;;  %15259 = vmatprep.subr.bf16.mxu0 %v17811_v36  ;;  %v17826_v15 = vcombine.low %v12421_v38, %v12425_v13  ;;  %v12470_v36 = vld [vmem:[#allocation6 + $0xa58] sm:$0xff]  ;;  %v17875_v28 = vcombine.high %v12469_v20, %v12473_v55  ;;  %v17874_v38 = vcombine.low %v12469_v20, %v12473_v55 }
 0x89d   :  { %15431 = vmatprep.subr.bf16.mxu1 %v17813_v1  ;;  %v17868_v1 = vcombine.low %v12462_v4, %v12466_v22  ;;  %v17877_v61 = vcombine.high %v12470_v36, %v12474_v62  ;;  %v17876_v13 = vcombine.low %v12470_v36, %v12474_v62 }
 0x89e   :  { %15260 = vmatpush1.bf16.msra.mxu0 %v17810_v8  ;;  %v12477_v8 = vld [vmem:[#allocation6 + $0xa90] sm:$0xff] }
 0x89f   :  { %15432 = vmatpush1.bf16.msra.mxu1 %v17812_v5  ;;  %15261 = vmatprep.subr.bf16.mxu0 %v17819_v6  ;;  %v12481_v5 = vld [vmem:[#allocation6 + $0xab0] sm:$0xff]  ;;  %v12478_v6 = vld [vmem:[#allocation6 + $0xa98] sm:$0xff] }
 0x8a0   :  { %15433 = vmatprep.subr.bf16.mxu1 %v17821_v60  ;;  %v12482_v60 = vld [vmem:[#allocation6 + $0xab8] sm:$0xff]  ;;  %v17883_v26 = vcombine.high %v12477_v8, %v12481_v5  ;;  %v17882_v59 = vcombine.low %v12477_v8, %v12481_v5 }
 0x8a1   :  { %v17885_v47 = vcombine.high %v12478_v6, %v12482_v60  ;;  %v17884_v43 = vcombine.low %v12478_v6, %v12482_v60 }
 0x8a2   :  { %15262 = vmatpush1.bf16.msra.mxu0 %v17818_v49  ;;  %v12485_v49 = vld [vmem:[#allocation6 + $0xad0] sm:$0xff] }
 0x8a3   :  { %15434 = vmatpush1.bf16.msra.mxu1 %v17820_v50  ;;  %15263 = vmatprep.subr.bf16.mxu0 %v17827_v54  ;;  %v12489_v50 = vld [vmem:[#allocation6 + $0xaf0] sm:$0xff]  ;;  %v12486_v54 = vld [vmem:[#allocation6 + $0xad8] sm:$0xff] }
 0x8a4   :  { %15435 = vmatprep.subr.bf16.mxu1 %v17829_v45  ;;  %v12490_v45 = vld [vmem:[#allocation6 + $0xaf8] sm:$0xff]  ;;  %v17891_v58 = vcombine.high %v12485_v49, %v12489_v50  ;;  %v17890_v17 = vcombine.low %v12485_v49, %v12489_v50 }
 0x8a5   :  { %v17893_v63 = vcombine.high %v12486_v54, %v12490_v45  ;;  %v17892_v29 = vcombine.low %v12486_v54, %v12490_v45 }
 0x8a6   :  { %15264 = vmatpush1.bf16.msra.mxu0 %v17826_v15  ;;  %v12493_v15 = vld [vmem:[#allocation6 + $0xb10] sm:$0xff] }
 0x8a7   :  { %15436 = vmatpush1.bf16.msra.mxu1 %v17828_v24  ;;  %15265 = vmatprep.subr.bf16.mxu0 %v17835_v41  ;;  %v12497_v24 = vld [vmem:[#allocation6 + $0xb30] sm:$0xff]  ;;  %v12494_v41 = vld [vmem:[#allocation6 + $0xb18] sm:$0xff] }
 0x8a8   :  { %15437 = vmatprep.subr.bf16.mxu1 %v17837_v25  ;;  %v12498_v25 = vld [vmem:[#allocation6 + $0xb38] sm:$0xff]  ;;  %v17899_v9 = vcombine.high %v12493_v15, %v12497_v24  ;;  %v17898_v2 = vcombine.low %v12493_v15, %v12497_v24 }
 0x8a9   :  { %v17901_v10 = vcombine.high %v12494_v41, %v12498_v25  ;;  %v17900_v18 = vcombine.low %v12494_v41, %v12498_v25  ;;  %v12557_v25 = vld [vmem:[#allocation6 + $0xd10] sm:$0xff] }
 0x8aa   :  { %15266 = vmatpush1.bf16.msra.mxu0 %v17834_v14  ;;  %v12501_v14 = vld [vmem:[#allocation6 + $0xb50] sm:$0xff] }
 0x8ab   :  { %15438 = vmatpush1.bf16.msra.mxu1 %v17836_v48  ;;  %15267 = vmatprep.subr.bf16.mxu0 %v17843_v39  ;;  %v12505_v48 = vld [vmem:[#allocation6 + $0xb70] sm:$0xff]  ;;  %v12502_v39 = vld [vmem:[#allocation6 + $0xb58] sm:$0xff] }
 0x8ac   :  { %15439 = vmatprep.subr.bf16.mxu1 %v17845_v0  ;;  %v12506_v0 = vld [vmem:[#allocation6 + $0xb78] sm:$0xff]  ;;  %v17907_v11 = vcombine.high %v12501_v14, %v12505_v48  ;;  %v17906_v27 = vcombine.low %v12501_v14, %v12505_v48 }
 0x8ad   :  { %v17909_v3 = vcombine.high %v12502_v39, %v12506_v0  ;;  %v17908_v12 = vcombine.low %v12502_v39, %v12506_v0  ;;  %v12565_v39 = vld [vmem:[#allocation6 + $0xd50] sm:$0xff] }
 0x8ae   :  { %15268 = vmatpush1.bf16.msra.mxu0 %v17842_v34  ;;  %v12509_v34 = vld [vmem:[#allocation6 + $0xb90] sm:$0xff] }
 0x8af   :  { %15440 = vmatpush1.bf16.msra.mxu1 %v17844_v31  ;;  %15269 = vmatprep.subr.bf16.mxu0 %v17851_v52  ;;  %v12513_v31 = vld [vmem:[#allocation6 + $0xbb0] sm:$0xff]  ;;  %v12510_v52 = vld [vmem:[#allocation6 + $0xb98] sm:$0xff] }
 0x8b0   :  { %15441 = vmatprep.subr.bf16.mxu1 %v17853_v46  ;;  %v12514_v46 = vld [vmem:[#allocation6 + $0xbb8] sm:$0xff]  ;;  %v17915_v35 = vcombine.high %v12509_v34, %v12513_v31  ;;  %v17914_v44 = vcombine.low %v12509_v34, %v12513_v31  ;;  %v12569_v0 = vld [vmem:[#allocation6 + $0xd70] sm:$0xff] }
 0x8b1   :  { %v17917_v32 = vcombine.high %v12510_v52, %v12514_v46  ;;  %v17916_v53 = vcombine.low %v12510_v52, %v12514_v46  ;;  %v17971_v34 = vcombine.high %v12565_v39, %v12569_v0  ;;  %v12573_v52 = vld [vmem:[#allocation6 + $0xd90] sm:$0xff] }
 0x8b2   :  { %15270 = vmatpush1.bf16.msra.mxu0 %v17850_v7  ;;  %v12517_v7 = vld [vmem:[#allocation6 + $0xbd0] sm:$0xff] }
 0x8b3   :  { %15442 = vmatpush1.bf16.msra.mxu1 %v17852_v21  ;;  %15271 = vmatprep.subr.bf16.mxu0 %v17859_v56  ;;  %v12521_v21 = vld [vmem:[#allocation6 + $0xbf0] sm:$0xff]  ;;  %v12518_v56 = vld [vmem:[#allocation6 + $0xbd8] sm:$0xff] }
 0x8b4   :  { %15443 = vmatprep.subr.bf16.mxu1 %v17861_v51  ;;  %v12522_v51 = vld [vmem:[#allocation6 + $0xbf8] sm:$0xff]  ;;  %v17923_v4 = vcombine.high %v12517_v7, %v12521_v21  ;;  %v17922_v20 = vcombine.low %v12517_v7, %v12521_v21  ;;  %v12577_v46 = vld [vmem:[#allocation6 + $0xdb0] sm:$0xff] }
 0x8b5   :  { %v17925_v22 = vcombine.high %v12518_v56, %v12522_v51  ;;  %v17924_v55 = vcombine.low %v12518_v56, %v12522_v51  ;;  %v17979_v7 = vcombine.high %v12573_v52, %v12577_v46 }
 0x8b6   :  { %15272 = vmatpush1.bf16.msra.mxu0 %v17858_v57  ;;  %v12525_v57 = vld [vmem:[#allocation6 + $0xc10] sm:$0xff] }
 0x8b7   :  { %15444 = vmatpush1.bf16.msra.mxu1 %v17860_v42  ;;  %15273 = vmatprep.subr.bf16.mxu0 %v17867_v40  ;;  %v12529_v42 = vld [vmem:[#allocation6 + $0xc30] sm:$0xff]  ;;  %v12526_v40 = vld [vmem:[#allocation6 + $0xc18] sm:$0xff] }
 0x8b8   :  { %15445 = vmatprep.subr.bf16.mxu1 %v17869_v19  ;;  %v12530_v19 = vld [vmem:[#allocation6 + $0xc38] sm:$0xff]  ;;  %v17931_v36 = vcombine.high %v12525_v57, %v12529_v42  ;;  %v17930_v8 = vcombine.low %v12525_v57, %v12529_v42 }
 0x8b9   :  { %v17933_v62 = vcombine.high %v12526_v40, %v12530_v19  ;;  %v17932_v5 = vcombine.low %v12526_v40, %v12530_v19  ;;  %v12582_v42 = vld [vmem:[#allocation6 + $0xdd8] sm:$0xff] }
 0x8ba   :  { %15274 = vmatpush1.bf16.msra.mxu0 %v17866_v16  ;;  %v12533_v16 = vld [vmem:[#allocation6 + $0xc50] sm:$0xff]  ;;  %v12586_v40 = vld [vmem:[#allocation6 + $0xdf8] sm:$0xff] }
 0x8bb   :  { %15446 = vmatpush1.bf16.msra.mxu1 %v17868_v1  ;;  %15275 = vmatprep.subr.bf16.mxu0 %v17875_v28  ;;  %v12537_v1 = vld [vmem:[#allocation6 + $0xc70] sm:$0xff]  ;;  %v12534_v28 = vld [vmem:[#allocation6 + $0xc58] sm:$0xff] }
 0x8bc   :  { %15447 = vmatprep.subr.bf16.mxu1 %v17877_v61  ;;  %v12538_v61 = vld [vmem:[#allocation6 + $0xc78] sm:$0xff]  ;;  %v17939_v6 = vcombine.high %v12533_v16, %v12537_v1  ;;  %v17938_v49 = vcombine.low %v12533_v16, %v12537_v1 }
 0x8bd   :  { %v17941_v60 = vcombine.high %v12534_v28, %v12538_v61  ;;  %v17940_v50 = vcombine.low %v12534_v28, %v12538_v61 }
 0x8be   :  { %15276 = vmatpush1.bf16.msra.mxu0 %v17874_v38  ;;  %v12541_v38 = vld [vmem:[#allocation6 + $0xc90] sm:$0xff] }
 0x8bf   :  { %15448 = vmatpush1.bf16.msra.mxu1 %v17876_v13  ;;  %15277 = vmatprep.subr.bf16.mxu0 %v17883_v26  ;;  %v12545_v13 = vld [vmem:[#allocation6 + $0xcb0] sm:$0xff]  ;;  %v12542_v26 = vld [vmem:[#allocation6 + $0xc98] sm:$0xff] }
 0x8c0   :  { %15449 = vmatprep.subr.bf16.mxu1 %v17885_v47  ;;  %v12546_v47 = vld [vmem:[#allocation6 + $0xcb8] sm:$0xff]  ;;  %v17947_v54 = vcombine.high %v12541_v38, %v12545_v13  ;;  %v17946_v15 = vcombine.low %v12541_v38, %v12545_v13  ;;  %v20702_v38 = vld [vmem:[#allocation9 + $0x40] sm:$0xff]  }
 0x8c1   :  { %v17949_v45 = vcombine.high %v12542_v26, %v12546_v47  ;;  %v20703_v13 = vld [vmem:[#allocation9] sm:$0xff]  }
 0x8c2   :  { %15278 = vmatpush1.bf16.msra.mxu0 %v17882_v59  ;;  %v12549_v59 = vld [vmem:[#allocation6 + $0xcd0] sm:$0xff] }
 0x8c3   :  { %15450 = vmatpush1.bf16.msra.mxu1 %v17884_v43  ;;  %15279 = vmatprep.subr.bf16.mxu0 %v17891_v58  ;;  %v12553_v43 = vld [vmem:[#allocation6 + $0xcf0] sm:$0xff]  ;;  %v12550_v58 = vld [vmem:[#allocation6 + $0xcd8] sm:$0xff] }
 0x8c4   :  { %15451 = vmatprep.subr.bf16.mxu1 %v17893_v63  ;;  %v12554_v63 = vld [vmem:[#allocation6 + $0xcf8] sm:$0xff]  ;;  %v17955_v24 = vcombine.high %v12549_v59, %v12553_v43 }
 0x8c5   :  { %v17957_v41 = vcombine.high %v12550_v58, %v12554_v63  ;;  %v17956_v14 = vcombine.low %v12550_v58, %v12554_v63  ;;  %v20712_v58 = vld [vmem:[#allocation9 + $0x68] sm:$0xff]  }
 0x8c6   :  { %15280 = vmatpush1.bf16.msra.mxu0 %v17890_v17  ;;  %v12561_v17 = vld [vmem:[#allocation6 + $0xd30] sm:$0xff] }
 0x8c7   :  { %15452 = vmatpush1.bf16.msra.mxu1 %v17892_v29  ;;  %15281 = vmatprep.subr.bf16.mxu0 %v17899_v9  ;;  %v12558_v29 = vld [vmem:[#allocation6 + $0xd18] sm:$0xff]  ;;  %v17963_v48 = vcombine.high %v12557_v25, %v12561_v17  ;;  %v20713_v63 = vld [vmem:[#allocation9 + $0x28] sm:$0xff]  }
 0x8c8   :  { %15453 = vmatprep.subr.bf16.mxu1 %v17901_v10  ;;  %v12562_v9 = vld [vmem:[#allocation6 + $0xd38] sm:$0xff]  ;;  %v17954_v10 = vcombine.low %v12549_v59, %v12553_v43  ;;  %v20710_v59 = vld [vmem:[#allocation9 + $0x60] sm:$0xff]  }
 0x8c9   :  { %v20711_v43 = vld [vmem:[#allocation9 + $0x20] sm:$0xff]  }
 0x8ca   :  { %15282 = vmatpush1.bf16.msra.mxu0 %v17898_v2  ;;  %v12566_v2 = vld [vmem:[#allocation6 + $0xd58] sm:$0xff] }
 0x8cb   :  { %15454 = vmatpush1.bf16.msra.mxu1 %v17900_v18  ;;  %15283 = vmatprep.subr.bf16.mxu0 %v17907_v11  ;;  %v12570_v18 = vld [vmem:[#allocation6 + $0xd78] sm:$0xff]  ;;  %v17962_v11 = vcombine.low %v12557_v25, %v12561_v17  ;;  %v21018_v25 = vmov 0.0   ;;  %v20719_v17 = vld [vmem:[#allocation12 + $0x8] sm:$0xff]  }
 0x8cc   :  { %15455 = vmatprep.subr.bf16.mxu1 %v17909_v3  ;;  %v17964_v3 = vcombine.low %v12558_v29, %v12562_v9  ;;  %v17973_v31 = vcombine.high %v12566_v2, %v12570_v18 }
 0x8ce   :  { %15284 = vmatpush1.bf16.msra.mxu0 %v17906_v27  ;;  %v12574_v27 = vld [vmem:[#allocation6 + $0xd98] sm:$0xff] }
 0x8cf   :  { %15456 = vmatpush1.bf16.msra.mxu1 %v17908_v12  ;;  %15285 = vmatprep.subr.bf16.mxu0 %v17915_v35  ;;  %v12578_v12 = vld [vmem:[#allocation6 + $0xdb8] sm:$0xff]  ;;  %v17970_v35 = vcombine.low %v12565_v39, %v12569_v0 }
 0x8d0   :  { %15457 = vmatprep.subr.bf16.mxu1 %v17917_v32  ;;  %v17972_v32 = vcombine.low %v12566_v2, %v12570_v18  ;;  %v17981_v51 = vcombine.high %v12574_v27, %v12578_v12  ;;  %v17980_v28 = vcombine.low %v12574_v27, %v12578_v12  ;;  %v21742_v2 = vsub.s32 0, %v21496_v30 }
 0x8d2   :  { %15286 = vmatpush1.bf16.msra.mxu0 %v17914_v44  ;;  %v12581_v44 = vld [vmem:[#allocation6 + $0xdd0] sm:$0xff] }
 0x8d3   :  { %15458 = vmatpush1.bf16.msra.mxu1 %v17916_v53  ;;  %15287 = vmatprep.subr.bf16.mxu0 %v17923_v4  ;;  %v12585_v53 = vld [vmem:[#allocation6 + $0xdf0] sm:$0xff] }
 0x8d4   :  { %15459 = vmatprep.subr.bf16.mxu1 %v17925_v22  ;;  %v17987_v61 = vcombine.high %v12581_v44, %v12585_v53 }
 0x8d6   :  { %15288 = vmatpush1.bf16.msra.mxu0 %v17922_v20 }
 0x8d7   :  { %15460 = vmatpush1.bf16.msra.mxu1 %v17924_v55  ;;  %15300 = vmatprep.subr.bf16.mxu0 %v17931_v36  ;;  %v17978_v36 = vcombine.low %v12573_v52, %v12577_v46 }
 0x8d8   :  { %15472 = vmatprep.subr.bf16.mxu1 %v17933_v62 }
 0x8d9   :  { %15290 = vmatmul.mubr.bf16.vlgmr.msra.gmra.mrb[32].mxu0 %v21611_v37 }
 0x8da   :  { %15462 = vmatmul.mubr.bf16.vlgmr.msra.gmra.mrb[32].mxu1 %v21611_v37  ;;  %15301 = vmatpush1.bf16.msra.mxu0 %v17930_v8  ;;  %v17948_v37 = vcombine.low %v12542_v26, %v12546_v47  ;;  %v20704_v26 = vld [vmem:[#allocation9 + $0x48] sm:$0xff]  }
 0x8db   :  { %15473 = vmatpush1.bf16.msra.mxu1 %v17932_v5  ;;  %15302 = vmatprep.subr.bf16.mxu0 %v17939_v6  ;;  %v17989_v5 = vcombine.high %v12582_v42, %v12586_v40  ;;  %v17986_v6 = vcombine.low %v12581_v44, %v12585_v53  ;;  %v20705_v47 = vld [vmem:[#allocation9 + $0x8] sm:$0xff]  }
 0x8dc   :  { %15474 = vmatprep.subr.bf16.mxu1 %v17941_v60  ;;  %15332 = vmatprep.mubr.bf16.mxu0 %v21741_v33  ;;  %v17988_v60 = vcombine.low %v12582_v42, %v12586_v40 }
 0x8dd   :  { %15504 = vmatprep.mubr.bf16.mxu1 %v21741_v33  ;;  %v17965_v33 = vcombine.high %v12558_v29, %v12562_v9  ;;  %v20720_v29 = vld [vmem:[#allocation12 + $0x10] sm:$0xff]   ;;  %v20721_v9 = vld [vmem:[#allocation12 + $0x18] sm:$0xff]  }
 0x8de   :  { %15303 = vmatpush1.bf16.msra.mxu0 %v17938_v49  ;;  %v20706_v49 = vld [vmem:[#allocation9 + $0x50] sm:$0xff]  }
 0x8df   :  { %15475 = vmatpush1.bf16.msra.mxu1 %v17940_v50  ;;  %15304 = vmatprep.subr.bf16.mxu0 %v17947_v54  ;;  %v20707_v50 = vld [vmem:[#allocation9 + $0x10] sm:$0xff]   ;;  %v20708_v54 = vld [vmem:[#allocation9 + $0x58] sm:$0xff]  }
 0x8e0   :  { %15476 = vmatprep.subr.bf16.mxu1 %v17949_v45  ;;  %v20709_v45 = vld [vmem:[#allocation9 + $0x18] sm:$0xff]  }
 0x8e2   :  { %15305 = vmatpush1.bf16.msra.mxu0 %v17946_v15  ;;  %v20715_v15 = vld [vmem:[#allocation9 + $0x30] sm:$0xff]  }
 0x8e3   :  { %15477 = vmatpush1.bf16.msra.mxu1 %v17948_v37  ;;  %15306 = vmatprep.subr.bf16.mxu0 %v17955_v24  ;;  %v20716_v37 = vld [vmem:[#allocation9 + $0x78] sm:$0xff]  }
 0x8e4   :  { %15478 = vmatprep.subr.bf16.mxu1 %v17957_v41  ;;  %v20717_v24 = vld [vmem:[#allocation9 + $0x38] sm:$0xff]   ;;  %v20718_v41 = vld [vmem:[#allocation12] sm:$0xff]  }
 0x8e6   :  { %15307 = vmatpush1.bf16.msra.mxu0 %v17954_v10  ;;  %v20722_v10 = vld [vmem:[#allocation12 + $0x20] sm:$0xff]  }
 0x8e7   :  { %15479 = vmatpush1.bf16.msra.mxu1 %v17956_v14  ;;  %15308 = vmatprep.subr.bf16.mxu0 %v17963_v48  ;;  %v15527_v14 = vld [vmem:[#allocation7] sm:$0x3] }
 0x8e8   :  { %15480 = vmatprep.subr.bf16.mxu1 %v17965_v33  ;;  %v15532_v18 = vrot.slane %v15527_v14, %v21742_v2 }
 0x8ea   :  { %15309 = vmatpush1.bf16.msra.mxu0 %v17962_v11 }
 0x8eb   :  { %15481 = vmatpush1.bf16.msra.mxu1 %v17964_v3  ;;  %15310 = vmatprep.subr.bf16.mxu0 %v17971_v34 }
 0x8ec   :  { %v21647_v21 = vpop.f32.mrb[28].mxu0  ;;  %v21649_v56 = vpop.f32.mrb[28].mxu1  ;;  %15482 = vmatprep.subr.bf16.mxu1 %v17973_v31  ;;  %v21743_v31 = vsub.s32 1, %v21496_v30 }
 0x8ed   :  { %v15515_v4 = vmax.f32 %v21647_v21, %v21649_v56  ;;  %v21653_v22 = vpop.f32.mrb[29].mxu0  ;;  %v21655_v57 = vpop.f32.mrb[29].mxu1 }
 0x8ee   :  { %v15516_v19 = vmax.f32 %v21653_v22, %v21655_v57  ;;  %v21659_v20 = vpop.f32.mrb[30].mxu0  ;;  %v21661_v55 = vpop.f32.mrb[30].mxu1  ;;  %15311 = vmatpush1.bf16.msra.mxu0 %v17970_v35  ;;  %v15536_v52 = vrot.slane %v15527_v14, %v21743_v31  ;;  %v20723_v57 = vld [vmem:[#allocation12 + $0x28] sm:$0xff]  }
 0x8ef   :  { %v15517_v62 = vmax.f32 %v21659_v20, %v21661_v55  ;;  %15483 = vmatpush1.bf16.msra.mxu1 %v17972_v32  ;;  %v21665_v16 = vpop.f32.mrb[31].mxu0  ;;  %v21667_v1 = vpop.f32.mrb[31].mxu1  ;;  %15312 = vmatprep.subr.bf16.mxu0 %v17979_v7  ;;  %v20725_v20 = vld [vmem:[#allocation12 + $0x38] sm:$0xff]   ;;  %v20726_v55 = vld [vmem:[#allocation15] sm:$0xff]  }
 0x8f0   :  { %v15518_v8 = vmax.f32 %v21665_v16, %v21667_v1  ;;  %15484 = vmatprep.subr.bf16.mxu1 %v17981_v51  ;;  %v20728_v16 = vld [vmem:[#allocation15 + $0x10] sm:$0xff]   ;;  %v20729_v1 = vld [vmem:[#allocation15 + $0x18] sm:$0xff]  }
 0x8f2   :  { %15313 = vmatpush1.bf16.msra.mxu0 %v17978_v36 }
 0x8f3   :  { %15485 = vmatpush1.bf16.msra.mxu1 %v17980_v28  ;;  %15314 = vmatprep.subr.bf16.mxu0 %v17987_v61 }
 0x8f4   :  { %15486 = vmatprep.subr.bf16.mxu1 %v17989_v5  ;;  %v20731_v5 = vld [vmem:[#allocation15 + $0x28] sm:$0xff]  }
 0x8f6   :  { %15315 = vmatpush1.bf16.msra.mxu0 %v17986_v6 }
 0x8f7   :  { %15487 = vmatpush1.bf16.msra.mxu1 %v17988_v60  ;;  %18025 = vmatprep.subr.bf16.mxu0 %v20702_v38  ;;  %v17990_v60 = vld [vmem:[#allocation10] ss:$0 sm:$0xff] }
 0x8f8   :  { %18065 = vmatprep.subr.bf16.mxu1 %v21018_v25 }
 0x8f9   :  { %15333 = vmatmul.mubr.bf16.vlgmr.msra.gmra.mrb[32].mxu0 %v21613_v23 }
 0x8fa   :  { %15505 = vmatmul.mubr.bf16.vlgmr.msra.gmra.mrb[32].mxu1 %v21613_v23  ;;  %18026 = vmatpush3.bf16.msra.mxu0 %v20703_v13  ;;  %v20714_v23 = vld [vmem:[#allocation9 + $0x70] sm:$0xff]  }
 0x8fb   :  { %18027 = vmatprep.subr.bf16.mxu0 %v20704_v26  ;;  %18066 = vmatpush3.bf16.msra.mxu1 %v20718_v41 }
 0x8fc   :  { %18067 = vmatprep.subr.bf16.mxu1 %v21018_v25  ;;  %18081 = vmatprep.mubr.msk.bf16.mxu1 %vm21019_vm0, %v21018_v25 }
 0x8fe   :  { %18028 = vmatpush3.bf16.msra.mxu0 %v20705_v47 }
 0x8ff   :  { %18029 = vmatprep.subr.bf16.mxu0 %v20706_v49  ;;  %18068 = vmatpush3.bf16.msra.mxu1 %v20719_v17 }
 0x900   :  { %18069 = vmatprep.subr.bf16.mxu1 %v21018_v25 }
 0x902   :  { %18030 = vmatpush3.bf16.msra.mxu0 %v20707_v50 }
 0x903   :  { %18031 = vmatprep.subr.bf16.mxu0 %v20708_v54  ;;  %18070 = vmatpush3.bf16.msra.mxu1 %v20720_v29 }
 0x904   :  { %18071 = vmatprep.subr.bf16.mxu1 %v21018_v25 }
 0x906   :  { %18032 = vmatpush3.bf16.msra.mxu0 %v20709_v45 }
 0x907   :  { %18033 = vmatprep.subr.bf16.mxu0 %v20710_v59  ;;  %18072 = vmatpush3.bf16.msra.mxu1 %v20721_v9 }
 0x908   :  { %18073 = vmatprep.subr.bf16.mxu1 %v21018_v25 }
 0x90a   :  { %18034 = vmatpush3.bf16.msra.mxu0 %v20711_v43 }
 0x90b   :  { %18035 = vmatprep.subr.bf16.mxu0 %v20712_v58  ;;  %18074 = vmatpush3.bf16.msra.mxu1 %v20722_v10  ;;  %v20732_v58 = vld [vmem:[#allocation15 + $0x30] sm:$0xff]  }
 0x90c   :  { %18075 = vmatprep.subr.bf16.mxu1 %v21018_v25 }
 0x90e   :  { %18036 = vmatpush3.bf16.msra.mxu0 %v20713_v63  ;;  %v20733_v63 = vld [vmem:[#allocation15 + $0x38] sm:$0xff]  }
 0x90f   :  { %18037 = vmatprep.subr.bf16.mxu0 %v20714_v23  ;;  %18076 = vmatpush3.bf16.msra.mxu1 %v20723_v57  ;;  %v18007_v23 = vld [vmem:[#allocation13] ss:$0 sm:$0xff] }
 0x910   :  { %18077 = vmatprep.subr.bf16.mxu1 %v21018_v25 }
 0x912   :  { %18038 = vmatpush3.bf16.msra.mxu0 %v20715_v15 }
 0x913   :  { %18039 = vmatprep.subr.bf16.mxu0 %v20716_v37 }
 0x916   :  { %18040 = vmatpush3.bf16.msra.mxu0 %v20717_v24 }
 0x917   :  { %18085 = vmatprep.subr.bf16.mxu0 %v21018_v25 }
 0x9cc   :  { %v15334_v48 = vpop.f32.mrb[32].mxu0 }
 0x9cd   :  { %v15506_v33 = vpop.f32.mrb[32].mxu1  ;;  %v15336_v39 = vpop.f32.mrb[33].mxu0 }
 0x9ce   :  { %v15519_v0 = vmax.f32 %v15334_v48, %v15506_v33  ;;  %v15508_v11 = vpop.f32.mrb[33].mxu1  ;;  %v15338_v3 = vpop.f32.mrb[34].mxu0  ;;  %v18016_v48 = vld [vmem:[#allocation16] ss:$0 sm:$0xff] }
 0x9cf   :  { %v15520_v34 = vmax.f32 %v15336_v39, %v15508_v11  ;;  %v15510_v46 = vpop.f32.mrb[34].mxu1  ;;  %v15340_v27 = vpop.f32.mrb[35].mxu0 }
 0x9d0   :  { %v15523_v12 = vmax.f32 %v15515_v4, %v15519_v0  ;;  %v15521_v35 = vmax.f32 %v15338_v3, %v15510_v46  ;;  %v15512_v32 = vpop.f32.mrb[35].mxu1 }
 0x9d1   :  { %v15524_v7 = vmax.f32 %v15516_v19, %v15520_v34  ;;  %v15522_v51 = vmax.f32 %v15340_v27, %v15512_v32  ;;  %v20724_v19 = vld [vmem:[#allocation12 + $0x30] sm:$0xff]  }
 0x9d2   :  { %v15539_v44 = vadd.f32 %v15532_v18, %v15523_v12  ;;  %v15525_v53 = vmax.f32 %v15517_v62, %v15521_v35  ;;  %18078 = vmatpush3.bf16.msra.mxu1 %v20724_v19  ;;  %v20727_v62 = vld [vmem:[#allocation15 + $0x8] sm:$0xff]  }
 0x9d3   :  { %v15540_v30 = vadd.f32 %v15536_v52, %v15524_v7  ;;  %v15526_v42 = vmax.f32 %v15518_v8, %v15522_v51  ;;  %18079 = vmatprep.subr.bf16.mxu1 %v21018_v25  ;;  %v20730_v8 = vld [vmem:[#allocation15 + $0x20] sm:$0xff]  }
 0x9d4   :  { %v15541_v40 = vadd.f32 %v15532_v18, %v15525_v53  ;;  %v15543_v56 = vmax.f32 %v15539_v44, 0.0 }
 0x9d5   :  { %v15542_v21 = vadd.f32 %v15536_v52, %v15526_v42  ;;  %v15544_v36 = vmax.f32 %v15540_v30, 0.0 }
 0x9d6   :  { %v15545_v4 = vmax.f32 %v15541_v40, 0.0  ;;  %18080 = vmatpush3.bf16.msra.mxu1 %v20725_v20 }
 0x9d7   :  { %v15546_v28 = vmax.f32 %v15542_v21, 0.0 }
 0x9d8   :  { %v15547_v61 = vpack.c.bf16 %v15545_v4, %v15543_v56 }
 0x9d9   :  { %v15548_v22 = vpack.c.bf16 %v15546_v28, %v15544_v36 }
 0x9db   :  { %15716 = vmatprep.mubr.bf16.mxu0 %v15548_v22 }
 0x9dc   :  { %15717 = vmatmul.mubr.bf16.vlgmr.msra.gmra.mrb[36].mxu0 %v15547_v61 }
 0x9dd   :  { %18101 = vmatprep.mubr.msk.bf16.mxu0 %vm21019_vm0, %v21018_v25  ;;  %18086 = vmatpush3.bf16.msra.mxu0 %v20726_v55 }
 0x9de   :  { %18087 = vmatprep.subr.bf16.mxu0 %v21018_v25 }
 0x9e1   :  { %18088 = vmatpush3.bf16.msra.mxu0 %v20727_v62 }
 0x9e2   :  { %18089 = vmatprep.subr.bf16.mxu0 %v21018_v25 }
 0x9e5   :  { %18090 = vmatpush3.bf16.msra.mxu0 %v20728_v16 }
 0x9e6   :  { %18091 = vmatprep.subr.bf16.mxu0 %v21018_v25 }
 0x9e9   :  { %18092 = vmatpush3.bf16.msra.mxu0 %v20729_v1 }
 0x9ea   :  { %18093 = vmatprep.subr.bf16.mxu0 %v21018_v25 }
 0x9ed   :  { %18094 = vmatpush3.bf16.msra.mxu0 %v20730_v8 }
 0x9ee   :  { %18095 = vmatprep.subr.bf16.mxu0 %v21018_v25 }
 0x9f1   :  { %18096 = vmatpush3.bf16.msra.mxu0 %v20731_v5 }
 0x9f2   :  { %18097 = vmatprep.subr.bf16.mxu0 %v21018_v25 }
 0x9f5   :  { %18098 = vmatpush3.bf16.msra.mxu0 %v20732_v58 }
 0x9f6   :  { %18099 = vmatprep.subr.bf16.mxu0 %v21018_v25 }
 0x9f9   :  { %18100 = vmatpush3.bf16.msra.mxu0 %v20733_v63 }
 0xaaf   :  { %v18041_v6 = vpop.f32.mrb[36].mxu0 }
 0xab0   :  { %v18042_v38 = vpop.f32.mrb[37].mxu0 }
 0xab1   :  { %v18043_v13 = vadd.f32 %v18042_v38, %v18041_v6  ;;  %v18044_v26 = vpop.f32.mrb[38].mxu0 }
 0xab2   :  { %v18045_v47 = vpop.f32.mrb[39].mxu0 }
 0xab3   :  { %v15719_v49 = vadd.f32 %v18043_v13, %v17990_v60  ;;  %v18046_v50 = vadd.f32 %v18045_v47, %v18044_v26 }
 0xab5   :  { %v15722_v54 = vadd.f32 %v18046_v50, %v17990_v60  ;;  %v15725_v45 = vmax.f32 %v15719_v49, 0.0 }
 0xab7   :  { %v15726_v59 = vmax.f32 %v15722_v54, 0.0 }
 0xab9   :  { %v15727_v43 = vpack.c.bf16 %v15726_v59, %v15725_v45 }
 0xabb   :  { %18082 = vmatmul.mubr.bf16.vlgmr.msra.gmra.mrb[36].mxu1 %v15727_v43 }
 0xb8e   :  { %v15833_v15 = vpop.f32.mrb[36].mxu1 }
 0xb8f   :  { %v15834_v37 = vadd.f32 %v18007_v23, %v15833_v15  ;;  %v18083_v24 = vpop.f32.mrb[37].mxu1 }
 0xb90   :  { %v15836_v41 = vpop.f32.mrb[38].mxu1 }
 0xb91   :  { %v15837_v17 = vadd.f32 %v18007_v23, %v15836_v41  ;;  %v18084_v29 = vpop.f32.mrb[39].mxu1  ;;  %v15840_v9 = vmax.f32 %v15834_v37, 0.0 }
 0xb93   :  { %v15841_v10 = vmax.f32 %v15837_v17, 0.0 }
 0xb95   :  { %v15842_v14 = vpack.c.bf16 %v15841_v10, %v15840_v9 }
 0xb97   :  { %18102 = vmatmul.mubr.bf16.vlgmr.msra.gmra.mrb[40].mxu0 %v15842_v14 }
 0xc6a   :  { %v15948_v33 = vpop.f32.mrb[40].mxu0 }
 0xc6b   :  { %v15949_v39 = vadd.f32 %v18016_v48, %v15948_v33  ;;  %v18103_v0 = vpop.f32.mrb[41].mxu0 }
 0xc6c   :  { %v15951_v2 = vpop.f32.mrb[42].mxu0 }
 0xc6d   :  { %15955 = vst [vmem:[%s21724_s11] sm:$0xff] %v15949_v39  ;;  %v15952_v25 = vadd.f32 %v18016_v48, %v15951_v2  ;;  %v18104_v18 = vpop.f32.mrb[43].mxu0 }
 0xc6f   :  { %15956 = vst [vmem:[%s21724_s11 + $0x8] sm:$0xff] %v15952_v25 }
 0xc70   :  { %15961 = vsyncpa [#allocation3], 1 }
 0xc71   :  { %15962 = vsyncpa [#allocation5], 1 }
 0xc72   :  { %15963 = vsyncpa [#allocation8], 1 }
 0xc73   :  { %15964 = vsyncpa [#allocation11], 1 }
 0xc74   :  { %15965 = vsyncpa [#allocation14], 1 }
 0xc75   :  { %15966 = vsyncpa [#allocation17], 1 }

</bundles_post_ra>
